<compile_context>
chip_gen: v5e
topology: v5e:2x2
jax: 0.10.0
libtpu: 0.0.40
codegen_flags: <defaults>
</compile_context>

<pallas_src>
import functools

import jax
import jax.numpy as jnp
from jax.experimental import pallas as pl
from jax.experimental.pallas import tpu as pltpu


# ----------------------------- Pallas kernel --------------------------------

def _decoder_kernel(z_ref, w0_ref, b0_ref, w1_ref, b1_ref, w2_ref, b2_ref,
                    w3_ref, b3_ref, o_ref):
    """Fused 4-layer MLP: (Linear+ReLU) x3 -> Linear -> Sigmoid.

    Weight tiles are VMEM-resident (bf16, single-buffered); intermediate
    activations live in vregs/VMEM only. MXU matmuls with f32 accumulation;
    bias/ReLU on the VPU, exp/reciprocal of the sigmoid on the EUP.
    """
    h = z_ref[...]                                                    # bf16 (TB, 16)
    h = jnp.dot(h, w0_ref[...], preferred_element_type=jnp.float32) + b0_ref[...]
    h = jnp.maximum(h, 0.0).astype(jnp.bfloat16)
    h = jnp.dot(h, w1_ref[...], preferred_element_type=jnp.float32) + b1_ref[...]
    h = jnp.maximum(h, 0.0).astype(jnp.bfloat16)
    h = jnp.dot(h, w2_ref[...], preferred_element_type=jnp.float32) + b2_ref[...]
    h = jnp.maximum(h, 0.0).astype(jnp.bfloat16)
    h = jnp.dot(h, w3_ref[...], preferred_element_type=jnp.float32) + b3_ref[...]
    # Sigmoid in f32: exp + approx reciprocal both run on the EUP slot.
    o_ref[...] = pl.reciprocal(1.0 + jnp.exp(-h), approx=True).astype(o_ref.dtype)


# ------------------------------ helpers --------------------------------------

def _round_up(x, m):
    return ((x + m - 1) // m) * m


def _init_linear(key, fan_in, fan_out):
    """PyTorch nn.Linear default init: U(-1/sqrt(fan_in), 1/sqrt(fan_in))."""
    kw, kb = jax.random.split(key)
    bound = 1.0 / (fan_in ** 0.5)
    w = jax.random.uniform(kw, (fan_in, fan_out), jnp.float32, -bound, bound)
    b = jax.random.uniform(kb, (fan_out,), jnp.float32, -bound, bound)
    return w, b


def init_decoder_params(key, input_dim=784, inter_dims=(500, 500, 2000), hid_dim=10):
    """Returns (raw f32 params, padded kernel params).

    Padded params are built ONCE: weights [Kp, Np] in bf16, biases [1, Np] f32.
    Np is rounded up to 128 (lane-dense). Kp is rounded to 16 for layer 0 (the
    only K that is not a prior layer's padded N) and to 128 otherwise. Zero
    padding is exact: padded rows/cols contribute 0, padded bias entries are 0,
    so padded lanes stay 0 through the ReLU layers; padded output lanes/rows
    are sliced off after the call.
    """
    dims = [hid_dim, inter_dims[-1], inter_dims[-2], inter_dims[-3], input_dim]
    keys = jax.random.split(key, len(dims) - 1)
    raw = [_init_linear(k, dims[i], dims[i + 1]) for i, k in enumerate(keys)]

    padded = []
    for i, (w, b) in enumerate(raw):
        k, n = w.shape
        kp = _round_up(k, 16) if i == 0 else _round_up(k, 128)
        np_ = _round_up(n, 128)
        w_p = jnp.zeros((kp, np_), jnp.bfloat16).at[:k, :n].set(w.astype(jnp.bfloat16))
        b_p = jnp.zeros((1, np_), jnp.float32).at[0, :n].set(b)
        padded.append((w_p, b_p))
    return raw, padded


def _pick_batch_tile(B):
    """Batch tile: >=16 (bf16 sublane pack), <=128 for small/medium B, 256 only
    when the grid still has >=2 steps (keeps the v7x second TC busy)."""
    if B <= 128:
        return min(128, _round_up(B, 16))
    if B >= 512:
        return 256
    return 128


# ------------------------------ forward --------------------------------------

def decoder_forward(padded_params, z, *, input_dim):
    """x_pro = Sigmoid(MLP(z)) via a single fused Pallas kernel."""
    (w0, b0), (w1, b1), (w2, b2), (w3, b3) = padded_params
    B, K = z.shape
    k0p = w0.shape[0]
    nout_p = w3.shape[1]

    tb = _pick_batch_tile(B)
    bp = _round_up(B, tb)
    z_p = jnp.zeros((bp, k0p), jnp.bfloat16).at[:B, :K].set(z.astype(jnp.bfloat16))

    const = lambda i: (0, 0)   # weights/biases: same block every grid step

    def resident(shape):
        # Single-buffered: constant index_map => fetched once, half the VMEM.
        return pl.BlockSpec(shape, const, pipeline_mode=pl.Buffered(1))

    out = pl.pallas_call(
        _decoder_kernel,
        out_shape=jax.ShapeDtypeStruct((bp, nout_p), jnp.float32),
        grid=(bp // tb,),
        in_specs=[
            pl.BlockSpec((tb, k0p), lambda i: (i, 0)),
            resident(w0.shape), resident(b0.shape),
            resident(w1.shape), resident(b1.shape),
            resident(w2.shape), resident(b2.shape),
            resident(w3.shape), resident(b3.shape),
        ],
        out_specs=pl.BlockSpec((tb, nout_p), lambda i: (i, 0)),
        compiler_params=pltpu.CompilerParams(
            dimension_semantics=("parallel",),
            vmem_limit_bytes=32 * 1024 * 1024),
    )(z_p, w0, b0, w1, b1, w2, b2, w3, b3)
    return out[:B, :input_dim]


def decoder_reference(raw_params, z):
    """Pure-JAX reference mimicking the kernel's bf16-in / f32-acc numerics."""
    h = z.astype(jnp.bfloat16)
    n_layers = len(raw_params)
    for i, (w, b) in enumerate(raw_params):
        h = jnp.dot(h, w.astype(jnp.bfloat16),
                    preferred_element_type=jnp.float32) + b
        if i < n_layers - 1:
            h = jnp.maximum(h, 0.0).astype(jnp.bfloat16)
    return jax.nn.sigmoid(h)


# -------------------------------- main ----------------------------------------

if __name__ == "__main__":
    # Module defaults: input_dim=784, inter_dims=[500,500,2000], hid_dim=10.
    B = 8
    input_dim = 784
    inter_dims = (500, 500, 2000)
    hid_dim = 10

    root = jax.random.PRNGKey(0)
    k_params, k_z = jax.random.split(root)

    raw_params, padded_params = init_decoder_params(
        k_params, input_dim=input_dim, inter_dims=inter_dims, hid_dim=hid_dim)
    z = jax.random.normal(k_z, (B, hid_dim), jnp.float32)

    fwd = jax.jit(functools.partial(decoder_forward, input_dim=input_dim))
    x_pro = fwd(padded_params, z)
    jax.block_until_ready(x_pro)

    assert x_pro.shape == (B, input_dim)
    assert bool(jnp.all((x_pro >= 0.0) & (x_pro <= 1.0)))

    # Numerical sanity check against a pure-JAX reference with the same
    # bf16-weight / f32-accumulate numerics (approx reciprocal adds ~1e-3).
    x_ref = decoder_reference(raw_params, z)
    max_err = float(jnp.max(jnp.abs(x_pro - x_ref)))
    assert max_err < 2e-2, f"max abs err {max_err}"

    print("KERNEL_OK")
</pallas_src>

<mosaic_0001>
module attributes {stable_mosaic.version = 11 : i64} {
  func.func @_decoder_kernel(%arg0: i32, %arg1: memref<16x16xbf16, #tpu.memory_space<vmem>>, %arg2: memref<16x2048xbf16, #tpu.memory_space<vmem>>, %arg3: memref<1x2048xf32, #tpu.memory_space<vmem>>, %arg4: memref<2048x512xbf16, #tpu.memory_space<vmem>>, %arg5: memref<1x512xf32, #tpu.memory_space<vmem>>, %arg6: memref<512x512xbf16, #tpu.memory_space<vmem>>, %arg7: memref<1x512xf32, #tpu.memory_space<vmem>>, %arg8: memref<512x896xbf16, #tpu.memory_space<vmem>>, %arg9: memref<1x896xf32, #tpu.memory_space<vmem>>, %arg10: memref<16x896xf32, #tpu.memory_space<vmem>>) attributes {dimension_semantics = [#tpu.dimension_semantics<parallel>], iteration_bounds = array<i64: 1>, scalar_prefetch = 0 : i64, scratch_operands = 0 : i64, tpu.core_type = #tpu.core_type<tc>, window_params = [{transform_indices = @transform_0, window_bounds = array<i64: 16, 16>}, {pipeline_mode = #tpu.pipeline_mode<synchronous>, transform_indices = @transform_1, window_bounds = array<i64: 16, 2048>}, {pipeline_mode = #tpu.pipeline_mode<synchronous>, transform_indices = @transform_2, window_bounds = array<i64: 1, 2048>}, {pipeline_mode = #tpu.pipeline_mode<synchronous>, transform_indices = @transform_3, window_bounds = array<i64: 2048, 512>}, {pipeline_mode = #tpu.pipeline_mode<synchronous>, transform_indices = @transform_4, window_bounds = array<i64: 1, 512>}, {pipeline_mode = #tpu.pipeline_mode<synchronous>, transform_indices = @transform_5, window_bounds = array<i64: 512, 512>}, {pipeline_mode = #tpu.pipeline_mode<synchronous>, transform_indices = @transform_6, window_bounds = array<i64: 1, 512>}, {pipeline_mode = #tpu.pipeline_mode<synchronous>, transform_indices = @transform_7, window_bounds = array<i64: 512, 896>}, {pipeline_mode = #tpu.pipeline_mode<synchronous>, transform_indices = @transform_8, window_bounds = array<i64: 1, 896>}, {transform_indices = @transform_9, window_bounds = array<i64: 16, 896>}]} {
    %c0 = arith.constant 0 : index
    %c0_0 = arith.constant 0 : index
    %0 = vector.load %arg1[%c0, %c0_0] : memref<16x16xbf16, #tpu.memory_space<vmem>>, vector<16x16xbf16>
    %c0_1 = arith.constant 0 : index
    %c0_2 = arith.constant 0 : index
    %1 = vector.load %arg2[%c0_1, %c0_2] : memref<16x2048xbf16, #tpu.memory_space<vmem>>, vector<16x2048xbf16>
    %cst = arith.constant dense<0.000000e+00> : vector<16x2048xf32>
    %2 = tpu.matmul %0, %1, %cst {dimension_numbers = #tpu.dot_dimension_numbers<[1], [0], [0], [1], [0, 0, 1, 1], [], []>} : vector<16x16xbf16>, vector<16x2048xbf16>, vector<16x2048xf32> -> vector<16x2048xf32>
    %c0_3 = arith.constant 0 : index
    %c0_4 = arith.constant 0 : index
    %3 = vector.load %arg3[%c0_3, %c0_4] : memref<1x2048xf32, #tpu.memory_space<vmem>>, vector<1x2048xf32>
    %4 = vector.broadcast %3 : vector<1x2048xf32> to vector<16x2048xf32>
    %5 = arith.addf %2, %4 : vector<16x2048xf32>
    %cst_5 = arith.constant 0.000000e+00 : f32
    %6 = vector.broadcast %cst_5 : f32 to vector<16x2048xf32>
    %7 = arith.maximumf %5, %6 : vector<16x2048xf32>
    %8 = arith.truncf %7 : vector<16x2048xf32> to vector<16x2048xbf16>
    %c0_6 = arith.constant 0 : index
    %c0_7 = arith.constant 0 : index
    %9 = vector.load %arg4[%c0_6, %c0_7] : memref<2048x512xbf16, #tpu.memory_space<vmem>>, vector<2048x512xbf16>
    %cst_8 = arith.constant dense<0.000000e+00> : vector<16x512xf32>
    %10 = tpu.matmul %8, %9, %cst_8 {dimension_numbers = #tpu.dot_dimension_numbers<[1], [0], [0], [1], [0, 0, 1, 1], [], []>} : vector<16x2048xbf16>, vector<2048x512xbf16>, vector<16x512xf32> -> vector<16x512xf32>
    %c0_9 = arith.constant 0 : index
    %c0_10 = arith.constant 0 : index
    %11 = vector.load %arg5[%c0_9, %c0_10] : memref<1x512xf32, #tpu.memory_space<vmem>>, vector<1x512xf32>
    %12 = vector.broadcast %11 : vector<1x512xf32> to vector<16x512xf32>
    %13 = arith.addf %10, %12 : vector<16x512xf32>
    %cst_11 = arith.constant 0.000000e+00 : f32
    %14 = vector.broadcast %cst_11 : f32 to vector<16x512xf32>
    %15 = arith.maximumf %13, %14 : vector<16x512xf32>
    %16 = arith.truncf %15 : vector<16x512xf32> to vector<16x512xbf16>
    %c0_12 = arith.constant 0 : index
    %c0_13 = arith.constant 0 : index
    %17 = vector.load %arg6[%c0_12, %c0_13] : memref<512x512xbf16, #tpu.memory_space<vmem>>, vector<512x512xbf16>
    %cst_14 = arith.constant dense<0.000000e+00> : vector<16x512xf32>
    %18 = tpu.matmul %16, %17, %cst_14 {dimension_numbers = #tpu.dot_dimension_numbers<[1], [0], [0], [1], [0, 0, 1, 1], [], []>} : vector<16x512xbf16>, vector<512x512xbf16>, vector<16x512xf32> -> vector<16x512xf32>
    %c0_15 = arith.constant 0 : index
    %c0_16 = arith.constant 0 : index
    %19 = vector.load %arg7[%c0_15, %c0_16] : memref<1x512xf32, #tpu.memory_space<vmem>>, vector<1x512xf32>
    %20 = vector.broadcast %19 : vector<1x512xf32> to vector<16x512xf32>
    %21 = arith.addf %18, %20 : vector<16x512xf32>
    %cst_17 = arith.constant 0.000000e+00 : f32
    %22 = vector.broadcast %cst_17 : f32 to vector<16x512xf32>
    %23 = arith.maximumf %21, %22 : vector<16x512xf32>
    %24 = arith.truncf %23 : vector<16x512xf32> to vector<16x512xbf16>
    %c0_18 = arith.constant 0 : index
    %c0_19 = arith.constant 0 : index
    %25 = vector.load %arg8[%c0_18, %c0_19] : memref<512x896xbf16, #tpu.memory_space<vmem>>, vector<512x896xbf16>
    %cst_20 = arith.constant dense<0.000000e+00> : vector<16x896xf32>
    %26 = tpu.matmul %24, %25, %cst_20 {dimension_numbers = #tpu.dot_dimension_numbers<[1], [0], [0], [1], [0, 0, 1, 1], [], []>} : vector<16x512xbf16>, vector<512x896xbf16>, vector<16x896xf32> -> vector<16x896xf32>
    %c0_21 = arith.constant 0 : index
    %c0_22 = arith.constant 0 : index
    %27 = vector.load %arg9[%c0_21, %c0_22] : memref<1x896xf32, #tpu.memory_space<vmem>>, vector<1x896xf32>
    %28 = vector.broadcast %27 : vector<1x896xf32> to vector<16x896xf32>
    %29 = arith.addf %26, %28 : vector<16x896xf32>
    %cst_23 = arith.constant 0.000000e+00 : f32
    %30 = vector.broadcast %cst_23 : f32 to vector<16x896xf32>
    %31 = arith.subf %30, %29 : vector<16x896xf32>
    %32 = math.exp %31 : vector<16x896xf32>
    %cst_24 = arith.constant 1.000000e+00 : f32
    %33 = vector.broadcast %cst_24 : f32 to vector<16x896xf32>
    %34 = arith.addf %33, %32 : vector<16x896xf32>
    %35 = tpu.reciprocal %34 {approx = true} : vector<16x896xf32> -> vector<16x896xf32>
    %c0_25 = arith.constant 0 : index
    %c0_26 = arith.constant 0 : index
    %36 = vector.load %arg10[%c0_25, %c0_26] : memref<16x896xf32, #tpu.memory_space<vmem>>, vector<16x896xf32>
    tpu.vector_store %arg10[%c0_25, %c0_26], %35 {strides = array<i32>} : memref<16x896xf32, #tpu.memory_space<vmem>>, vector<16x896xf32>,
    return
  }
  func.func @transform_0(%arg0: i32) -> (i32, i32) {
    %c0_i32 = arith.constant 0 : i32
    %c0_i32_0 = arith.constant 0 : i32
    return %arg0, %c0_i32 : i32, i32
  }
  func.func @transform_1(%arg0: i32) -> (i32, i32) {
    %c0_i32 = arith.constant 0 : i32
    %c0_i32_0 = arith.constant 0 : i32
    %c0_i32_1 = arith.constant 0 : i32
    return %c0_i32, %c0_i32_0 : i32, i32
  }
  func.func @transform_2(%arg0: i32) -> (i32, i32) {
    %c0_i32 = arith.constant 0 : i32
    %c0_i32_0 = arith.constant 0 : i32
    %c0_i32_1 = arith.constant 0 : i32
    return %c0_i32, %c0_i32_0 : i32, i32
  }
  func.func @transform_3(%arg0: i32) -> (i32, i32) {
    %c0_i32 = arith.constant 0 : i32
    %c0_i32_0 = arith.constant 0 : i32
    %c0_i32_1 = arith.constant 0 : i32
    return %c0_i32, %c0_i32_0 : i32, i32
  }
  func.func @transform_4(%arg0: i32) -> (i32, i32) {
    %c0_i32 = arith.constant 0 : i32
    %c0_i32_0 = arith.constant 0 : i32
    %c0_i32_1 = arith.constant 0 : i32
    return %c0_i32, %c0_i32_0 : i32, i32
  }
  func.func @transform_5(%arg0: i32) -> (i32, i32) {
    %c0_i32 = arith.constant 0 : i32
    %c0_i32_0 = arith.constant 0 : i32
    %c0_i32_1 = arith.constant 0 : i32
    return %c0_i32, %c0_i32_0 : i32, i32
  }
  func.func @transform_6(%arg0: i32) -> (i32, i32) {
    %c0_i32 = arith.constant 0 : i32
    %c0_i32_0 = arith.constant 0 : i32
    %c0_i32_1 = arith.constant 0 : i32
    return %c0_i32, %c0_i32_0 : i32, i32
  }
  func.func @transform_7(%arg0: i32) -> (i32, i32) {
    %c0_i32 = arith.constant 0 : i32
    %c0_i32_0 = arith.constant 0 : i32
    %c0_i32_1 = arith.constant 0 : i32
    return %c0_i32, %c0_i32_0 : i32, i32
  }
  func.func @transform_8(%arg0: i32) -> (i32, i32) {
    %c0_i32 = arith.constant 0 : i32
    %c0_i32_0 = arith.constant 0 : i32
    %c0_i32_1 = arith.constant 0 : i32
    return %c0_i32, %c0_i32_0 : i32, i32
  }
  func.func @transform_9(%arg0: i32) -> (i32, i32) {
    %c0_i32 = arith.constant 0 : i32
    %c0_i32_0 = arith.constant 0 : i32
    return %arg0, %c0_i32 : i32, i32
  }
}

</mosaic_0001>

<bundles_post_ra>
// kernel: decoder_forward.1
= control target key start
LH: loop header
LB: loop body
LE: loop exit
PB: predicated region body
PF: predicated region fallthrough
CT: control target
= control target key end

     0   :  { %14 = vsyncpa [#allocation3], 0  ;;  %s12782_s0 = inlined_call_operand.vmem [shape: bf16[16,16], index: 0, kind: input, shape index: {}]   ;;  %s12783_s1 = inlined_call_operand.hbm [shape: bf16[16,2048], index: 1, kind: input, shape index: {}]   ;;  %s12784_s2 = inlined_call_operand.hbm [shape: f32[1,2048], index: 2, kind: input, shape index: {}]   ;;  %s12785_s3 = inlined_call_operand.hbm [shape: bf16[2048,512], index: 3, kind: input, shape index: {}]   ;;  %s12786_s4 = inlined_call_operand.hbm [shape: f32[1,512], index: 4, kind: input, shape index: {}]   ;;  %s12787_s5 = inlined_call_operand.hbm [shape: bf16[512,512], index: 5, kind: input, shape index: {}]   ;;  %s12788_s6 = inlined_call_operand.hbm [shape: f32[1,512], index: 6, kind: input, shape index: {}]   ;;  %s12789_s7 = inlined_call_operand.hbm [shape: bf16[512,896], index: 7, kind: input, shape index: {}]   ;;  %s12790_s8 = inlined_call_operand.hbm [shape: f32[1,896], index: 8, kind: input, shape index: {}]   ;;  %s12791_s9 = inlined_call_operand.vmem [shape: f32[16,896], index: 9, kind: output, shape index: {}]  }
   0x1   :  { %15 = vsyncpa [#allocation5], 0 }
   0x2   :  { %16 = vsyncpa [#allocation8], 0 }
   0x3   :  { %17 = vsyncpa [#allocation11], 0  ;;  %s39_s11 = sshll.u32 %s12784_s2, 4  ;;  %s40_s11 = int_to_ptr.hbm [resolvable:$true] %s39_s11 }
   0x4   :  { %18 = vsyncpa [#allocation14], 0  ;;  %s12173_s12 = smov [#allocation4]   ;;  %s63_s16 = sshll.u32 %s12786_s4, 4  ;;  %s64_s16 = int_to_ptr.hbm [resolvable:$true] %s63_s16 }
   0x5   :  { %s41_s13 = sshll.u32 %s12173_s12, 4  ;;  %s12174_s17 = smov [#allocation7]   ;;  %s42_s13 = int_to_ptr.vmem [resolvable:$true] %s41_s13 }
   0x6   :  { %44 = dma.hbm_to_vmem [thread:$0]  %s40_s11, 256, %s42_s13, [#allocation5]  }
   0x7   :  { %s65_s18 = sshll.u32 %s12174_s17, 4  ;;  %s87_s21 = sshll.u32 %s12788_s6, 4  ;;  %s66_s18 = int_to_ptr.vmem [resolvable:$true] %s65_s18  ;;  %s88_s21 = int_to_ptr.hbm [resolvable:$true] %s87_s21 }
   0x8   :  { %68 = dma.hbm_to_vmem [thread:$0]  %s64_s16, 64, %s66_s18, [#allocation8]  }
   0x9   :  { %s25_s23 = sshll.u32 %s12783_s1, 4  ;;  %s12175_s24 = smov [#allocation10]   ;;  %s26_s23 = int_to_ptr.hbm [resolvable:$true] %s25_s23 }
   0xa   :  { %s89_s25 = sshll.u32 %s12175_s24, 4  ;;  %s12176_s4 = smov [#allocation2]   ;;  %s90_s25 = int_to_ptr.vmem [resolvable:$true] %s89_s25 }
   0xb   :  { %92 = dma.hbm_to_vmem [thread:$0]  %s88_s21, 64, %s90_s25, [#allocation11]  }
   0xc   :  { %s27_s26 = sshll.u32 %s12176_s4, 4  ;;  %s12177_s27 = smov 1024   ;;  %s28_s26 = int_to_ptr.vmem [resolvable:$true] %s27_s26 }
   0xd   :  { %s12178_s28 = smov 64   ;;  %s49_s30 = sshll.u32 %s12785_s3, 4  ;;  %s50_s30 = int_to_ptr.hbm [resolvable:$true] %s49_s30 }
   0xe   :  { %33 = dma.hbm_to_vmem [thread:$0]  %s26_s23, 2048, %s28_s26, [#allocation3], %s12177_s27, %s12177_s27, %s12178_s28  }
   0xf   :  { %s12179_s10 = smov [#allocation6]   ;;  %s73_s13 = sshll.u32 %s12787_s5, 4  ;;  %s74_s13 = int_to_ptr.hbm [resolvable:$true] %s73_s13 }
  0x10   :  { %s51_s11 = sshll.u32 %s12179_s10, 4  ;;  %s12180_s14 = smov 256   ;;  %s52_s11 = int_to_ptr.vmem [resolvable:$true] %s51_s11 }
  0x11   :  { %s12181_s15 = smov 16   ;;  %s12182_s16 = smov [#allocation9]  }
  0x12   :  { %57 = dma.hbm_to_vmem [thread:$0]  %s50_s30, 65536, %s52_s11, [#allocation5], %s12180_s14, %s12180_s14, %s12181_s15  }
  0x13   :  { %s75_s17 = sshll.u32 %s12182_s16, 4  ;;  %s97_s20 = sshll.u32 %s12789_s7, 4  ;;  %s76_s17 = int_to_ptr.vmem [resolvable:$true] %s75_s17  ;;  %s98_s20 = int_to_ptr.hbm [resolvable:$true] %s97_s20 }
  0x14   :  { %81 = dma.hbm_to_vmem [thread:$0]  %s74_s13, 16384, %s76_s17, [#allocation8], %s12180_s14, %s12180_s14, %s12181_s15  }
  0x15   :  { %s12183_s3 = smov [#allocation12]   ;;  %s111_s5 = sshll.u32 %s12790_s8, 4  ;;  %s112_s5 = int_to_ptr.hbm [resolvable:$true] %s111_s5 }
  0x16   :  { %s99_s21 = sshll.u32 %s12183_s3, 4  ;;  %s12184_s23 = smov 448   ;;  %s100_s21 = int_to_ptr.vmem [resolvable:$true] %s99_s21 }
  0x17   :  { %s12185_s24 = smov 28   ;;  %s12186_s25 = smov [#allocation13]  }
  0x18   :  { %105 = dma.hbm_to_vmem [thread:$0]  %s98_s20, 28672, %s100_s21, [#allocation11], %s12184_s23, %s12184_s23, %s12185_s24  }
  0x19   :  { %s113_s4 = sshll.u32 %s12186_s25, 4  ;;  %s114_s4 = int_to_ptr.vmem [resolvable:$true] %s113_s4 }
  0x1a   :  { %116 = dma.hbm_to_vmem [thread:$0]  %s112_s5, 112, %s114_s4, [#allocation14]  }
  0x1b   :  { %12163 = dma.done.wait [#allocation3], 2048  }
  0x1c   :  { %12164 = vsyncadd [#allocation3], 4294965248 }
  0x1d   :  { %12165 = dma.done.wait [#allocation5], 65792  }
  0x1e   :  { %12166 = vsyncadd [#allocation5], 4294901504 }
  0x1f   :  { %12167 = dma.done.wait [#allocation8], 16448  }
  0x20   :  { %12168 = vsyncadd [#allocation8], 4294950848 }
  0x21   :  { %12169 = dma.done.wait [#allocation11], 28736  }
  0x22   :  { %12170 = vsyncadd [#allocation11], 4294938560 }
  0x23   :  { %12171 = dma.done.wait [#allocation14], 112  }
  0x24   :  { %12172 = vsyncadd [#allocation14], 4294967184  ;;  %v7484_v0 = vld [vmem:[#allocation2] sm:$0xf]  ;;  %v11019_v2 = vld [vmem:[#allocation2 + $0x4] sm:$0xf] }
  0x25   :  { %v11027_v1 = vld [vmem:[#allocation2 + $0x3c] sm:$0xf0]  ;;  %v7486_v4 = vld [vmem:[#allocation2 + $0x40] sm:$0xf0]  ;;  %v7492_v5 = vld [vmem:[#allocation2 + $0x8] sm:$0xf] }
  0x26   :  { %v7485_v3 = vor.u32 %v11027_v1, %v7484_v0  ;;  %v11028_v6 = vld [vmem:[#allocation2 + $0x44] sm:$0xf0]  ;;  %v7489_v7 = vor.u32 %v11019_v2, %v7486_v4  ;;  %v11020_v9 = vld [vmem:[#allocation2 + $0xc] sm:$0xf]  ;;  %v12264_v11 = vld [vmem:[%s12782_s0] sm:$0xff]  ;;  %vm289_vm0 = vcmask 130048  }
  0x27   :  { %v7493_v8 = vor.u32 %v11028_v6, %v7492_v5  ;;  %v7494_v10 = vld [vmem:[#allocation2 + $0x48] sm:$0xf0]  ;;  %v7500_v13 = vld [vmem:[#allocation2 + $0x10] sm:$0xf]  ;;  %v7508_v15 = vld [vmem:[#allocation2 + $0x18] sm:$0xf] }
  0x28   :  { %300 = vmatpush.bf16.msra.mxu0 %v7485_v3  ;;  %v7497_v12 = vor.u32 %v11020_v9, %v7494_v10  ;;  %v11029_v14 = vld [vmem:[#allocation2 + $0x4c] sm:$0xf0]  ;;  %314 = vmatpush.bf16.msra.mxu1 %v7489_v7  ;;  %v11030_v17 = vld [vmem:[#allocation2 + $0x54] sm:$0xf0]  ;;  %v11022_v18 = vld [vmem:[#allocation2 + $0x1c] sm:$0xf] }
  0x29   :  { %328 = vmatpush.bf16.msra.mxu2 %v7493_v8  ;;  %v7501_v16 = vor.u32 %v11029_v14, %v7500_v13  ;;  %v7510_v19 = vld [vmem:[#allocation2 + $0x58] sm:$0xf0]  ;;  %v7509_v20 = vor.u32 %v11030_v17, %v7508_v15  ;;  %v11021_v22 = vld [vmem:[#allocation2 + $0x14] sm:$0xf]  ;;  %v7516_v24 = vld [vmem:[#allocation2 + $0x20] sm:$0xf] }
  0x2a   :  { %342 = vmatpush.bf16.msra.mxu3 %v7497_v12  ;;  %v7513_v21 = vor.u32 %v11022_v18, %v7510_v19  ;;  %v7502_v23 = vld [vmem:[#allocation2 + $0x50] sm:$0xf0]  ;;  %v11031_v26 = vld [vmem:[#allocation2 + $0x5c] sm:$0xf0]  ;;  %v7524_v27 = vld [vmem:[#allocation2 + $0x28] sm:$0xf] }
  0x2b   :  { %7546 = vmatmul.msk.bf16.vlgmr.msra.gmra.mxu0 %vm289_vm0, %v12264_v11  ;;  %v7505_v25 = vor.u32 %v11021_v22, %v7502_v23  ;;  %v11032_v28 = vld [vmem:[#allocation2 + $0x64] sm:$0xf0]  ;;  %7547 = vmatmul.msk.bf16.vlgmr.msra.gmra.mxu1 %vm289_vm0, %v12264_v11  ;;  %v7517_v29 = vor.u32 %v11031_v26, %v7516_v24  ;;  %v11023_v31 = vld [vmem:[#allocation2 + $0x24] sm:$0xf]  ;;  %v11024_v33 = vld [vmem:[#allocation2 + $0x2c] sm:$0xf] }
  0x2c   :  { %7548 = vmatmul.msk.bf16.vlgmr.msra.gmra.mxu2 %vm289_vm0, %v12264_v11  ;;  %v7525_v30 = vor.u32 %v11032_v28, %v7524_v27  ;;  %v7518_v32 = vld [vmem:[#allocation2 + $0x60] sm:$0xf0]  ;;  %356 = vmatpush.bf16.msrb.mxu0 %v7501_v16  ;;  %v7526_v35 = vld [vmem:[#allocation2 + $0x68] sm:$0xf0]  ;;  %v7532_v37 = vld [vmem:[#allocation2 + $0x30] sm:$0xf] }
  0x2d   :  { %7549 = vmatmul.msk.bf16.vlgmr.msra.gmra.mxu3 %vm289_vm0, %v12264_v11  ;;  %v7521_v34 = vor.u32 %v11023_v31, %v7518_v32  ;;  %384 = vmatpush.bf16.msrb.mxu2 %v7509_v20  ;;  %v7529_v36 = vor.u32 %v11024_v33, %v7526_v35  ;;  %v11033_v38 = vld [vmem:[#allocation2 + $0x6c] sm:$0xf0]  ;;  %v7540_v39 = vld [vmem:[#allocation2 + $0x38] sm:$0xf]  ;;  %v11025_v41 = vld [vmem:[#allocation2 + $0x34] sm:$0xf] }
  0x2e   :  { %398 = vmatpush.bf16.msrb.mxu3 %v7513_v21  ;;  %370 = vmatpush.bf16.msrb.mxu1 %v7505_v25  ;;  %v11034_v40 = vld [vmem:[#allocation2 + $0x74] sm:$0xf0]  ;;  %v7534_v42 = vld [vmem:[#allocation2 + $0x70] sm:$0xf0]  ;;  %v11026_v43 = vld [vmem:[#allocation2 + $0x3c] sm:$0xf]  ;;  %v7533_v45 = vor.u32 %v11033_v38, %v7532_v37 }
  0x2f   :  { %v7542_v44 = vld [vmem:[#allocation2 + $0x78] sm:$0xf0]  ;;  %v7541_v46 = vor.u32 %v11034_v40, %v7540_v39  ;;  %v7537_v47 = vor.u32 %v11025_v41, %v7534_v42  ;;  %v7676_v49 = vld [vmem:[#allocation6 + $0xe0] sm:$0xf]  ;;  %v11065_v50 = vld [vmem:[#allocation6 + $0xec] sm:$0xf0] }
  0x30   :  { %412 = vmatpush.bf16.msra.mxu0 %v7517_v29  ;;  %v7545_v48 = vor.u32 %v11026_v43, %v7542_v44  ;;  %v7804_v51 = vld [vmem:[#allocation6 + $0x1e0] sm:$0xf]  ;;  %v11097_v52 = vld [vmem:[#allocation6 + $0x1ec] sm:$0xf0]  ;;  %v7677_v57 = vor.u32 %v11065_v50, %v7676_v49 }
  0x31   :  { %440 = vmatpush.bf16.msra.mxu2 %v7525_v30  ;;  %v7932_v53 = vld [vmem:[#allocation6 + $0x2e0] sm:$0xf]  ;;  %v11129_v54 = vld [vmem:[#allocation6 + $0x2ec] sm:$0xf0]  ;;  %v7805_v58 = vor.u32 %v11097_v52, %v7804_v51 }
  0x32   :  { %426 = vmatpush.bf16.msra.mxu1 %v7521_v34  ;;  %454 = vmatpush.bf16.msra.mxu3 %v7529_v36  ;;  %v8060_v55 = vld [vmem:[#allocation6 + $0x3e0] sm:$0xf]  ;;  %v11161_v56 = vld [vmem:[#allocation6 + $0x3ec] sm:$0xf0]  ;;  %v7933_v62 = vor.u32 %v11129_v54, %v7932_v53 }
  0x33   :  { %v7660_v59 = vld [vmem:[#allocation6 + $0xc0] sm:$0xf]  ;;  %v11061_v60 = vld [vmem:[#allocation6 + $0xcc] sm:$0xf0]  ;;  %v8061_v0 = vor.u32 %v11161_v56, %v8060_v55 }
  0x34   :  { %v7788_v61 = vld [vmem:[#allocation6 + $0x1c0] sm:$0xf]  ;;  %v11093_v63 = vld [vmem:[#allocation6 + $0x1cc] sm:$0xf0]  ;;  %v7661_v5 = vor.u32 %v11061_v60, %v7660_v59 }
  0x35   :  { %v7916_v1 = vld [vmem:[#allocation6 + $0x2c0] sm:$0xf]  ;;  %v11125_v2 = vld [vmem:[#allocation6 + $0x2cc] sm:$0xf0]  ;;  %v7789_v6 = vor.u32 %v11093_v63, %v7788_v61 }
  0x36   :  { %v8044_v3 = vld [vmem:[#allocation6 + $0x3c0] sm:$0xf]  ;;  %v11157_v4 = vld [vmem:[#allocation6 + $0x3cc] sm:$0xf0]  ;;  %v7917_v10 = vor.u32 %v11125_v2, %v7916_v1 }
  0x37   :  { %v7644_v7 = vld [vmem:[#allocation6 + $0xa0] sm:$0xf]  ;;  %v11057_v8 = vld [vmem:[#allocation6 + $0xac] sm:$0xf0]  ;;  %v8045_v13 = vor.u32 %v11157_v4, %v8044_v3 }
  0x38   :  { %v7772_v9 = vld [vmem:[#allocation6 + $0x1a0] sm:$0xf]  ;;  %v11089_v12 = vld [vmem:[#allocation6 + $0x1ac] sm:$0xf0]  ;;  %v7645_v18 = vor.u32 %v11057_v8, %v7644_v7 }
  0x39   :  { %v7900_v14 = vld [vmem:[#allocation6 + $0x2a0] sm:$0xf]  ;;  %v11121_v15 = vld [vmem:[#allocation6 + $0x2ac] sm:$0xf0]  ;;  %v7773_v19 = vor.u32 %v11089_v12, %v7772_v9 }
  0x3a   :  { %v8028_v16 = vld [vmem:[#allocation6 + $0x3a0] sm:$0xf]  ;;  %v11153_v17 = vld [vmem:[#allocation6 + $0x3ac] sm:$0xf0]  ;;  %v7901_v23 = vor.u32 %v11121_v15, %v7900_v14 }
  0x3b   :  { %7550 = vmatmul.msk.bf16.vlgmr.msrb.gmra.mxu0 %vm289_vm0, %v12264_v11  ;;  %7551 = vmatmul.msk.bf16.vlgmr.msrb.gmra.mxu1 %vm289_vm0, %v12264_v11  ;;  %v7628_v20 = vld [vmem:[#allocation6 + $0x80] sm:$0xf]  ;;  %v11053_v21 = vld [vmem:[#allocation6 + $0x8c] sm:$0xf0]  ;;  %v8029_v25 = vor.u32 %v11153_v17, %v8028_v16 }
  0x3c   :  { %7552 = vmatmul.msk.bf16.vlgmr.msrb.gmra.mxu2 %vm289_vm0, %v12264_v11  ;;  %468 = vmatpush.bf16.msrb.mxu0 %v7533_v45  ;;  %v7756_v22 = vld [vmem:[#allocation6 + $0x180] sm:$0xf]  ;;  %v11085_v24 = vld [vmem:[#allocation6 + $0x18c] sm:$0xf0]  ;;  %v7629_v30 = vor.u32 %v11053_v21, %v7628_v20 }
  0x3d   :  { %7553 = vmatmul.msk.bf16.vlgmr.msrb.gmra.mxu3 %vm289_vm0, %v12264_v11  ;;  %496 = vmatpush.bf16.msrb.mxu2 %v7541_v46  ;;  %v7884_v26 = vld [vmem:[#allocation6 + $0x280] sm:$0xf]  ;;  %v11117_v27 = vld [vmem:[#allocation6 + $0x28c] sm:$0xf0]  ;;  %v7757_v31 = vor.u32 %v11085_v24, %v7756_v22 }
  0x3e   :  { %482 = vmatpush.bf16.msrb.mxu1 %v7537_v47  ;;  %510 = vmatpush.bf16.msrb.mxu3 %v7545_v48  ;;  %v8012_v28 = vld [vmem:[#allocation6 + $0x380] sm:$0xf]  ;;  %v11149_v29 = vld [vmem:[#allocation6 + $0x38c] sm:$0xf0]  ;;  %v7885_v35 = vor.u32 %v11117_v27, %v7884_v26 }
  0x3f   :  { %v7612_v32 = vld [vmem:[#allocation6 + $0x60] sm:$0xf]  ;;  %v11049_v33 = vld [vmem:[#allocation6 + $0x6c] sm:$0xf0]  ;;  %v8013_v37 = vor.u32 %v11149_v29, %v8012_v28 }
  0x40   :  { %v7740_v34 = vld [vmem:[#allocation6 + $0x160] sm:$0xf]  ;;  %v11081_v36 = vld [vmem:[#allocation6 + $0x16c] sm:$0xf0]  ;;  %v7613_v42 = vor.u32 %v11049_v33, %v7612_v32 }
  0x41   :  { %v7868_v38 = vld [vmem:[#allocation6 + $0x260] sm:$0xf]  ;;  %v11113_v39 = vld [vmem:[#allocation6 + $0x26c] sm:$0xf0]  ;;  %v7741_v43 = vor.u32 %v11081_v36, %v7740_v34 }
  0x42   :  { %v7996_v40 = vld [vmem:[#allocation6 + $0x360] sm:$0xf]  ;;  %v11145_v41 = vld [vmem:[#allocation6 + $0x36c] sm:$0xf0]  ;;  %v7869_v47 = vor.u32 %v11113_v39, %v7868_v38 }
  0x43   :  { %v7596_v44 = vld [vmem:[#allocation6 + $0x40] sm:$0xf]  ;;  %v11045_v45 = vld [vmem:[#allocation6 + $0x4c] sm:$0xf0]  ;;  %v7997_v49 = vor.u32 %v11145_v41, %v7996_v40 }
  0x44   :  { %v7724_v46 = vld [vmem:[#allocation6 + $0x140] sm:$0xf]  ;;  %v11077_v48 = vld [vmem:[#allocation6 + $0x14c] sm:$0xf0]  ;;  %v7597_v54 = vor.u32 %v11045_v45, %v7596_v44 }
  0x45   :  { %v7852_v50 = vld [vmem:[#allocation6 + $0x240] sm:$0xf]  ;;  %v11109_v51 = vld [vmem:[#allocation6 + $0x24c] sm:$0xf0]  ;;  %v7725_v55 = vor.u32 %v11077_v48, %v7724_v46 }
  0x46   :  { %v7980_v52 = vld [vmem:[#allocation6 + $0x340] sm:$0xf]  ;;  %v11141_v53 = vld [vmem:[#allocation6 + $0x34c] sm:$0xf0]  ;;  %v7853_v59 = vor.u32 %v11109_v51, %v7852_v50 }
  0x47   :  { %v7580_v56 = vld [vmem:[#allocation6 + $0x20] sm:$0xf]  ;;  %v11073_v60 = vld [vmem:[#allocation6 + $0x12c] sm:$0xf0]  ;;  %v7981_v61 = vor.u32 %v11141_v53, %v7980_v52 }
  0x48   :  { %v11105_v63 = vld [vmem:[#allocation6 + $0x22c] sm:$0xf0]  ;;  %v7564_v3 = vld [vmem:[#allocation6] sm:$0xf] }
  0x49   :  { %v11137_v1 = vld [vmem:[#allocation6 + $0x32c] sm:$0xf0]  ;;  %v8188_v7 = vld [vmem:[#allocation6 + $0x4e0] sm:$0xf] }
  0x4a   :  { %v11193_v9 = vld [vmem:[#allocation6 + $0x4ec] sm:$0xf0]  ;;  %v7820_v14 = vld [vmem:[#allocation6 + $0x200] sm:$0xf] }
  0x4b   :  { %7554 = vmatmul.msk.bf16.vlgmr.msra.gmra.mxu0 %vm289_vm0, %v12264_v11  ;;  %7555 = vmatmul.msk.bf16.vlgmr.msra.gmra.mxu1 %vm289_vm0, %v12264_v11  ;;  %v11225_v12 = vld [vmem:[#allocation6 + $0x5ec] sm:$0xf0]  ;;  %v7948_v16 = vld [vmem:[#allocation6 + $0x300] sm:$0xf]  ;;  %v8189_v22 = vor.u32 %v11193_v9, %v8188_v7 }
  0x4c   :  { %7556 = vmatmul.msk.bf16.vlgmr.msra.gmra.mxu2 %vm289_vm0, %v12264_v11  ;;  %3647 = vmatpush.bf16.msra.mxu0 %v7677_v57  ;;  %v11041_v57 = vld [vmem:[#allocation6 + $0x2c] sm:$0xf0]  ;;  %v8172_v26 = vld [vmem:[#allocation6 + $0x4c0] sm:$0xf] }
  0x4d   :  { %7557 = vmatmul.msk.bf16.vlgmr.msra.gmra.mxu3 %vm289_vm0, %v12264_v11  ;;  %3661 = vmatpush.bf16.msra.mxu1 %v7805_v58  ;;  %v7708_v58 = vld [vmem:[#allocation6 + $0x120] sm:$0xf]  ;;  %v7581_v2 = vor.u32 %v11041_v57, %v7580_v56  ;;  %v11101_v15 = vld [vmem:[#allocation6 + $0x20c] sm:$0xf0] }
  0x4e   :  { %3675 = vmatpush.bf16.msra.mxu2 %v7933_v62  ;;  %3689 = vmatpush.bf16.msra.mxu3 %v8061_v0  ;;  %v7836_v62 = vld [vmem:[#allocation6 + $0x220] sm:$0xf]  ;;  %v7709_v4 = vor.u32 %v11073_v60, %v7708_v58  ;;  %v11257_v20 = vld [vmem:[#allocation6 + $0x6ec] sm:$0xf0]  ;;  %v7821_v28 = vor.u32 %v11101_v15, %v7820_v14 }
  0x4f   :  { %v7964_v0 = vld [vmem:[#allocation6 + $0x320] sm:$0xf]  ;;  %v7837_v8 = vor.u32 %v11105_v63, %v7836_v62  ;;  %v11289_v24 = vld [vmem:[#allocation6 + $0x7ec] sm:$0xf0] }
  0x50   :  { %3648 = vmatpush.bf16.msra.mxu0 %v7661_v5  ;;  %v7692_v5 = vld [vmem:[#allocation6 + $0x100] sm:$0xf]  ;;  %v11189_v27 = vld [vmem:[#allocation6 + $0x4cc] sm:$0xf0] }
  0x51   :  { %3662 = vmatpush.bf16.msra.mxu1 %v7789_v6  ;;  %v11069_v6 = vld [vmem:[#allocation6 + $0x10c] sm:$0xf0]  ;;  %v8300_v29 = vld [vmem:[#allocation6 + $0x5c0] sm:$0xf]  ;;  %v8173_v36 = vor.u32 %v11189_v27, %v8172_v26 }
  0x52   :  { %3676 = vmatpush.bf16.msra.mxu2 %v7917_v10  ;;  %3690 = vmatpush.bf16.msra.mxu3 %v8045_v13  ;;  %v8316_v10 = vld [vmem:[#allocation6 + $0x5e0] sm:$0xf]  ;;  %v7965_v13 = vor.u32 %v11137_v1, %v7964_v0  ;;  %v7693_v21 = vor.u32 %v11069_v6, %v7692_v5  ;;  %v11285_v38 = vld [vmem:[#allocation6 + $0x7cc] sm:$0xf0] }
  0x53   :  { %v8428_v34 = vld [vmem:[#allocation6 + $0x6c0] sm:$0xf]  ;;  %v11185_v41 = vld [vmem:[#allocation6 + $0x4ac] sm:$0xf0] }
  0x54   :  { %3649 = vmatpush.bf16.msra.mxu0 %v7645_v18  ;;  %v11133_v18 = vld [vmem:[#allocation6 + $0x30c] sm:$0xf0]  ;;  %v8156_v40 = vld [vmem:[#allocation6 + $0x4a0] sm:$0xf] }
  0x55   :  { %3663 = vmatpush.bf16.msra.mxu1 %v7773_v19  ;;  %v8444_v19 = vld [vmem:[#allocation6 + $0x6e0] sm:$0xf]  ;;  %v8157_v46 = vor.u32 %v11185_v41, %v8156_v40  ;;  %v11213_v51 = vld [vmem:[#allocation6 + $0x58c] sm:$0xf0] }
  0x56   :  { %3677 = vmatpush.bf16.msra.mxu2 %v7901_v23  ;;  %3691 = vmatpush.bf16.msra.mxu3 %v8029_v25  ;;  %v8572_v23 = vld [vmem:[#allocation6 + $0x7e0] sm:$0xf]  ;;  %v8317_v25 = vor.u32 %v11225_v12, %v8316_v10  ;;  %v8445_v32 = vor.u32 %v11257_v20, %v8444_v19  ;;  %v11281_v58 = vld [vmem:[#allocation6 + $0x7ac] sm:$0xf0] }
  0x57   :  { %v8573_v33 = vor.u32 %v11289_v24, %v8572_v23  ;;  %v8140_v48 = vld [vmem:[#allocation6 + $0x480] sm:$0xf]  ;;  %v11209_v0 = vld [vmem:[#allocation6 + $0x56c] sm:$0xf0] }
  0x58   :  { %3650 = vmatpush.bf16.msra.mxu0 %v7629_v30  ;;  %v11221_v30 = vld [vmem:[#allocation6 + $0x5cc] sm:$0xf0]  ;;  %v8268_v50 = vld [vmem:[#allocation6 + $0x580] sm:$0xf] }
  0x59   :  { %3664 = vmatpush.bf16.msra.mxu1 %v7757_v31  ;;  %v7949_v31 = vor.u32 %v11133_v18, %v7948_v16  ;;  %v8301_v39 = vor.u32 %v11221_v30, %v8300_v29  ;;  %v8269_v53 = vor.u32 %v11213_v51, %v8268_v50  ;;  %v8540_v56 = vld [vmem:[#allocation6 + $0x7a0] sm:$0xf]  ;;  %v11277_v5 = vld [vmem:[#allocation6 + $0x78c] sm:$0xf0] }
  0x5a   :  { %3678 = vmatpush.bf16.msra.mxu2 %v7885_v35  ;;  %3692 = vmatpush.bf16.msra.mxu3 %v8013_v37  ;;  %v11253_v35 = vld [vmem:[#allocation6 + $0x6cc] sm:$0xf0]  ;;  %v8556_v37 = vld [vmem:[#allocation6 + $0x7c0] sm:$0xf] }
  0x5b   :  { %7558 = vmatmul.msk.bf16.vlgmr.msrb.gmra.mxu0 %vm289_vm0, %v12264_v11  ;;  %7559 = vmatmul.msk.bf16.vlgmr.msrb.gmra.mxu1 %vm289_vm0, %v12264_v11  ;;  %v8429_v44 = vor.u32 %v11253_v35, %v8428_v34  ;;  %v8557_v45 = vor.u32 %v11285_v38, %v8556_v37  ;;  %v8124_v60 = vld [vmem:[#allocation6 + $0x460] sm:$0xf]  ;;  %v11205_v12 = vld [vmem:[#allocation6 + $0x54c] sm:$0xf0] }
  0x5c   :  { %7560 = vmatmul.msk.bf16.vlgmr.msrb.gmra.mxu2 %vm289_vm0, %v12264_v11  ;;  %3651 = vmatpush.bf16.msra.mxu0 %v7613_v42  ;;  %v8284_v42 = vld [vmem:[#allocation6 + $0x5a0] sm:$0xf]  ;;  %v11241_v15 = vld [vmem:[#allocation6 + $0x66c] sm:$0xf0] }
  0x5d   :  { %7561 = vmatmul.msk.bf16.vlgmr.msrb.gmra.mxu3 %vm289_vm0, %v12264_v11  ;;  %3665 = vmatpush.bf16.msra.mxu1 %v7741_v43  ;;  %v11037_v11 = vld [vmem:[#allocation6 + $0xc] sm:$0xf0]  ;;  %v8252_v62 = vld [vmem:[#allocation6 + $0x560] sm:$0xf] }
  0x5e   :  { %3679 = vmatpush.bf16.msra.mxu2 %v7869_v47  ;;  %3693 = vmatpush.bf16.msra.mxu3 %v7997_v49  ;;  %v7565_v17 = vor.u32 %v11037_v11, %v7564_v3  ;;  %v11217_v43 = vld [vmem:[#allocation6 + $0x5ac] sm:$0xf0]  ;;  %v8253_v1 = vor.u32 %v11209_v0, %v8252_v62  ;;  %v8108_v7 = vld [vmem:[#allocation6 + $0x440] sm:$0xf] }
  0x5f   :  { %v8285_v47 = vor.u32 %v11217_v43, %v8284_v42  ;;  %v11181_v49 = vld [vmem:[#allocation6 + $0x48c] sm:$0xf0]  ;;  %v8236_v9 = vld [vmem:[#allocation6 + $0x540] sm:$0xf] }
  0x60   :  { %3652 = vmatpush.bf16.msra.mxu0 %v7597_v54  ;;  %v8141_v52 = vor.u32 %v11181_v49, %v8140_v48  ;;  %v8412_v54 = vld [vmem:[#allocation6 + $0x6a0] sm:$0xf]  ;;  %v11245_v3 = vld [vmem:[#allocation6 + $0x68c] sm:$0xf0] }
  0x61   :  { %3666 = vmatpush.bf16.msra.mxu1 %v7725_v55  ;;  %v11249_v55 = vld [vmem:[#allocation6 + $0x6ac] sm:$0xf0]  ;;  %v8380_v14 = vld [vmem:[#allocation6 + $0x660] sm:$0xf] }
  0x62   :  { %3680 = vmatpush.bf16.msra.mxu2 %v7853_v59  ;;  %3694 = vmatpush.bf16.msra.mxu3 %v7981_v61  ;;  %v8413_v57 = vor.u32 %v11249_v55, %v8412_v54  ;;  %v8541_v59 = vor.u32 %v11281_v58, %v8540_v56  ;;  %v11177_v61 = vld [vmem:[#allocation6 + $0x46c] sm:$0xf0]  ;;  %v8508_v16 = vld [vmem:[#allocation6 + $0x760] sm:$0xf] }
  0x63   :  { %v8125_v63 = vor.u32 %v11177_v61, %v8124_v60  ;;  %v11273_v18 = vld [vmem:[#allocation6 + $0x76c] sm:$0xf0]  ;;  %v8092_v20 = vld [vmem:[#allocation6 + $0x420] sm:$0xf] }
  0x64   :  { %3653 = vmatpush.bf16.msra.mxu0 %v7581_v2  ;;  %v8396_v2 = vld [vmem:[#allocation6 + $0x680] sm:$0xf]  ;;  %v8509_v19 = vor.u32 %v11273_v18, %v8508_v16  ;;  %v11201_v24 = vld [vmem:[#allocation6 + $0x52c] sm:$0xf0] }
  0x65   :  { %3667 = vmatpush.bf16.msra.mxu1 %v7709_v4  ;;  %v8397_v11 = vor.u32 %v11245_v3, %v8396_v2  ;;  %v8524_v4 = vld [vmem:[#allocation6 + $0x780] sm:$0xf]  ;;  %v11237_v27 = vld [vmem:[#allocation6 + $0x64c] sm:$0xf0] }
  0x66   :  { %3681 = vmatpush.bf16.msra.mxu2 %v7837_v8  ;;  %3695 = vmatpush.bf16.msra.mxu3 %v7965_v13  ;;  %v8525_v6 = vor.u32 %v11277_v5, %v8524_v4  ;;  %v11173_v8 = vld [vmem:[#allocation6 + $0x44c] sm:$0xf0]  ;;  %v8237_v13 = vor.u32 %v11205_v12, %v8236_v9  ;;  %v8220_v23 = vld [vmem:[#allocation6 + $0x520] sm:$0xf] }
  0x67   :  { %v8109_v10 = vor.u32 %v11173_v8, %v8108_v7  ;;  %v8364_v26 = vld [vmem:[#allocation6 + $0x640] sm:$0xf]  ;;  %v11269_v30 = vld [vmem:[#allocation6 + $0x74c] sm:$0xf0] }
  0x68   :  { %3654 = vmatpush.bf16.msra.mxu0 %v7565_v17  ;;  %v8381_v17 = vor.u32 %v11241_v15, %v8380_v14  ;;  %v8365_v29 = vor.u32 %v11237_v27, %v8364_v26  ;;  %v8204_v34 = vld [vmem:[#allocation6 + $0x500] sm:$0xf]  ;;  %v11265_v41 = vld [vmem:[#allocation6 + $0x72c] sm:$0xf0] }
  0x69   :  { %3668 = vmatpush.bf16.msra.mxu1 %v7693_v21  ;;  %v11169_v21 = vld [vmem:[#allocation6 + $0x42c] sm:$0xf0]  ;;  %v8348_v38 = vld [vmem:[#allocation6 + $0x620] sm:$0xf] }
  0x6a   :  { %3682 = vmatpush.bf16.msra.mxu2 %v7821_v28  ;;  %3696 = vmatpush.bf16.msra.mxu3 %v7949_v31  ;;  %v8492_v28 = vld [vmem:[#allocation6 + $0x740] sm:$0xf]  ;;  %v11261_v48 = vld [vmem:[#allocation6 + $0x70c] sm:$0xf0] }
  0x6b   :  { %v8493_v31 = vor.u32 %v11269_v30, %v8492_v28  ;;  %v8476_v40 = vld [vmem:[#allocation6 + $0x720] sm:$0xf]  ;;  %v12298_v50 = vld [vmem:[#allocation4] sm:$0xff] }
  0x6c   :  { %3703 = vmatpush.bf16.msrb.mxu0 %v8189_v22  ;;  %v8093_v22 = vor.u32 %v11169_v21, %v8092_v20  ;;  %v8477_v43 = vor.u32 %v11265_v41, %v8476_v40  ;;  %v173_v54 = vperm.slane %v12298_v50, 1  ;;  %v11321_v0 = vld [vmem:[#allocation6 + $0x8ec] sm:$0xf0]  ;;  %v174_v2 = vperm.slane %v12298_v50, 2  ;;  %v8684_v12 = vld [vmem:[#allocation6 + $0x8c0] sm:$0xf] }
  0x6d   :  { %3717 = vmatpush.bf16.msrb.mxu1 %v8317_v25  ;;  %v8221_v25 = vor.u32 %v11201_v24, %v8220_v23  ;;  %v11353_v4 = vld [vmem:[#allocation6 + $0x9ec] sm:$0xf0]  ;;  %v175_v5 = vperm.slane %v12298_v50, 3  ;;  %v8812_v16 = vld [vmem:[#allocation6 + $0x9c0] sm:$0xf]  ;;  %v176_v23 = vperm.slane %v12298_v50, 4 }
  0x6e   :  { %3731 = vmatpush.bf16.msrb.mxu2 %v8445_v32  ;;  %3745 = vmatpush.bf16.msrb.mxu3 %v8573_v33  ;;  %v8076_v32 = vld [vmem:[#allocation6 + $0x400] sm:$0xf]  ;;  %v11165_v33 = vld [vmem:[#allocation6 + $0x40c] sm:$0xf0] }
  0x6f   :  { %v8077_v35 = vor.u32 %v11165_v33, %v8076_v32  ;;  %v8956_v20 = vld [vmem:[#allocation6 + $0xae0] sm:$0xf]  ;;  %v11385_v27 = vld [vmem:[#allocation6 + $0xaec] sm:$0xf0] }
  0x70   :  { %3704 = vmatpush.bf16.msrb.mxu0 %v8173_v36  ;;  %v11197_v36 = vld [vmem:[#allocation6 + $0x50c] sm:$0xf0]  ;;  %v9084_v28 = vld [vmem:[#allocation6 + $0xbe0] sm:$0xf]  ;;  %v8957_v41 = vor.u32 %v11385_v27, %v8956_v20 }
  0x71   :  { %3718 = vmatpush.bf16.msrb.mxu1 %v8301_v39  ;;  %v8205_v37 = vor.u32 %v11197_v36, %v8204_v34  ;;  %v11233_v39 = vld [vmem:[#allocation6 + $0x62c] sm:$0xf0]  ;;  %v8668_v33 = vld [vmem:[#allocation6 + $0x8a0] sm:$0xf] }
  0x72   :  { %3732 = vmatpush.bf16.msrb.mxu2 %v8429_v44  ;;  %3746 = vmatpush.bf16.msrb.mxu3 %v8557_v45  ;;  %v8349_v42 = vor.u32 %v11233_v39, %v8348_v38  ;;  %v8332_v44 = vld [vmem:[#allocation6 + $0x600] sm:$0xf]  ;;  %v11229_v45 = vld [vmem:[#allocation6 + $0x60c] sm:$0xf0] }
  0x73   :  { %v11417_v32 = vld [vmem:[#allocation6 + $0xbec] sm:$0xf0]  ;;  %v8908_v20 = vld [vmem:[#allocation6 + $0xa80] sm:$0xf] }
  0x74   :  { %3705 = vmatpush.bf16.msrb.mxu0 %v8157_v46  ;;  %v8333_v46 = vor.u32 %v11229_v45, %v8332_v44  ;;  %v11313_v34 = vld [vmem:[#allocation6 + $0x8ac] sm:$0xf0]  ;;  %v8940_v45 = vld [vmem:[#allocation6 + $0xac0] sm:$0xf] }
  0x75   :  { %3719 = vmatpush.bf16.msrb.mxu1 %v8285_v47  ;;  %v8460_v47 = vld [vmem:[#allocation6 + $0x700] sm:$0xf]  ;;  %v11345_v38 = vld [vmem:[#allocation6 + $0x9ac] sm:$0xf0]  ;;  %v8669_v44 = vor.u32 %v11313_v34, %v8668_v33  ;;  %v12324_v33 = vld [vmem:[#allocation4 + $0x8] sm:$0xff] }
  0x76   :  { %3733 = vmatpush.bf16.msrb.mxu2 %v8413_v57  ;;  %3747 = vmatpush.bf16.msrb.mxu3 %v8541_v59  ;;  %v8461_v49 = vor.u32 %v11261_v48, %v8460_v47  ;;  %v9068_v47 = vld [vmem:[#allocation6 + $0xbc0] sm:$0xf] }
  0x77   :  { %v8748_v34 = vld [vmem:[#allocation6 + $0x940] sm:$0xf] }
  0x78   :  { %3706 = vmatpush.bf16.msrb.mxu0 %v8141_v52  ;;  %v172_v52 = vperm.slane %v12298_v50, 0 }
  0x79   :  { %3720 = vmatpush.bf16.msrb.mxu1 %v8269_v53 }
  0x7a   :  { %3734 = vmatpush.bf16.msrb.mxu2 %v8397_v11  ;;  %3748 = vmatpush.bf16.msrb.mxu3 %v8525_v6  ;;  %v8828_v11 = vld [vmem:[#allocation6 + $0x9e0] sm:$0xf] }
  0x7c   :  { %3707 = vmatpush.bf16.msrb.mxu0 %v8125_v63  ;;  %v8700_v63 = vld [vmem:[#allocation6 + $0x8e0] sm:$0xf] }
  0x7d   :  { %3721 = vmatpush.bf16.msrb.mxu1 %v8253_v1  ;;  %v8701_v8 = vor.u32 %v11321_v0, %v8700_v63 }
  0x7e   :  { %3735 = vmatpush.bf16.msrb.mxu2 %v8381_v17  ;;  %3749 = vmatpush.bf16.msrb.mxu3 %v8509_v19  ;;  %v11349_v17 = vld [vmem:[#allocation6 + $0x9cc] sm:$0xf0] }
  0x80   :  { %3708 = vmatpush.bf16.msrb.mxu0 %v8109_v10  ;;  %v8829_v10 = vor.u32 %v11353_v4, %v8828_v11  ;;  %v11409_v11 = vld [vmem:[#allocation6 + $0xbac] sm:$0xf0] }
  0x81   :  { %3722 = vmatpush.bf16.msrb.mxu1 %v8237_v13  ;;  %v11317_v13 = vld [vmem:[#allocation6 + $0x8cc] sm:$0xf0] }
  0x82   :  { %3736 = vmatpush.bf16.msrb.mxu2 %v8365_v29  ;;  %3750 = vmatpush.bf16.msrb.mxu3 %v8493_v31  ;;  %v8685_v26 = vor.u32 %v11317_v13, %v8684_v12  ;;  %v8813_v31 = vor.u32 %v11349_v17, %v8812_v16  ;;  %v11305_v12 = vld [vmem:[#allocation6 + $0x86c] sm:$0xf0]  ;;  %v8764_v16 = vld [vmem:[#allocation6 + $0x960] sm:$0xf] }
  0x83   :  { %v11337_v17 = vld [vmem:[#allocation6 + $0x96c] sm:$0xf0] }
  0x84   :  { %3709 = vmatpush.bf16.msrb.mxu0 %v8093_v22 }
  0x85   :  { %3723 = vmatpush.bf16.msrb.mxu1 %v8221_v25  ;;  %v177_v25 = vperm.slane %v12298_v50, 5 }
  0x86   :  { %3737 = vmatpush.bf16.msrb.mxu2 %v8349_v42  ;;  %3751 = vmatpush.bf16.msrb.mxu3 %v8477_v43  ;;  %v9085_v43 = vor.u32 %v11417_v32, %v9084_v28 }
  0x88   :  { %3710 = vmatpush.bf16.msrb.mxu0 %v8077_v35 }
  0x89   :  { %3724 = vmatpush.bf16.msrb.mxu1 %v8205_v37  ;;  %v8796_v37 = vld [vmem:[#allocation6 + $0x9a0] sm:$0xf] }
  0x8a   :  { %3738 = vmatpush.bf16.msrb.mxu2 %v8333_v46  ;;  %3752 = vmatpush.bf16.msrb.mxu3 %v8461_v49  ;;  %v11381_v46 = vld [vmem:[#allocation6 + $0xacc] sm:$0xf0] }
  0xa8   :  { %v302_v51 = vpop.f32.mrf.mxu0  ;;  %v316_v53 = vpop.f32.mrf.mxu1 }
  0xa9   :  { %v303_v55 = vadd.f32 %v302_v51, %v172_v52  ;;  %v317_v56 = vadd.f32 %v316_v53, %v173_v54  ;;  %v8797_v51 = vor.u32 %v11345_v38, %v8796_v37  ;;  %v8652_v53 = vld [vmem:[#allocation6 + $0x880] sm:$0xf] }
  0xaa   :  { %v8892_v38 = vld [vmem:[#allocation6 + $0xa60] sm:$0xf] }
  0xab   :  { %v517_v60 = vmax.f32 %v303_v55, 0.0  ;;  %v518_v1 = vmax.f32 %v317_v56, 0.0  ;;  %v8780_v56 = vld [vmem:[#allocation6 + $0x980] sm:$0xf] }
  0xaf   :  { %v330_v57 = vpop.f32.mrf.mxu2 }
  0xb0   :  { %v344_v58 = vpop.f32.mrf.mxu3  ;;  %v304_v59 = vpop.f32.mrf.mxu0  ;;  %v331_v14 = vadd.f32 %v330_v57, %v174_v2  ;;  %v11341_v57 = vld [vmem:[#allocation6 + $0x98c] sm:$0xf0] }
  0xb1   :  { %v305_v61 = vadd.f32 %v304_v59, %v172_v52  ;;  %v318_v62 = vpop.f32.mrf.mxu1  ;;  %v345_v18 = vadd.f32 %v344_v58, %v175_v5  ;;  %v11413_v52 = vld [vmem:[#allocation6 + $0xbcc] sm:$0xf0]  ;;  %v178_v58 = vperm.slane %v12298_v50, 6 }
  0xb2   :  { %v319_v3 = vadd.f32 %v318_v62, %v173_v54  ;;  %v519_v35 = vmax.f32 %v331_v14, 0.0  ;;  %v11309_v54 = vld [vmem:[#allocation6 + $0x88c] sm:$0xf0]  ;;  %v9069_v0 = vor.u32 %v11413_v52, %v9068_v47  ;;  %v9020_v47 = vld [vmem:[#allocation6 + $0xb60] sm:$0xf] }
  0xb3   :  { %v533_v6 = vmax.f32 %v305_v61, 0.0  ;;  %v520_v39 = vmax.f32 %v345_v18, 0.0  ;;  %v8924_v61 = vld [vmem:[#allocation6 + $0xaa0] sm:$0xf] }
  0xb4   :  { %v534_v7 = vmax.f32 %v319_v3, 0.0  ;;  %v9052_v3 = vld [vmem:[#allocation6 + $0xba0] sm:$0xf] }
  0xb5   :  { %v12304_v9 = vpack.c.bf16 %v533_v6, %v517_v60  ;;  %v8941_v60 = vor.u32 %v11381_v46, %v8940_v45 }
  0xb6   :  { %v12306_v15 = vpack.c.bf16 %v534_v7, %v518_v1  ;;  %v8653_v1 = vor.u32 %v11309_v54, %v8652_v53  ;;  %v180_v53 = vperm.slane %v12324_v33, 0 }
  0xb7   :  { %v332_v19 = vpop.f32.mrf.mxu2  ;;  %3655 = vmatmul.bf16.vlgmr.msra.gmra.mxu0 %v12304_v9 }
  0xb8   :  { %v333_v21 = vadd.f32 %v332_v19, %v174_v2  ;;  %v346_v22 = vpop.f32.mrf.mxu3  ;;  %3669 = vmatmul.bf16.vlgmr.msra.gmra.mxu1 %v12306_v15  ;;  %3759 = vmatpush.bf16.msra.mxu0 %v8701_v8  ;;  %v358_v24 = vpop.f32.mrf.mxu0  ;;  %v11377_v2 = vld [vmem:[#allocation6 + $0xaac] sm:$0xf0]  ;;  %v8781_v8 = vor.u32 %v11341_v57, %v8780_v56  ;;  %v8604_v56 = vld [vmem:[#allocation6 + $0x820] sm:$0xf] }
  0xb9   :  { %v347_v29 = vadd.f32 %v346_v22, %v175_v5  ;;  %3773 = vmatpush.bf16.msra.mxu1 %v8829_v10  ;;  %v372_v30 = vpop.f32.mrf.mxu1  ;;  %v359_v49 = vadd.f32 %v358_v24, %v176_v23  ;;  %v179_v5 = vperm.slane %v12298_v50, 7  ;;  %v8636_v10 = vld [vmem:[#allocation6 + $0x860] sm:$0xf]  ;;  %v8925_v19 = vor.u32 %v11377_v2, %v8924_v61  ;;  %v11297_v57 = vld [vmem:[#allocation6 + $0x82c] sm:$0xf0] }
  0xba   :  { %v535_v36 = vmax.f32 %v333_v21, 0.0  ;;  %v373_v55 = vadd.f32 %v372_v30, %v177_v25  ;;  %v9053_v24 = vor.u32 %v11409_v11, %v9052_v3  ;;  %v8637_v50 = vor.u32 %v11305_v12, %v8636_v10  ;;  %v8620_v30 = vld [vmem:[#allocation6 + $0x840] sm:$0xf]  ;;  %v11365_v11 = vld [vmem:[#allocation6 + $0xa4c] sm:$0xf0] }
  0xbb   :  { %v536_v40 = vmax.f32 %v347_v29, 0.0  ;;  %v521_v4 = vmax.f32 %v359_v49, 0.0  ;;  %v8765_v29 = vor.u32 %v11337_v17, %v8764_v16  ;;  %v11401_v49 = vld [vmem:[#allocation6 + $0xb6c] sm:$0xf0]  ;;  %v8605_v3 = vor.u32 %v11297_v57, %v8604_v56  ;;  %v8588_v10 = vld [vmem:[#allocation6 + $0x800] sm:$0xf] }
  0xbc   :  { %v12312_v42 = vpack.c.bf16 %v535_v36, %v519_v35  ;;  %3760 = vmatpush.bf16.msra.mxu0 %v8685_v26  ;;  %v522_v13 = vmax.f32 %v373_v55, 0.0  ;;  %v11373_v26 = vld [vmem:[#allocation6 + $0xa8c] sm:$0xf0]  ;;  %v9021_v2 = vor.u32 %v11401_v49, %v9020_v47  ;;  %v9212_v16 = vld [vmem:[#allocation6 + $0xce0] sm:$0xf] }
  0xbd   :  { %v12314_v48 = vpack.c.bf16 %v536_v40, %v520_v39  ;;  %3774 = vmatpush.bf16.msra.mxu1 %v8813_v31  ;;  %v11301_v31 = vld [vmem:[#allocation6 + $0x84c] sm:$0xf0]  ;;  %v8909_v37 = vor.u32 %v11373_v26, %v8908_v20  ;;  %v8972_v57 = vld [vmem:[#allocation6 + $0xb00] sm:$0xf] }
  0xbe   :  { %3683 = vmatmul.bf16.vlgmr.msra.gmra.mxu2 %v12312_v42  ;;  %v11333_v35 = vld [vmem:[#allocation6 + $0x94c] sm:$0xf0]  ;;  %v8621_v46 = vor.u32 %v11301_v31, %v8620_v30  ;;  %v8988_v31 = vld [vmem:[#allocation6 + $0xb20] sm:$0xf] }
  0xbf   :  { %3697 = vmatmul.bf16.vlgmr.msra.gmra.mxu3 %v12314_v48  ;;  %3787 = vmatpush.bf16.msra.mxu2 %v8957_v41  ;;  %v386_v59 = vpop.f32.mrf.mxu2  ;;  %v11369_v39 = vld [vmem:[#allocation6 + $0xa6c] sm:$0xf0]  ;;  %v8749_v55 = vor.u32 %v11333_v35, %v8748_v34 }
  0xc0   :  { %3801 = vmatpush.bf16.msra.mxu3 %v9085_v43  ;;  %v400_v62 = vpop.f32.mrf.mxu3  ;;  %3761 = vmatpush.bf16.msra.mxu0 %v8669_v44  ;;  %v360_v63 = vpop.f32.mrf.mxu0  ;;  %v387_v21 = vadd.f32 %v386_v59, %v178_v58  ;;  %v11293_v12 = vld [vmem:[#allocation6 + $0x80c] sm:$0xf0] }
  0xc1   :  { %3775 = vmatpush.bf16.msra.mxu1 %v8797_v51  ;;  %v361_v6 = vadd.f32 %v360_v63, %v176_v23  ;;  %v374_v7 = vpop.f32.mrf.mxu1  ;;  %v9036_v23 = vld [vmem:[#allocation6 + $0xb80] sm:$0xf]  ;;  %v401_v27 = vadd.f32 %v400_v62, %v179_v5  ;;  %v181_v62 = vperm.slane %v12324_v33, 1  ;;  %v8893_v63 = vor.u32 %v11369_v39, %v8892_v38  ;;  %v11449_v17 = vld [vmem:[#allocation6 + $0xcec] sm:$0xf0] }
  0xc2   :  { %v375_v14 = vadd.f32 %v374_v7, %v177_v25  ;;  %v11405_v25 = vld [vmem:[#allocation6 + $0xb8c] sm:$0xf0]  ;;  %v523_v40 = vmax.f32 %v387_v21, 0.0  ;;  %v183_v21 = vperm.slane %v12324_v33, 3  ;;  %v9213_v38 = vor.u32 %v11449_v17, %v9212_v16 }
  0xc3   :  { %v537_v18 = vmax.f32 %v361_v6, 0.0  ;;  %3788 = vmatpush.bf16.msra.mxu2 %v8941_v60  ;;  %v9037_v45 = vor.u32 %v11405_v25, %v9036_v23  ;;  %v524_v51 = vmax.f32 %v401_v27, 0.0  ;;  %v11329_v60 = vld [vmem:[#allocation6 + $0x92c] sm:$0xf0]  ;;  %v8860_v25 = vld [vmem:[#allocation6 + $0xa20] sm:$0xf] }
  0xc4   :  { %3802 = vmatpush.bf16.msra.mxu3 %v9069_v0  ;;  %v538_v22 = vmax.f32 %v375_v14, 0.0  ;;  %3762 = vmatpush.bf16.msra.mxu0 %v8653_v1  ;;  %v8876_v0 = vld [vmem:[#allocation6 + $0xa40] sm:$0xf]  ;;  %v11325_v14 = vld [vmem:[#allocation6 + $0x90c] sm:$0xf0] }
  0xc5   :  { %v12320_v28 = vpack.c.bf16 %v537_v18, %v521_v4  ;;  %3776 = vmatpush.bf16.msra.mxu1 %v8781_v8  ;;  %v9004_v4 = vld [vmem:[#allocation6 + $0xb40] sm:$0xf]  ;;  %v11361_v30 = vld [vmem:[#allocation6 + $0xa2c] sm:$0xf0] }
  0xc6   :  { %v12322_v32 = vpack.c.bf16 %v538_v22, %v522_v13  ;;  %v8716_v13 = vld [vmem:[#allocation6 + $0x900] sm:$0xf]  ;;  %v8877_v22 = vor.u32 %v11365_v11, %v8876_v0  ;;  %v11393_v39 = vld [vmem:[#allocation6 + $0xb2c] sm:$0xf0] }
  0xc7   :  { %3789 = vmatpush.bf16.msra.mxu2 %v8925_v19  ;;  %v388_v36 = vpop.f32.mrf.mxu2  ;;  %3711 = vmatmul.bf16.vlgmr.msrb.gmra.mxu0 %v12320_v28  ;;  %v182_v19 = vperm.slane %v12324_v33, 2  ;;  %v8989_v56 = vor.u32 %v11393_v39, %v8988_v31  ;;  %v9596_v0 = vld [vmem:[#allocation6 + $0xfe0] sm:$0xf] }
  0xc8   :  { %3803 = vmatpush.bf16.msra.mxu3 %v9053_v24  ;;  %v389_v41 = vadd.f32 %v388_v36, %v178_v58  ;;  %v402_v43 = vpop.f32.mrf.mxu3  ;;  %3763 = vmatpush.bf16.msra.mxu0 %v8637_v50  ;;  %v414_v44 = vpop.f32.mrf.mxu0  ;;  %v8732_v58 = vld [vmem:[#allocation6 + $0x920] sm:$0xf]  ;;  %v11481_v50 = vld [vmem:[#allocation6 + $0xdec] sm:$0xf0] }
  0xc9   :  { %v403_v52 = vadd.f32 %v402_v43, %v179_v5  ;;  %3777 = vmatpush.bf16.msra.mxu1 %v8765_v29  ;;  %v428_v54 = vpop.f32.mrf.mxu1  ;;  %v11397_v5 = vld [vmem:[#allocation6 + $0xb4c] sm:$0xf0]  ;;  %v415_v7 = vadd.f32 %v414_v44, %v180_v53  ;;  %v8733_v8 = vor.u32 %v11329_v60, %v8732_v58  ;;  %v9340_v24 = vld [vmem:[#allocation6 + $0xde0] sm:$0xf]  ;;  %v8589_v29 = vor.u32 %v11293_v12, %v8588_v10 }
  0xca   :  { %v539_v59 = vmax.f32 %v389_v41, 0.0  ;;  %3725 = vmatmul.bf16.vlgmr.msrb.gmra.mxu1 %v12322_v32  ;;  %v429_v18 = vadd.f32 %v428_v54, %v181_v62  ;;  %v9005_v27 = vor.u32 %v11397_v5, %v9004_v4  ;;  %v9341_v43 = vor.u32 %v11481_v50, %v9340_v24  ;;  %v11445_v44 = vld [vmem:[#allocation6 + $0xccc] sm:$0xf0]  ;;  %v9180_v11 = vld [vmem:[#allocation6 + $0xca0] sm:$0xf] }
  0xcb   :  { %v540_v61 = vmax.f32 %v403_v52, 0.0  ;;  %3790 = vmatpush.bf16.msra.mxu2 %v8909_v37  ;;  %v525_v34 = vmax.f32 %v415_v7, 0.0  ;;  %v8717_v37 = vor.u32 %v11325_v14, %v8716_v13  ;;  %v8844_v52 = vld [vmem:[#allocation6 + $0xa00] sm:$0xf]  ;;  %v11357_v54 = vld [vmem:[#allocation6 + $0xa0c] sm:$0xf0] }
  0xcc   :  { %v12330_v1 = vpack.c.bf16 %v539_v59, %v523_v40  ;;  %3804 = vmatpush.bf16.msra.mxu3 %v9037_v45  ;;  %3764 = vmatpush.bf16.msra.mxu0 %v8621_v46  ;;  %v9196_v40 = vld [vmem:[#allocation6 + $0xcc0] sm:$0xf]  ;;  %v11477_v46 = vld [vmem:[#allocation6 + $0xdcc] sm:$0xf0]  ;;  %v526_v47 = vmax.f32 %v429_v18, 0.0 }
  0xcd   :  { %v12332_v6 = vpack.c.bf16 %v540_v61, %v524_v51  ;;  %3778 = vmatpush.bf16.msra.mxu1 %v8749_v55  ;;  %v9324_v45 = vld [vmem:[#allocation6 + $0xdc0] sm:$0xf]  ;;  %v8861_v51 = vor.u32 %v11361_v30, %v8860_v25  ;;  %v11389_v59 = vld [vmem:[#allocation6 + $0xb0c] sm:$0xf0]  ;;  %v9197_v61 = vor.u32 %v11445_v44, %v9196_v40 }
  0xce   :  { %3739 = vmatmul.bf16.vlgmr.msrb.gmra.mxu2 %v12330_v1  ;;  %v11441_v4 = vld [vmem:[#allocation6 + $0xcac] sm:$0xf0]  ;;  %v9308_v10 = vld [vmem:[#allocation6 + $0xda0] sm:$0xf]  ;;  %v8973_v17 = vor.u32 %v11389_v59, %v8972_v57 }
  0xcf   :  { %3753 = vmatmul.bf16.vlgmr.msrb.gmra.mxu3 %v12332_v6  ;;  %3791 = vmatpush.bf16.msra.mxu2 %v8893_v63  ;;  %v442_v20 = vpop.f32.mrf.mxu2  ;;  %v11513_v63 = vld [vmem:[#allocation6 + $0xeec] sm:$0xf0]  ;;  %v9164_v31 = vld [vmem:[#allocation6 + $0xc80] sm:$0xf] }
  0xd0   :  { %3805 = vmatpush.bf16.msra.mxu3 %v9021_v2  ;;  %3765 = vmatpush.bf16.msra.mxu0 %v8605_v3  ;;  %v416_v26 = vpop.f32.mrf.mxu0  ;;  %v456_v23 = vpop.f32.mrf.mxu3  ;;  %v443_v55 = vadd.f32 %v442_v20, %v182_v19  ;;  %v9325_v2 = vor.u32 %v11477_v46, %v9324_v45  ;;  %v11545_v3 = vld [vmem:[#allocation6 + $0xfec] sm:$0xf0]  ;;  %v9452_v20 = vld [vmem:[#allocation6 + $0xec0] sm:$0xf] }
  0xd1   :  { %3779 = vmatpush.bf16.msra.mxu1 %v8733_v8  ;;  %v417_v35 = vadd.f32 %v416_v26, %v180_v53  ;;  %v430_v36 = vpop.f32.mrf.mxu1  ;;  %v457_v60 = vadd.f32 %v456_v23, %v183_v21  ;;  %v8845_v8 = vor.u32 %v11357_v54, %v8844_v52  ;;  %v11473_v12 = vld [vmem:[#allocation6 + $0xdac] sm:$0xf0]  ;;  %v9597_v26 = vor.u32 %v11545_v3, %v9596_v0  ;;  %v9436_v44 = vld [vmem:[#allocation6 + $0xea0] sm:$0xf] }
  0xd2   :  { %v431_v41 = vadd.f32 %v430_v36, %v181_v62  ;;  %v9468_v62 = vld [vmem:[#allocation6 + $0xee0] sm:$0xf]  ;;  %v527_v13 = vmax.f32 %v443_v55, 0.0  ;;  %v9181_v23 = vor.u32 %v11441_v4, %v9180_v11  ;;  %v9309_v30 = vor.u32 %v11473_v12, %v9308_v10  ;;  %v11469_v36 = vld [vmem:[#allocation6 + $0xd8c] sm:$0xf0] }
  0xd3   :  { %v541_v49 = vmax.f32 %v417_v35, 0.0  ;;  %3792 = vmatpush.bf16.msra.mxu2 %v8877_v22  ;;  %v9469_v18 = vor.u32 %v11513_v63, %v9468_v62  ;;  %v11509_v22 = vld [vmem:[#allocation6 + $0xecc] sm:$0xf0]  ;;  %v528_v24 = vmax.f32 %v457_v60, 0.0  ;;  %v9292_v35 = vld [vmem:[#allocation6 + $0xd80] sm:$0xf] }
  0xd4   :  { %3806 = vmatpush.bf16.msra.mxu3 %v9005_v27  ;;  %v542_v53 = vmax.f32 %v431_v41, 0.0  ;;  %3766 = vmatpush.bf16.msra.mxu0 %v8589_v29  ;;  %v9580_v27 = vld [vmem:[#allocation6 + $0xfc0] sm:$0xf]  ;;  %v11541_v29 = vld [vmem:[#allocation6 + $0xfcc] sm:$0xf0] }
  0xd5   :  { %v12340_v58 = vpack.c.bf16 %v541_v49, %v525_v34  ;;  %3780 = vmatpush.bf16.msra.mxu1 %v8717_v37  ;;  %v11437_v34 = vld [vmem:[#allocation6 + $0xc8c] sm:$0xf0]  ;;  %v9581_v41 = vor.u32 %v11541_v29, %v9580_v27  ;;  %v9564_v46 = vld [vmem:[#allocation6 + $0xfa0] sm:$0xf]  ;;  %v186_v27 = vperm.slane %v12324_v33, 6 }
  0xd6   :  { %v12344_v5 = vpack.c.bf16 %v542_v53, %v526_v47  ;;  %v11505_v45 = vld [vmem:[#allocation6 + $0xeac] sm:$0xf0]  ;;  %v9293_v47 = vor.u32 %v11469_v36, %v9292_v35  ;;  %v9276_v54 = vld [vmem:[#allocation6 + $0xd60] sm:$0xf]  ;;  %v187_v35 = vperm.slane %v12324_v33, 7 }
  0xd7   :  { %3793 = vmatpush.bf16.msra.mxu2 %v8861_v51  ;;  %v444_v7 = vpop.f32.mrf.mxu2  ;;  %3767 = vmatmul.bf16.vlgmr.msra.gmra.mxu0 %v12340_v58  ;;  %v11537_v49 = vld [vmem:[#allocation6 + $0xfac] sm:$0xf0]  ;;  %v9148_v51 = vld [vmem:[#allocation6 + $0xc60] sm:$0xf]  ;;  %v9437_v53 = vor.u32 %v11505_v45, %v9436_v44 }
  0xd8   :  { %3815 = vmatpush.bf16.msrb.mxu0 %v9213_v38  ;;  %3807 = vmatpush.bf16.msra.mxu3 %v8989_v56  ;;  %v445_v14 = vadd.f32 %v444_v7, %v182_v19  ;;  %v458_v16 = vpop.f32.mrf.mxu3  ;;  %v12352_v37 = vpop.f32.mrf.mxu0  ;;  %v11433_v52 = vld [vmem:[#allocation6 + $0xc6c] sm:$0xf0]  ;;  %v9565_v56 = vor.u32 %v11537_v49, %v9564_v46  ;;  %v9420_v59 = vld [vmem:[#allocation6 + $0xe80] sm:$0xf] }
  0xd9   :  { %3829 = vmatpush.bf16.msrb.mxu1 %v9341_v43  ;;  %v459_v50 = vadd.f32 %v458_v16, %v183_v21  ;;  %v9453_v21 = vor.u32 %v11509_v22, %v9452_v20  ;;  %v12356_v39 = vpop.f32.mrf.mxu1  ;;  %v9165_v43 = vor.u32 %v11437_v34, %v9164_v31  ;;  %v11465_v55 = vld [vmem:[#allocation6 + $0xd6c] sm:$0xf0]  ;;  %v9149_v57 = vor.u32 %v11433_v52, %v9148_v51  ;;  %v9132_v0 = vld [vmem:[#allocation6 + $0xc40] sm:$0xf] }
  0xda   :  { %v543_v25 = vmax.f32 %v445_v14, 0.0  ;;  %3781 = vmatmul.bf16.vlgmr.msra.gmra.mxu1 %v12344_v5  ;;  %v11501_v60 = vld [vmem:[#allocation6 + $0xe8c] sm:$0xf0]  ;;  %v9277_v62 = vor.u32 %v11465_v55, %v9276_v54  ;;  %v9260_v11 = vld [vmem:[#allocation6 + $0xd40] sm:$0xf]  ;;  %v185_v14 = vperm.slane %v12324_v33, 5 }
  0xdb   :  { %v544_v19 = vmax.f32 %v459_v50, 0.0  ;;  %3794 = vmatpush.bf16.msra.mxu2 %v8845_v8  ;;  %v11533_v63 = vld [vmem:[#allocation6 + $0xf8c] sm:$0xf0]  ;;  %v184_v8 = vperm.slane %v12324_v33, 4  ;;  %v9421_v10 = vor.u32 %v11501_v60, %v9420_v59  ;;  %v9404_v12 = vld [vmem:[#allocation6 + $0xe60] sm:$0xf] }
  0xdc   :  { %3816 = vmatpush.bf16.msrb.mxu0 %v9197_v61  ;;  %v12354_v38 = vpack.c.bf16 %v543_v25, %v527_v13  ;;  %3808 = vmatpush.bf16.msra.mxu3 %v8973_v17  ;;  %v9548_v61 = vld [vmem:[#allocation6 + $0xf80] sm:$0xf]  ;;  %v11461_v4 = vld [vmem:[#allocation6 + $0xd4c] sm:$0xf0]  ;;  %v11063_v54 = vld [vmem:[#allocation6 + $0xe4] sm:$0xf] }
  0xdd   :  { %3830 = vmatpush.bf16.msrb.mxu1 %v9325_v2  ;;  %v12358_v40 = vpack.c.bf16 %v544_v19, %v528_v24  ;;  %v11429_v2 = vld [vmem:[#allocation6 + $0xc4c] sm:$0xf0]  ;;  %v9549_v16 = vor.u32 %v11533_v63, %v9548_v61  ;;  %v9261_v24 = vor.u32 %v11461_v4, %v9260_v11  ;;  %v9116_v50 = vld [vmem:[#allocation6 + $0xc20] sm:$0xf]  ;;  %v471_v31 = vadd.f32 %v12352_v37, %v184_v8  ;;  %v7678_v55 = vld [vmem:[#allocation6 + $0xf0] sm:$0xf0] }
  0xde   :  { %3795 = vmatmul.bf16.vlgmr.msra.gmra.mxu2 %v12354_v38  ;;  %v11497_v13 = vld [vmem:[#allocation6 + $0xe6c] sm:$0xf0]  ;;  %v9133_v17 = vor.u32 %v11429_v2, %v9132_v0  ;;  %v9244_v25 = vld [vmem:[#allocation6 + $0xd20] sm:$0xf] }
  0xdf   :  { %3843 = vmatpush.bf16.msrb.mxu2 %v9469_v18  ;;  %3809 = vmatmul.bf16.vlgmr.msra.gmra.mxu3 %v12358_v40  ;;  %v12362_v3 = vpop.f32.mrf.mxu2  ;;  %v9532_v18 = vld [vmem:[#allocation6 + $0xf60] sm:$0xf]  ;;  %v11529_v20 = vld [vmem:[#allocation6 + $0xf6c] sm:$0xf0]  ;;  %v9405_v29 = vor.u32 %v11497_v13, %v9404_v12 }
  0xe0   :  { %3857 = vmatpush.bf16.msrb.mxu3 %v9597_v26  ;;  %3817 = vmatpush.bf16.msrb.mxu0 %v9181_v23  ;;  %v12364_v7 = vpop.f32.mrf.mxu3  ;;  %v472_v22 = vpop.f32.mrf.mxu0  ;;  %v11425_v26 = vld [vmem:[#allocation6 + $0xc2c] sm:$0xf0]  ;;  %v9533_v34 = vor.u32 %v11529_v20, %v9532_v18  ;;  %v9388_v36 = vld [vmem:[#allocation6 + $0xe40] sm:$0xf]  ;;  %v499_v13 = vadd.f32 %v12362_v3, %v186_v27  ;;  %v7662_v18 = vld [vmem:[#allocation6 + $0xd0] sm:$0xf0] }
  0xe1   :  { %3831 = vmatpush.bf16.msrb.mxu1 %v9309_v30  ;;  %v486_v23 = vpop.f32.mrf.mxu1  ;;  %v11457_v30 = vld [vmem:[#allocation6 + $0xd2c] sm:$0xf0]  ;;  %v473_v19 = vadd.f32 %v472_v22, %v184_v8  ;;  %v9516_v45 = vld [vmem:[#allocation6 + $0xf40] sm:$0xf]  ;;  %v7681_v8 = vor.u32 %v11063_v54, %v7678_v55  ;;  %v11091_v20 = vld [vmem:[#allocation6 + $0x1c4] sm:$0xf] }
  0xe2   :  { %v11493_v44 = vld [vmem:[#allocation6 + $0xe4c] sm:$0xf0]  ;;  %v9100_v49 = vld [vmem:[#allocation6 + $0xc00] sm:$0xf] }
  0xe3   :  { %3844 = vmatpush.bf16.msrb.mxu2 %v9453_v21  ;;  %v485_v21 = vadd.f32 %v12356_v39, %v185_v14  ;;  %v11525_v46 = vld [vmem:[#allocation6 + $0xf4c] sm:$0xf0]  ;;  %v9228_v37 = vld [vmem:[#allocation6 + $0xd00] sm:$0xf]  ;;  %v545_v33 = vmax.f32 %v473_v19, 0.0 }
  0xe4   :  { %3858 = vmatpush.bf16.msrb.mxu3 %v9581_v41  ;;  %3818 = vmatpush.bf16.msrb.mxu0 %v9165_v43  ;;  %v9117_v41 = vor.u32 %v11425_v26, %v9116_v50  ;;  %v487_v43 = vadd.f32 %v486_v23, %v185_v14  ;;  %v11421_v51 = vld [vmem:[#allocation6 + $0xc0c] sm:$0xf0]  ;;  %v11095_v39 = vld [vmem:[#allocation6 + $0x1e4] sm:$0xf]  ;;  %v9372_v0 = vld [vmem:[#allocation6 + $0xe20] sm:$0xf] }
  0xe5   :  { %3832 = vmatpush.bf16.msrb.mxu1 %v9293_v47  ;;  %v9245_v47 = vor.u32 %v11457_v30, %v9244_v25  ;;  %v11453_v52 = vld [vmem:[#allocation6 + $0xd0c] sm:$0xf0]  ;;  %v530_v60 = vmax.f32 %v485_v21, 0.0  ;;  %v9101_v63 = vor.u32 %v11421_v51, %v9100_v49  ;;  %v7790_v23 = vld [vmem:[#allocation6 + $0x1d0] sm:$0xf0] }
  0xe6   :  { %v546_v61 = vmax.f32 %v487_v43, 0.0  ;;  %v11489_v2 = vld [vmem:[#allocation6 + $0xe2c] sm:$0xf0]  ;;  %v9229_v4 = vor.u32 %v11453_v52, %v9228_v37  ;;  %v11159_v21 = vld [vmem:[#allocation6 + $0x3e4] sm:$0xf]  ;;  %v7793_v43 = vor.u32 %v11091_v20, %v7790_v23 }
  0xe7   :  { %3845 = vmatpush.bf16.msrb.mxu2 %v9437_v53  ;;  %v529_v53 = vmax.f32 %v471_v31, 0.0  ;;  %v500_v59 = vpop.f32.mrf.mxu2  ;;  %v11521_v12 = vld [vmem:[#allocation6 + $0xf2c] sm:$0xf0]  ;;  %v9373_v50 = vor.u32 %v11489_v2, %v9372_v0  ;;  %v9484_v31 = vld [vmem:[#allocation6 + $0xf00] sm:$0xf] }
  0xe8   :  { %3859 = vmatpush.bf16.msrb.mxu3 %v9565_v56  ;;  %3819 = vmatpush.bf16.msrb.mxu0 %v9149_v57  ;;  %v9389_v56 = vor.u32 %v11493_v44, %v9388_v36  ;;  %v7806_v57 = vld [vmem:[#allocation6 + $0x1f0] sm:$0xf0]  ;;  %v514_v11 = vpop.f32.mrf.mxu3  ;;  %v11485_v25 = vld [vmem:[#allocation6 + $0xe0c] sm:$0xf0]  ;;  %v12376_v30 = vpack.c.bf16 %v546_v61, %v530_v60  ;;  %v11055_v44 = vld [vmem:[#allocation6 + $0xa4] sm:$0xf] }
  0xe9   :  { %3833 = vmatpush.bf16.msrb.mxu1 %v9277_v62  ;;  %v9517_v62 = vor.u32 %v11525_v46, %v9516_v45  ;;  %v7809_v14 = vor.u32 %v11095_v39, %v7806_v57  ;;  %v12373_v22 = vpack.c.bf16 %v545_v33, %v529_v53  ;;  %v515_v26 = vadd.f32 %v514_v11, %v187_v35  ;;  %v7934_v36 = vld [vmem:[#allocation6 + $0x2f0] sm:$0xf0]  ;;  %v11087_v51 = vld [vmem:[#allocation6 + $0x1a4] sm:$0xf] }
  0xea   :  { %v7646_v45 = vld [vmem:[#allocation6 + $0xb0] sm:$0xf0]  ;;  %v11123_v33 = vld [vmem:[#allocation6 + $0x2c4] sm:$0xf] }
  0xeb   :  { %3846 = vmatpush.bf16.msrb.mxu2 %v9421_v10  ;;  %v9500_v10 = vld [vmem:[#allocation6 + $0xf20] sm:$0xf]  ;;  %v7774_v37 = vld [vmem:[#allocation6 + $0x1b0] sm:$0xf0]  ;;  %v7649_v53 = vor.u32 %v11055_v44, %v7646_v45  ;;  %v11155_v39 = vld [vmem:[#allocation6 + $0x3c4] sm:$0xf] }
  0xec   :  { %3860 = vmatpush.bf16.msrb.mxu3 %v9549_v16  ;;  %3820 = vmatpush.bf16.msrb.mxu0 %v9133_v17  ;;  %v501_v16 = vadd.f32 %v500_v59, %v186_v27  ;;  %v11059_v17 = vld [vmem:[#allocation6 + $0xc4] sm:$0xf]  ;;  %v9501_v3 = vor.u32 %v11521_v12, %v9500_v10  ;;  %v11517_v27 = vld [vmem:[#allocation6 + $0xf0c] sm:$0xf0]  ;;  %v7777_v59 = vor.u32 %v11087_v51, %v7774_v37  ;;  %v8046_v60 = vld [vmem:[#allocation6 + $0x3d0] sm:$0xf0] }
  0xed   :  { %3834 = vmatpush.bf16.msrb.mxu1 %v9261_v24  ;;  %v513_v24 = vadd.f32 %v12364_v7, %v187_v35  ;;  %v7665_v19 = vor.u32 %v11059_v17, %v7662_v18  ;;  %v8062_v7 = vld [vmem:[#allocation6 + $0x3f0] sm:$0xf0]  ;;  %v9485_v52 = vor.u32 %v11517_v27, %v9484_v31  ;;  %v11051_v61 = vld [vmem:[#allocation6 + $0x84] sm:$0xf] }
  0xee   :  { %v547_v35 = vmax.f32 %v501_v16, 0.0  ;;  %v8065_v55 = vor.u32 %v11159_v21, %v8062_v7  ;;  %v11083_v0 = vld [vmem:[#allocation6 + $0x184] sm:$0xf]  ;;  %v7758_v2 = vld [vmem:[#allocation6 + $0x190] sm:$0xf0] }
  0xef   :  { %3847 = vmatpush.bf16.msrb.mxu2 %v9405_v29  ;;  %v9356_v29 = vld [vmem:[#allocation6 + $0xe00] sm:$0xf]  ;;  %v532_v46 = vmax.f32 %v513_v24, 0.0  ;;  %v11119_v10 = vld [vmem:[#allocation6 + $0x2a4] sm:$0xf] }
  0xf0   :  { %3861 = vmatpush.bf16.msrb.mxu3 %v9533_v34  ;;  %3821 = vmatpush.bf16.msrb.mxu0 %v9117_v41  ;;  %v11127_v34 = vld [vmem:[#allocation6 + $0x2e4] sm:$0xf]  ;;  %v531_v41 = vmax.f32 %v499_v13, 0.0  ;;  %v9357_v49 = vor.u32 %v11485_v25, %v9356_v29  ;;  %v7902_v12 = vld [vmem:[#allocation6 + $0x2b0] sm:$0xf0] }
  0xf1   :  { %3835 = vmatpush.bf16.msrb.mxu1 %v9245_v47  ;;  %v548_v47 = vmax.f32 %v515_v26, 0.0  ;;  %v7937_v54 = vor.u32 %v11127_v34, %v7934_v36  ;;  %v11151_v13 = vld [vmem:[#allocation6 + $0x3a4] sm:$0xf]  ;;  %v8030_v16 = vld [vmem:[#allocation6 + $0x3b0] sm:$0xf0] }
  0xf2   :  { %v12380_v57 = vpack.c.bf16 %v547_v35, %v531_v41  ;;  %v11047_v17 = vld [vmem:[#allocation6 + $0x64] sm:$0xf]  ;;  %v7614_v18 = vld [vmem:[#allocation6 + $0x70] sm:$0xf0]  ;;  %v8033_v26 = vor.u32 %v11151_v13, %v8030_v16 }
  0xf3   :  { %3848 = vmatpush.bf16.msrb.mxu2 %v9389_v56  ;;  %v7918_v56 = vld [vmem:[#allocation6 + $0x2d0] sm:$0xf0]  ;;  %v11079_v20 = vld [vmem:[#allocation6 + $0x164] sm:$0xf]  ;;  %v7617_v23 = vor.u32 %v11047_v17, %v7614_v18 }
  0xf4   :  { %3862 = vmatpush.bf16.msrb.mxu3 %v9517_v62  ;;  %3822 = vmatpush.bf16.msrb.mxu0 %v9101_v63  ;;  %v7630_v62 = vld [vmem:[#allocation6 + $0x90] sm:$0xf0]  ;;  %v12382_v63 = vpack.c.bf16 %v548_v47, %v532_v46  ;;  %v7921_v11 = vor.u32 %v11123_v33, %v7918_v56  ;;  %v11115_v29 = vld [vmem:[#allocation6 + $0x284] sm:$0xf] }
  0xf5   :  { %3836 = vmatpush.bf16.msrb.mxu1 %v9229_v4  ;;  %v8049_v4 = vor.u32 %v11155_v39, %v8046_v60  ;;  %v7742_v24 = vld [vmem:[#allocation6 + $0x170] sm:$0xf0]  ;;  %v11043_v34 = vld [vmem:[#allocation6 + $0x44] sm:$0xf] }
  0xf6   :  { %v7886_v25 = vld [vmem:[#allocation6 + $0x290] sm:$0xf0]  ;;  %v7745_v31 = vor.u32 %v11079_v20, %v7742_v24  ;;  %v11075_v36 = vld [vmem:[#allocation6 + $0x144] sm:$0xf] }
  0xf7   :  { %3849 = vmatpush.bf16.msrb.mxu2 %v9373_v50  ;;  %3823 = vmatmul.bf16.vlgmr.msrb.gmra.mxu0 %v12373_v22  ;;  %v7905_v50 = vor.u32 %v11119_v10, %v7902_v12  ;;  %v8014_v27 = vld [vmem:[#allocation6 + $0x390] sm:$0xf0]  ;;  %v7889_v7 = vor.u32 %v11115_v29, %v7886_v25  ;;  %v11143_v45 = vld [vmem:[#allocation6 + $0x364] sm:$0xf] }
  0xf8   :  { %3871 = vmatpush.bf16.msra.mxu0 %v7681_v8  ;;  %3863 = vmatpush.bf16.msrb.mxu3 %v9501_v3  ;;  %v7633_v8 = vor.u32 %v11051_v61, %v7630_v62  ;;  %v11147_v3 = vld [vmem:[#allocation6 + $0x384] sm:$0xf]  ;;  %v7726_v21 = vld [vmem:[#allocation6 + $0x150] sm:$0xf0] }
  0xf9   :  { %3885 = vmatpush.bf16.msra.mxu1 %v7809_v14  ;;  %v7761_v14 = vor.u32 %v11083_v0, %v7758_v2  ;;  %v8017_v41 = vor.u32 %v11147_v3, %v8014_v27  ;;  %v7870_v44 = vld [vmem:[#allocation6 + $0x270] sm:$0xf0]  ;;  %v7729_v46 = vor.u32 %v11075_v36, %v7726_v21  ;;  %v11071_v37 = vld [vmem:[#allocation6 + $0x124] sm:$0xf] }
  0xfa   :  { %3837 = vmatmul.bf16.vlgmr.msrb.gmra.mxu1 %v12376_v30  ;;  %v7998_v47 = vld [vmem:[#allocation6 + $0x370] sm:$0xf0]  ;;  %v11139_v39 = vld [vmem:[#allocation6 + $0x344] sm:$0xf] }
  0xfb   :  { %3850 = vmatpush.bf16.msrb.mxu2 %v9357_v49  ;;  %v11039_v49 = vld [vmem:[#allocation6 + $0x24] sm:$0xf]  ;;  %v7582_v51 = vld [vmem:[#allocation6 + $0x30] sm:$0xf0] }
  0xfc   :  { %3872 = vmatpush.bf16.msra.mxu0 %v7665_v19  ;;  %3864 = vmatpush.bf16.msrb.mxu3 %v9485_v52  ;;  %v7598_v19 = vld [vmem:[#allocation6 + $0x50] sm:$0xf0]  ;;  %v7585_v33 = vor.u32 %v11039_v49, %v7582_v51  ;;  %v11035_v61 = vld [vmem:[#allocation6 + $0x4] sm:$0xf] }
  0xfd   :  { %3886 = vmatpush.bf16.msra.mxu1 %v7793_v43  ;;  %v7601_v35 = vor.u32 %v11043_v34, %v7598_v19  ;;  %v11111_v43 = vld [vmem:[#allocation6 + $0x264] sm:$0xf]  ;;  %v7710_v52 = vld [vmem:[#allocation6 + $0x130] sm:$0xf0] }
  0xfe   :  { %3851 = vmatmul.bf16.vlgmr.msrb.gmra.mxu2 %v12380_v57  ;;  %v7854_v56 = vld [vmem:[#allocation6 + $0x250] sm:$0xf0]  ;;  %v7713_v60 = vor.u32 %v11071_v37, %v7710_v52  ;;  %v11067_v0 = vld [vmem:[#allocation6 + $0x104] sm:$0xf] }
  0xff   :  { %3899 = vmatpush.bf16.msra.mxu2 %v7937_v54  ;;  %3865 = vmatmul.bf16.vlgmr.msrb.gmra.mxu3 %v12382_v63  ;;  %v7873_v54 = vor.u32 %v11111_v43, %v7870_v44  ;;  %v7566_v62 = vld [vmem:[#allocation6 + $0x10] sm:$0xf0]  ;;  %v11223_v10 = vld [vmem:[#allocation6 + $0x5e4] sm:$0xf] }
 0x100   :  { %3913 = vmatpush.bf16.msra.mxu3 %v8065_v55  ;;  %3873 = vmatpush.bf16.msra.mxu0 %v7649_v53  ;;  %v11107_v55 = vld [vmem:[#allocation6 + $0x244] sm:$0xf]  ;;  %v8001_v53 = vor.u32 %v11143_v45, %v7998_v47  ;;  %v7694_v2 = vld [vmem:[#allocation6 + $0x110] sm:$0xf0] }
 0x101   :  { %3887 = vmatpush.bf16.msra.mxu1 %v7777_v59  ;;  %v7982_v59 = vld [vmem:[#allocation6 + $0x350] sm:$0xf0]  ;;  %v11103_v16 = vld [vmem:[#allocation6 + $0x224] sm:$0xf]  ;;  %v7697_v18 = vor.u32 %v11067_v0, %v7694_v2 }
 0x102   :  { %v8318_v12 = vld [vmem:[#allocation6 + $0x5f0] sm:$0xf0]  ;;  %v7985_v13 = vor.u32 %v11139_v39, %v7982_v59  ;;  %v11135_v24 = vld [vmem:[#allocation6 + $0x324] sm:$0xf] }
 0x103   :  { %3900 = vmatpush.bf16.msra.mxu2 %v7921_v11  ;;  %v11191_v11 = vld [vmem:[#allocation6 + $0x4e4] sm:$0xf]  ;;  %v7838_v17 = vld [vmem:[#allocation6 + $0x230] sm:$0xf0] }
 0x104   :  { %3914 = vmatpush.bf16.msra.mxu3 %v8049_v4  ;;  %3874 = vmatpush.bf16.msra.mxu0 %v7633_v8  ;;  %v8190_v4 = vld [vmem:[#allocation6 + $0x4f0] sm:$0xf0]  ;;  %v7857_v8 = vor.u32 %v11107_v55, %v7854_v56  ;;  %v7841_v25 = vor.u32 %v11103_v16, %v7838_v17  ;;  %v11219_v3 = vld [vmem:[#allocation6 + $0x5c4] sm:$0xf] }
 0x105   :  { %3888 = vmatpush.bf16.msra.mxu1 %v7761_v14  ;;  %v7569_v14 = vor.u32 %v11035_v61, %v7566_v62  ;;  %v8193_v20 = vor.u32 %v11191_v11, %v8190_v4  ;;  %v8174_v29 = vld [vmem:[#allocation6 + $0x4d0] sm:$0xf0]  ;;  %v11099_v27 = vld [vmem:[#allocation6 + $0x204] sm:$0xf] }
 0x106   :  { %v7822_v19 = vld [vmem:[#allocation6 + $0x210] sm:$0xf0]  ;;  %v11131_v36 = vld [vmem:[#allocation6 + $0x304] sm:$0xf] }
 0x107   :  { %3901 = vmatpush.bf16.msra.mxu2 %v7905_v50  ;;  %v7966_v50 = vld [vmem:[#allocation6 + $0x330] sm:$0xf0]  ;;  %v11287_v43 = vld [vmem:[#allocation6 + $0x7e4] sm:$0xf]  ;;  %v7825_v49 = vor.u32 %v11099_v27, %v7822_v19 }
 0x108   :  { %3915 = vmatpush.bf16.msra.mxu3 %v8033_v26  ;;  %3875 = vmatpush.bf16.msra.mxu0 %v7617_v23  ;;  %v8321_v26 = vor.u32 %v11223_v10, %v8318_v12  ;;  %v11187_v23 = vld [vmem:[#allocation6 + $0x4c4] sm:$0xf]  ;;  %v7969_v34 = vor.u32 %v11135_v24, %v7966_v50  ;;  %v7950_v21 = vld [vmem:[#allocation6 + $0x310] sm:$0xf0] }
 0x109   :  { %3889 = vmatpush.bf16.msra.mxu1 %v7745_v31  ;;  %v8302_v31 = vld [vmem:[#allocation6 + $0x5d0] sm:$0xf0]  ;;  %v11215_v51 = vld [vmem:[#allocation6 + $0x5a4] sm:$0xf]  ;;  %v7953_v52 = vor.u32 %v11131_v36, %v7950_v21 }
 0x10a   :  { %v8305_v44 = vor.u32 %v11219_v3, %v8302_v31  ;;  %v8574_v45 = vld [vmem:[#allocation6 + $0x7f0] sm:$0xf0]  ;;  %v11283_v39 = vld [vmem:[#allocation6 + $0x7c4] sm:$0xf] }
 0x10b   :  { %3902 = vmatpush.bf16.msra.mxu2 %v7889_v7  ;;  %v8177_v7 = vor.u32 %v11187_v23, %v8174_v29  ;;  %v8158_v47 = vld [vmem:[#allocation6 + $0x4b0] sm:$0xf0]  ;;  %v8577_v55 = vor.u32 %v11287_v43, %v8574_v45  ;;  %v11179_v61 = vld [vmem:[#allocation6 + $0x484] sm:$0xf] }
 0x10c   :  { %3916 = vmatpush.bf16.msra.mxu3 %v8017_v41  ;;  %3876 = vmatpush.bf16.msra.mxu0 %v7601_v35  ;;  %v11255_v41 = vld [vmem:[#allocation6 + $0x6e4] sm:$0xf]  ;;  %v8446_v35 = vld [vmem:[#allocation6 + $0x6f0] sm:$0xf0] }
 0x10d   :  { %3890 = vmatpush.bf16.msra.mxu1 %v7729_v46  ;;  %v11183_v46 = vld [vmem:[#allocation6 + $0x4a4] sm:$0xf]  ;;  %v8286_v37 = vld [vmem:[#allocation6 + $0x5b0] sm:$0xf0] }
 0x10e   :  { %v8430_v56 = vld [vmem:[#allocation6 + $0x6d0] sm:$0xf0]  ;;  %v8289_v59 = vor.u32 %v11215_v51, %v8286_v37  ;;  %v11211_v0 = vld [vmem:[#allocation6 + $0x584] sm:$0xf] }
 0x10f   :  { %3903 = vmatpush.bf16.msra.mxu2 %v7873_v54  ;;  %v8449_v54 = vor.u32 %v11255_v41, %v8446_v35  ;;  %v8142_v62 = vld [vmem:[#allocation6 + $0x490] sm:$0xf0]  ;;  %v11247_v10 = vld [vmem:[#allocation6 + $0x6a4] sm:$0xf] }
 0x110   :  { %3917 = vmatpush.bf16.msra.mxu3 %v8001_v53  ;;  %3877 = vmatpush.bf16.msra.mxu0 %v7585_v33  ;;  %v8161_v53 = vor.u32 %v11183_v46, %v8158_v47  ;;  %v11251_v33 = vld [vmem:[#allocation6 + $0x6c4] sm:$0xf]  ;;  %v8270_v2 = vld [vmem:[#allocation6 + $0x590] sm:$0xf0] }
 0x111   :  { %3891 = vmatpush.bf16.msra.mxu1 %v7713_v60  ;;  %v8558_v60 = vld [vmem:[#allocation6 + $0x7d0] sm:$0xf0]  ;;  %v8433_v11 = vor.u32 %v11251_v33, %v8430_v56  ;;  %v11175_v17 = vld [vmem:[#allocation6 + $0x464] sm:$0xf] }
 0x112   :  { %v8561_v4 = vor.u32 %v11283_v39, %v8558_v60  ;;  %v8414_v12 = vld [vmem:[#allocation6 + $0x6b0] sm:$0xf0]  ;;  %v11243_v29 = vld [vmem:[#allocation6 + $0x684] sm:$0xf] }
 0x113   :  { %3904 = vmatpush.bf16.msra.mxu2 %v7857_v8  ;;  %v8145_v8 = vor.u32 %v11179_v61, %v8142_v62  ;;  %v8542_v16 = vld [vmem:[#allocation6 + $0x7b0] sm:$0xf0]  ;;  %v8417_v50 = vor.u32 %v11247_v10, %v8414_v12  ;;  %v11275_v3 = vld [vmem:[#allocation6 + $0x784] sm:$0xf] }
 0x114   :  { %3918 = vmatpush.bf16.msra.mxu3 %v7985_v13  ;;  %3878 = vmatpush.bf16.msra.mxu0 %v7569_v14  ;;  %v11279_v13 = vld [vmem:[#allocation6 + $0x7a4] sm:$0xf]  ;;  %v8273_v14 = vor.u32 %v11211_v0, %v8270_v2  ;;  %v8254_v24 = vld [vmem:[#allocation6 + $0x570] sm:$0xf0] }
 0x115   :  { %3892 = vmatpush.bf16.msra.mxu1 %v7697_v18  ;;  %v8126_v18 = vld [vmem:[#allocation6 + $0x470] sm:$0xf0]  ;;  %v11203_v36 = vld [vmem:[#allocation6 + $0x544] sm:$0xf] }
 0x116   :  { %v8129_v23 = vor.u32 %v11175_v17, %v8126_v18  ;;  %v8526_v27 = vld [vmem:[#allocation6 + $0x790] sm:$0xf0]  ;;  %v11239_v43 = vld [vmem:[#allocation6 + $0x664] sm:$0xf] }
 0x117   :  { %3905 = vmatpush.bf16.msra.mxu2 %v7841_v25  ;;  %3879 = vmatmul.bf16.vlgmr.msra.gmra.mxu0 %v12304_v9  ;;  %v8398_v25 = vld [vmem:[#allocation6 + $0x690] sm:$0xf0]  ;;  %v8529_v41 = vor.u32 %v11275_v3, %v8526_v27  ;;  %v11271_v45 = vld [vmem:[#allocation6 + $0x764] sm:$0xf] }
 0x118   :  { %3927 = vmatpush.bf16.msrb.mxu0 %v8193_v20  ;;  %3919 = vmatpush.bf16.msra.mxu3 %v7969_v34  ;;  %v11207_v20 = vld [vmem:[#allocation6 + $0x564] sm:$0xf]  ;;  %v8110_v19 = vld [vmem:[#allocation6 + $0x450] sm:$0xf0] }
 0x119   :  { %3941 = vmatpush.bf16.msrb.mxu1 %v8321_v26  ;;  %v8545_v26 = vor.u32 %v11279_v13, %v8542_v16  ;;  %v8257_v31 = vor.u32 %v11207_v20, %v8254_v24  ;;  %v11171_v34 = vld [vmem:[#allocation6 + $0x444] sm:$0xf]  ;;  %v8238_v21 = vld [vmem:[#allocation6 + $0x550] sm:$0xf0] }
 0x11a   :  { %3893 = vmatmul.bf16.vlgmr.msra.gmra.mxu1 %v12306_v15  ;;  %v8113_v35 = vor.u32 %v11171_v34, %v8110_v19  ;;  %v8241_v46 = vor.u32 %v11203_v36, %v8238_v21  ;;  %v8510_v47 = vld [vmem:[#allocation6 + $0x770] sm:$0xf0]  ;;  %v11199_v37 = vld [vmem:[#allocation6 + $0x524] sm:$0xf] }
 0x11b   :  { %3906 = vmatpush.bf16.msra.mxu2 %v7825_v49  ;;  %v11167_v49 = vld [vmem:[#allocation6 + $0x424] sm:$0xf]  ;;  %v8094_v51 = vld [vmem:[#allocation6 + $0x430] sm:$0xf0] }
 0x11c   :  { %3928 = vmatpush.bf16.msrb.mxu0 %v8177_v7  ;;  %3920 = vmatpush.bf16.msra.mxu3 %v7953_v52  ;;  %v8401_v7 = vor.u32 %v11243_v29, %v8398_v25  ;;  %v8222_v52 = vld [vmem:[#allocation6 + $0x530] sm:$0xf0]  ;;  %v8097_v33 = vor.u32 %v11167_v49, %v8094_v51  ;;  %v11267_v39 = vld [vmem:[#allocation6 + $0x744] sm:$0xf]  ;;  %v12390_v49 = vld [vmem:[#allocation7] sm:$0xf] }
 0x11d   :  { %3942 = vmatpush.bf16.msrb.mxu1 %v8305_v44  ;;  %v8382_v44 = vld [vmem:[#allocation6 + $0x670] sm:$0xf0]  ;;  %v8225_v60 = vor.u32 %v11199_v37, %v8222_v52  ;;  %v11163_v61 = vld [vmem:[#allocation6 + $0x404] sm:$0xf] }
 0x11e   :  { %3907 = vmatmul.bf16.vlgmr.msra.gmra.mxu2 %v12312_v42  ;;  %v8366_v56 = vld [vmem:[#allocation6 + $0x650] sm:$0xf0]  ;;  %v11195_v0 = vld [vmem:[#allocation6 + $0x504] sm:$0xf] }
 0x11f   :  { %3955 = vmatpush.bf16.msrb.mxu2 %v8449_v54  ;;  %3921 = vmatmul.bf16.vlgmr.msra.gmra.mxu3 %v12314_v48  ;;  %v8385_v54 = vor.u32 %v11239_v43, %v8382_v44  ;;  %v8078_v62 = vld [vmem:[#allocation6 + $0x410] sm:$0xf0]  ;;  %v11351_v10 = vld [vmem:[#allocation6 + $0x9e4] sm:$0xf] }
 0x120   :  { %3969 = vmatpush.bf16.msrb.mxu3 %v8577_v55  ;;  %3929 = vmatpush.bf16.msrb.mxu0 %v8161_v53  ;;  %v11235_v55 = vld [vmem:[#allocation6 + $0x644] sm:$0xf]  ;;  %v8513_v53 = vor.u32 %v11271_v45, %v8510_v47  ;;  %v8206_v2 = vld [vmem:[#allocation6 + $0x510] sm:$0xf0] }
 0x121   :  { %3943 = vmatpush.bf16.msrb.mxu1 %v8289_v59  ;;  %v8494_v59 = vld [vmem:[#allocation6 + $0x750] sm:$0xf0]  ;;  %v11231_v16 = vld [vmem:[#allocation6 + $0x624] sm:$0xf]  ;;  %v8209_v18 = vor.u32 %v11195_v0, %v8206_v2 }
 0x122   :  { %v8830_v12 = vld [vmem:[#allocation6 + $0x9f0] sm:$0xf0]  ;;  %v8497_v13 = vor.u32 %v11267_v39, %v8494_v59  ;;  %v11263_v24 = vld [vmem:[#allocation6 + $0x724] sm:$0xf]  ;;  %v12793_v39 = vperm.slane %v12390_v49, 0 }
 0x123   :  { %3956 = vmatpush.bf16.msrb.mxu2 %v8433_v11  ;;  %v11319_v11 = vld [vmem:[#allocation6 + $0x8e4] sm:$0xf]  ;;  %v8350_v17 = vld [vmem:[#allocation6 + $0x630] sm:$0xf0] }
 0x124   :  { %3970 = vmatpush.bf16.msrb.mxu3 %v8561_v4  ;;  %3930 = vmatpush.bf16.msrb.mxu0 %v8145_v8  ;;  %v8702_v4 = vld [vmem:[#allocation6 + $0x8f0] sm:$0xf0]  ;;  %v8369_v8 = vor.u32 %v11235_v55, %v8366_v56  ;;  %v11347_v25 = vld [vmem:[#allocation6 + $0x9c4] sm:$0xf]  ;;  %v8353_v3 = vor.u32 %v11231_v16, %v8350_v17 }
 0x125   :  { %3944 = vmatpush.bf16.msrb.mxu1 %v8273_v14  ;;  %v8081_v14 = vor.u32 %v11163_v61, %v8078_v62  ;;  %v8705_v20 = vor.u32 %v11319_v11, %v8702_v4  ;;  %v8686_v29 = vld [vmem:[#allocation6 + $0x8d0] sm:$0xf0]  ;;  %v11227_v27 = vld [vmem:[#allocation6 + $0x604] sm:$0xf] }
 0x126   :  { %v8334_v34 = vld [vmem:[#allocation6 + $0x610] sm:$0xf0]  ;;  %v11259_v36 = vld [vmem:[#allocation6 + $0x704] sm:$0xf] }
 0x127   :  { %3957 = vmatpush.bf16.msrb.mxu2 %v8417_v50  ;;  %v8478_v50 = vld [vmem:[#allocation6 + $0x730] sm:$0xf0]  ;;  %v11415_v43 = vld [vmem:[#allocation6 + $0xbe4] sm:$0xf]  ;;  %v8337_v51 = vor.u32 %v11227_v27, %v8334_v34 }
 0x128   :  { %3971 = vmatpush.bf16.msrb.mxu3 %v8545_v26  ;;  %3931 = vmatpush.bf16.msrb.mxu0 %v8129_v23  ;;  %v8833_v26 = vor.u32 %v11351_v10, %v8830_v12  ;;  %v11315_v23 = vld [vmem:[#allocation6 + $0x8c4] sm:$0xf]  ;;  %v8481_v19 = vor.u32 %v11263_v24, %v8478_v50  ;;  %v8462_v21 = vld [vmem:[#allocation6 + $0x710] sm:$0xf0] }
 0x129   :  { %3945 = vmatpush.bf16.msrb.mxu1 %v8257_v31  ;;  %v8814_v31 = vld [vmem:[#allocation6 + $0x9d0] sm:$0xf0]  ;;  %v11343_v37 = vld [vmem:[#allocation6 + $0x9a4] sm:$0xf] }
 0x12a   :  { %v9086_v44 = vld [vmem:[#allocation6 + $0xbf0] sm:$0xf0]  ;;  %v8817_v45 = vor.u32 %v11347_v25, %v8814_v31  ;;  %v11307_v0 = vld [vmem:[#allocation6 + $0x884] sm:$0xf] }
 0x12b   :  { %3958 = vmatpush.bf16.msrb.mxu2 %v8401_v7  ;;  %v11383_v7 = vld [vmem:[#allocation6 + $0xae4] sm:$0xf]  ;;  %v8670_v47 = vld [vmem:[#allocation6 + $0x8b0] sm:$0xf0] }
 0x12c   :  { %3972 = vmatpush.bf16.msrb.mxu3 %v8529_v41  ;;  %3932 = vmatpush.bf16.msrb.mxu0 %v8113_v35  ;;  %v8689_v41 = vor.u32 %v11315_v23, %v8686_v29  ;;  %v8958_v35 = vld [vmem:[#allocation6 + $0xaf0] sm:$0xf0]  ;;  %v11339_v11 = vld [vmem:[#allocation6 + $0x984] sm:$0xf] }
 0x12d   :  { %3946 = vmatpush.bf16.msrb.mxu1 %v8241_v46  ;;  %v11311_v46 = vld [vmem:[#allocation6 + $0x8a4] sm:$0xf]  ;;  %v8798_v52 = vld [vmem:[#allocation6 + $0x9b0] sm:$0xf0]  ;;  %v8961_v55 = vor.u32 %v11383_v7, %v8958_v35 }
 0x12e   :  { %v8673_v56 = vor.u32 %v11311_v46, %v8670_v47  ;;  %v8942_v59 = vld [vmem:[#allocation6 + $0xad0] sm:$0xf0]  ;;  %v8801_v61 = vor.u32 %v11343_v37, %v8798_v52  ;;  %v11407_v17 = vld [vmem:[#allocation6 + $0xba4] sm:$0xf] }
 0x12f   :  { %3959 = vmatpush.bf16.msrb.mxu2 %v8385_v54  ;;  %v8465_v54 = vor.u32 %v11259_v36, %v8462_v21  ;;  %v9070_v62 = vld [vmem:[#allocation6 + $0xbd0] sm:$0xf0]  ;;  %v11335_v29 = vld [vmem:[#allocation6 + $0x964] sm:$0xf] }
 0x130   :  { %3973 = vmatpush.bf16.msrb.mxu3 %v8513_v53  ;;  %3933 = vmatpush.bf16.msrb.mxu0 %v8097_v33  ;;  %v11379_v53 = vld [vmem:[#allocation6 + $0xac4] sm:$0xf]  ;;  %v9089_v33 = vor.u32 %v11415_v43, %v9086_v44  ;;  %v8654_v2 = vld [vmem:[#allocation6 + $0x890] sm:$0xf0] }
 0x131   :  { %3947 = vmatpush.bf16.msrb.mxu1 %v8225_v60  ;;  %v11411_v60 = vld [vmem:[#allocation6 + $0xbc4] sm:$0xf]  ;;  %v8782_v4 = vld [vmem:[#allocation6 + $0x990] sm:$0xf0] }
 0x132   :  { %v9073_v12 = vor.u32 %v11411_v60, %v9070_v62  ;;  %v8926_v16 = vld [vmem:[#allocation6 + $0xab0] sm:$0xf0]  ;;  %v8785_v24 = vor.u32 %v11339_v11, %v8782_v4  ;;  %v11403_v21 = vld [vmem:[#allocation6 + $0xb84] sm:$0xf] }
 0x133   :  { %3960 = vmatpush.bf16.msrb.mxu2 %v8369_v8  ;;  %v8945_v8 = vor.u32 %v11379_v53, %v8942_v59  ;;  %v9054_v50 = vld [vmem:[#allocation6 + $0xbb0] sm:$0xf0]  ;;  %v11299_v35 = vld [vmem:[#allocation6 + $0x844] sm:$0xf] }
 0x134   :  { %3974 = vmatpush.bf16.msrb.mxu3 %v8497_v13  ;;  %3934 = vmatpush.bf16.msrb.mxu0 %v8081_v14  ;;  %v3656_v10 = vpop.f32.mrf.mxu0  ;;  %v8657_v13 = vor.u32 %v11307_v0, %v8654_v2  ;;  %v11375_v14 = vld [vmem:[#allocation6 + $0xaa4] sm:$0xf]  ;;  %v8638_v23 = vld [vmem:[#allocation6 + $0x870] sm:$0xf0]  ;;  %v9057_v27 = vor.u32 %v11407_v17, %v9054_v50 }
 0x135   :  { %3948 = vmatpush.bf16.msrb.mxu1 %v8209_v18  ;;  %v3657_v18 = vadd.f32 %v3656_v10, %v12793_v39  ;;  %v8766_v25 = vld [vmem:[#allocation6 + $0x970] sm:$0xf0]  ;;  %v8929_v31 = vor.u32 %v11375_v14, %v8926_v16  ;;  %v11331_v44 = vld [vmem:[#allocation6 + $0x944] sm:$0xf] }
 0x136   :  { %v8910_v36 = vld [vmem:[#allocation6 + $0xa90] sm:$0xf0]  ;;  %v8769_v7 = vor.u32 %v11335_v29, %v8766_v25  ;;  %v11367_v52 = vld [vmem:[#allocation6 + $0xa64] sm:$0xf] }
 0x137   :  { %3961 = vmatpush.bf16.msrb.mxu2 %v8353_v3  ;;  %3935 = vmatmul.bf16.vlgmr.msrb.gmra.mxu0 %v12320_v28  ;;  %v8622_v43 = vld [vmem:[#allocation6 + $0x850] sm:$0xf0]  ;;  %v11327_v60 = vld [vmem:[#allocation6 + $0x924] sm:$0xf] }
 0x138   :  { %3983 = vmatpush.bf16.msra.mxu0 %v8705_v20  ;;  %3975 = vmatpush.bf16.msrb.mxu3 %v8481_v19  ;;  %v3670_v20 = vpop.f32.mrf.mxu1  ;;  %v11371_v19 = vld [vmem:[#allocation6 + $0xa84] sm:$0xf]  ;;  %v8625_v37 = vor.u32 %v11299_v35, %v8622_v43  ;;  %v8606_v59 = vld [vmem:[#allocation6 + $0x830] sm:$0xf0] }
 0x139   :  { %3997 = vmatpush.bf16.msra.mxu1 %v8833_v26  ;;  %v11303_v26 = vld [vmem:[#allocation6 + $0x864] sm:$0xf]  ;;  %v3671_v3 = vadd.f32 %v3670_v20, %v3657_v18  ;;  %v8913_v46 = vor.u32 %v11371_v19, %v8910_v36  ;;  %v8590_v17 = vld [vmem:[#allocation6 + $0x810] sm:$0xf0] }
 0x13a   :  { %3949 = vmatmul.bf16.vlgmr.msrb.gmra.mxu1 %v12322_v32  ;;  %v8641_v34 = vor.u32 %v11303_v26, %v8638_v23  ;;  %v11363_v2 = vld [vmem:[#allocation6 + $0xa44] sm:$0xf]  ;;  %v8718_v50 = vld [vmem:[#allocation6 + $0x910] sm:$0xf0] }
 0x13b   :  { %3962 = vmatpush.bf16.msrb.mxu2 %v8337_v51  ;;  %v11395_v10 = vld [vmem:[#allocation6 + $0xb44] sm:$0xf]  ;;  %v9214_v23 = vld [vmem:[#allocation6 + $0xcf0] sm:$0xf0] }
 0x13c   :  { %3984 = vmatpush.bf16.msra.mxu0 %v8689_v41  ;;  %3976 = vmatpush.bf16.msrb.mxu3 %v8465_v54  ;;  %v9038_v41 = vld [vmem:[#allocation6 + $0xb90] sm:$0xf0]  ;;  %v12399_v47 = vpop.f32.mrf.mxu0  ;;  %v11291_v16 = vld [vmem:[#allocation6 + $0x804] sm:$0xf] }
 0x13d   :  { %3998 = vmatpush.bf16.msra.mxu1 %v8817_v45  ;;  %v8750_v45 = vld [vmem:[#allocation6 + $0x950] sm:$0xf0]  ;;  %v9041_v51 = vor.u32 %v11403_v21, %v9038_v41  ;;  %v11323_v18 = vld [vmem:[#allocation6 + $0x904] sm:$0xf]  ;;  %v8593_v36 = vor.u32 %v11291_v16, %v8590_v17 }
 0x13e   :  { %3963 = vmatmul.bf16.vlgmr.msrb.gmra.mxu2 %v12330_v1  ;;  %v8894_v54 = vld [vmem:[#allocation6 + $0xa70] sm:$0xf0]  ;;  %v8753_v53 = vor.u32 %v11331_v44, %v8750_v45  ;;  %v11447_v26 = vld [vmem:[#allocation6 + $0xce4] sm:$0xf]  ;;  %v8721_v41 = vor.u32 %v11323_v18, %v8718_v50 }
 0x13f   :  { %4011 = vmatpush.bf16.msra.mxu2 %v8961_v55  ;;  %3977 = vmatmul.bf16.vlgmr.msrb.gmra.mxu3 %v12332_v6  ;;  %v11399_v55 = vld [vmem:[#allocation6 + $0xb64] sm:$0xf]  ;;  %v8897_v0 = vor.u32 %v11367_v52, %v8894_v54  ;;  %v9217_v35 = vor.u32 %v11447_v26, %v9214_v23  ;;  %v8990_v43 = vld [vmem:[#allocation6 + $0xb30] sm:$0xf0] }
 0x140   :  { %4025 = vmatpush.bf16.msra.mxu3 %v9089_v33  ;;  %3985 = vmatpush.bf16.msra.mxu0 %v8673_v56  ;;  %v9022_v33 = vld [vmem:[#allocation6 + $0xb70] sm:$0xf0]  ;;  %v11295_v56 = vld [vmem:[#allocation6 + $0x824] sm:$0xf]  ;;  %v12401_v62 = vpop.f32.mrf.mxu1 }
 0x141   :  { %3999 = vmatpush.bf16.msra.mxu1 %v8801_v61  ;;  %v8734_v61 = vld [vmem:[#allocation6 + $0x930] sm:$0xf0]  ;;  %v9025_v11 = vor.u32 %v11399_v55, %v9022_v33  ;;  %v8609_v4 = vor.u32 %v11295_v56, %v8606_v59  ;;  %v11479_v25 = vld [vmem:[#allocation6 + $0xde4] sm:$0xf] }
 0x142   :  { %v8737_v14 = vor.u32 %v11327_v60, %v8734_v61  ;;  %v11359_v21 = vld [vmem:[#allocation6 + $0xa24] sm:$0xf]  ;;  %v9326_v55 = vld [vmem:[#allocation6 + $0xdd0] sm:$0xf0] }
 0x143   :  { %4012 = vmatpush.bf16.msra.mxu2 %v8945_v8  ;;  %v8878_v8 = vld [vmem:[#allocation6 + $0xa50] sm:$0xf0]  ;;  %v11475_v54 = vld [vmem:[#allocation6 + $0xdc4] sm:$0xf] }
 0x144   :  { %4026 = vmatpush.bf16.msra.mxu3 %v9073_v12  ;;  %3986 = vmatpush.bf16.msra.mxu0 %v8657_v13  ;;  %v9006_v12 = vld [vmem:[#allocation6 + $0xb50] sm:$0xf0]  ;;  %v3684_v13 = vpop.f32.mrf.mxu2  ;;  %v8881_v29 = vor.u32 %v11363_v2, %v8878_v8  ;;  %v11387_v60 = vld [vmem:[#allocation6 + $0xb04] sm:$0xf] }
 0x145   :  { %4000 = vmatpush.bf16.msra.mxu1 %v8785_v24  ;;  %v3685_v20 = vadd.f32 %v3684_v13, %v3671_v3  ;;  %v3698_v24 = vpop.f32.mrf.mxu3  ;;  %v9009_v19 = vor.u32 %v11395_v10, %v9006_v12  ;;  %v11391_v3 = vld [vmem:[#allocation6 + $0xb24] sm:$0xf]  ;;  %v8846_v59 = vld [vmem:[#allocation6 + $0xa10] sm:$0xf0]  ;;  %v9329_v12 = vor.u32 %v11475_v54, %v9326_v55 }
 0x146   :  { %v8993_v56 = vor.u32 %v11391_v3, %v8990_v43  ;;  %v8974_v61 = vld [vmem:[#allocation6 + $0xb10] sm:$0xf0]  ;;  %v11543_v8 = vld [vmem:[#allocation6 + $0xfe4] sm:$0xf] }
 0x147   :  { %4013 = vmatpush.bf16.msra.mxu2 %v8929_v31  ;;  %v9342_v31 = vld [vmem:[#allocation6 + $0xdf0] sm:$0xf0]  ;;  %v11471_v18 = vld [vmem:[#allocation6 + $0xda4] sm:$0xf]  ;;  %v8977_v50 = vor.u32 %v11387_v60, %v8974_v61 }
 0x148   :  { %4027 = vmatpush.bf16.msra.mxu3 %v9057_v27  ;;  %3987 = vmatpush.bf16.msra.mxu0 %v8641_v34  ;;  %v3699_v27 = vadd.f32 %v3698_v24, %v3685_v20  ;;  %v3712_v34 = vpop.f32.mrf.mxu0  ;;  %v9345_v45 = vor.u32 %v11479_v25, %v9342_v31  ;;  %v9598_v13 = vld [vmem:[#allocation6 + $0xff0] sm:$0xf0]  ;;  %v11507_v25 = vld [vmem:[#allocation6 + $0xec4] sm:$0xf] }
 0x149   :  { %4001 = vmatpush.bf16.msra.mxu1 %v8769_v7  ;;  %v8862_v7 = vld [vmem:[#allocation6 + $0xa30] sm:$0xf0]  ;;  %v9601_v23 = vor.u32 %v11543_v8, %v9598_v13  ;;  %v11463_v60 = vld [vmem:[#allocation6 + $0xd64] sm:$0xf] }
 0x14a   :  { %v3713_v44 = vadd.f32 %v3712_v34, %v3699_v27  ;;  %v8865_v52 = vor.u32 %v11359_v21, %v8862_v7  ;;  %v9182_v16 = vld [vmem:[#allocation6 + $0xcb0] sm:$0xf0]  ;;  %v11539_v27 = vld [vmem:[#allocation6 + $0xfc4] sm:$0xf] }
 0x14b   :  { %4014 = vmatpush.bf16.msra.mxu2 %v8913_v46  ;;  %v11443_v46 = vld [vmem:[#allocation6 + $0xcc4] sm:$0xf]  ;;  %v9310_v20 = vld [vmem:[#allocation6 + $0xdb0] sm:$0xf0] }
 0x14c   :  { %4028 = vmatpush.bf16.msra.mxu3 %v9041_v51  ;;  %3988 = vmatpush.bf16.msra.mxu0 %v8625_v37  ;;  %v9198_v51 = vld [vmem:[#allocation6 + $0xcd0] sm:$0xf0]  ;;  %v3726_v37 = vpop.f32.mrf.mxu1  ;;  %v9313_v34 = vor.u32 %v11471_v18, %v9310_v20  ;;  %v11427_v20 = vld [vmem:[#allocation6 + $0xc44] sm:$0xf] }
 0x14d   :  { %4002 = vmatpush.bf16.msra.mxu1 %v8753_v53  ;;  %v11355_v53 = vld [vmem:[#allocation6 + $0xa04] sm:$0xf]  ;;  %v3727_v33 = vadd.f32 %v3726_v37, %v3713_v44  ;;  %v9201_v2 = vor.u32 %v11443_v46, %v9198_v51  ;;  %v12405_v10 = vpop.f32.mrf.mxu3  ;;  %v9454_v31 = vld [vmem:[#allocation6 + $0xed0] sm:$0xf0] }
 0x14e   :  { %v8849_v17 = vor.u32 %v11355_v53, %v8846_v59  ;;  %v9166_v21 = vld [vmem:[#allocation6 + $0xc90] sm:$0xf0]  ;;  %v9457_v3 = vor.u32 %v11507_v25, %v9454_v31  ;;  %v11503_v46 = vld [vmem:[#allocation6 + $0xea4] sm:$0xf] }
 0x14f   :  { %4015 = vmatpush.bf16.msra.mxu2 %v8897_v0  ;;  %v12403_v0 = vpop.f32.mrf.mxu2  ;;  %v9438_v51 = vld [vmem:[#allocation6 + $0xeb0] sm:$0xf0]  ;;  %v11535_v37 = vld [vmem:[#allocation6 + $0xfa4] sm:$0xf] }
 0x150   :  { %4029 = vmatpush.bf16.msra.mxu3 %v9025_v11  ;;  %3989 = vmatpush.bf16.msra.mxu0 %v8609_v4  ;;  %v11511_v11 = vld [vmem:[#allocation6 + $0xee4] sm:$0xf]  ;;  %v9470_v4 = vld [vmem:[#allocation6 + $0xef0] sm:$0xf0]  ;;  %v12409_v24 = vpop.f32.mrf.mxu0 }
 0x151   :  { %4003 = vmatpush.bf16.msra.mxu1 %v8737_v14  ;;  %v11439_v14 = vld [vmem:[#allocation6 + $0xca4] sm:$0xf]  ;;  %v9473_v26 = vor.u32 %v11511_v11, %v9470_v4  ;;  %v9566_v53 = vld [vmem:[#allocation6 + $0xfb0] sm:$0xf0]  ;;  %v9441_v4 = vor.u32 %v11503_v46, %v9438_v51 }
 0x152   :  { %v9150_v59 = vld [vmem:[#allocation6 + $0xc70] sm:$0xf0]  ;;  %v9569_v8 = vor.u32 %v11535_v37, %v9566_v53  ;;  %v11455_v46 = vld [vmem:[#allocation6 + $0xd24] sm:$0xf] }
 0x153   :  { %4016 = vmatpush.bf16.msra.mxu2 %v8881_v29  ;;  %v9185_v29 = vor.u32 %v11439_v14, %v9182_v16  ;;  %v9278_v61 = vld [vmem:[#allocation6 + $0xd70] sm:$0xf0]  ;;  %v11531_v14 = vld [vmem:[#allocation6 + $0xf84] sm:$0xf] }
 0x154   :  { %4030 = vmatpush.bf16.msra.mxu3 %v9009_v19  ;;  %3990 = vmatpush.bf16.msra.mxu0 %v8593_v36  ;;  %v9582_v19 = vld [vmem:[#allocation6 + $0xfd0] sm:$0xf0]  ;;  %v11435_v36 = vld [vmem:[#allocation6 + $0xc84] sm:$0xf]  ;;  %v12411_v7 = vpop.f32.mrf.mxu1 }
 0x155   :  { %4004 = vmatpush.bf16.msra.mxu1 %v8721_v41  ;;  %v11467_v41 = vld [vmem:[#allocation6 + $0xd84] sm:$0xf]  ;;  %v9585_v44 = vor.u32 %v11539_v27, %v9582_v19  ;;  %v3754_v54 = vpop.f32.mrf.mxu3  ;;  %v9422_v13 = vld [vmem:[#allocation6 + $0xe90] sm:$0xf0] }
 0x156   :  { %v9550_v18 = vld [vmem:[#allocation6 + $0xf90] sm:$0xf0] }
 0x157   :  { %4017 = vmatpush.bf16.msra.mxu2 %v8865_v52  ;;  %3991 = vmatmul.bf16.vlgmr.msra.gmra.mxu0 %v12340_v58  ;;  %v3740_v43 = vpop.f32.mrf.mxu2  ;;  %v9246_v51 = vld [vmem:[#allocation6 + $0xd30] sm:$0xf0] }
 0x158   :  { %4039 = vmatpush.bf16.msrb.mxu0 %v9217_v35  ;;  %4031 = vmatpush.bf16.msra.mxu3 %v8993_v56  ;;  %v9294_v35 = vld [vmem:[#allocation6 + $0xd90] sm:$0xf0]  ;;  %v3741_v52 = vadd.f32 %v3740_v43, %v3727_v33  ;;  %v11431_v56 = vld [vmem:[#allocation6 + $0xc64] sm:$0xf]  ;;  %v3768_v11 = vpop.f32.mrf.mxu0 }
 0x159   :  { %4053 = vmatpush.bf16.msrb.mxu1 %v9345_v45  ;;  %v9169_v45 = vor.u32 %v11435_v36, %v9166_v21  ;;  %v9297_v55 = vor.u32 %v11467_v41, %v9294_v35  ;;  %v9153_v33 = vor.u32 %v11431_v56, %v9150_v59  ;;  %v11495_v36 = vld [vmem:[#allocation6 + $0xe64] sm:$0xf]  ;;  %v9406_v21 = vld [vmem:[#allocation6 + $0xe70] sm:$0xf0] }
 0x15a   :  { %4005 = vmatmul.bf16.vlgmr.msra.gmra.mxu1 %v12344_v5  ;;  %v11527_v41 = vld [vmem:[#allocation6 + $0xf64] sm:$0xf]  ;;  %v9534_v43 = vld [vmem:[#allocation6 + $0xf70] sm:$0xf0]  ;;  %v9409_v37 = vor.u32 %v11495_v36, %v9406_v21  ;;  %v7668_v21 = vld [vmem:[#allocation6 + $0xc8] sm:$0xf] }
 0x15b   :  { %4018 = vmatpush.bf16.msra.mxu2 %v8849_v17  ;;  %v9281_v17 = vor.u32 %v11463_v60, %v9278_v61  ;;  %v9390_v53 = vld [vmem:[#allocation6 + $0xe50] sm:$0xf0]  ;;  %v11523_v56 = vld [vmem:[#allocation6 + $0xf44] sm:$0xf]  ;;  %v9249_v60 = vor.u32 %v11455_v46, %v9246_v51 }
 0x15c   :  { %4040 = vmatpush.bf16.msrb.mxu0 %v9201_v2  ;;  %4032 = vmatpush.bf16.msra.mxu3 %v8977_v50  ;;  %v3755_v2 = vadd.f32 %v3754_v54, %v3741_v52  ;;  %v9134_v50 = vld [vmem:[#allocation6 + $0xc50] sm:$0xf0]  ;;  %v11491_v52 = vld [vmem:[#allocation6 + $0xe44] sm:$0xf]  ;;  %v9537_v54 = vor.u32 %v11527_v41, %v9534_v43  ;;  %v11062_v41 = vld [vmem:[#allocation6 + $0xd4] sm:$0xf0] }
 0x15d   :  { %4054 = vmatpush.bf16.msrb.mxu1 %v9329_v12  ;;  %v11499_v12 = vld [vmem:[#allocation6 + $0xe84] sm:$0xf]  ;;  %v9137_v19 = vor.u32 %v11427_v20, %v9134_v50  ;;  %v12417_v35 = vpop.f32.mrf.mxu3  ;;  %v9518_v59 = vld [vmem:[#allocation6 + $0xf50] sm:$0xf0] }
 0x15e   :  { %4019 = vmatmul.bf16.vlgmr.msra.gmra.mxu2 %v12354_v38  ;;  %v3769_v16 = vadd.f32 %v3768_v11, %v3755_v2  ;;  %v9425_v25 = vor.u32 %v11499_v12, %v9422_v13  ;;  %v11419_v61 = vld [vmem:[#allocation6 + $0xc04] sm:$0xf]  ;;  %v9102_v2 = vld [vmem:[#allocation6 + $0xc10] sm:$0xf0]  ;;  %v9393_v12 = vor.u32 %v11491_v52, %v9390_v53  ;;  %v7812_v13 = vld [vmem:[#allocation6 + $0x1e8] sm:$0xf] }
 0x15f   :  { %4067 = vmatpush.bf16.msrb.mxu2 %v9473_v26  ;;  %4033 = vmatmul.bf16.vlgmr.msra.gmra.mxu3 %v12358_v40  ;;  %v11459_v26 = vld [vmem:[#allocation6 + $0xd44] sm:$0xf]  ;;  %v12415_v27 = vpop.f32.mrf.mxu2  ;;  %v9374_v50 = vld [vmem:[#allocation6 + $0xe30] sm:$0xf0]  ;;  %v11130_v53 = vld [vmem:[#allocation6 + $0x2f4] sm:$0xf0] }
 0x160   :  { %4081 = vmatpush.bf16.msrb.mxu3 %v9601_v23  ;;  %4041 = vmatpush.bf16.msrb.mxu0 %v9185_v29  ;;  %v9262_v23 = vld [vmem:[#allocation6 + $0xd50] sm:$0xf0]  ;;  %v3782_v29 = vpop.f32.mrf.mxu1  ;;  %v11451_v11 = vld [vmem:[#allocation6 + $0xd04] sm:$0xf] }
 0x161   :  { %4055 = vmatpush.bf16.msrb.mxu1 %v9313_v34  ;;  %v3783_v31 = vadd.f32 %v3782_v29, %v3769_v16  ;;  %v9553_v34 = vor.u32 %v11531_v14, %v9550_v18  ;;  %v11098_v14 = vld [vmem:[#allocation6 + $0x1f4] sm:$0xf0]  ;;  %v9105_v18 = vor.u32 %v11419_v61, %v9102_v2  ;;  %v11487_v20 = vld [vmem:[#allocation6 + $0xe24] sm:$0xf]  ;;  %v9486_v52 = vld [vmem:[#allocation6 + $0xf10] sm:$0xf0] }
 0x162   :  { %v7813_v36 = vor.u32 %v11098_v14, %v7812_v13  ;;  %v9377_v43 = vor.u32 %v11487_v20, %v9374_v50  ;;  %v11483_v46 = vld [vmem:[#allocation6 + $0xe04] sm:$0xf]  ;;  %v7652_v61 = vld [vmem:[#allocation6 + $0xa8] sm:$0xf]  ;;  %v11058_v2 = vld [vmem:[#allocation6 + $0xb4] sm:$0xf0] }
 0x163   :  { %4068 = vmatpush.bf16.msrb.mxu2 %v9457_v3  ;;  %v9265_v3 = vor.u32 %v11459_v26, %v9262_v23  ;;  %v11126_v20 = vld [vmem:[#allocation6 + $0x2d4] sm:$0xf0]  ;;  %v8052_v50 = vld [vmem:[#allocation6 + $0x3c8] sm:$0xf] }
 0x164   :  { %4082 = vmatpush.bf16.msrb.mxu3 %v9585_v44  ;;  %4042 = vmatpush.bf16.msrb.mxu0 %v9169_v45  ;;  %v11423_v44 = vld [vmem:[#allocation6 + $0xc24] sm:$0xf]  ;;  %v9118_v45 = vld [vmem:[#allocation6 + $0xc30] sm:$0xf0] }
 0x165   :  { %4056 = vmatpush.bf16.msrb.mxu1 %v9297_v55  ;;  %v9121_v55 = vor.u32 %v11423_v44, %v9118_v45  ;;  %v3810_v23 = vpop.f32.mrf.mxu3  ;;  %v7796_v44 = vld [vmem:[#allocation6 + $0x1c8] sm:$0xf]  ;;  %v11094_v45 = vld [vmem:[#allocation6 + $0x1d4] sm:$0xf0] }
 0x167   :  { %4069 = vmatpush.bf16.msrb.mxu2 %v9441_v4  ;;  %v9230_v4 = vld [vmem:[#allocation6 + $0xd10] sm:$0xf0]  ;;  %v3796_v16 = vpop.f32.mrf.mxu2 }
 0x168   :  { %4083 = vmatpush.bf16.msrb.mxu3 %v9569_v8  ;;  %4043 = vmatpush.bf16.msrb.mxu0 %v9153_v33  ;;  %v7684_v8 = vld [vmem:[#allocation6 + $0xe8] sm:$0xf]  ;;  %v11066_v33 = vld [vmem:[#allocation6 + $0xf4] sm:$0xf0]  ;;  %v3797_v26 = vadd.f32 %v3796_v16, %v3783_v31  ;;  %v9233_v29 = vor.u32 %v11451_v11, %v9230_v4  ;;  %v9358_v31 = vld [vmem:[#allocation6 + $0xe10] sm:$0xf0]  ;;  %v12425_v14 = vpop.f32.mrf.mxu1 }
 0x169   :  { %4057 = vmatpush.bf16.msrb.mxu1 %v9281_v17  ;;  %v9521_v17 = vor.u32 %v11523_v56, %v9518_v59  ;;  %v8068_v56 = vld [vmem:[#allocation6 + $0x3e8] sm:$0xf]  ;;  %v7797_v59 = vor.u32 %v11094_v45, %v7796_v44  ;;  %v9361_v11 = vor.u32 %v11483_v46, %v9358_v31  ;;  %12794 = vst [vmem:[#allocation20_spill] sm:$0xff] %v12425_v14  ;;  %v11122_v44 = vld [vmem:[#allocation6 + $0x2b4] sm:$0xf0] }
 0x16a   :  { %v7780_v4 = vld [vmem:[#allocation6 + $0x1a8] sm:$0xf] }
 0x16b   :  { %4070 = vmatpush.bf16.msrb.mxu2 %v9425_v25  ;;  %v7685_v25 = vor.u32 %v11066_v33, %v7684_v8  ;;  %v11090_v8 = vld [vmem:[#allocation6 + $0x1b4] sm:$0xf0]  ;;  %v12422_v33 = vpop.f32.mrf.mxu0  ;;  %v8036_v45 = vld [vmem:[#allocation6 + $0x3a8] sm:$0xf] }
 0x16c   :  { %4084 = vmatpush.bf16.msrb.mxu3 %v9553_v34  ;;  %4044 = vmatpush.bf16.msrb.mxu0 %v9137_v19  ;;  %v11519_v34 = vld [vmem:[#allocation6 + $0xf24] sm:$0xf]  ;;  %v9502_v19 = vld [vmem:[#allocation6 + $0xf30] sm:$0xf0]  ;;  %v7620_v31 = vld [vmem:[#allocation6 + $0x68] sm:$0xf] }
 0x16d   :  { %4058 = vmatpush.bf16.msrb.mxu1 %v9265_v3  ;;  %v12419_v3 = vadd.f32 %v3810_v23, %v3797_v26  ;;  %v9505_v51 = vor.u32 %v11519_v34, %v9502_v19  ;;  %v7781_v26 = vor.u32 %v11090_v8, %v7780_v4  ;;  %v11158_v23 = vld [vmem:[#allocation6 + $0x3d4] sm:$0xf0]  ;;  %v7764_v34 = vld [vmem:[#allocation6 + $0x188] sm:$0xf] }
 0x16e   :  { %v11086_v19 = vld [vmem:[#allocation6 + $0x194] sm:$0xf0]  ;;  %v8020_v4 = vld [vmem:[#allocation6 + $0x388] sm:$0xf] }
 0x16f   :  { %4071 = vmatpush.bf16.msrb.mxu2 %v9409_v37  ;;  %v11515_v37 = vld [vmem:[#allocation6 + $0xf04] sm:$0xf]  ;;  %v7765_v46 = vor.u32 %v11086_v19, %v7764_v34  ;;  %v8004_v34 = vld [vmem:[#allocation6 + $0x368] sm:$0xf]  ;;  %v12432_v19 = vpop.f32.mrf.mxu3 }
 0x170   :  { %4085 = vmatpush.bf16.msrb.mxu3 %v9537_v54  ;;  %4045 = vmatpush.bf16.msrb.mxu0 %v9121_v55  ;;  %v7669_v54 = vor.u32 %v11062_v41, %v7668_v21  ;;  %v7940_v55 = vld [vmem:[#allocation6 + $0x2e8] sm:$0xf]  ;;  %v8053_v21 = vor.u32 %v11158_v23, %v8052_v50  ;;  %12796 = vst [vmem:[#allocation22_spill] sm:$0xff] %v12432_v19 }
 0x171   :  { %4059 = vmatpush.bf16.msrb.mxu1 %v9249_v60  ;;  %v11162_v60 = vld [vmem:[#allocation6 + $0x3f4] sm:$0xf0]  ;;  %v7941_v13 = vor.u32 %v11130_v53, %v7940_v55 }
 0x172   :  { %v8069_v16 = vor.u32 %v11162_v60, %v8068_v56 }
 0x173   :  { %4072 = vmatpush.bf16.msrb.mxu2 %v9393_v12  ;;  %v9489_v12 = vor.u32 %v11515_v37, %v9486_v52  ;;  %v11050_v37 = vld [vmem:[#allocation6 + $0x74] sm:$0xf0]  ;;  %v7748_v52 = vld [vmem:[#allocation6 + $0x168] sm:$0xf] }
 0x174   :  { %4086 = vmatpush.bf16.msrb.mxu3 %v9521_v17  ;;  %4046 = vmatpush.bf16.msrb.mxu0 %v9105_v18  ;;  %v7653_v17 = vor.u32 %v11058_v2, %v7652_v61  ;;  %v7924_v18 = vld [vmem:[#allocation6 + $0x2c8] sm:$0xf]  ;;  %v3824_v55 = vpop.f32.mrf.mxu0  ;;  %v7621_v61 = vor.u32 %v11050_v37, %v7620_v31 }
 0x175   :  { %4060 = vmatpush.bf16.msrb.mxu1 %v9233_v29  ;;  %v7636_v29 = vld [vmem:[#allocation6 + $0x88] sm:$0xf]  ;;  %v3825_v56 = vadd.f32 %v3824_v55, %v12419_v3  ;;  %v11142_v55 = vld [vmem:[#allocation6 + $0x354] sm:$0xf0] }
 0x176   :  { %v7892_v2 = vld [vmem:[#allocation6 + $0x288] sm:$0xf] }
 0x177   :  { %4073 = vmatpush.bf16.msrb.mxu2 %v9377_v43  ;;  %4047 = vmatmul.bf16.vlgmr.msrb.gmra.mxu0 %v12373_v22  ;;  %v7908_v43 = vld [vmem:[#allocation6 + $0x2a8] sm:$0xf] }
 0x178   :  { %4095 = vmatpush.bf16.msra.mxu0 %v7685_v25  ;;  %4087 = vmatpush.bf16.msrb.mxu3 %v9505_v51  ;;  %v11054_v25 = vld [vmem:[#allocation6 + $0x94] sm:$0xf0]  ;;  %v7909_v53 = vor.u32 %v11122_v44, %v7908_v43  ;;  %v7716_v44 = vld [vmem:[#allocation6 + $0x128] sm:$0xf] }
 0x179   :  { %4109 = vmatpush.bf16.msra.mxu1 %v7813_v36  ;;  %v7925_v36 = vor.u32 %v11126_v20, %v7924_v18  ;;  %v7637_v41 = vor.u32 %v11054_v25, %v7636_v29  ;;  %v11154_v51 = vld [vmem:[#allocation6 + $0x3b4] sm:$0xf0]  ;;  %v7732_v18 = vld [vmem:[#allocation6 + $0x148] sm:$0xf] }
 0x17a   :  { %4061 = vmatmul.bf16.vlgmr.msrb.gmra.mxu1 %v12376_v30  ;;  %v8037_v60 = vor.u32 %v11154_v51, %v8036_v45  ;;  %v11078_v20 = vld [vmem:[#allocation6 + $0x154] sm:$0xf0]  ;;  %v7876_v29 = vld [vmem:[#allocation6 + $0x268] sm:$0xf] }
 0x17b   :  { %4074 = vmatpush.bf16.msrb.mxu2 %v9361_v11  ;;  %v11118_v11 = vld [vmem:[#allocation6 + $0x294] sm:$0xf0]  ;;  %v7860_v51 = vld [vmem:[#allocation6 + $0x248] sm:$0xf] }
 0x17c   :  { %4096 = vmatpush.bf16.msra.mxu0 %v7669_v54  ;;  %4088 = vmatpush.bf16.msrb.mxu3 %v9489_v12  ;;  %v11082_v54 = vld [vmem:[#allocation6 + $0x174] sm:$0xf0]  ;;  %v7893_v50 = vor.u32 %v11118_v11, %v7892_v2  ;;  %v8196_v2 = vld [vmem:[#allocation6 + $0x4e8] sm:$0xf] }
 0x17d   :  { %4110 = vmatpush.bf16.msra.mxu1 %v7797_v59  ;;  %v3838_v59 = vpop.f32.mrf.mxu1  ;;  %v7749_v8 = vor.u32 %v11082_v54, %v7748_v52  ;;  %v11150_v12 = vld [vmem:[#allocation6 + $0x394] sm:$0xf0]  ;;  %v7988_v54 = vld [vmem:[#allocation6 + $0x348] sm:$0xf] }
 0x17e   :  { %4075 = vmatmul.bf16.vlgmr.msrb.gmra.mxu2 %v12380_v57  ;;  %v8021_v3 = vor.u32 %v11150_v12, %v8020_v4  ;;  %v11114_v25 = vld [vmem:[#allocation6 + $0x274] sm:$0xf0] }
 0x17f   :  { %4123 = vmatpush.bf16.msra.mxu2 %v7941_v13  ;;  %4089 = vmatmul.bf16.vlgmr.msrb.gmra.mxu3 %v12382_v63  ;;  %v7604_v13 = vld [vmem:[#allocation6 + $0x48] sm:$0xf]  ;;  %v11042_v43 = vld [vmem:[#allocation6 + $0x34] sm:$0xf0] }
 0x180   :  { %4137 = vmatpush.bf16.msra.mxu3 %v8069_v16  ;;  %4097 = vmatpush.bf16.msra.mxu0 %v7653_v17  ;;  %v11046_v16 = vld [vmem:[#allocation6 + $0x54] sm:$0xf0]  ;;  %v3839_v17 = vadd.f32 %v3838_v59, %v3825_v56  ;;  %v7572_v56 = vld [vmem:[#allocation6 + $0x8] sm:$0xf] }
 0x181   :  { %4111 = vmatpush.bf16.msra.mxu1 %v7781_v26  ;;  %v12430_v26 = vpop.f32.mrf.mxu2  ;;  %v7605_v23 = vor.u32 %v11046_v16, %v7604_v13  ;;  %v11074_v45 = vld [vmem:[#allocation6 + $0x134] sm:$0xf0]  ;;  %v7989_v16 = vor.u32 %v11142_v55, %v7988_v54 }
 0x182   :  { %12795 = vst [vmem:[#allocation21_spill] sm:$0xff] %v12430_v26  ;;  %v11110_v52 = vld [vmem:[#allocation6 + $0x254] sm:$0xf0] }
 0x183   :  { %4124 = vmatpush.bf16.msra.mxu2 %v7925_v36  ;;  %v7733_v36 = vor.u32 %v11078_v20, %v7732_v18  ;;  %v11038_v59 = vld [vmem:[#allocation6 + $0x14] sm:$0xf0]  ;;  %v7861_v4 = vor.u32 %v11110_v52, %v7860_v51  ;;  %v7844_v20 = vld [vmem:[#allocation6 + $0x228] sm:$0xf] }
 0x184   :  { %4138 = vmatpush.bf16.msra.mxu3 %v8053_v21  ;;  %4098 = vmatpush.bf16.msra.mxu0 %v7637_v41  ;;  %v11146_v21 = vld [vmem:[#allocation6 + $0x374] sm:$0xf0]  ;;  %v7588_v41 = vld [vmem:[#allocation6 + $0x28] sm:$0xf]  ;;  %v7573_v18 = vor.u32 %v11038_v59, %v7572_v56 }
 0x185   :  { %4112 = vmatpush.bf16.msra.mxu1 %v7765_v46  ;;  %v7877_v46 = vor.u32 %v11114_v25, %v7876_v29  ;;  %v8005_v31 = vor.u32 %v11146_v21, %v8004_v34  ;;  %v7589_v37 = vor.u32 %v11042_v43, %v7588_v41  ;;  %v11194_v11 = vld [vmem:[#allocation6 + $0x4f4] sm:$0xf0]  ;;  %v7972_v34 = vld [vmem:[#allocation6 + $0x328] sm:$0xf] }
 0x186   :  { %v11226_v12 = vld [vmem:[#allocation6 + $0x5f4] sm:$0xf0]  ;;  %v8197_v25 = vor.u32 %v11194_v11, %v8196_v2  ;;  %v8180_v41 = vld [vmem:[#allocation6 + $0x4c8] sm:$0xf] }
 0x187   :  { %4125 = vmatpush.bf16.msra.mxu2 %v7909_v53  ;;  %v7717_v53 = vor.u32 %v11074_v45, %v7716_v44  ;;  %v11190_v43 = vld [vmem:[#allocation6 + $0x4d4] sm:$0xf0]  ;;  %v7956_v52 = vld [vmem:[#allocation6 + $0x308] sm:$0xf] }
 0x188   :  { %4139 = vmatpush.bf16.msra.mxu3 %v8037_v60  ;;  %4099 = vmatpush.bf16.msra.mxu0 %v7621_v61  ;;  %v7700_v60 = vld [vmem:[#allocation6 + $0x108] sm:$0xf]  ;;  %v11070_v61 = vld [vmem:[#allocation6 + $0x114] sm:$0xf0]  ;;  %v8181_v55 = vor.u32 %v11190_v43, %v8180_v41 }
 0x189   :  { %4113 = vmatpush.bf16.msra.mxu1 %v7749_v8  ;;  %v8324_v8 = vld [vmem:[#allocation6 + $0x5e8] sm:$0xf]  ;;  %v3852_v13 = vpop.f32.mrf.mxu2  ;;  %v7701_v29 = vor.u32 %v11070_v61, %v7700_v60  ;;  %v11222_v51 = vld [vmem:[#allocation6 + $0x5d4] sm:$0xf0] }
 0x18a   :  { %v8325_v21 = vor.u32 %v11226_v12, %v8324_v8  ;;  %v11134_v54 = vld [vmem:[#allocation6 + $0x314] sm:$0xf0]  ;;  %v8580_v59 = vld [vmem:[#allocation6 + $0x7e8] sm:$0xf] }
 0x18b   :  { %4126 = vmatpush.bf16.msra.mxu2 %v7893_v50  ;;  %v11106_v50 = vld [vmem:[#allocation6 + $0x234] sm:$0xf0]  ;;  %v8164_v2 = vld [vmem:[#allocation6 + $0x4a8] sm:$0xf] }
 0x18c   :  { %4140 = vmatpush.bf16.msra.mxu3 %v8021_v3  ;;  %4100 = vmatpush.bf16.msra.mxu0 %v7605_v23  ;;  %v3853_v3 = vadd.f32 %v3852_v13, %v3839_v17  ;;  %v3866_v23 = vpop.f32.mrf.mxu3  ;;  %v7845_v45 = vor.u32 %v11106_v50, %v7844_v20  ;;  %v11102_v17 = vld [vmem:[#allocation6 + $0x214] sm:$0xf0]  ;;  %v8292_v8 = vld [vmem:[#allocation6 + $0x5a8] sm:$0xf]  ;;  %v12437_v13 = vpop.f32.mrf.mxu0 }
 0x18d   :  { %4114 = vmatpush.bf16.msra.mxu1 %v7733_v36  ;;  %v11138_v36 = vld [vmem:[#allocation6 + $0x334] sm:$0xf0]  ;;  %12798 = vst [vmem:[#allocation24_spill] sm:$0xff] %v12437_v13  ;;  %v8276_v43 = vld [vmem:[#allocation6 + $0x588] sm:$0xf] }
 0x18e   :  { %v12434_v44 = vadd.f32 %v3866_v23, %v3853_v3  ;;  %v11258_v56 = vld [vmem:[#allocation6 + $0x6f4] sm:$0xf0]  ;;  %v8436_v3 = vld [vmem:[#allocation6 + $0x6c8] sm:$0xf] }
 0x18f   :  { %4127 = vmatpush.bf16.msra.mxu2 %v7877_v46  ;;  %v8308_v46 = vld [vmem:[#allocation6 + $0x5c8] sm:$0xf]  ;;  %v11290_v61 = vld [vmem:[#allocation6 + $0x7f4] sm:$0xf0] }
 0x190   :  { %4141 = vmatpush.bf16.msra.mxu3 %v8005_v31  ;;  %4101 = vmatpush.bf16.msra.mxu0 %v7589_v37  ;;  %12797 = vst [vmem:[#allocation23_spill] sm:$0xff] %v12434_v44  ;;  %v7828_v31 = vld [vmem:[#allocation6 + $0x208] sm:$0xf]  ;;  %v7973_v37 = vor.u32 %v11138_v36, %v7972_v34  ;;  %v8309_v60 = vor.u32 %v11222_v51, %v8308_v46  ;;  %v11186_v11 = vld [vmem:[#allocation6 + $0x4b4] sm:$0xf0]  ;;  %v12792_v51 = vperm.slane %v12390_v49, 1 }
 0x191   :  { %4115 = vmatpush.bf16.msra.mxu1 %v7717_v53  ;;  %v8452_v53 = vld [vmem:[#allocation6 + $0x6e8] sm:$0xf]  ;;  %v11218_v12 = vld [vmem:[#allocation6 + $0x5b4] sm:$0xf0]  ;;  %v8581_v20 = vor.u32 %v11290_v61, %v8580_v59  ;;  %v8165_v50 = vor.u32 %v11186_v11, %v8164_v2 }
 0x192   :  { %v11254_v23 = vld [vmem:[#allocation6 + $0x6d4] sm:$0xf0]  ;;  %v8293_v34 = vor.u32 %v11218_v12, %v8292_v8  ;;  %v8692_v44 = vld [vmem:[#allocation6 + $0x8c8] sm:$0xf] }
 0x193   :  { %4128 = vmatpush.bf16.msra.mxu2 %v7861_v4  ;;  %v7829_v4 = vor.u32 %v11102_v17, %v7828_v31  ;;  %v11286_v36 = vld [vmem:[#allocation6 + $0x7d4] sm:$0xf0]  ;;  %v8437_v46 = vor.u32 %v11254_v23, %v8436_v3  ;;  %v8420_v17 = vld [vmem:[#allocation6 + $0x6a8] sm:$0xf] }
 0x194   :  { %4142 = vmatpush.bf16.msra.mxu3 %v7989_v16  ;;  %4102 = vmatpush.bf16.msra.mxu0 %v7573_v18  ;;  %v7957_v16 = vor.u32 %v11134_v54, %v7956_v52  ;;  %v8453_v18 = vor.u32 %v11258_v56, %v8452_v53  ;;  %v11182_v41 = vld [vmem:[#allocation6 + $0x494] sm:$0xf0]  ;;  %v8548_v54 = vld [vmem:[#allocation6 + $0x7a8] sm:$0xf]  ;;  %v3880_v2 = vpop.f32.mrf.mxu0 }
 0x195   :  { %4116 = vmatpush.bf16.msra.mxu1 %v7701_v29  ;;  %v8564_v29 = vld [vmem:[#allocation6 + $0x7c8] sm:$0xf]  ;;  %v11250_v52 = vld [vmem:[#allocation6 + $0x6b4] sm:$0xf0] }
 0x196   :  { %v8565_v31 = vor.u32 %v11286_v36, %v8564_v29  ;;  %v11282_v53 = vld [vmem:[#allocation6 + $0x7b4] sm:$0xf0]  ;;  %v8132_v56 = vld [vmem:[#allocation6 + $0x468] sm:$0xf]  ;;  %v8421_v11 = vor.u32 %v11250_v52, %v8420_v17 }
 0x197   :  { %4129 = vmatpush.bf16.msra.mxu2 %v7845_v45  ;;  %4103 = vmatmul.bf16.vlgmr.msra.gmra.mxu0 %v12304_v9  ;;  %v11214_v45 = vld [vmem:[#allocation6 + $0x594] sm:$0xf0]  ;;  %v8549_v8 = vor.u32 %v11282_v53, %v8548_v54  ;;  %v8116_v29 = vld [vmem:[#allocation6 + $0x448] sm:$0xf] }
 0x198   :  { %4151 = vmatpush.bf16.msrb.mxu0 %v8197_v25  ;;  %4143 = vmatpush.bf16.msra.mxu3 %v7973_v37  ;;  %v12440_v25 = vpop.f32.mrf.mxu1  ;;  %v11178_v59 = vld [vmem:[#allocation6 + $0x474] sm:$0xf0]  ;;  %v8516_v52 = vld [vmem:[#allocation6 + $0x768] sm:$0xf] }
 0x199   :  { %4165 = vmatpush.bf16.msrb.mxu1 %v8325_v21  ;;  %12799 = vst [vmem:[#allocation25_spill] sm:$0xff] %v12440_v25  ;;  %v8148_v21 = vld [vmem:[#allocation6 + $0x488] sm:$0xf]  ;;  %v11210_v61 = vld [vmem:[#allocation6 + $0x574] sm:$0xf0]  ;;  %v8133_v12 = vor.u32 %v11178_v59, %v8132_v56  ;;  %v12449_v59 = vpop.f32.mrf.mxu3 }
 0x19a   :  { %4117 = vmatmul.bf16.vlgmr.msra.gmra.mxu1 %v12306_v15  ;;  %v8149_v37 = vor.u32 %v11182_v41, %v8148_v21  ;;  %v11278_v23 = vld [vmem:[#allocation6 + $0x794] sm:$0xf0]  ;;  %v8244_v21 = vld [vmem:[#allocation6 + $0x548] sm:$0xf]  ;;  %12801 = vst [vmem:[#allocation27_spill] sm:$0xff] %v12449_v59 }
 0x19b   :  { %4130 = vmatpush.bf16.msra.mxu2 %v7829_v4  ;;  %v3881_v4 = vadd.f32 %v3880_v2, %v12792_v51  ;;  %v11206_v41 = vld [vmem:[#allocation6 + $0x554] sm:$0xf0]  ;;  %v8100_v53 = vld [vmem:[#allocation6 + $0x428] sm:$0xf] }
 0x19c   :  { %4152 = vmatpush.bf16.msrb.mxu0 %v8181_v55  ;;  %4144 = vmatpush.bf16.msra.mxu3 %v7957_v16  ;;  %v8277_v55 = vor.u32 %v11214_v45, %v8276_v43  ;;  %v8404_v16 = vld [vmem:[#allocation6 + $0x688] sm:$0xf]  ;;  %v12447_v45 = vpop.f32.mrf.mxu2  ;;  %v11242_v17 = vld [vmem:[#allocation6 + $0x674] sm:$0xf0]  ;;  %v8245_v54 = vor.u32 %v11206_v41, %v8244_v21 }
 0x19d   :  { %4166 = vmatpush.bf16.msrb.mxu1 %v8309_v60  ;;  %v8260_v60 = vld [vmem:[#allocation6 + $0x568] sm:$0xf]  ;;  %12800 = vst [vmem:[#allocation26_spill] sm:$0xff] %v12447_v45  ;;  %v11170_v56 = vld [vmem:[#allocation6 + $0x434] sm:$0xf0] }
 0x19e   :  { %4131 = vmatmul.bf16.vlgmr.msra.gmra.mxu2 %v12312_v42  ;;  %v8261_v3 = vor.u32 %v11210_v61, %v8260_v60  ;;  %v8228_v60 = vld [vmem:[#allocation6 + $0x528] sm:$0xf]  ;;  %v11202_v61 = vld [vmem:[#allocation6 + $0x534] sm:$0xf0] }
 0x19f   :  { %4179 = vmatpush.bf16.msrb.mxu2 %v8453_v18  ;;  %4145 = vmatmul.bf16.vlgmr.msra.gmra.mxu3 %v12314_v48  ;;  %v11246_v18 = vld [vmem:[#allocation6 + $0x694] sm:$0xf0]  ;;  %v9204_v13 = vld [vmem:[#allocation6 + $0xcc8] sm:$0xf] }
 0x1a0   :  { %4193 = vmatpush.bf16.msrb.mxu3 %v8581_v20  ;;  %4153 = vmatpush.bf16.msrb.mxu0 %v8165_v50  ;;  %v8532_v20 = vld [vmem:[#allocation6 + $0x788] sm:$0xf]  ;;  %v3894_v50 = vpop.f32.mrf.mxu1  ;;  %v8405_v43 = vor.u32 %v11246_v18, %v8404_v16  ;;  %v11270_v18 = vld [vmem:[#allocation6 + $0x754] sm:$0xf0] }
 0x1a1   :  { %4167 = vmatpush.bf16.msrb.mxu1 %v8293_v34  ;;  %v11174_v34 = vld [vmem:[#allocation6 + $0x454] sm:$0xf0]  ;;  %v3895_v36 = vadd.f32 %v3894_v50, %v3881_v4  ;;  %v8500_v16 = vld [vmem:[#allocation6 + $0x748] sm:$0xf] }
 0x1a2   :  { %v8084_v50 = vld [vmem:[#allocation6 + $0x408] sm:$0xf]  ;;  %v11322_v21 = vld [vmem:[#allocation6 + $0x8f4] sm:$0xf0]  ;;  %v3922_v51 = vpop.f32.mrf.mxu3 }
 0x1a3   :  { %4180 = vmatpush.bf16.msrb.mxu2 %v8437_v46  ;;  %v8533_v46 = vor.u32 %v11278_v23, %v8532_v20  ;;  %v8229_v20 = vor.u32 %v11202_v61, %v8228_v60  ;;  %v8212_v23 = vld [vmem:[#allocation6 + $0x508] sm:$0xf]  ;;  %v11266_v61 = vld [vmem:[#allocation6 + $0x734] sm:$0xf0] }
 0x1a4   :  { %4194 = vmatpush.bf16.msrb.mxu3 %v8565_v31  ;;  %4154 = vmatpush.bf16.msrb.mxu0 %v8149_v37  ;;  %v8117_v31 = vor.u32 %v11174_v34, %v8116_v29  ;;  %v8388_v37 = vld [vmem:[#allocation6 + $0x668] sm:$0xf]  ;;  %v11198_v29 = vld [vmem:[#allocation6 + $0x514] sm:$0xf0] }
 0x1a5   :  { %4168 = vmatpush.bf16.msrb.mxu1 %v8277_v55  ;;  %v11274_v55 = vld [vmem:[#allocation6 + $0x774] sm:$0xf0]  ;;  %v8389_v2 = vor.u32 %v11242_v17, %v8388_v37  ;;  %v8708_v34 = vld [vmem:[#allocation6 + $0x8e8] sm:$0xf] }
 0x1a6   :  { %v8517_v4 = vor.u32 %v11274_v55, %v8516_v52  ;;  %v11354_v37 = vld [vmem:[#allocation6 + $0x9f4] sm:$0xf0]  ;;  %v8356_v52 = vld [vmem:[#allocation6 + $0x628] sm:$0xf] }
 0x1a7   :  { %4181 = vmatpush.bf16.msrb.mxu2 %v8421_v11  ;;  %v8372_v11 = vld [vmem:[#allocation6 + $0x648] sm:$0xf]  ;;  %v11234_v55 = vld [vmem:[#allocation6 + $0x634] sm:$0xf0] }
 0x1a8   :  { %4195 = vmatpush.bf16.msrb.mxu3 %v8549_v8  ;;  %4155 = vmatpush.bf16.msrb.mxu0 %v8133_v12  ;;  %v8101_v8 = vor.u32 %v11170_v56, %v8100_v53  ;;  %v11238_v12 = vld [vmem:[#allocation6 + $0x654] sm:$0xf0]  ;;  %v8709_v56 = vor.u32 %v11322_v21, %v8708_v34  ;;  %v8484_v60 = vld [vmem:[#allocation6 + $0x728] sm:$0xf] }
 0x1a9   :  { %4169 = vmatpush.bf16.msrb.mxu1 %v8261_v3  ;;  %v11166_v3 = vld [vmem:[#allocation6 + $0x414] sm:$0xf0]  ;;  %v8373_v41 = vor.u32 %v11238_v12, %v8372_v11  ;;  %v8820_v12 = vld [vmem:[#allocation6 + $0x9c8] sm:$0xf] }
 0x1aa   :  { %v8085_v17 = vor.u32 %v11166_v3, %v8084_v50  ;;  %v11262_v50 = vld [vmem:[#allocation6 + $0x714] sm:$0xf0]  ;;  %v9092_v34 = vld [vmem:[#allocation6 + $0xbe8] sm:$0xf] }
 0x1ab   :  { %4182 = vmatpush.bf16.msrb.mxu2 %v8405_v43  ;;  %v8836_v43 = vld [vmem:[#allocation6 + $0x9e8] sm:$0xf]  ;;  %v11418_v21 = vld [vmem:[#allocation6 + $0xbf4] sm:$0xf0] }
 0x1ac   :  { %4196 = vmatpush.bf16.msrb.mxu3 %v8533_v46  ;;  %4156 = vmatpush.bf16.msrb.mxu0 %v8117_v31  ;;  %v3908_v46 = vpop.f32.mrf.mxu2  ;;  %v8501_v31 = vor.u32 %v11270_v18, %v8500_v16  ;;  %v8837_v39 = vor.u32 %v11354_v37, %v8836_v43  ;;  %v8340_v16 = vld [vmem:[#allocation6 + $0x608] sm:$0xf]  ;;  %v8485_v18 = vor.u32 %v11266_v61, %v8484_v60  ;;  %v11314_v43 = vld [vmem:[#allocation6 + $0x8b4] sm:$0xf0]  ;;  %v12457_v60 = vpop.f32.mrf.mxu1 }
 0x1ad   :  { %4170 = vmatpush.bf16.msrb.mxu1 %v8245_v54  ;;  %v3909_v53 = vadd.f32 %v3908_v46, %v3895_v36  ;;  %v8213_v54 = vor.u32 %v11198_v29, %v8212_v23  ;;  %v11230_v36 = vld [vmem:[#allocation6 + $0x614] sm:$0xf0]  ;;  %v8964_v23 = vld [vmem:[#allocation6 + $0xae8] sm:$0xf] }
 0x1ae   :  { %v11386_v29 = vld [vmem:[#allocation6 + $0xaf4] sm:$0xf0]  ;;  %v8341_v37 = vor.u32 %v11230_v36, %v8340_v16  ;;  %v8804_v46 = vld [vmem:[#allocation6 + $0x9a8] sm:$0xf] }
 0x1af   :  { %4183 = vmatpush.bf16.msrb.mxu2 %v8389_v2  ;;  %v11318_v2 = vld [vmem:[#allocation6 + $0x8d4] sm:$0xf0]  ;;  %v12451_v11 = vadd.f32 %v3922_v51, %v3909_v53  ;;  %v8948_v53 = vld [vmem:[#allocation6 + $0xac8] sm:$0xf] }
 0x1b0   :  { %4197 = vmatpush.bf16.msrb.mxu3 %v8517_v4  ;;  %4157 = vmatpush.bf16.msrb.mxu0 %v8101_v8  ;;  %v8357_v4 = vor.u32 %v11234_v55, %v8356_v52  ;;  %v11350_v8 = vld [vmem:[#allocation6 + $0x9d4] sm:$0xf0]  ;;  %v8693_v3 = vor.u32 %v11318_v2, %v8692_v44  ;;  %v8965_v52 = vor.u32 %v11386_v29, %v8964_v23  ;;  %v9060_v23 = vld [vmem:[#allocation6 + $0xba8] sm:$0xf] }
 0x1b1   :  { %4171 = vmatpush.bf16.msrb.mxu1 %v8229_v20  ;;  %v8468_v20 = vld [vmem:[#allocation6 + $0x708] sm:$0xf]  ;;  %v8821_v51 = vor.u32 %v11350_v8, %v8820_v12  ;;  %v9093_v55 = vor.u32 %v11418_v21, %v9092_v34  ;;  %v11414_v2 = vld [vmem:[#allocation6 + $0xbd4] sm:$0xf0] }
 0x1b2   :  { %v8469_v44 = vor.u32 %v11262_v50, %v8468_v20  ;;  %v11310_v12 = vld [vmem:[#allocation6 + $0x894] sm:$0xf0]  ;;  %v8788_v8 = vld [vmem:[#allocation6 + $0x988] sm:$0xf] }
 0x1b3   :  { %4184 = vmatpush.bf16.msrb.mxu2 %v8373_v41  ;;  %v8676_v41 = vld [vmem:[#allocation6 + $0x8a8] sm:$0xf]  ;;  %v11342_v16 = vld [vmem:[#allocation6 + $0x994] sm:$0xf0] }
 0x1b4   :  { %4198 = vmatpush.bf16.msrb.mxu3 %v8501_v31  ;;  %4158 = vmatpush.bf16.msrb.mxu0 %v8085_v17  ;;  %v11346_v31 = vld [vmem:[#allocation6 + $0x9b4] sm:$0xf0]  ;;  %v12454_v17 = vpop.f32.mrf.mxu0  ;;  %v8932_v50 = vld [vmem:[#allocation6 + $0xaa8] sm:$0xf]  ;;  %v8789_v29 = vor.u32 %v11342_v16, %v8788_v8 }
 0x1b5   :  { %4172 = vmatpush.bf16.msrb.mxu1 %v8213_v54  ;;  %v11382_v54 = vld [vmem:[#allocation6 + $0xad4] sm:$0xf0]  ;;  %v8805_v61 = vor.u32 %v11346_v31, %v8804_v46  ;;  %v8756_v8 = vld [vmem:[#allocation6 + $0x948] sm:$0xf] }
 0x1b6   :  { %v11410_v34 = vld [vmem:[#allocation6 + $0xbb4] sm:$0xf0] }
 0x1b7   :  { %4185 = vmatpush.bf16.msrb.mxu2 %v8357_v4  ;;  %4159 = vmatmul.bf16.vlgmr.msrb.gmra.mxu0 %v12320_v28  ;;  %v8660_v4 = vld [vmem:[#allocation6 + $0x888] sm:$0xf]  ;;  %v11306_v21 = vld [vmem:[#allocation6 + $0x874] sm:$0xf0] }
 0x1b8   :  { %4207 = vmatpush.bf16.msra.mxu0 %v8709_v56  ;;  %4199 = vmatpush.bf16.msrb.mxu3 %v8485_v18  ;;  %v9076_v56 = vld [vmem:[#allocation6 + $0xbc8] sm:$0xf]  ;;  %v8949_v18 = vor.u32 %v11382_v54, %v8948_v53  ;;  %v8661_v20 = vor.u32 %v11310_v12, %v8660_v4  ;;  %v3950_v54 = vpop.f32.mrf.mxu1  ;;  %v11302_v4 = vld [vmem:[#allocation6 + $0x854] sm:$0xf0] }
 0x1b9   :  { %4221 = vmatpush.bf16.msra.mxu1 %v8837_v39  ;;  %v8677_v39 = vor.u32 %v11314_v43, %v8676_v41  ;;  %v9077_v36 = vor.u32 %v11414_v2, %v9076_v56  ;;  %v8772_v41 = vld [vmem:[#allocation6 + $0x968] sm:$0xf]  ;;  %v11338_v43 = vld [vmem:[#allocation6 + $0x974] sm:$0xf0] }
 0x1ba   :  { %4173 = vmatmul.bf16.vlgmr.msrb.gmra.mxu1 %v12322_v32  ;;  %v9044_v53 = vld [vmem:[#allocation6 + $0xb88] sm:$0xf]  ;;  %v8773_v56 = vor.u32 %v11338_v43, %v8772_v41  ;;  %v11334_v16 = vld [vmem:[#allocation6 + $0x954] sm:$0xf0]  ;;  %v12464_v41 = vpop.f32.mrf.mxu3 }
 0x1bb   :  { %4186 = vmatpush.bf16.msrb.mxu2 %v8341_v37  ;;  %v8628_v2 = vld [vmem:[#allocation6 + $0x848] sm:$0xf] }
 0x1bc   :  { %4208 = vmatpush.bf16.msra.mxu0 %v8693_v3  ;;  %4200 = vmatpush.bf16.msrb.mxu3 %v8469_v44  ;;  %v11378_v3 = vld [vmem:[#allocation6 + $0xab4] sm:$0xf0]  ;;  %v3936_v37 = vpop.f32.mrf.mxu0  ;;  %v9061_v44 = vor.u32 %v11410_v34, %v9060_v23  ;;  %v9028_v23 = vld [vmem:[#allocation6 + $0xb68] sm:$0xf] }
 0x1bd   :  { %4222 = vmatpush.bf16.msra.mxu1 %v8821_v51  ;;  %v8644_v51 = vld [vmem:[#allocation6 + $0x868] sm:$0xf]  ;;  %v8933_v46 = vor.u32 %v11378_v3, %v8932_v50  ;;  %v3937_v31 = vadd.f32 %v3936_v37, %v12451_v11  ;;  %v11370_v3 = vld [vmem:[#allocation6 + $0xa74] sm:$0xf0] }
 0x1be   :  { %4187 = vmatmul.bf16.vlgmr.msrb.gmra.mxu2 %v12330_v1  ;;  %v8900_v50 = vld [vmem:[#allocation6 + $0xa68] sm:$0xf]  ;;  %v11402_v34 = vld [vmem:[#allocation6 + $0xb74] sm:$0xf0] }
 0x1bf   :  { %4235 = vmatpush.bf16.msra.mxu2 %v8965_v52  ;;  %4201 = vmatmul.bf16.vlgmr.msrb.gmra.mxu3 %v12332_v6  ;;  %v8645_v52 = vor.u32 %v11306_v21, %v8644_v51  ;;  %v3951_v12 = vadd.f32 %v3950_v54, %v3937_v31  ;;  %v8612_v51 = vld [vmem:[#allocation6 + $0x828] sm:$0xf]  ;;  %v11298_v21 = vld [vmem:[#allocation6 + $0x834] sm:$0xf0] }
 0x1c0   :  { %4249 = vmatpush.bf16.msra.mxu3 %v9093_v55  ;;  %4209 = vmatpush.bf16.msra.mxu0 %v8677_v39  ;;  %v8916_v55 = vld [vmem:[#allocation6 + $0xa88] sm:$0xf]  ;;  %v11374_v39 = vld [vmem:[#allocation6 + $0xa94] sm:$0xf0] }
 0x1c1   :  { %4223 = vmatpush.bf16.msra.mxu1 %v8805_v61  ;;  %v11406_v61 = vld [vmem:[#allocation6 + $0xb94] sm:$0xf0]  ;;  %v8740_v43 = vld [vmem:[#allocation6 + $0x928] sm:$0xf] }
 0x1c2   :  { %v9045_v11 = vor.u32 %v11406_v61, %v9044_v53  ;;  %v11330_v37 = vld [vmem:[#allocation6 + $0x934] sm:$0xf0]  ;;  %v8884_v31 = vld [vmem:[#allocation6 + $0xa48] sm:$0xf]  ;;  %v3978_v45 = vpop.f32.mrf.mxu3 }
 0x1c3   :  { %4236 = vmatpush.bf16.msra.mxu2 %v8949_v18  ;;  %v8917_v18 = vor.u32 %v11374_v39, %v8916_v55  ;;  %v11366_v55 = vld [vmem:[#allocation6 + $0xa54] sm:$0xf0]  ;;  %v9012_v39 = vld [vmem:[#allocation6 + $0xb48] sm:$0xf]  ;;  %v8741_v54 = vor.u32 %v11330_v37, %v8740_v43 }
 0x1c4   :  { %4250 = vmatpush.bf16.msra.mxu3 %v9077_v36  ;;  %4210 = vmatpush.bf16.msra.mxu0 %v8661_v20  ;;  %v12462_v36 = vpop.f32.mrf.mxu2  ;;  %v8629_v20 = vor.u32 %v11302_v4, %v8628_v2  ;;  %v11398_v53 = vld [vmem:[#allocation6 + $0xb54] sm:$0xf0]  ;;  %v8724_v2 = vld [vmem:[#allocation6 + $0x908] sm:$0xf]  ;;  %v8885_v59 = vor.u32 %v11366_v55, %v8884_v31 }
 0x1c5   :  { %4224 = vmatpush.bf16.msra.mxu1 %v8789_v29  ;;  %v8757_v29 = vor.u32 %v11334_v16, %v8756_v8  ;;  %v11294_v61 = vld [vmem:[#allocation6 + $0x814] sm:$0xf0]  ;;  %v9220_v8 = vld [vmem:[#allocation6 + $0xce8] sm:$0xf] }
 0x1c6   :  { %v11326_v4 = vld [vmem:[#allocation6 + $0x914] sm:$0xf0]  ;;  %v8996_v43 = vld [vmem:[#allocation6 + $0xb28] sm:$0xf] }
 0x1c7   :  { %4237 = vmatpush.bf16.msra.mxu2 %v8933_v46  ;;  %v8901_v46 = vor.u32 %v11370_v3, %v8900_v50  ;;  %v11450_v16 = vld [vmem:[#allocation6 + $0xcf4] sm:$0xf0]  ;;  %v9332_v55 = vld [vmem:[#allocation6 + $0xdc8] sm:$0xf] }
 0x1c8   :  { %4251 = vmatpush.bf16.msra.mxu3 %v9061_v44  ;;  %4211 = vmatpush.bf16.msra.mxu0 %v8645_v52  ;;  %v9029_v44 = vor.u32 %v11402_v34, %v9028_v23  ;;  %v8613_v52 = vor.u32 %v11298_v21, %v8612_v51  ;;  %v11482_v50 = vld [vmem:[#allocation6 + $0xdf4] sm:$0xf0]  ;;  %v8868_v23 = vld [vmem:[#allocation6 + $0xa28] sm:$0xf]  ;;  %v9221_v21 = vor.u32 %v11450_v16, %v9220_v8 }
 0x1c9   :  { %4225 = vmatpush.bf16.msra.mxu1 %v8773_v56  ;;  %v8596_v56 = vld [vmem:[#allocation6 + $0x808] sm:$0xf]  ;;  %v11362_v34 = vld [vmem:[#allocation6 + $0xa34] sm:$0xf0] }
 0x1ca   :  { %v8597_v3 = vor.u32 %v11294_v61, %v8596_v56  ;;  %v11394_v37 = vld [vmem:[#allocation6 + $0xb34] sm:$0xf0]  ;;  %v9604_v8 = vld [vmem:[#allocation6 + $0xfe8] sm:$0xf] }
 0x1cb   :  { %4238 = vmatpush.bf16.msra.mxu2 %v8917_v18  ;;  %v9348_v18 = vld [vmem:[#allocation6 + $0xde8] sm:$0xf]  ;;  %v11390_v56 = vld [vmem:[#allocation6 + $0xb14] sm:$0xf0] }
 0x1cc   :  { %4252 = vmatpush.bf16.msra.mxu3 %v9045_v11  ;;  %4212 = vmatpush.bf16.msra.mxu0 %v8629_v20  ;;  %v3964_v11 = vpop.f32.mrf.mxu2  ;;  %v9013_v20 = vor.u32 %v11398_v53, %v9012_v39  ;;  %v9349_v25 = vor.u32 %v11482_v50, %v9348_v18  ;;  %v8852_v39 = vld [vmem:[#allocation6 + $0xa08] sm:$0xf]  ;;  %v8997_v53 = vor.u32 %v11394_v37, %v8996_v43  ;;  %v11546_v16 = vld [vmem:[#allocation6 + $0xff4] sm:$0xf0]  ;;  %v12472_v43 = vpop.f32.mrf.mxu1 }
 0x1cd   :  { %4226 = vmatpush.bf16.msra.mxu1 %v8757_v29  ;;  %v3965_v51 = vadd.f32 %v3964_v11, %v3951_v12  ;;  %v8725_v29 = vor.u32 %v11326_v4, %v8724_v2  ;;  %v11358_v12 = vld [vmem:[#allocation6 + $0xa14] sm:$0xf0]  ;;  %v9476_v2 = vld [vmem:[#allocation6 + $0xee8] sm:$0xf] }
 0x1ce   :  { %v11514_v4 = vld [vmem:[#allocation6 + $0xef4] sm:$0xf0]  ;;  %v8853_v50 = vor.u32 %v11358_v12, %v8852_v39  ;;  %v9316_v11 = vld [vmem:[#allocation6 + $0xda8] sm:$0xf] }
 0x1cf   :  { %4239 = vmatpush.bf16.msra.mxu2 %v8901_v46  ;;  %v11446_v46 = vld [vmem:[#allocation6 + $0xcd4] sm:$0xf0]  ;;  %v12466_v31 = vadd.f32 %v3978_v45, %v3965_v51  ;;  %v9460_v51 = vld [vmem:[#allocation6 + $0xec8] sm:$0xf] }
 0x1d0   :  { %4253 = vmatpush.bf16.msra.mxu3 %v9029_v44  ;;  %4213 = vmatpush.bf16.msra.mxu0 %v8613_v52  ;;  %v8869_v44 = vor.u32 %v11362_v34, %v8868_v23  ;;  %v11478_v52 = vld [vmem:[#allocation6 + $0xdd4] sm:$0xf0]  ;;  %v9205_v61 = vor.u32 %v11446_v46, %v9204_v13  ;;  %v9477_v23 = vor.u32 %v11514_v4, %v9476_v2  ;;  %v9572_v2 = vld [vmem:[#allocation6 + $0xfa8] sm:$0xf] }
 0x1d1   :  { %4227 = vmatpush.bf16.msra.mxu1 %v8741_v54  ;;  %v8980_v54 = vld [vmem:[#allocation6 + $0xb08] sm:$0xf]  ;;  %v9333_v45 = vor.u32 %v11478_v52, %v9332_v55  ;;  %v11442_v18 = vld [vmem:[#allocation6 + $0xcb4] sm:$0xf0]  ;;  %v9605_v34 = vor.u32 %v11546_v16, %v9604_v8 }
 0x1d2   :  { %v8981_v13 = vor.u32 %v11390_v56, %v8980_v54  ;;  %v11542_v46 = vld [vmem:[#allocation6 + $0xfd4] sm:$0xf0]  ;;  %v9300_v52 = vld [vmem:[#allocation6 + $0xd88] sm:$0xf] }
 0x1d3   :  { %4240 = vmatpush.bf16.msra.mxu2 %v8885_v59  ;;  %v9188_v59 = vld [vmem:[#allocation6 + $0xca8] sm:$0xf]  ;;  %v11438_v55 = vld [vmem:[#allocation6 + $0xc94] sm:$0xf0] }
 0x1d4   :  { %4254 = vmatpush.bf16.msra.mxu3 %v9013_v20  ;;  %4214 = vmatpush.bf16.msra.mxu0 %v8597_v3  ;;  %v11474_v20 = vld [vmem:[#allocation6 + $0xdb4] sm:$0xf0]  ;;  %v12469_v3 = vpop.f32.mrf.mxu0  ;;  %v9444_v56 = vld [vmem:[#allocation6 + $0xea8] sm:$0xf] }
 0x1d5   :  { %4228 = vmatpush.bf16.msra.mxu1 %v8725_v29  ;;  %v11510_v29 = vld [vmem:[#allocation6 + $0xed4] sm:$0xf0]  ;;  %v9317_v37 = vor.u32 %v11474_v20, %v9316_v11 }
 0x1d6   :  { %v11470_v39 = vld [vmem:[#allocation6 + $0xd94] sm:$0xf0] }
 0x1d7   :  { %4241 = vmatpush.bf16.msra.mxu2 %v8869_v44  ;;  %4215 = vmatmul.bf16.vlgmr.msra.gmra.mxu0 %v12340_v58  ;;  %v9172_v44 = vld [vmem:[#allocation6 + $0xc88] sm:$0xf]  ;;  %v9301_v4 = vor.u32 %v11470_v39, %v9300_v52  ;;  %v11538_v8 = vld [vmem:[#allocation6 + $0xfb4] sm:$0xf0] }
 0x1d8   :  { %4263 = vmatpush.bf16.msrb.mxu0 %v9221_v21  ;;  %4255 = vmatpush.bf16.msra.mxu3 %v8997_v53  ;;  %v9588_v21 = vld [vmem:[#allocation6 + $0xfc8] sm:$0xf]  ;;  %v9461_v53 = vor.u32 %v11510_v29, %v9460_v51  ;;  %v9173_v54 = vor.u32 %v11438_v55, %v9172_v44  ;;  %v11434_v16 = vld [vmem:[#allocation6 + $0xc74] sm:$0xf0]  ;;  %v4006_v29 = vpop.f32.mrf.mxu1 }
 0x1d9   :  { %4277 = vmatpush.bf16.msrb.mxu1 %v9349_v25  ;;  %v9189_v25 = vor.u32 %v11442_v18, %v9188_v59  ;;  %v9589_v12 = vor.u32 %v11542_v46, %v9588_v21  ;;  %v9284_v59 = vld [vmem:[#allocation6 + $0xd68] sm:$0xf]  ;;  %v11466_v18 = vld [vmem:[#allocation6 + $0xd74] sm:$0xf0] }
 0x1da   :  { %4229 = vmatmul.bf16.vlgmr.msra.gmra.mxu1 %v12344_v5  ;;  %v9556_v51 = vld [vmem:[#allocation6 + $0xf88] sm:$0xf]  ;;  %v9285_v21 = vor.u32 %v11466_v18, %v9284_v59  ;;  %v11430_v44 = vld [vmem:[#allocation6 + $0xc54] sm:$0xf0]  ;;  %v12479_v59 = vpop.f32.mrf.mxu3 }
 0x1db   :  { %4242 = vmatpush.bf16.msra.mxu2 %v8853_v50  ;;  %v9140_v46 = vld [vmem:[#allocation6 + $0xc48] sm:$0xf]  ;;  %v11462_v39 = vld [vmem:[#allocation6 + $0xd54] sm:$0xf0]  ;;  %12802 = vst [vmem:[#allocation28_spill] sm:$0xff] %v12479_v59 }
 0x1dc   :  { %4264 = vmatpush.bf16.msrb.mxu0 %v9205_v61  ;;  %4256 = vmatpush.bf16.msra.mxu3 %v8981_v13  ;;  %v11506_v61 = vld [vmem:[#allocation6 + $0xeb4] sm:$0xf0]  ;;  %v3992_v50 = vpop.f32.mrf.mxu0  ;;  %v9573_v13 = vor.u32 %v11538_v8, %v9572_v2  ;;  %v9268_v52 = vld [vmem:[#allocation6 + $0xd48] sm:$0xf]  ;;  %v11060_v59 = vld [vmem:[#allocation6 + $0xcc] sm:$0xf] }
 0x1dd   :  { %4278 = vmatpush.bf16.msrb.mxu1 %v9333_v45  ;;  %v9156_v45 = vld [vmem:[#allocation6 + $0xc68] sm:$0xf]  ;;  %v9445_v11 = vor.u32 %v11506_v61, %v9444_v56  ;;  %v3993_v20 = vadd.f32 %v3992_v50, %v12466_v31  ;;  %v11498_v61 = vld [vmem:[#allocation6 + $0xe74] sm:$0xf0] }
 0x1de   :  { %4243 = vmatmul.bf16.vlgmr.msra.gmra.mxu2 %v12354_v38  ;;  %v9412_v56 = vld [vmem:[#allocation6 + $0xe68] sm:$0xf]  ;;  %v11530_v8 = vld [vmem:[#allocation6 + $0xf74] sm:$0xf0] }
 0x1df   :  { %4291 = vmatpush.bf16.msrb.mxu2 %v9477_v23  ;;  %4257 = vmatmul.bf16.vlgmr.msra.gmra.mxu3 %v12358_v40  ;;  %v9157_v23 = vor.u32 %v11434_v16, %v9156_v45  ;;  %v4007_v55 = vadd.f32 %v4006_v29, %v3993_v20  ;;  %v9540_v2 = vld [vmem:[#allocation6 + $0xf68] sm:$0xf]  ;;  %v11426_v16 = vld [vmem:[#allocation6 + $0xc34] sm:$0xf0] }
 0x1e0   :  { %4305 = vmatpush.bf16.msrb.mxu3 %v9605_v34  ;;  %4265 = vmatpush.bf16.msrb.mxu0 %v9189_v25  ;;  %v9428_v34 = vld [vmem:[#allocation6 + $0xe88] sm:$0xf]  ;;  %v11502_v25 = vld [vmem:[#allocation6 + $0xe94] sm:$0xf0] }
 0x1e1   :  { %4279 = vmatpush.bf16.msrb.mxu1 %v9317_v37  ;;  %v11534_v37 = vld [vmem:[#allocation6 + $0xf94] sm:$0xf0]  ;;  %v9124_v45 = vld [vmem:[#allocation6 + $0xc28] sm:$0xf] }
 0x1e2   :  { %v9557_v31 = vor.u32 %v11534_v37, %v9556_v51  ;;  %v9252_v18 = vld [vmem:[#allocation6 + $0xd28] sm:$0xf]  ;;  %v11458_v50 = vld [vmem:[#allocation6 + $0xd34] sm:$0xf0]  ;;  %v4034_v26 = vpop.f32.mrf.mxu3 }
 0x1e3   :  { %4292 = vmatpush.bf16.msrb.mxu2 %v9461_v53  ;;  %v9429_v53 = vor.u32 %v11502_v25, %v9428_v34  ;;  %v9396_v20 = vld [vmem:[#allocation6 + $0xe48] sm:$0xf]  ;;  %v11494_v34 = vld [vmem:[#allocation6 + $0xe54] sm:$0xf0]  ;;  %v9253_v29 = vor.u32 %v11458_v50, %v9252_v18 }
 0x1e4   :  { %4306 = vmatpush.bf16.msrb.mxu3 %v9589_v12  ;;  %4266 = vmatpush.bf16.msrb.mxu0 %v9173_v54  ;;  %v12477_v12 = vpop.f32.mrf.mxu2  ;;  %v9141_v54 = vor.u32 %v11430_v44, %v9140_v46  ;;  %v9524_v25 = vld [vmem:[#allocation6 + $0xf48] sm:$0xf]  ;;  %v11526_v51 = vld [vmem:[#allocation6 + $0xf54] sm:$0xf0]  ;;  %v9397_v19 = vor.u32 %v11494_v34, %v9396_v20  ;;  %v11092_v34 = vld [vmem:[#allocation6 + $0x1cc] sm:$0xf] }
 0x1e5   :  { %4280 = vmatpush.bf16.msrb.mxu1 %v9301_v4  ;;  %v9269_v4 = vor.u32 %v11462_v39, %v9268_v52  ;;  %v11422_v37 = vld [vmem:[#allocation6 + $0xc14] sm:$0xf0]  ;;  %v9236_v46 = vld [vmem:[#allocation6 + $0xd08] sm:$0xf]  ;;  %v11064_v52 = vld [vmem:[#allocation6 + $0xec] sm:$0xf] }
 0x1e6   :  { %v11454_v44 = vld [vmem:[#allocation6 + $0xd14] sm:$0xf0]  ;;  %v7686_v39 = vld [vmem:[#allocation6 + $0xf8] sm:$0xf0]  ;;  %v9508_v18 = vld [vmem:[#allocation6 + $0xf28] sm:$0xf] }
 0x1e7   :  { %4293 = vmatpush.bf16.msrb.mxu2 %v9445_v11  ;;  %v9413_v11 = vor.u32 %v11498_v61, %v9412_v56  ;;  %v7814_v56 = vld [vmem:[#allocation6 + $0x1f8] sm:$0xf0]  ;;  %v11522_v50 = vld [vmem:[#allocation6 + $0xf34] sm:$0xf0] }
 0x1e8   :  { %4307 = vmatpush.bf16.msrb.mxu3 %v9573_v13  ;;  %4267 = vmatpush.bf16.msrb.mxu0 %v9157_v23  ;;  %v9541_v13 = vor.u32 %v11530_v8, %v9540_v2  ;;  %v9125_v23 = vor.u32 %v11426_v16, %v9124_v45  ;;  %v9380_v2 = vld [vmem:[#allocation6 + $0xe28] sm:$0xf]  ;;  %v11490_v8 = vld [vmem:[#allocation6 + $0xe34] sm:$0xf0]  ;;  %v7689_v16 = vor.u32 %v11064_v52, %v7686_v39  ;;  %v11160_v52 = vld [vmem:[#allocation6 + $0x3ec] sm:$0xf] }
 0x1e9   :  { %4281 = vmatpush.bf16.msrb.mxu1 %v9285_v21  ;;  %v9108_v21 = vld [vmem:[#allocation6 + $0xc08] sm:$0xf]  ;;  %v8070_v39 = vld [vmem:[#allocation6 + $0x3f8] sm:$0xf0] }
 0x1ea   :  { %v9109_v61 = vor.u32 %v11422_v37, %v9108_v21  ;;  %v11518_v21 = vld [vmem:[#allocation6 + $0xf14] sm:$0xf0] }
 0x1eb   :  { %4294 = vmatpush.bf16.msrb.mxu2 %v9429_v53  ;;  %v11096_v53 = vld [vmem:[#allocation6 + $0x1ec] sm:$0xf] }
 0x1ec   :  { %4308 = vmatpush.bf16.msrb.mxu3 %v9557_v31  ;;  %4268 = vmatpush.bf16.msrb.mxu0 %v9141_v54  ;;  %v4020_v31 = vpop.f32.mrf.mxu2  ;;  %v9525_v54 = vor.u32 %v11526_v51, %v9524_v25  ;;  %v7817_v14 = vor.u32 %v11096_v53, %v7814_v56  ;;  %v9364_v25 = vld [vmem:[#allocation6 + $0xe08] sm:$0xf]  ;;  %v9509_v51 = vor.u32 %v11522_v50, %v9508_v18  ;;  %v7654_v53 = vld [vmem:[#allocation6 + $0xb8] sm:$0xf0]  ;;  %v11052_v50 = vld [vmem:[#allocation6 + $0x8c] sm:$0xf] }
 0x1ed   :  { %4282 = vmatpush.bf16.msrb.mxu1 %v9269_v4  ;;  %v4021_v45 = vadd.f32 %v4020_v31, %v4007_v55  ;;  %v9237_v4 = vor.u32 %v11454_v44, %v9236_v46  ;;  %v11486_v55 = vld [vmem:[#allocation6 + $0xe14] sm:$0xf0]  ;;  %v11128_v46 = vld [vmem:[#allocation6 + $0x2ec] sm:$0xf]  ;;  %v7942_v44 = vld [vmem:[#allocation6 + $0x2f8] sm:$0xf0] }
 0x1ee   :  { %v9365_v56 = vor.u32 %v11486_v55, %v9364_v25  ;;  %v11088_v31 = vld [vmem:[#allocation6 + $0x1ac] sm:$0xf]  ;;  %v8054_v18 = vld [vmem:[#allocation6 + $0x3d8] sm:$0xf0] }
 0x1ef   :  { %4295 = vmatpush.bf16.msrb.mxu2 %v9413_v11  ;;  %v7670_v11 = vld [vmem:[#allocation6 + $0xd8] sm:$0xf0]  ;;  %v12481_v20 = vadd.f32 %v4034_v26, %v4021_v45  ;;  %v11124_v45 = vld [vmem:[#allocation6 + $0x2cc] sm:$0xf] }
 0x1f0   :  { %4309 = vmatpush.bf16.msrb.mxu3 %v9541_v13  ;;  %4269 = vmatpush.bf16.msrb.mxu0 %v9125_v23  ;;  %v9381_v13 = vor.u32 %v11490_v8, %v9380_v2  ;;  %v7798_v23 = vld [vmem:[#allocation6 + $0x1d8] sm:$0xf0]  ;;  %v7673_v37 = vor.u32 %v11060_v59, %v7670_v11  ;;  %v7945_v2 = vor.u32 %v11128_v46, %v7942_v44  ;;  %v11120_v55 = vld [vmem:[#allocation6 + $0x2ac] sm:$0xf] }
 0x1f1   :  { %4283 = vmatpush.bf16.msrb.mxu1 %v9253_v29  ;;  %v9492_v29 = vld [vmem:[#allocation6 + $0xf08] sm:$0xf]  ;;  %v7801_v26 = vor.u32 %v11092_v34, %v7798_v23  ;;  %v8073_v59 = vor.u32 %v11160_v52, %v8070_v39  ;;  %v7638_v11 = vld [vmem:[#allocation6 + $0x98] sm:$0xf0]  ;;  %v11048_v44 = vld [vmem:[#allocation6 + $0x6c] sm:$0xf] }
 0x1f2   :  { %v7766_v34 = vld [vmem:[#allocation6 + $0x198] sm:$0xf0] }
 0x1f3   :  { %4296 = vmatpush.bf16.msrb.mxu2 %v9397_v19  ;;  %v11056_v19 = vld [vmem:[#allocation6 + $0xac] sm:$0xf]  ;;  %v8038_v46 = vld [vmem:[#allocation6 + $0x3b8] sm:$0xf0] }
 0x1f4   :  { %4310 = vmatpush.bf16.msrb.mxu3 %v9525_v54  ;;  %4270 = vmatpush.bf16.msrb.mxu0 %v9109_v61  ;;  %v7782_v54 = vld [vmem:[#allocation6 + $0x1b8] sm:$0xf0]  ;;  %v9493_v61 = vor.u32 %v11518_v21, %v9492_v29  ;;  %v7657_v8 = vor.u32 %v11056_v19, %v7654_v53  ;;  %v11152_v21 = vld [vmem:[#allocation6 + $0x3ac] sm:$0xf] }
 0x1f5   :  { %4284 = vmatpush.bf16.msrb.mxu1 %v9237_v4  ;;  %v11156_v4 = vld [vmem:[#allocation6 + $0x3cc] sm:$0xf]  ;;  %v7910_v29 = vld [vmem:[#allocation6 + $0x2b8] sm:$0xf0]  ;;  %v8041_v53 = vor.u32 %v11152_v21, %v8038_v46 }
 0x1f6   :  { %v8057_v25 = vor.u32 %v11156_v4, %v8054_v18  ;;  %v7622_v52 = vld [vmem:[#allocation6 + $0x78] sm:$0xf0]  ;;  %v7913_v19 = vor.u32 %v11120_v55, %v7910_v29  ;;  %v11072_v29 = vld [vmem:[#allocation6 + $0x12c] sm:$0xf] }
 0x1f7   :  { %4297 = vmatpush.bf16.msrb.mxu2 %v9381_v13  ;;  %4271 = vmatmul.bf16.vlgmr.msrb.gmra.mxu0 %v12373_v22  ;;  %v11084_v13 = vld [vmem:[#allocation6 + $0x18c] sm:$0xf]  ;;  %v7750_v39 = vld [vmem:[#allocation6 + $0x178] sm:$0xf0] }
 0x1f8   :  { %4319 = vmatpush.bf16.msra.mxu0 %v7689_v16  ;;  %4311 = vmatpush.bf16.msrb.mxu3 %v9509_v51  ;;  %v7785_v16 = vor.u32 %v11088_v31, %v7782_v54  ;;  %v7641_v51 = vor.u32 %v11052_v50, %v7638_v11  ;;  %v11116_v31 = vld [vmem:[#allocation6 + $0x28c] sm:$0xf]  ;;  %v7894_v54 = vld [vmem:[#allocation6 + $0x298] sm:$0xf0] }
 0x1f9   :  { %4333 = vmatpush.bf16.msra.mxu1 %v7817_v14  ;;  %v7926_v14 = vld [vmem:[#allocation6 + $0x2d8] sm:$0xf0]  ;;  %v11112_v11 = vld [vmem:[#allocation6 + $0x26c] sm:$0xf] }
 0x1fa   :  { %4285 = vmatmul.bf16.vlgmr.msrb.gmra.mxu1 %v12376_v30  ;;  %v7929_v23 = vor.u32 %v11124_v45, %v7926_v14  ;;  %v7606_v45 = vld [vmem:[#allocation6 + $0x58] sm:$0xf0]  ;;  %v11076_v14 = vld [vmem:[#allocation6 + $0x14c] sm:$0xf] }
 0x1fb   :  { %4298 = vmatpush.bf16.msrb.mxu2 %v9365_v56  ;;  %v7625_v56 = vor.u32 %v11048_v44, %v7622_v52  ;;  %v7734_v4 = vld [vmem:[#allocation6 + $0x158] sm:$0xf0]  ;;  %v11108_v46 = vld [vmem:[#allocation6 + $0x24c] sm:$0xf] }
 0x1fc   :  { %4320 = vmatpush.bf16.msra.mxu0 %v7673_v37  ;;  %4312 = vmatpush.bf16.msrb.mxu3 %v9493_v61  ;;  %v7769_v37 = vor.u32 %v11084_v13, %v7766_v34  ;;  %v11148_v61 = vld [vmem:[#allocation6 + $0x38c] sm:$0xf]  ;;  %v7878_v13 = vld [vmem:[#allocation6 + $0x278] sm:$0xf0] }
 0x1fd   :  { %4334 = vmatpush.bf16.msra.mxu1 %v7801_v26  ;;  %v11080_v26 = vld [vmem:[#allocation6 + $0x16c] sm:$0xf]  ;;  %v7590_v55 = vld [vmem:[#allocation6 + $0x38] sm:$0xf0] }
 0x1fe   :  { %4299 = vmatmul.bf16.vlgmr.msrb.gmra.mxu2 %v12380_v57  ;;  %v11144_v34 = vld [vmem:[#allocation6 + $0x36c] sm:$0xf]  ;;  %v7718_v21 = vld [vmem:[#allocation6 + $0x138] sm:$0xf0] }
 0x1ff   :  { %4347 = vmatpush.bf16.msra.mxu2 %v7945_v2  ;;  %4313 = vmatmul.bf16.vlgmr.msrb.gmra.mxu3 %v12382_v63  ;;  %v7753_v2 = vor.u32 %v11080_v26, %v7750_v39  ;;  %v7862_v26 = vld [vmem:[#allocation6 + $0x258] sm:$0xf0]  ;;  %v11140_v39 = vld [vmem:[#allocation6 + $0x34c] sm:$0xf] }
 0x200   :  { %4361 = vmatpush.bf16.msra.mxu3 %v8073_v59  ;;  %4321 = vmatpush.bf16.msra.mxu0 %v7657_v8  ;;  %v8022_v59 = vld [vmem:[#allocation6 + $0x398] sm:$0xf0]  ;;  %v11044_v8 = vld [vmem:[#allocation6 + $0x4c] sm:$0xf] }
 0x201   :  { %4335 = vmatpush.bf16.msra.mxu1 %v7785_v16  ;;  %v7897_v16 = vor.u32 %v11116_v31, %v7894_v54  ;;  %v8025_v18 = vor.u32 %v11148_v61, %v8022_v59  ;;  %v7609_v50 = vor.u32 %v11044_v8, %v7606_v45  ;;  %v7574_v31 = vld [vmem:[#allocation6 + $0x18] sm:$0xf0]  ;;  %v11068_v54 = vld [vmem:[#allocation6 + $0x10c] sm:$0xf]  ;;  %v7865_v8 = vor.u32 %v11108_v46, %v7862_v26 }
 0x202   :  { %v7702_v61 = vld [vmem:[#allocation6 + $0x118] sm:$0xf0]  ;;  %v11224_v45 = vld [vmem:[#allocation6 + $0x5ec] sm:$0xf] }
 0x203   :  { %4348 = vmatpush.bf16.msra.mxu2 %v7929_v23  ;;  %v7737_v23 = vor.u32 %v11076_v14, %v7734_v4  ;;  %v8198_v59 = vld [vmem:[#allocation6 + $0x4f8] sm:$0xf0]  ;;  %v11100_v46 = vld [vmem:[#allocation6 + $0x20c] sm:$0xf] }
 0x204   :  { %4362 = vmatpush.bf16.msra.mxu3 %v8057_v25  ;;  %4322 = vmatpush.bf16.msra.mxu0 %v7641_v51  ;;  %v8006_v25 = vld [vmem:[#allocation6 + $0x378] sm:$0xf0]  ;;  %v11040_v51 = vld [vmem:[#allocation6 + $0x2c] sm:$0xf] }
 0x205   :  { %4336 = vmatpush.bf16.msra.mxu1 %v7769_v37  ;;  %v7881_v37 = vor.u32 %v11112_v11, %v7878_v13  ;;  %v8009_v44 = vor.u32 %v11144_v34, %v8006_v25  ;;  %v7593_v52 = vor.u32 %v11040_v51, %v7590_v55  ;;  %v8326_v14 = vld [vmem:[#allocation6 + $0x5f8] sm:$0xf0]  ;;  %v7705_v11 = vor.u32 %v11068_v54, %v7702_v61  ;;  %v11136_v34 = vld [vmem:[#allocation6 + $0x32c] sm:$0xf] }
 0x206   :  { %v8329_v25 = vor.u32 %v11224_v45, %v8326_v14  ;;  %v11188_v51 = vld [vmem:[#allocation6 + $0x4cc] sm:$0xf]  ;;  %v8182_v55 = vld [vmem:[#allocation6 + $0x4d8] sm:$0xf0] }
 0x207   :  { %4349 = vmatpush.bf16.msra.mxu2 %v7913_v19  ;;  %v7990_v19 = vld [vmem:[#allocation6 + $0x358] sm:$0xf0]  ;;  %v11132_v26 = vld [vmem:[#allocation6 + $0x30c] sm:$0xf] }
 0x208   :  { %4363 = vmatpush.bf16.msra.mxu3 %v8041_v53  ;;  %4323 = vmatpush.bf16.msra.mxu0 %v7625_v56  ;;  %v7721_v53 = vor.u32 %v11072_v29, %v7718_v21  ;;  %v11036_v56 = vld [vmem:[#allocation6 + $0xc] sm:$0xf]  ;;  %v7993_v4 = vor.u32 %v11140_v39, %v7990_v19  ;;  %v7958_v39 = vld [vmem:[#allocation6 + $0x318] sm:$0xf0]  ;;  %v8185_v19 = vor.u32 %v11188_v51, %v8182_v55 }
 0x209   :  { %4337 = vmatpush.bf16.msra.mxu1 %v7753_v2  ;;  %v11192_v2 = vld [vmem:[#allocation6 + $0x4ec] sm:$0xf]  ;;  %v8582_v61 = vld [vmem:[#allocation6 + $0x7f8] sm:$0xf0] }
 0x20a   :  { %v8201_v13 = vor.u32 %v11192_v2, %v8198_v59  ;;  %v11220_v21 = vld [vmem:[#allocation6 + $0x5cc] sm:$0xf]  ;;  %v8166_v59 = vld [vmem:[#allocation6 + $0x4b8] sm:$0xf0] }
 0x20b   :  { %4350 = vmatpush.bf16.msra.mxu2 %v7897_v16  ;;  %v7577_v16 = vor.u32 %v11036_v56, %v7574_v31  ;;  %v8454_v56 = vld [vmem:[#allocation6 + $0x6f8] sm:$0xf0]  ;;  %v11288_v31 = vld [vmem:[#allocation6 + $0x7ec] sm:$0xf] }
 0x20c   :  { %4364 = vmatpush.bf16.msra.mxu3 %v8025_v18  ;;  %4324 = vmatpush.bf16.msra.mxu0 %v7609_v50  ;;  %v11104_v18 = vld [vmem:[#allocation6 + $0x22c] sm:$0xf]  ;;  %v7846_v50 = vld [vmem:[#allocation6 + $0x238] sm:$0xf0] }
 0x20d   :  { %4338 = vmatpush.bf16.msra.mxu1 %v7737_v23  ;;  %v7974_v23 = vld [vmem:[#allocation6 + $0x338] sm:$0xf0]  ;;  %v7849_v29 = vor.u32 %v11104_v18, %v7846_v50  ;;  %v11184_v2 = vld [vmem:[#allocation6 + $0x4ac] sm:$0xf]  ;;  %v8585_v18 = vor.u32 %v11288_v31, %v8582_v61 }
 0x20e   :  { %v11216_v45 = vld [vmem:[#allocation6 + $0x5ac] sm:$0xf]  ;;  %v8294_v14 = vld [vmem:[#allocation6 + $0x5b8] sm:$0xf0]  ;;  %v8169_v50 = vor.u32 %v11184_v2, %v8166_v59 }
 0x20f   :  { %4351 = vmatpush.bf16.msra.mxu2 %v7881_v37  ;;  %v8310_v37 = vld [vmem:[#allocation6 + $0x5d8] sm:$0xf0]  ;;  %v11180_v51 = vld [vmem:[#allocation6 + $0x48c] sm:$0xf] }
 0x210   :  { %4365 = vmatpush.bf16.msra.mxu3 %v8009_v44  ;;  %4325 = vmatpush.bf16.msra.mxu0 %v7593_v52  ;;  %v7977_v44 = vor.u32 %v11136_v34, %v7974_v23  ;;  %v7830_v52 = vld [vmem:[#allocation6 + $0x218] sm:$0xf0]  ;;  %v8313_v54 = vor.u32 %v11220_v21, %v8310_v37  ;;  %v11284_v34 = vld [vmem:[#allocation6 + $0x7cc] sm:$0xf]  ;;  %v8297_v23 = vor.u32 %v11216_v45, %v8294_v14 }
 0x211   :  { %4339 = vmatpush.bf16.msra.mxu1 %v7721_v53  ;;  %v11256_v53 = vld [vmem:[#allocation6 + $0x6ec] sm:$0xf]  ;;  %v8150_v55 = vld [vmem:[#allocation6 + $0x498] sm:$0xf0] }
 0x212   :  { %v8153_v37 = vor.u32 %v11180_v51, %v8150_v55  ;;  %v8262_v31 = vld [vmem:[#allocation6 + $0x578] sm:$0xf0]  ;;  %v11244_v59 = vld [vmem:[#allocation6 + $0x68c] sm:$0xf] }
 0x213   :  { %4352 = vmatpush.bf16.msra.mxu2 %v7865_v8  ;;  %v7833_v8 = vor.u32 %v11100_v46, %v7830_v52  ;;  %v11248_v46 = vld [vmem:[#allocation6 + $0x6ac] sm:$0xf]  ;;  %v8534_v14 = vld [vmem:[#allocation6 + $0x798] sm:$0xf0] }
 0x214   :  { %4366 = vmatpush.bf16.msra.mxu3 %v7993_v4  ;;  %4326 = vmatpush.bf16.msra.mxu0 %v7577_v16  ;;  %v7961_v4 = vor.u32 %v11132_v26, %v7958_v39  ;;  %v8457_v16 = vor.u32 %v11256_v53, %v8454_v56  ;;  %v11280_v52 = vld [vmem:[#allocation6 + $0x7ac] sm:$0xf]  ;;  %v8550_v39 = vld [vmem:[#allocation6 + $0x7b8] sm:$0xf0] }
 0x215   :  { %4340 = vmatpush.bf16.msra.mxu1 %v7705_v11  ;;  %v11252_v11 = vld [vmem:[#allocation6 + $0x6cc] sm:$0xf]  ;;  %v8134_v53 = vld [vmem:[#allocation6 + $0x478] sm:$0xf0]  ;;  %v8553_v61 = vor.u32 %v11280_v52, %v8550_v39 }
 0x216   :  { %v11208_v56 = vld [vmem:[#allocation6 + $0x56c] sm:$0xf]  ;;  %v8518_v55 = vld [vmem:[#allocation6 + $0x778] sm:$0xf0] }
 0x217   :  { %4353 = vmatpush.bf16.msra.mxu2 %v7849_v29  ;;  %4327 = vmatmul.bf16.vlgmr.msra.gmra.mxu0 %v12304_v9  ;;  %v11212_v9 = vld [vmem:[#allocation6 + $0x58c] sm:$0xf]  ;;  %v8278_v29 = vld [vmem:[#allocation6 + $0x598] sm:$0xf0] }
 0x218   :  { %4375 = vmatpush.bf16.msrb.mxu0 %v8201_v13  ;;  %4367 = vmatpush.bf16.msra.mxu3 %v7977_v44  ;;  %v8438_v13 = vld [vmem:[#allocation6 + $0x6d8] sm:$0xf0]  ;;  %v8281_v26 = vor.u32 %v11212_v9, %v8278_v29  ;;  %v11276_v45 = vld [vmem:[#allocation6 + $0x78c] sm:$0xf] }
 0x219   :  { %4389 = vmatpush.bf16.msrb.mxu1 %v8329_v25  ;;  %v8566_v25 = vld [vmem:[#allocation6 + $0x7d8] sm:$0xf0]  ;;  %v8441_v21 = vor.u32 %v11252_v11, %v8438_v13  ;;  %v8537_v11 = vor.u32 %v11276_v45, %v8534_v14  ;;  %v11168_v9 = vld [vmem:[#allocation6 + $0x42c] sm:$0xf] }
 0x21a   :  { %4341 = vmatmul.bf16.vlgmr.msra.gmra.mxu1 %v12306_v15  ;;  %v8569_v15 = vor.u32 %v11284_v34, %v8566_v25  ;;  %v8422_v44 = vld [vmem:[#allocation6 + $0x6b8] sm:$0xf0]  ;;  %v11240_v34 = vld [vmem:[#allocation6 + $0x66c] sm:$0xf] }
 0x21b   :  { %4354 = vmatpush.bf16.msra.mxu2 %v7833_v8  ;;  %v8406_v8 = vld [vmem:[#allocation6 + $0x698] sm:$0xf0]  ;;  %v11272_v25 = vld [vmem:[#allocation6 + $0x76c] sm:$0xf] }
 0x21c   :  { %4376 = vmatpush.bf16.msrb.mxu0 %v8185_v19  ;;  %4368 = vmatpush.bf16.msra.mxu3 %v7961_v4  ;;  %v11176_v19 = vld [vmem:[#allocation6 + $0x46c] sm:$0xf]  ;;  %v8102_v29 = vld [vmem:[#allocation6 + $0x438] sm:$0xf0] }
 0x21d   :  { %4390 = vmatpush.bf16.msrb.mxu1 %v8313_v54  ;;  %v8425_v54 = vor.u32 %v11248_v46, %v8422_v44  ;;  %v8137_v2 = vor.u32 %v11176_v19, %v8134_v53  ;;  %v11172_v4 = vld [vmem:[#allocation6 + $0x44c] sm:$0xf]  ;;  %v8521_v44 = vor.u32 %v11272_v25, %v8518_v55  ;;  %v8105_v52 = vor.u32 %v11168_v9, %v8102_v29  ;;  %v8502_v19 = vld [vmem:[#allocation6 + $0x758] sm:$0xf0]  ;;  %v12491_v53 = vpop.f32.mrf.mxu0  ;;  %v12493_v55 = vpop.f32.mrf.mxu1 }
 0x21e   :  { %4355 = vmatmul.bf16.vlgmr.msra.gmra.mxu2 %v12312_v42  ;;  %v8265_v42 = vor.u32 %v11208_v56, %v8262_v31  ;;  %v11236_v46 = vld [vmem:[#allocation6 + $0x64c] sm:$0xf]  ;;  %v8838_v14 = vld [vmem:[#allocation6 + $0x9f8] sm:$0xf0] }
 0x21f   :  { %4403 = vmatpush.bf16.msrb.mxu2 %v8457_v16  ;;  %4369 = vmatmul.bf16.vlgmr.msra.gmra.mxu3 %v12314_v48  ;;  %v8118_v16 = vld [vmem:[#allocation6 + $0x458] sm:$0xf0]  ;;  %v8409_v48 = vor.u32 %v11244_v59, %v8406_v8  ;;  %v11268_v39 = vld [vmem:[#allocation6 + $0x74c] sm:$0xf] }
 0x220   :  { %4417 = vmatpush.bf16.msrb.mxu3 %v8585_v18  ;;  %4377 = vmatpush.bf16.msrb.mxu0 %v8169_v50  ;;  %v11204_v18 = vld [vmem:[#allocation6 + $0x54c] sm:$0xf]  ;;  %v8246_v50 = vld [vmem:[#allocation6 + $0x558] sm:$0xf0]  ;;  %v8121_v13 = vor.u32 %v11172_v4, %v8118_v16  ;;  %v8505_v4 = vor.u32 %v11268_v39, %v8502_v19 }
 0x221   :  { %4391 = vmatpush.bf16.msrb.mxu1 %v8297_v23  ;;  %v8390_v23 = vld [vmem:[#allocation6 + $0x678] sm:$0xf0]  ;;  %v8249_v51 = vor.u32 %v11204_v18, %v8246_v50  ;;  %v11164_v31 = vld [vmem:[#allocation6 + $0x40c] sm:$0xf] }
 0x222   :  { %v11320_v59 = vld [vmem:[#allocation6 + $0x8ec] sm:$0xf]  ;;  %v8710_v8 = vld [vmem:[#allocation6 + $0x8f8] sm:$0xf0] }
 0x223   :  { %4404 = vmatpush.bf16.msrb.mxu2 %v8441_v21  ;;  %v11200_v21 = vld [vmem:[#allocation6 + $0x52c] sm:$0xf]  ;;  %v8358_v50 = vld [vmem:[#allocation6 + $0x638] sm:$0xf0] }
 0x224   :  { %4418 = vmatpush.bf16.msrb.mxu3 %v8569_v15  ;;  %4378 = vmatpush.bf16.msrb.mxu0 %v8153_v37  ;;  %v8230_v15 = vld [vmem:[#allocation6 + $0x538] sm:$0xf0]  ;;  %v8393_v37 = vor.u32 %v11240_v34, %v8390_v23  ;;  %v11232_v18 = vld [vmem:[#allocation6 + $0x62c] sm:$0xf] }
 0x225   :  { %4392 = vmatpush.bf16.msrb.mxu1 %v8281_v26  ;;  %v8374_v26 = vld [vmem:[#allocation6 + $0x658] sm:$0xf0]  ;;  %v8233_v56 = vor.u32 %v11200_v21, %v8230_v15  ;;  %v11316_v25 = vld [vmem:[#allocation6 + $0x8cc] sm:$0xf]  ;;  %v8361_v9 = vor.u32 %v11232_v18, %v8358_v50 }
 0x226   :  { %v8377_v45 = vor.u32 %v11236_v46, %v8374_v26  ;;  %v8486_v34 = vld [vmem:[#allocation6 + $0x738] sm:$0xf0]  ;;  %v11348_v29 = vld [vmem:[#allocation6 + $0x9cc] sm:$0xf]  ;;  %v12495_v26 = vpop.f32.mrf.mxu0 }
 0x227   :  { %4405 = vmatpush.bf16.msrb.mxu2 %v8425_v54  ;;  %v8086_v54 = vld [vmem:[#allocation6 + $0x418] sm:$0xf0]  ;;  %v11228_v15 = vld [vmem:[#allocation6 + $0x60c] sm:$0xf] }
 0x228   :  { %4419 = vmatpush.bf16.msrb.mxu3 %v8553_v61  ;;  %4379 = vmatpush.bf16.msrb.mxu0 %v8137_v2  ;;  %v11196_v61 = vld [vmem:[#allocation6 + $0x50c] sm:$0xf]  ;;  %v8214_v2 = vld [vmem:[#allocation6 + $0x518] sm:$0xf0]  ;;  %v8089_v16 = vor.u32 %v11164_v31, %v8086_v54 }
 0x229   :  { %4393 = vmatpush.bf16.msrb.mxu1 %v8265_v42  ;;  %v11352_v42 = vld [vmem:[#allocation6 + $0x9ec] sm:$0xf]  ;;  %v8822_v21 = vld [vmem:[#allocation6 + $0x9d8] sm:$0xf0] }
 0x22a   :  { %v8841_v23 = vor.u32 %v11352_v42, %v8838_v14  ;;  %v8342_v46 = vld [vmem:[#allocation6 + $0x618] sm:$0xf0]  ;;  %v11384_v19 = vld [vmem:[#allocation6 + $0xaec] sm:$0xf]  ;;  %v8825_v54 = vor.u32 %v11348_v29, %v8822_v21 }
 0x22b   :  { %4406 = vmatpush.bf16.msrb.mxu2 %v8409_v48  ;;  %v8217_v48 = vor.u32 %v11196_v61, %v8214_v2  ;;  %v11416_v31 = vld [vmem:[#allocation6 + $0xbec] sm:$0xf]  ;;  %v9094_v61 = vld [vmem:[#allocation6 + $0xbf8] sm:$0xf0] }
 0x22c   :  { %4420 = vmatpush.bf16.msrb.mxu3 %v8537_v11  ;;  %4380 = vmatpush.bf16.msrb.mxu0 %v8121_v13  ;;  %v8713_v11 = vor.u32 %v11320_v59, %v8710_v8  ;;  %v11264_v13 = vld [vmem:[#allocation6 + $0x72c] sm:$0xf]  ;;  %v8678_v59 = vld [vmem:[#allocation6 + $0x8b8] sm:$0xf0]  ;;  %v12497_v8 = vpop.f32.mrf.mxu2  ;;  %v9097_v50 = vor.u32 %v11416_v31, %v9094_v61 }
 0x22d   :  { %4394 = vmatpush.bf16.msrb.mxu1 %v8249_v51  ;;  %v8694_v51 = vld [vmem:[#allocation6 + $0x8d8] sm:$0xf0]  ;;  %v11312_v2 = vld [vmem:[#allocation6 + $0x8ac] sm:$0xf] }
 0x22e   :  { %v8697_v39 = vor.u32 %v11316_v25, %v8694_v51  ;;  %v11344_v42 = vld [vmem:[#allocation6 + $0x9ac] sm:$0xf]  ;;  %v8806_v14 = vld [vmem:[#allocation6 + $0x9b8] sm:$0xf0] }
 0x22f   :  { %4407 = vmatpush.bf16.msrb.mxu2 %v8393_v37  ;;  %v8489_v37 = vor.u32 %v11264_v13, %v8486_v34  ;;  %v8950_v13 = vld [vmem:[#allocation6 + $0xad8] sm:$0xf0]  ;;  %v11412_v34 = vld [vmem:[#allocation6 + $0xbcc] sm:$0xf] }
 0x230   :  { %4421 = vmatpush.bf16.msrb.mxu3 %v8521_v44  ;;  %4381 = vmatpush.bf16.msrb.mxu0 %v8105_v52  ;;  %v11260_v44 = vld [vmem:[#allocation6 + $0x70c] sm:$0xf]  ;;  %v8470_v52 = vld [vmem:[#allocation6 + $0x718] sm:$0xf0] }
 0x231   :  { %4395 = vmatpush.bf16.msrb.mxu1 %v8233_v56  ;;  %v8966_v56 = vld [vmem:[#allocation6 + $0xaf8] sm:$0xf0]  ;;  %v11340_v29 = vld [vmem:[#allocation6 + $0x98c] sm:$0xf] }
 0x232   :  { %v8969_v18 = vor.u32 %v11384_v19, %v8966_v56  ;;  %v9078_v25 = vld [vmem:[#allocation6 + $0xbd8] sm:$0xf0]  ;;  %v11304_v56 = vld [vmem:[#allocation6 + $0x86c] sm:$0xf] }
 0x233   :  { %4408 = vmatpush.bf16.msrb.mxu2 %v8377_v45  ;;  %v8345_v45 = vor.u32 %v11228_v15, %v8342_v46  ;;  %v8662_v51 = vld [vmem:[#allocation6 + $0x898] sm:$0xf0]  ;;  %v9081_v15 = vor.u32 %v11412_v34, %v9078_v25  ;;  %v11376_v46 = vld [vmem:[#allocation6 + $0xaac] sm:$0xf] }
 0x234   :  { %4422 = vmatpush.bf16.msrb.mxu3 %v8505_v4  ;;  %4382 = vmatpush.bf16.msrb.mxu0 %v8089_v16  ;;  %v12500_v4 = vpop.f32.mrf.mxu3  ;;  %v8473_v16 = vor.u32 %v11260_v44, %v8470_v52  ;;  %v8790_v21 = vld [vmem:[#allocation6 + $0x998] sm:$0xf0]  ;;  %v11408_v52 = vld [vmem:[#allocation6 + $0xbac] sm:$0xf]  ;;  %v12508_v61 = vpop.f32.mrf.mxu2 }
 0x235   :  { %4396 = vmatpush.bf16.msrb.mxu1 %v8217_v48  ;;  %v8681_v48 = vor.u32 %v11312_v2, %v8678_v59  ;;  %v8934_v44 = vld [vmem:[#allocation6 + $0xab8] sm:$0xf0]  ;;  %12804 = vst [vmem:[#allocation30_spill] sm:$0xff] %v12508_v61  ;;  %v11336_v2 = vld [vmem:[#allocation6 + $0x96c] sm:$0xf] }
 0x236   :  { %v9062_v19 = vld [vmem:[#allocation6 + $0xbb8] sm:$0xf0]  ;;  %v11444_v61 = vld [vmem:[#allocation6 + $0xccc] sm:$0xf] }
 0x237   :  { %4409 = vmatpush.bf16.msrb.mxu2 %v8361_v9  ;;  %4383 = vmatmul.bf16.vlgmr.msrb.gmra.mxu0 %v12320_v28  ;;  %v11308_v28 = vld [vmem:[#allocation6 + $0x88c] sm:$0xf]  ;;  %v12503_v9 = vpop.f32.mrf.mxu1  ;;  %v8646_v31 = vld [vmem:[#allocation6 + $0x878] sm:$0xf0] }
 0x238   :  { %4431 = vmatpush.bf16.msra.mxu0 %v8713_v11  ;;  %4423 = vmatpush.bf16.msrb.mxu3 %v8489_v37  ;;  %v11380_v11 = vld [vmem:[#allocation6 + $0xacc] sm:$0xf]  ;;  %12803 = vst [vmem:[#allocation29_spill] sm:$0xff] %v12503_v9  ;;  %v8665_v37 = vor.u32 %v11308_v28, %v8662_v51  ;;  %v8774_v59 = vld [vmem:[#allocation6 + $0x978] sm:$0xf0] }
 0x239   :  { %4445 = vmatpush.bf16.msra.mxu1 %v8841_v23  ;;  %v8809_v23 = vor.u32 %v11344_v42, %v8806_v14  ;;  %v8937_v42 = vor.u32 %v11376_v46, %v8934_v44  ;;  %v8649_v14 = vor.u32 %v11304_v56, %v8646_v31  ;;  %v8630_v34 = vld [vmem:[#allocation6 + $0x858] sm:$0xf0]  ;;  %v11296_v44 = vld [vmem:[#allocation6 + $0x82c] sm:$0xf] }
 0x23a   :  { %4397 = vmatmul.bf16.vlgmr.msrb.gmra.mxu1 %v12322_v32  ;;  %v8953_v32 = vor.u32 %v11380_v11, %v8950_v13  ;;  %v9046_v11 = vld [vmem:[#allocation6 + $0xb98] sm:$0xf0]  ;;  %v11300_v13 = vld [vmem:[#allocation6 + $0x84c] sm:$0xf] }
 0x23b   :  { %4410 = vmatpush.bf16.msrb.mxu2 %v8345_v45  ;;  %v9030_v46 = vld [vmem:[#allocation6 + $0xb78] sm:$0xf0]  ;;  %v11356_v9 = vld [vmem:[#allocation6 + $0xa0c] sm:$0xf] }
 0x23c   :  { %4432 = vmatpush.bf16.msra.mxu0 %v8697_v39  ;;  %4424 = vmatpush.bf16.msrb.mxu3 %v8473_v16  ;;  %v8793_v39 = vor.u32 %v11340_v29, %v8790_v21  ;;  %v12511_v45 = vpop.f32.mrf.mxu3  ;;  %v11372_v16 = vld [vmem:[#allocation6 + $0xa8c] sm:$0xf]  ;;  %v8633_v29 = vor.u32 %v11300_v13, %v8630_v34  ;;  %v8742_v56 = vld [vmem:[#allocation6 + $0x938] sm:$0xf0] }
 0x23d   :  { %4446 = vmatpush.bf16.msra.mxu1 %v8825_v54  ;;  %v12506_v54 = vpop.f32.mrf.mxu0  ;;  %12805 = vst [vmem:[#allocation31_spill] sm:$0xff] %v12511_v45  ;;  %v11368_v21 = vld [vmem:[#allocation6 + $0xa6c] sm:$0xf]  ;;  %v8598_v13 = vld [vmem:[#allocation6 + $0x818] sm:$0xf0] }
 0x23e   :  { %4411 = vmatmul.bf16.vlgmr.msrb.gmra.mxu2 %v12330_v1  ;;  %v9065_v1 = vor.u32 %v11408_v52, %v9062_v19  ;;  %v8614_v52 = vld [vmem:[#allocation6 + $0x838] sm:$0xf0]  ;;  %v11328_v19 = vld [vmem:[#allocation6 + $0x92c] sm:$0xf] }
 0x23f   :  { %4459 = vmatpush.bf16.msra.mxu2 %v8969_v18  ;;  %4425 = vmatmul.bf16.vlgmr.msrb.gmra.mxu3 %v12332_v6  ;;  %v8918_v18 = vld [vmem:[#allocation6 + $0xa98] sm:$0xf0]  ;;  %v12513_v28 = vpop.f32.mrf.mxu1  ;;  %v11324_v34 = vld [vmem:[#allocation6 + $0x90c] sm:$0xf] }
 0x240   :  { %4473 = vmatpush.bf16.msra.mxu3 %v9097_v50  ;;  %4433 = vmatpush.bf16.msra.mxu0 %v8681_v48  ;;  %v11404_v50 = vld [vmem:[#allocation6 + $0xb8c] sm:$0xf]  ;;  %v8777_v48 = vor.u32 %v11336_v2, %v8774_v59  ;;  %v8758_v6 = vld [vmem:[#allocation6 + $0x958] sm:$0xf0]  ;;  %v8921_v25 = vor.u32 %v11372_v16, %v8918_v18  ;;  %v12517_v59 = vpop.f32.mrf.mxu2 }
 0x241   :  { %4447 = vmatpush.bf16.msra.mxu1 %v8809_v23  ;;  %v11332_v23 = vld [vmem:[#allocation6 + $0x94c] sm:$0xf]  ;;  %v9049_v51 = vor.u32 %v11404_v50, %v9046_v11  ;;  %12806 = vst [vmem:[#allocation32_spill] sm:$0xff] %v12517_v59  ;;  %v9014_v18 = vld [vmem:[#allocation6 + $0xb58] sm:$0xf0] }
 0x242   :  { %v11364_v2 = vld [vmem:[#allocation6 + $0xa4c] sm:$0xf]  ;;  %v8998_v45 = vld [vmem:[#allocation6 + $0xb38] sm:$0xf0] }
 0x243   :  { %4460 = vmatpush.bf16.msra.mxu2 %v8953_v32  ;;  %v8902_v32 = vld [vmem:[#allocation6 + $0xa78] sm:$0xf0]  ;;  %v11396_v16 = vld [vmem:[#allocation6 + $0xb4c] sm:$0xf] }
 0x244   :  { %4474 = vmatpush.bf16.msra.mxu3 %v9081_v15  ;;  %4434 = vmatpush.bf16.msra.mxu0 %v8665_v37  ;;  %v11400_v15 = vld [vmem:[#allocation6 + $0xb6c] sm:$0xf]  ;;  %v8761_v37 = vor.u32 %v11332_v23, %v8758_v6  ;;  %v8905_v31 = vor.u32 %v11368_v21, %v8902_v32  ;;  %v12519_v50 = vpop.f32.mrf.mxu3  ;;  %v8726_v23 = vld [vmem:[#allocation6 + $0x918] sm:$0xf0] }
 0x245   :  { %4448 = vmatpush.bf16.msra.mxu1 %v8793_v39  ;;  %v12515_v39 = vpop.f32.mrf.mxu0  ;;  %12807 = vst [vmem:[#allocation33_spill] sm:$0xff] %v12519_v50  ;;  %v11292_v11 = vld [vmem:[#allocation6 + $0x80c] sm:$0xf]  ;;  %v9206_v59 = vld [vmem:[#allocation6 + $0xcd8] sm:$0xf0] }
 0x246   :  { %v11448_v6 = vld [vmem:[#allocation6 + $0xcec] sm:$0xf] }
 0x247   :  { %4461 = vmatpush.bf16.msra.mxu2 %v8937_v42  ;;  %v9033_v42 = vor.u32 %v11400_v15, %v9030_v46  ;;  %v11480_v32 = vld [vmem:[#allocation6 + $0xdec] sm:$0xf]  ;;  %v9017_v15 = vor.u32 %v11396_v16, %v9014_v18  ;;  %v8601_v46 = vor.u32 %v11292_v11, %v8598_v13  ;;  %v8854_v11 = vld [vmem:[#allocation6 + $0xa18] sm:$0xf0] }
 0x248   :  { %4475 = vmatpush.bf16.msra.mxu3 %v9065_v1  ;;  %4435 = vmatpush.bf16.msra.mxu0 %v8649_v14  ;;  %v8617_v1 = vor.u32 %v11296_v44, %v8614_v52  ;;  %v8886_v14 = vld [vmem:[#allocation6 + $0xa58] sm:$0xf0]  ;;  %v11360_v44 = vld [vmem:[#allocation6 + $0xa2c] sm:$0xf]  ;;  %v12528_v18 = vpop.f32.mrf.mxu2 }
 0x249   :  { %4449 = vmatpush.bf16.msra.mxu1 %v8777_v48  ;;  %v8745_v48 = vor.u32 %v11328_v19, %v8742_v56  ;;  %v8889_v21 = vor.u32 %v11364_v2, %v8886_v14  ;;  %v8870_v52 = vld [vmem:[#allocation6 + $0xa38] sm:$0xf0]  ;;  %v11392_v56 = vld [vmem:[#allocation6 + $0xb2c] sm:$0xf] }
 0x24a   :  { %v11476_v2 = vld [vmem:[#allocation6 + $0xdcc] sm:$0xf]  ;;  %v9334_v14 = vld [vmem:[#allocation6 + $0xdd8] sm:$0xf0] }
 0x24b   :  { %4462 = vmatpush.bf16.msra.mxu2 %v8921_v25  ;;  %v9222_v25 = vld [vmem:[#allocation6 + $0xcf8] sm:$0xf0]  ;;  %v11388_v13 = vld [vmem:[#allocation6 + $0xb0c] sm:$0xf] }
 0x24c   :  { %4476 = vmatpush.bf16.msra.mxu3 %v9049_v51  ;;  %4436 = vmatpush.bf16.msra.mxu0 %v8633_v29  ;;  %v9350_v51 = vld [vmem:[#allocation6 + $0xdf8] sm:$0xf0]  ;;  %v12521_v29 = vpop.f32.mrf.mxu1  ;;  %v9225_v19 = vor.u32 %v11448_v6, %v9222_v25  ;;  %v9209_v6 = vor.u32 %v11444_v61, %v9206_v59  ;;  %v11512_v25 = vld [vmem:[#allocation6 + $0xeec] sm:$0xf] }
 0x24d   :  { %4450 = vmatpush.bf16.msra.mxu1 %v8761_v37  ;;  %v8729_v37 = vor.u32 %v11324_v34, %v8726_v23  ;;  %v9353_v50 = vor.u32 %v11480_v32, %v9350_v51  ;;  %v12526_v16 = vpop.f32.mrf.mxu0  ;;  %v8982_v34 = vld [vmem:[#allocation6 + $0xb18] sm:$0xf0]  ;;  %v12530_v23 = vpop.f32.mrf.mxu3  ;;  %v11544_v32 = vld [vmem:[#allocation6 + $0xfec] sm:$0xf] }
 0x24e   :  { %v9606_v51 = vld [vmem:[#allocation6 + $0xff8] sm:$0xf0]  ;;  %v8985_v61 = vor.u32 %v11388_v13, %v8982_v34 }
 0x24f   :  { %4463 = vmatpush.bf16.msra.mxu2 %v8905_v31  ;;  %v8873_v31 = vor.u32 %v11360_v44, %v8870_v52  ;;  %v11440_v44 = vld [vmem:[#allocation6 + $0xcac] sm:$0xf]  ;;  %v9190_v52 = vld [vmem:[#allocation6 + $0xcb8] sm:$0xf0] }
 0x250   :  { %4477 = vmatpush.bf16.msra.mxu3 %v9033_v42  ;;  %4437 = vmatpush.bf16.msra.mxu0 %v8617_v1  ;;  %v12808_v42 = vperm.slane %v12390_v49, 0  ;;  %v9302_v13 = vld [vmem:[#allocation6 + $0xd98] sm:$0xf0] }
 0x251   :  { %4451 = vmatpush.bf16.msra.mxu1 %v8745_v48  ;;  %v9001_v48 = vor.u32 %v11392_v56, %v8998_v45  ;;  %v8857_v45 = vor.u32 %v11356_v9, %v8854_v11  ;;  %v11468_v11 = vld [vmem:[#allocation6 + $0xd8c] sm:$0xf] }
 0x252   :  { %v3659_v1 = vadd.f32 %v12399_v47, %v12808_v42  ;;  %v9337_v47 = vor.u32 %v11476_v2, %v9334_v14  ;;  %v9462_v2 = vld [vmem:[#allocation6 + $0xed8] sm:$0xf0]  ;;  %v11540_v14 = vld [vmem:[#allocation6 + $0xfcc] sm:$0xf] }
 0x253   :  { %4464 = vmatpush.bf16.msra.mxu2 %v8889_v21  ;;  %v9478_v21 = vld [vmem:[#allocation6 + $0xef8] sm:$0xf0] }
 0x254   :  { %4478 = vmatpush.bf16.msra.mxu3 %v9017_v15  ;;  %4438 = vmatpush.bf16.msra.mxu0 %v8601_v46  ;;  %v11472_v15 = vld [vmem:[#allocation6 + $0xdac] sm:$0xf]  ;;  %v9318_v46 = vld [vmem:[#allocation6 + $0xdb8] sm:$0xf0]  ;;  %v3673_v56 = vadd.f32 %v12401_v62, %v3659_v1  ;;  %v9481_v59 = vor.u32 %v11512_v25, %v9478_v21  ;;  %v12539_v42 = vpop.f32.mrf.mxu1 }
 0x255   :  { %4452 = vmatpush.bf16.msra.mxu1 %v8729_v37  ;;  %v9609_v37 = vor.u32 %v11544_v32, %v9606_v51  ;;  %v9321_v62 = vor.u32 %v11472_v15, %v9318_v46  ;;  %v9590_v1 = vld [vmem:[#allocation6 + $0xfd8] sm:$0xf0]  ;;  %v12541_v34 = vpop.f32.mrf.mxu0  ;;  %v11536_v21 = vld [vmem:[#allocation6 + $0xfac] sm:$0xf]  ;;  %v12545_v51 = vpop.f32.mrf.mxu2 }
 0x256   :  { %v9446_v25 = vld [vmem:[#allocation6 + $0xeb8] sm:$0xf0]  ;;  %v12548_v46 = vpop.f32.mrf.mxu3 }
 0x257   :  { %4465 = vmatpush.bf16.msra.mxu2 %v8873_v31  ;;  %4439 = vmatmul.bf16.vlgmr.msra.gmra.mxu0 %v12340_v58  ;;  %v3687_v31 = vadd.f32 %v12403_v0, %v3673_v56  ;;  %v12809_v58 = vperm.slane %v12390_v49, 1  ;;  %v9593_v49 = vor.u32 %v11540_v14, %v9590_v1  ;;  %v9158_v15 = vld [vmem:[#allocation6 + $0xc78] sm:$0xf0]  ;;  %v11464_v56 = vld [vmem:[#allocation6 + $0xd6c] sm:$0xf] }
 0x258   :  { %4487 = vmatpush.bf16.msrb.mxu0 %v9225_v19  ;;  %4479 = vmatpush.bf16.msra.mxu3 %v9001_v48  ;;  %v11508_v19 = vld [vmem:[#allocation6 + $0xecc] sm:$0xf]  ;;  %v9174_v48 = vld [vmem:[#allocation6 + $0xc98] sm:$0xf0] }
 0x259   :  { %4501 = vmatpush.bf16.msrb.mxu1 %v9353_v50  ;;  %v9193_v50 = vor.u32 %v11440_v44, %v9190_v52  ;;  %v3883_v9 = vadd.f32 %v12454_v17, %v12809_v58  ;;  %v11504_v17 = vld [vmem:[#allocation6 + $0xeac] sm:$0xf]  ;;  %v3701_v32 = vadd.f32 %v12405_v10, %v3687_v31  ;;  %v9305_v44 = vor.u32 %v11468_v11, %v9302_v13  ;;  %v9574_v52 = vld [vmem:[#allocation6 + $0xfb8] sm:$0xf0]  ;;  %v11969_v10 = vld [vmem:[#allocation7] sm:$0xf] }
 0x25a   :  { %4453 = vmatmul.bf16.vlgmr.msra.gmra.mxu1 %v12344_v5  ;;  %v11436_v5 = vld [vmem:[#allocation6 + $0xc8c] sm:$0xf] }
 0x25b   :  { %4466 = vmatpush.bf16.msra.mxu2 %v8857_v45  ;;  %v9177_v0 = vor.u32 %v11436_v5, %v9174_v48  ;;  %v11432_v45 = vld [vmem:[#allocation6 + $0xc6c] sm:$0xf]  ;;  %v3715_v31 = vadd.f32 %v12409_v24, %v3701_v32  ;;  %v9270_v5 = vld [vmem:[#allocation6 + $0xd58] sm:$0xf0] }
 0x25c   :  { %4488 = vmatpush.bf16.msrb.mxu0 %v9209_v6  ;;  %4480 = vmatpush.bf16.msra.mxu3 %v8985_v61  ;;  %v9465_v6 = vor.u32 %v11508_v19, %v9462_v2  ;;  %v9286_v61 = vld [vmem:[#allocation6 + $0xd78] sm:$0xf0]  ;;  %v11500_v19 = vld [vmem:[#allocation6 + $0xe8c] sm:$0xf]  ;;  %v12553_v58 = vpop.f32.mrf.mxu1 }
 0x25d   :  { %4502 = vmatpush.bf16.msrb.mxu1 %v9337_v47  ;;  %v3897_v47 = vadd.f32 %v12457_v60, %v3883_v9  ;;  %v9449_v60 = vor.u32 %v11504_v17, %v9446_v25  ;;  %v9430_v2 = vld [vmem:[#allocation6 + $0xe98] sm:$0xf0]  ;;  %v11532_v14 = vld [vmem:[#allocation6 + $0xf8c] sm:$0xf]  ;;  %v3729_v25 = vadd.f32 %v12411_v7, %v3715_v31  ;;  %v12559_v32 = vpop.f32.mrf.mxu0 }
 0x25e   :  { %4467 = vmatmul.bf16.vlgmr.msra.gmra.mxu2 %v12354_v38  ;;  %v9577_v38 = vor.u32 %v11536_v21, %v9574_v52  ;;  %v9558_v9 = vld [vmem:[#allocation6 + $0xf98] sm:$0xf0]  ;;  %v11460_v1 = vld [vmem:[#allocation6 + $0xd4c] sm:$0xf]  ;;  %v9433_v13 = vor.u32 %v11500_v19, %v9430_v2 }
 0x25f   :  { %4515 = vmatpush.bf16.msrb.mxu2 %v9481_v59  ;;  %4481 = vmatmul.bf16.vlgmr.msra.gmra.mxu3 %v12358_v40  ;;  %v3911_v59 = vadd.f32 %v12462_v36, %v3897_v47  ;;  %v9289_v40 = vor.u32 %v11464_v56, %v9286_v61  ;;  %v9142_v36 = vld [vmem:[#allocation6 + $0xc58] sm:$0xf0]  ;;  %v11496_v24 = vld [vmem:[#allocation6 + $0xe6c] sm:$0xf]  ;;  %v12561_v47 = vpop.f32.mrf.mxu2  ;;  %v3743_v61 = vadd.f32 %v12415_v27, %v3729_v25 }
 0x260   :  { %4529 = vmatpush.bf16.msrb.mxu3 %v9609_v37  ;;  %4489 = vmatpush.bf16.msrb.mxu0 %v9193_v50  ;;  %v1081_v37 = vperm.slane %v11969_v10, 2  ;;  %v9161_v50 = vor.u32 %v11432_v45, %v9158_v15  ;;  %v11528_v17 = vld [vmem:[#allocation6 + $0xf6c] sm:$0xf]  ;;  %v9126_v52 = vld [vmem:[#allocation6 + $0xc38] sm:$0xf0]  ;;  %v12563_v45 = vpop.f32.mrf.mxu3 }
 0x261   :  { %4503 = vmatpush.bf16.msrb.mxu1 %v9321_v62  ;;  %v11428_v62 = vld [vmem:[#allocation6 + $0xc4c] sm:$0xf]  ;;  %v3925_v48 = vadd.f32 %v12464_v41, %v3911_v59  ;;  %v9273_v41 = vor.u32 %v11460_v1, %v9270_v5  ;;  %v9254_v56 = vld [vmem:[#allocation6 + $0xd38] sm:$0xf0]  ;;  %v11577_v1 = vld [vmem:[#allocation9 + $0xec] sm:$0xf0] }
 0x262   :  { %v4105_v11 = vadd.f32 %v12515_v39, %v1081_v37  ;;  %v9542_v39 = vld [vmem:[#allocation6 + $0xf78] sm:$0xf0]  ;;  %v11456_v15 = vld [vmem:[#allocation6 + $0xd2c] sm:$0xf]  ;;  %v4107_v10 = vadd.f32 %v12526_v16, %v1081_v37  ;;  %v3757_v16 = vadd.f32 %v12417_v35, %v3743_v61 }
 0x263   :  { %4516 = vmatpush.bf16.msrb.mxu2 %v9465_v6  ;;  %v9561_v6 = vor.u32 %v11532_v14, %v9558_v9  ;;  %v3939_v21 = vadd.f32 %v12469_v3, %v3925_v48  ;;  %v11492_v3 = vld [vmem:[#allocation6 + $0xe4c] sm:$0xf]  ;;  %v9526_v2 = vld [vmem:[#allocation6 + $0xf58] sm:$0xf0]  ;;  %v9257_v27 = vor.u32 %v11456_v15, %v9254_v56  ;;  %v12810_v15 = vld [vmem:[#allocation28_spill] sm:$0xff] }
 0x264   :  { %4530 = vmatpush.bf16.msrb.mxu3 %v9593_v49  ;;  %4490 = vmatpush.bf16.msrb.mxu0 %v9177_v0  ;;  %v9145_v49 = vor.u32 %v11428_v62, %v9142_v36  ;;  %v9414_v0 = vld [vmem:[#allocation6 + $0xe78] sm:$0xf0]  ;;  %v4119_v59 = vadd.f32 %v12521_v29, %v4105_v11  ;;  %v11524_v19 = vld [vmem:[#allocation6 + $0xf4c] sm:$0xf]  ;;  %v9724_v36 = vld [vmem:[#allocation9 + $0xe0] sm:$0xf]  ;;  %v12572_v5 = vpop.f32.mrf.mxu1 }
 0x265   :  { %4504 = vmatpush.bf16.msrb.mxu1 %v9305_v44  ;;  %v11424_v44 = vld [vmem:[#allocation6 + $0xc2c] sm:$0xf]  ;;  %v9417_v7 = vor.u32 %v11496_v24, %v9414_v0  ;;  %v3953_v14 = vadd.f32 %v12472_v43, %v3939_v21  ;;  %v9110_v29 = vld [vmem:[#allocation6 + $0xc18] sm:$0xf0]  ;;  %v9852_v11 = vld [vmem:[#allocation9 + $0x1e0] sm:$0xf] }
 0x266   :  { %v4133_v31 = vadd.f32 %v12528_v18, %v4119_v59  ;;  %v11452_v9 = vld [vmem:[#allocation6 + $0xd0c] sm:$0xf]  ;;  %v9238_v62 = vld [vmem:[#allocation6 + $0xd18] sm:$0xf0]  ;;  %v11609_v43 = vld [vmem:[#allocation9 + $0x1ec] sm:$0xf0]  ;;  %v4121_v18 = vadd.f32 %v12539_v42, %v4107_v10 }
 0x267   :  { %4517 = vmatpush.bf16.msrb.mxu2 %v9449_v60  ;;  %v9545_v60 = vor.u32 %v11528_v17, %v9542_v39  ;;  %v3967_v37 = vadd.f32 %v12477_v12, %v3953_v14  ;;  %v9382_v24 = vld [vmem:[#allocation6 + $0xe38] sm:$0xf0]  ;;  %v12576_v17 = vpop.f32.mrf.mxu0  ;;  %v9241_v35 = vor.u32 %v11452_v9, %v9238_v62  ;;  %v9725_v12 = vor.u32 %v11577_v1, %v9724_v36  ;;  %v11520_v25 = vld [vmem:[#allocation6 + $0xf2c] sm:$0xf]  ;;  %v11573_v42 = vld [vmem:[#allocation9 + $0xcc] sm:$0xf0]  ;;  %v12582_v59 = vpop.f32.mrf.mxu2 }
 0x268   :  { %4531 = vmatpush.bf16.msrb.mxu3 %v9577_v38  ;;  %4491 = vmatpush.bf16.msrb.mxu0 %v9161_v50  ;;  %v9129_v38 = vor.u32 %v11424_v44, %v9126_v52  ;;  %v9398_v50 = vld [vmem:[#allocation6 + $0xe58] sm:$0xf0]  ;;  %v4147_v0 = vadd.f32 %v12530_v23, %v4133_v31  ;;  %v9853_v39 = vor.u32 %v11609_v43, %v9852_v11  ;;  %v9708_v44 = vld [vmem:[#allocation9 + $0xc0] sm:$0xf]  ;;  %v12584_v10 = vpop.f32.mrf.mxu3  ;;  %v11641_v14 = vld [vmem:[#allocation9 + $0x2ec] sm:$0xf0] }
 0x269   :  { %4505 = vmatpush.bf16.msrb.mxu1 %v9289_v40  ;;  %v11420_v40 = vld [vmem:[#allocation6 + $0xc0c] sm:$0xf]  ;;  %v9401_v48 = vor.u32 %v11492_v3, %v9398_v50  ;;  %v9510_v21 = vld [vmem:[#allocation6 + $0xf38] sm:$0xf0]  ;;  %v3771_v52 = vadd.f32 %v12422_v33, %v3757_v16  ;;  %v3981_v56 = vadd.f32 %v12810_v15, %v3967_v37  ;;  %v11605_v3 = vld [vmem:[#allocation9 + $0x1cc] sm:$0xf0] }
 0x26a   :  { %v4161_v61 = vadd.f32 %v12541_v34, %v4147_v0  ;;  %v11516_v50 = vld [vmem:[#allocation6 + $0xf0c] sm:$0xf]  ;;  %v9494_v34 = vld [vmem:[#allocation6 + $0xf18] sm:$0xf0]  ;;  %v12811_v9 = vld [vmem:[#allocation20_spill] sm:$0xff] }
 0x26b   :  { %4518 = vmatpush.bf16.msrb.mxu2 %v9433_v13  ;;  %v9529_v13 = vor.u32 %v11524_v19, %v9526_v2  ;;  %v3995_v33 = vadd.f32 %v12491_v53, %v3981_v56  ;;  %v9709_v19 = vor.u32 %v11573_v42, %v9708_v44  ;;  %v9980_v2 = vld [vmem:[#allocation9 + $0x2e0] sm:$0xf]  ;;  %v3785_v62 = vadd.f32 %v12811_v9, %v3771_v52  ;;  %v11601_v37 = vld [vmem:[#allocation9 + $0x1ac] sm:$0xf0]  ;;  %v12812_v43 = vld [vmem:[#allocation21_spill] sm:$0xff] }
 0x26c   :  { %4532 = vmatpush.bf16.msrb.mxu3 %v9561_v6  ;;  %4492 = vmatpush.bf16.msrb.mxu0 %v9145_v49  ;;  %v9113_v6 = vor.u32 %v11420_v40, %v9110_v29  ;;  %v11488_v49 = vld [vmem:[#allocation6 + $0xe2c] sm:$0xf]  ;;  %v9692_v40 = vld [vmem:[#allocation9 + $0xa0] sm:$0xf]  ;;  %v11569_v29 = vld [vmem:[#allocation9 + $0xac] sm:$0xf0]  ;;  %v4175_v36 = vadd.f32 %v12553_v58, %v4161_v61  ;;  %v12590_v1 = vpop.f32.mrf.mxu1  ;;  %v9981_v11 = vor.u32 %v11641_v14, %v9980_v2 }
 0x26d   :  { %4506 = vmatpush.bf16.msrb.mxu1 %v9273_v41  ;;  %v4135_v41 = vadd.f32 %v12545_v51, %v4121_v18  ;;  %v9385_v23 = vor.u32 %v11488_v49, %v9382_v24  ;;  %v9513_v51 = vor.u32 %v11520_v25, %v9510_v21  ;;  %v9820_v16 = vld [vmem:[#allocation9 + $0x1a0] sm:$0xf]  ;;  %v3799_v18 = vadd.f32 %v12812_v43, %v3785_v62  ;;  %v11637_v49 = vld [vmem:[#allocation9 + $0x2cc] sm:$0xf0] }
 0x26e   :  { %v9693_v58 = vor.u32 %v11569_v29, %v9692_v40  ;;  %v9821_v24 = vor.u32 %v11601_v37, %v9820_v16  ;;  %v9676_v0 = vld [vmem:[#allocation9 + $0x80] sm:$0xf]  ;;  %v11597_v21 = vld [vmem:[#allocation9 + $0x18c] sm:$0xf0]  ;;  %v12815_v29 = vld [vmem:[#allocation25_spill] sm:$0xff] }
 0x26f   :  { %4519 = vmatpush.bf16.msrb.mxu2 %v9417_v7  ;;  %v9836_v7 = vld [vmem:[#allocation9 + $0x1c0] sm:$0xf]  ;;  %v4149_v31 = vadd.f32 %v12548_v46, %v4135_v41  ;;  %v9497_v46 = vor.u32 %v11516_v50, %v9494_v34  ;;  %v11633_v15 = vld [vmem:[#allocation9 + $0x2ac] sm:$0xf0] }
 0x270   :  { %4533 = vmatpush.bf16.msrb.mxu3 %v9545_v60  ;;  %4493 = vmatpush.bf16.msrb.mxu0 %v9129_v38  ;;  %v11484_v60 = vld [vmem:[#allocation6 + $0xe0c] sm:$0xf]  ;;  %v9366_v38 = vld [vmem:[#allocation6 + $0xe18] sm:$0xf0]  ;;  %v9804_v25 = vld [vmem:[#allocation9 + $0x180] sm:$0xf] }
 0x271   :  { %4507 = vmatpush.bf16.msrb.mxu1 %v9257_v27  ;;  %v9837_v27 = vor.u32 %v11605_v3, %v9836_v7  ;;  %v9369_v53 = vor.u32 %v11484_v60, %v9366_v38  ;;  %v12813_v44 = vld [vmem:[#allocation22_spill] sm:$0xff]  ;;  %v9805_v61 = vor.u32 %v11597_v21, %v9804_v25  ;;  %v12814_v60 = vld [vmem:[#allocation24_spill] sm:$0xff] }
 0x272   :  { %v9948_v52 = vld [vmem:[#allocation9 + $0x2a0] sm:$0xf]  ;;  %v11629_v34 = vld [vmem:[#allocation9 + $0x28c] sm:$0xf0] }
 0x273   :  { %4520 = vmatpush.bf16.msrb.mxu2 %v9401_v48  ;;  %v4163_v48 = vadd.f32 %v12559_v32, %v4149_v31  ;;  %v9788_v3 = vld [vmem:[#allocation9 + $0x160] sm:$0xf]  ;;  %v11557_v14 = vld [vmem:[#allocation9 + $0x4c] sm:$0xf0]  ;;  %v4049_v31 = vadd.f32 %v12495_v26, %v12481_v20 }
 0x274   :  { %4534 = vmatpush.bf16.msrb.mxu3 %v9529_v13  ;;  %4494 = vmatpush.bf16.msrb.mxu0 %v9113_v6  ;;  %v4009_v13 = vadd.f32 %v12493_v55, %v3995_v33  ;;  %v9964_v6 = vld [vmem:[#allocation9 + $0x2c0] sm:$0xf]  ;;  %v12600_v55 = vpop.f32.mrf.mxu3  ;;  %v4232_v33 = vpop.f32.mrf.mxu1  ;;  %v11589_v40 = vld [vmem:[#allocation9 + $0x14c] sm:$0xf0] }
 0x275   :  { %4508 = vmatpush.bf16.msrb.mxu1 %v9241_v35  ;;  %v11565_v35 = vld [vmem:[#allocation9 + $0x8c] sm:$0xf0]  ;;  %v4177_v41 = vadd.f32 %v12572_v5, %v4163_v48  ;;  %v9660_v5 = vld [vmem:[#allocation9 + $0x60] sm:$0xf] }
 0x276   :  { %v4023_v32 = vadd.f32 %v12497_v8, %v4009_v13  ;;  %v9677_v42 = vor.u32 %v11565_v35, %v9676_v0  ;;  %v9916_v37 = vld [vmem:[#allocation9 + $0x260] sm:$0xf]  ;;  %v11625_v48 = vld [vmem:[#allocation9 + $0x26c] sm:$0xf0] }
 0x277   :  { %4521 = vmatpush.bf16.msrb.mxu2 %v9385_v23  ;;  %4495 = vmatmul.bf16.vlgmr.msrb.gmra.mxu0 %v12373_v22  ;;  %v4189_v22 = vadd.f32 %v12561_v47, %v4175_v36  ;;  %v3813_v47 = vadd.f32 %v12813_v44, %v3799_v18  ;;  %v4191_v56 = vadd.f32 %v12582_v59, %v4177_v41  ;;  %v11561_v23 = vld [vmem:[#allocation9 + $0x6c] sm:$0xf0]  ;;  %v9628_v18 = vld [vmem:[#allocation9 + $0x20] sm:$0xf]  ;;  %v12820_v41 = vld [vmem:[#allocation27_spill] sm:$0xff] }
 0x278   :  { %5333 = vmatpush.bf16.msra.mxu0 %v9725_v12  ;;  %4535 = vmatpush.bf16.msrb.mxu3 %v9513_v51  ;;  %v4218_v12 = vpop.f32.mrf.mxu0  ;;  %v4037_v7 = vadd.f32 %v12500_v4, %v4023_v32  ;;  %v11593_v51 = vld [vmem:[#allocation9 + $0x16c] sm:$0xf0]  ;;  %v9917_v0 = vor.u32 %v11625_v48, %v9916_v37  ;;  %v12819_v35 = vld [vmem:[#allocation30_spill] sm:$0xff] }
 0x279   :  { %5347 = vmatpush.bf16.msra.mxu1 %v9853_v39  ;;  %v9965_v39 = vor.u32 %v11637_v49, %v9964_v6  ;;  %v4203_v8 = vadd.f32 %v12563_v45, %v4189_v22  ;;  %v3827_v38 = vadd.f32 %v12814_v60, %v3813_v47  ;;  %v9949_v45 = vor.u32 %v11633_v15, %v9948_v52  ;;  %v11553_v13 = vld [vmem:[#allocation9 + $0x2c] sm:$0xf0]  ;;  %v9756_v22 = vld [vmem:[#allocation9 + $0x120] sm:$0xf]  ;;  %v11607_v60 = vld [vmem:[#allocation9 + $0x1e4] sm:$0xf] }
 0x27a   :  { %4509 = vmatmul.bf16.vlgmr.msrb.gmra.mxu1 %v12376_v30  ;;  %v4244_v30 = vpop.f32.mrf.mxu2  ;;  %v4051_v59 = vadd.f32 %v12506_v54, %v4037_v7  ;;  %v4205_v2 = vadd.f32 %v12584_v10, %v4191_v56  ;;  %v9789_v4 = vor.u32 %v11593_v51, %v9788_v3  ;;  %v12818_v6 = vld [vmem:[#allocation32_spill] sm:$0xff]  ;;  %v9629_v25 = vor.u32 %v11553_v13, %v9628_v18  ;;  %v9612_v52 = vld [vmem:[#allocation9] sm:$0xf]  ;;  %v12821_v56 = vld [vmem:[#allocation33_spill] sm:$0xff] }
 0x27b   :  { %4522 = vmatpush.bf16.msrb.mxu2 %v9369_v53  ;;  %v4217_v50 = vadd.f32 %v12576_v17, %v4203_v8  ;;  %v9772_v17 = vld [vmem:[#allocation9 + $0x140] sm:$0xf]  ;;  %v3841_v9 = vadd.f32 %v12815_v29, %v3827_v38  ;;  %v11621_v21 = vld [vmem:[#allocation9 + $0x24c] sm:$0xf0]  ;;  %v9726_v7 = vld [vmem:[#allocation9 + $0xf0] sm:$0xf0] }
 0x27c   :  { %5334 = vmatpush.bf16.msra.mxu0 %v9709_v19  ;;  %4536 = vmatpush.bf16.msrb.mxu3 %v9497_v46  ;;  %v9932_v19 = vld [vmem:[#allocation9 + $0x280] sm:$0xf]  ;;  %v4219_v62 = vadd.f32 %v4218_v12, %v4205_v2  ;;  %v4065_v53 = vadd.f32 %v12513_v28, %v4051_v59  ;;  %v4260_v26 = vpop.f32.mrf.mxu3  ;;  %v9773_v43 = vor.u32 %v11589_v40, %v9772_v17  ;;  %v4286_v12 = vpop.f32.mrf.mxu1  ;;  %v11549_v15 = vld [vmem:[#allocation9 + $0xc] sm:$0xf0]  ;;  %v9854_v38 = vld [vmem:[#allocation9 + $0x1f0] sm:$0xf0] }
 0x27d   :  { %5348 = vmatpush.bf16.msra.mxu1 %v9837_v27  ;;  %v4231_v54 = vadd.f32 %v12590_v1, %v4217_v50  ;;  %v9933_v36 = vor.u32 %v11629_v34, %v9932_v19  ;;  %v12816_v46 = vld [vmem:[#allocation26_spill] sm:$0xff]  ;;  %v12822_v50 = vld [vmem:[#allocation31_spill] sm:$0xff]  ;;  %v11617_v19 = vld [vmem:[#allocation9 + $0x22c] sm:$0xf0] }
 0x27e   :  { %4523 = vmatmul.bf16.vlgmr.msrb.gmra.mxu2 %v12380_v57  ;;  %v9661_v57 = vor.u32 %v11561_v23, %v9660_v5  ;;  %v4079_v49 = vadd.f32 %v12818_v6, %v4065_v53  ;;  %v4233_v28 = vadd.f32 %v4232_v33, %v4219_v62  ;;  %v9740_v8 = vld [vmem:[#allocation9 + $0x100] sm:$0xf]  ;;  %v11581_v5 = vld [vmem:[#allocation9 + $0x10c] sm:$0xf0]  ;;  %v11575_v23 = vld [vmem:[#allocation9 + $0xe4] sm:$0xf]  ;;  %v9613_v33 = vor.u32 %v11549_v15, %v9612_v52 }
 0x27f   :  { %5361 = vmatpush.bf16.msra.mxu2 %v9981_v11  ;;  %4537 = vmatmul.bf16.vlgmr.msrb.gmra.mxu3 %v12382_v63  ;;  %v9644_v63 = vld [vmem:[#allocation9 + $0x40] sm:$0xf]  ;;  %v3855_v11 = vadd.f32 %v12816_v46, %v3841_v9  ;;  %v4245_v20 = vadd.f32 %v4244_v30, %v4231_v54  ;;  %v11571_v17 = vld [vmem:[#allocation9 + $0xc4] sm:$0xf]  ;;  %v9710_v40 = vld [vmem:[#allocation9 + $0xd0] sm:$0xf0] }
 0x280   :  { %5335 = vmatpush.bf16.msra.mxu0 %v9693_v58  ;;  %v4272_v27 = vpop.f32.mrf.mxu0  ;;  %v9645_v16 = vor.u32 %v11557_v14, %v9644_v63  ;;  %v12817_v58 = vld [vmem:[#allocation29_spill] sm:$0xff]  ;;  %v9900_v30 = vld [vmem:[#allocation9 + $0x240] sm:$0xf]  ;;  %v9741_v63 = vor.u32 %v11581_v5, %v9740_v8  ;;  %v9729_v14 = vor.u32 %v11575_v23, %v9726_v7  ;;  %v12823_v29 = vld [vmem:[#allocation23_spill] sm:$0xff] }
 0x281   :  { %5349 = vmatpush.bf16.msra.mxu1 %v9821_v24  ;;  %v4063_v1 = vadd.f32 %v12817_v58, %v4049_v31  ;;  %v11585_v24 = vld [vmem:[#allocation9 + $0x12c] sm:$0xf0]  ;;  %v4259_v44 = vadd.f32 %v12600_v55, %v4245_v20  ;;  %v9901_v51 = vor.u32 %v11621_v21, %v9900_v30  ;;  %v4543_v9 = vmax.f32 %v12823_v29, 0.0  ;;  %v11603_v53 = vld [vmem:[#allocation9 + $0x1c4] sm:$0xf] }
 0x282   :  { %v4246_v10 = vpop.f32.mrf.mxu2  ;;  %v9868_v37 = vld [vmem:[#allocation9 + $0x200] sm:$0xf]  ;;  %v11613_v48 = vld [vmem:[#allocation9 + $0x20c] sm:$0xf0]  ;;  %v9713_v20 = vor.u32 %v11571_v17, %v9710_v40  ;;  %v9694_v6 = vld [vmem:[#allocation9 + $0xb0] sm:$0xf0] }
 0x283   :  { %5362 = vmatpush.bf16.msra.mxu2 %v9965_v39  ;;  %v4077_v32 = vadd.f32 %v12819_v35, %v4063_v1  ;;  %v3869_v39 = vadd.f32 %v12820_v41, %v3855_v11  ;;  %v4247_v47 = vadd.f32 %v4246_v10, %v4233_v28  ;;  %v4273_v3 = vadd.f32 %v4272_v27, %v4259_v44  ;;  %v9838_v10 = vld [vmem:[#allocation9 + $0x1d0] sm:$0xf0]  ;;  %v11567_v1 = vld [vmem:[#allocation9 + $0xa4] sm:$0xf] }
 0x284   :  { %5336 = vmatpush.bf16.msra.mxu0 %v9677_v42  ;;  %v9757_v42 = vor.u32 %v11585_v24, %v9756_v22  ;;  %v9857_v27 = vor.u32 %v11607_v60, %v9854_v38  ;;  %v4288_v13 = vpop.f32.mrf.mxu1  ;;  %v9841_v58 = vor.u32 %v11603_v53, %v9838_v10  ;;  %v9869_v22 = vor.u32 %v11613_v48, %v9868_v37  ;;  %v11599_v24 = vld [vmem:[#allocation9 + $0x1a4] sm:$0xf]  ;;  %v9822_v28 = vld [vmem:[#allocation9 + $0x1b0] sm:$0xf0] }
 0x285   :  { %5350 = vmatpush.bf16.msra.mxu1 %v9805_v61  ;;  %v4093_v61 = vadd.f32 %v12821_v56, %v4079_v49  ;;  %v4547_v34 = vmax.f32 %v3869_v39, 0.0  ;;  %v4261_v2 = vadd.f32 %v4260_v26, %v4247_v47  ;;  %v4287_v54 = vadd.f32 %v4286_v12, %v4273_v3  ;;  %v11639_v26 = vld [vmem:[#allocation9 + $0x2e4] sm:$0xf]  ;;  %v9966_v21 = vld [vmem:[#allocation9 + $0x2d0] sm:$0xf0] }
 0x286   :  { %v11635_v30 = vld [vmem:[#allocation9 + $0x2c4] sm:$0xf]  ;;  %v9825_v39 = vor.u32 %v11599_v24, %v9822_v28  ;;  %v9678_v47 = vld [vmem:[#allocation9 + $0x90] sm:$0xf0] }
 0x287   :  { %5363 = vmatpush.bf16.msra.mxu2 %v9949_v45  ;;  %v4091_v45 = vadd.f32 %v12822_v50, %v4077_v32  ;;  %v4548_v31 = vmax.f32 %v4093_v61, 0.0  ;;  %v12626_v46 = vpack.c.bf16 %v4547_v34, %v4543_v9  ;;  %v11563_v44 = vld [vmem:[#allocation9 + $0x84] sm:$0xf]  ;;  %v9806_v15 = vld [vmem:[#allocation9 + $0x190] sm:$0xf0]  ;;  %v9969_v8 = vor.u32 %v11635_v30, %v9966_v21 }
 0x288   :  { %5337 = vmatpush.bf16.msra.mxu0 %v9661_v57  ;;  %v4274_v59 = vpop.f32.mrf.mxu0  ;;  %v9884_v57 = vld [vmem:[#allocation9 + $0x220] sm:$0xf]  ;;  %v11595_v52 = vld [vmem:[#allocation9 + $0x184] sm:$0xf]  ;;  %v9681_v5 = vor.u32 %v11563_v44, %v9678_v47  ;;  %v9950_v7 = vld [vmem:[#allocation9 + $0x2b0] sm:$0xf0] }
 0x289   :  { %5351 = vmatpush.bf16.msra.mxu1 %v9789_v4  ;;  %v4314_v4 = vpop.f32.mrf.mxu3  ;;  %v4275_v62 = vadd.f32 %v4274_v59, %v4261_v2  ;;  %v11631_v23 = vld [vmem:[#allocation9 + $0x2a4] sm:$0xf]  ;;  %v9809_v3 = vor.u32 %v11595_v52, %v9806_v15  ;;  %v9662_v60 = vld [vmem:[#allocation9 + $0x70] sm:$0xf0]  ;;  %v9844_v30 = vld [vmem:[#allocation9 + $0x1c8] sm:$0xf] }
 0x28a   :  { %v4300_v55 = vpop.f32.mrf.mxu2  ;;  %v11591_v50 = vld [vmem:[#allocation9 + $0x164] sm:$0xf]  ;;  %v9953_v59 = vor.u32 %v11631_v23, %v9950_v7  ;;  %v9646_v2 = vld [vmem:[#allocation9 + $0x50] sm:$0xf0]  ;;  %v11606_v21 = vld [vmem:[#allocation9 + $0x1d4] sm:$0xf0] }
 0x28b   :  { %5364 = vmatpush.bf16.msra.mxu2 %v9933_v36  ;;  %v9885_v36 = vor.u32 %v11617_v19, %v9884_v57  ;;  %v4301_v11 = vadd.f32 %v4300_v55, %v4287_v54  ;;  %v4289_v49 = vadd.f32 %v4288_v13, %v4275_v62  ;;  %v9934_v57 = vld [vmem:[#allocation9 + $0x290] sm:$0xf0]  ;;  %v11555_v34 = vld [vmem:[#allocation9 + $0x44] sm:$0xf]  ;;  %v11578_v13 = vld [vmem:[#allocation9 + $0xf4] sm:$0xf0]  ;;  %v9845_v52 = vor.u32 %v11606_v21, %v9844_v30 }
 0x28c   :  { %5338 = vmatpush.bf16.msra.mxu0 %v9645_v16  ;;  %v4544_v16 = vmax.f32 %v4091_v45, 0.0  ;;  %v9790_v45 = vld [vmem:[#allocation9 + $0x170] sm:$0xf0]  ;;  %v11551_v29 = vld [vmem:[#allocation9 + $0x24] sm:$0xf] }
 0x28d   :  { %5352 = vmatpush.bf16.msra.mxu1 %v9773_v43  ;;  %v9982_v43 = vld [vmem:[#allocation9 + $0x2f0] sm:$0xf0]  ;;  %v4315_v32 = vadd.f32 %v4314_v4, %v4301_v11  ;;  %v9793_v19 = vor.u32 %v11591_v50, %v9790_v45  ;;  %v11587_v4 = vld [vmem:[#allocation9 + $0x144] sm:$0xf]  ;;  %v9988_v47 = vld [vmem:[#allocation9 + $0x2e8] sm:$0xf] }
 0x28e   :  { %v12628_v18 = vpack.c.bf16 %v4548_v31, %v4544_v16  ;;  %v9985_v35 = vor.u32 %v11639_v26, %v9982_v43  ;;  %v9649_v31 = vor.u32 %v11555_v34, %v9646_v2  ;;  %v9918_v17 = vld [vmem:[#allocation9 + $0x270] sm:$0xf0]  ;;  %v11583_v54 = vld [vmem:[#allocation9 + $0x124] sm:$0xf]  ;;  %v9732_v43 = vld [vmem:[#allocation9 + $0xe8] sm:$0xf] }
 0x28f   :  { %5365 = vmatpush.bf16.msra.mxu2 %v9917_v0  ;;  %v4545_v56 = vmax.f32 %v4315_v32, 0.0  ;;  %v9630_v9 = vld [vmem:[#allocation9 + $0x30] sm:$0xf0]  ;;  %v11619_v10 = vld [vmem:[#allocation9 + $0x244] sm:$0xf] }
 0x290   :  { %5339 = vmatpush.bf16.msra.mxu0 %v9629_v25  ;;  %v9697_v25 = vor.u32 %v11567_v1, %v9694_v6  ;;  %v9758_v62 = vld [vmem:[#allocation9 + $0x130] sm:$0xf0]  ;;  %v9633_v53 = vor.u32 %v11551_v29, %v9630_v9  ;;  %v11547_v48 = vld [vmem:[#allocation9 + $0x4] sm:$0xf]  ;;  %v9860_v1 = vld [vmem:[#allocation9 + $0x1e8] sm:$0xf] }
 0x291   :  { %5353 = vmatpush.bf16.msra.mxu1 %v9757_v42  ;;  %v4316_v41 = vpop.f32.mrf.mxu3  ;;  %v9902_v16 = vld [vmem:[#allocation9 + $0x250] sm:$0xf0]  ;;  %v9761_v37 = vor.u32 %v11583_v54, %v9758_v62  ;;  %v11610_v6 = vld [vmem:[#allocation9 + $0x1f4] sm:$0xf0]  ;;  %v9716_v32 = vld [vmem:[#allocation9 + $0xc8] sm:$0xf] }
 0x292   :  { %v4302_v0 = vpop.f32.mrf.mxu2  ;;  %v9614_v11 = vld [vmem:[#allocation9 + $0x10] sm:$0xf0]  ;;  %v9700_v15 = vld [vmem:[#allocation9 + $0xa8] sm:$0xf]  ;;  %v11566_v45 = vld [vmem:[#allocation9 + $0x94] sm:$0xf0] }
 0x293   :  { %5366 = vmatpush.bf16.msra.mxu2 %v9901_v51  ;;  %v4303_v12 = vadd.f32 %v4302_v0, %v4289_v49  ;;  %v11559_v51 = vld [vmem:[#allocation9 + $0x64] sm:$0xf]  ;;  %v9742_v26 = vld [vmem:[#allocation9 + $0x110] sm:$0xf0]  ;;  %v9617_v49 = vor.u32 %v11547_v48, %v9614_v11  ;;  %v9733_v0 = vor.u32 %v11578_v13, %v9732_v43  ;;  %v9684_v50 = vld [vmem:[#allocation9 + $0x88] sm:$0xf] }
 0x294   :  { %5340 = vmatpush.bf16.msra.mxu0 %v9613_v33  ;;  %v9665_v55 = vor.u32 %v11559_v51, %v9662_v60  ;;  %v11627_v33 = vld [vmem:[#allocation9 + $0x284] sm:$0xf]  ;;  %v9886_v24 = vld [vmem:[#allocation9 + $0x230] sm:$0xf0]  ;;  %v11638_v51 = vld [vmem:[#allocation9 + $0x2d4] sm:$0xf0]  ;;  %v9685_v34 = vor.u32 %v11566_v45, %v9684_v50 }
 0x295   :  { %5354 = vmatpush.bf16.msra.mxu1 %v9741_v63  ;;  %v4317_v42 = vadd.f32 %v4316_v41, %v4303_v12  ;;  %v9774_v63 = vld [vmem:[#allocation9 + $0x150] sm:$0xf0]  ;;  %v11574_v12 = vld [vmem:[#allocation9 + $0xd4] sm:$0xf0]  ;;  %v11611_v41 = vld [vmem:[#allocation9 + $0x204] sm:$0xf] }
 0x296   :  { %v9777_v40 = vor.u32 %v11587_v4, %v9774_v63  ;;  %v9717_v44 = vor.u32 %v11574_v12, %v9716_v32  ;;  %v9956_v2 = vld [vmem:[#allocation9 + $0x2a8] sm:$0xf]  ;;  %v11634_v4 = vld [vmem:[#allocation9 + $0x2b4] sm:$0xf0]  ;;  %v10092_v9 = vld [vmem:[#allocation9 + $0x3c0] sm:$0xf] }
 0x297   :  { %5367 = vmatpush.bf16.msra.mxu2 %v9885_v36  ;;  %5341 = vmatmul.bf16.vlgmr.msra.gmra.mxu0 %v12626_v46  ;;  %v4549_v61 = vmax.f32 %v4317_v42, 0.0  ;;  %v11642_v42 = vld [vmem:[#allocation9 + $0x2f4] sm:$0xf0]  ;;  %v9957_v29 = vor.u32 %v11634_v4, %v9956_v2  ;;  %v11669_v54 = vld [vmem:[#allocation9 + $0x3cc] sm:$0xf0] }
 0x298   :  { %5389 = vmatpush.bf16.msrb.mxu0 %v9729_v14  ;;  %5355 = vmatmul.bf16.vlgmr.msra.gmra.mxu1 %v12628_v18  ;;  %v9937_v14 = vor.u32 %v11627_v33, %v9934_v57  ;;  %v9989_v23 = vor.u32 %v11642_v42, %v9988_v47  ;;  %v10108_v57 = vld [vmem:[#allocation9 + $0x3e0] sm:$0xf]  ;;  %v11558_v48 = vld [vmem:[#allocation9 + $0x54] sm:$0xf0]  ;;  %v9780_v11 = vld [vmem:[#allocation9 + $0x148] sm:$0xf] }
 0x299   :  { %5403 = vmatpush.bf16.msrb.mxu1 %v9857_v27  ;;  %v12632_v38 = vpack.c.bf16 %v4549_v61, %v4545_v56  ;;  %v11623_v27 = vld [vmem:[#allocation9 + $0x264] sm:$0xf]  ;;  %v9828_v61 = vld [vmem:[#allocation9 + $0x1a8] sm:$0xf]  ;;  %v10076_v43 = vld [vmem:[#allocation9 + $0x3a0] sm:$0xf] }
 0x29a   :  { %v9921_v36 = vor.u32 %v11623_v27, %v9918_v17  ;;  %v11562_v27 = vld [vmem:[#allocation9 + $0x74] sm:$0xf0]  ;;  %v9796_v17 = vld [vmem:[#allocation9 + $0x168] sm:$0xf]  ;;  %v11665_v13 = vld [vmem:[#allocation9 + $0x3ac] sm:$0xf0] }
 0x29b   :  { %5368 = vmatpush.bf16.msra.mxu2 %v9869_v22  ;;  %v11615_v22 = vld [vmem:[#allocation9 + $0x224] sm:$0xf]  ;;  %v11586_v32 = vld [vmem:[#allocation9 + $0x134] sm:$0xf0]  ;;  %v11661_v30 = vld [vmem:[#allocation9 + $0x38c] sm:$0xf0] }
 0x29c   :  { %5390 = vmatpush.bf16.msrb.mxu0 %v9713_v20  ;;  %v11579_v20 = vld [vmem:[#allocation9 + $0x104] sm:$0xf]  ;;  %v9892_v45 = vld [vmem:[#allocation9 + $0x228] sm:$0xf]  ;;  %v9718_v2 = vld [vmem:[#allocation9 + $0xd8] sm:$0xf0] }
 0x29d   :  { %5404 = vmatpush.bf16.msrb.mxu1 %v9841_v58  ;;  %v9905_v58 = vor.u32 %v11619_v10, %v9902_v16  ;;  %v9745_v28 = vor.u32 %v11579_v20, %v9742_v26  ;;  %v10093_v10 = vor.u32 %v11669_v54, %v10092_v9  ;;  %v11590_v20 = vld [vmem:[#allocation9 + $0x154] sm:$0xf0]  ;;  %v11604_v4 = vld [vmem:[#allocation9 + $0x1cc] sm:$0xf] }
 0x29e   :  { %5369 = vmatmul.bf16.vlgmr.msra.gmra.mxu2 %v12632_v38  ;;  %v11614_v9 = vld [vmem:[#allocation9 + $0x214] sm:$0xf0] }
 0x29f   :  { %5417 = vmatpush.bf16.msrb.mxu2 %v9985_v35  ;;  %v9861_v35 = vor.u32 %v11610_v6, %v9860_v1  ;;  %v9924_v1 = vld [vmem:[#allocation9 + $0x268] sm:$0xf]  ;;  %v11626_v6 = vld [vmem:[#allocation9 + $0x274] sm:$0xf0] }
 0x2a0   :  { %5391 = vmatpush.bf16.msrb.mxu0 %v9697_v25  ;;  %v9889_v25 = vor.u32 %v11615_v22, %v9886_v24  ;;  %v9781_v22 = vor.u32 %v11590_v20, %v9780_v11  ;;  %v9636_v24 = vld [vmem:[#allocation9 + $0x28] sm:$0xf]  ;;  %v9925_v12 = vor.u32 %v11626_v6, %v9924_v1  ;;  %v11600_v11 = vld [vmem:[#allocation9 + $0x1ac] sm:$0xf] }
 0x2a1   :  { %5405 = vmatpush.bf16.msrb.mxu1 %v9825_v39  ;;  %v9870_v39 = vld [vmem:[#allocation9 + $0x210] sm:$0xf0] }
 0x2a2   :  { %v9873_v56 = vor.u32 %v11611_v41, %v9870_v39  ;;  %v9908_v41 = vld [vmem:[#allocation9 + $0x248] sm:$0xf]  ;;  %v11622_v39 = vld [vmem:[#allocation9 + $0x254] sm:$0xf0] }
 0x2a3   :  { %5418 = vmatpush.bf16.msrb.mxu2 %v9969_v8  ;;  %v11570_v8 = vld [vmem:[#allocation9 + $0xb4] sm:$0xf0] }
 0x2a4   :  { %5392 = vmatpush.bf16.msrb.mxu0 %v9681_v5  ;;  %v11602_v5 = vld [vmem:[#allocation9 + $0x1b4] sm:$0xf0]  ;;  %v9701_v7 = vor.u32 %v11570_v8, %v9700_v15  ;;  %v9748_v15 = vld [vmem:[#allocation9 + $0x108] sm:$0xf] }
 0x2a5   :  { %5406 = vmatpush.bf16.msrb.mxu1 %v9809_v3  ;;  %v9972_v3 = vld [vmem:[#allocation9 + $0x2c8] sm:$0xf]  ;;  %v9829_v60 = vor.u32 %v11602_v5, %v9828_v61  ;;  %v11582_v8 = vld [vmem:[#allocation9 + $0x114] sm:$0xf0]  ;;  %v9734_v61 = vld [vmem:[#allocation9 + $0xf8] sm:$0xf0] }
 0x2a6   :  { %v9973_v33 = vor.u32 %v11638_v51, %v9972_v3  ;;  %v11608_v5 = vld [vmem:[#allocation9 + $0x1ec] sm:$0xf]  ;;  %v10044_v3 = vld [vmem:[#allocation9 + $0x360] sm:$0xf]  ;;  %v11657_v51 = vld [vmem:[#allocation9 + $0x36c] sm:$0xf0] }
 0x2a7   :  { %5419 = vmatpush.bf16.msrb.mxu2 %v9953_v59  ;;  %v9812_v59 = vld [vmem:[#allocation9 + $0x188] sm:$0xf] }
 0x2a8   :  { %5393 = vmatpush.bf16.msrb.mxu0 %v9665_v55  ;;  %v11598_v55 = vld [vmem:[#allocation9 + $0x194] sm:$0xf0] }
 0x2a9   :  { %5407 = vmatpush.bf16.msrb.mxu1 %v9793_v19  ;;  %v11673_v19 = vld [vmem:[#allocation9 + $0x3ec] sm:$0xf0] }
 0x2aa   :  { %v10109_v63 = vor.u32 %v11673_v19, %v10108_v57 }
 0x2ab   :  { %5420 = vmatpush.bf16.msrb.mxu2 %v9937_v14  ;;  %v9813_v14 = vor.u32 %v11598_v55, %v9812_v59  ;;  %v11618_v59 = vld [vmem:[#allocation9 + $0x234] sm:$0xf0]  ;;  %v10045_v55 = vor.u32 %v11657_v51, %v10044_v3  ;;  %v11592_v51 = vld [vmem:[#allocation9 + $0x16c] sm:$0xf] }
 0x2ac   :  { %5394 = vmatpush.bf16.msrb.mxu0 %v9649_v31  ;;  %v9668_v31 = vld [vmem:[#allocation9 + $0x68] sm:$0xf]  ;;  %5375 = vmatpush.bf16.msra.mxu3 %v10109_v63  ;;  %v9893_v63 = vor.u32 %v11618_v59, %v9892_v45  ;;  %v11667_v59 = vld [vmem:[#allocation9 + $0x3c4] sm:$0xf] }
 0x2ad   :  { %5408 = vmatpush.bf16.msrb.mxu1 %v9777_v40  ;;  %v11594_v40 = vld [vmem:[#allocation9 + $0x174] sm:$0xf0]  ;;  %v9669_v62 = vor.u32 %v11562_v27, %v9668_v31  ;;  %v10028_v31 = vld [vmem:[#allocation9 + $0x340] sm:$0xf]  ;;  %v11653_v27 = vld [vmem:[#allocation9 + $0x34c] sm:$0xf0] }
 0x2ae   :  { %v9797_v16 = vor.u32 %v11594_v40, %v9796_v17  ;;  %v12644_v40 = vpop.f32.mrf.mxu2  ;;  %v10029_v54 = vor.u32 %v11653_v27, %v10028_v31  ;;  %v11556_v31 = vld [vmem:[#allocation9 + $0x4c] sm:$0xf]  ;;  %v9654_v27 = vld [vmem:[#allocation9 + $0x58] sm:$0xf0] }
 0x2af   :  { %5421 = vmatpush.bf16.msrb.mxu2 %v9921_v36  ;;  %v9940_v36 = vld [vmem:[#allocation9 + $0x288] sm:$0xf] }
 0x2b0   :  { %5395 = vmatpush.bf16.msrb.mxu0 %v9633_v53  ;;  %v11630_v53 = vld [vmem:[#allocation9 + $0x294] sm:$0xf0]  ;;  %5376 = vmatpush.bf16.msra.mxu3 %v10093_v10  ;;  %v9990_v10 = vld [vmem:[#allocation9 + $0x2f8] sm:$0xf0] }
 0x2b1   :  { %5409 = vmatpush.bf16.msrb.mxu1 %v9761_v37  ;;  %v9652_v37 = vld [vmem:[#allocation9 + $0x48] sm:$0xf]  ;;  %v9941_v26 = vor.u32 %v11630_v53, %v9940_v36  ;;  %v11640_v53 = vld [vmem:[#allocation9 + $0x2ec] sm:$0xf] }
 0x2b3   :  { %5422 = vmatpush.bf16.msrb.mxu2 %v9905_v58  ;;  %v9653_v58 = vor.u32 %v11558_v48, %v9652_v37  ;;  %v11568_v37 = vld [vmem:[#allocation9 + $0xac] sm:$0xf]  ;;  %v9702_v48 = vld [vmem:[#allocation9 + $0xb8] sm:$0xf0] }
 0x2b4   :  { %5396 = vmatpush.bf16.msrb.mxu0 %v9617_v49  ;;  %v10077_v49 = vor.u32 %v11665_v13, %v10076_v43  ;;  %v10012_v43 = vld [vmem:[#allocation9 + $0x320] sm:$0xf]  ;;  %v11649_v13 = vld [vmem:[#allocation9 + $0x32c] sm:$0xf0]  ;;  %v9705_v6 = vor.u32 %v11568_v37, %v9702_v48  ;;  %v11624_v37 = vld [vmem:[#allocation9 + $0x26c] sm:$0xf] }
 0x2b5   :  { %5410 = vmatpush.bf16.msrb.mxu1 %v9745_v28  ;;  %v11554_v28 = vld [vmem:[#allocation9 + $0x34] sm:$0xf0]  ;;  %v10013_v1 = vor.u32 %v11649_v13, %v10012_v43  ;;  %v9926_v48 = vld [vmem:[#allocation9 + $0x278] sm:$0xf0]  ;;  %v11552_v13 = vld [vmem:[#allocation9 + $0x2c] sm:$0xf] }
 0x2b6   :  { %5377 = vmatpush.bf16.msra.mxu3 %v10077_v49  ;;  %v9637_v21 = vor.u32 %v11554_v28, %v9636_v24  ;;  %v11636_v49 = vld [vmem:[#allocation9 + $0x2cc] sm:$0xf] }
 0x2b7   :  { %5423 = vmatpush.bf16.msrb.mxu2 %v9889_v25  ;;  %5397 = vmatmul.bf16.vlgmr.msrb.gmra.mxu0 %v12626_v46  ;;  %v10060_v25 = vld [vmem:[#allocation9 + $0x380] sm:$0xf] }
 0x2b8   :  { %5445 = vmatpush.bf16.msra.mxu0 %v9733_v0  ;;  %5411 = vmatmul.bf16.vlgmr.msrb.gmra.mxu1 %v12628_v18  ;;  %v12638_v0 = vpop.f32.mrf.mxu0  ;;  %v10061_v47 = vor.u32 %v11661_v30, %v10060_v25  ;;  %v9814_v25 = vld [vmem:[#allocation9 + $0x198] sm:$0xf0]  ;;  %v9996_v30 = vld [vmem:[#allocation9 + $0x300] sm:$0xf] }
 0x2b9   :  { %5459 = vmatpush.bf16.msra.mxu1 %v9861_v35  ;;  %v9764_v35 = vld [vmem:[#allocation9 + $0x128] sm:$0xf] }
 0x2ba   :  { %v9765_v42 = vor.u32 %v11586_v32, %v9764_v35  ;;  %5378 = vmatpush.bf16.msra.mxu3 %v10061_v47  ;;  %v11564_v35 = vld [vmem:[#allocation9 + $0x8c] sm:$0xf]  ;;  %v9686_v32 = vld [vmem:[#allocation9 + $0x98] sm:$0xf0]  ;;  %v11671_v47 = vld [vmem:[#allocation9 + $0x3e4] sm:$0xf] }
 0x2bb   :  { %5424 = vmatpush.bf16.msrb.mxu2 %v9873_v56  ;;  %v11576_v56 = vld [vmem:[#allocation9 + $0xec] sm:$0xf] }
 0x2bc   :  { %5446 = vmatpush.bf16.msra.mxu0 %v9717_v44  ;;  %v9620_v44 = vld [vmem:[#allocation9 + $0x8] sm:$0xf]  ;;  %v9737_v57 = vor.u32 %v11576_v56, %v9734_v61  ;;  %v12654_v61 = vpop.f32.mrf.mxu2 }
 0x2bd   :  { %5460 = vmatpush.bf16.msra.mxu1 %v9845_v52  ;;  %v11550_v52 = vld [vmem:[#allocation9 + $0x14] sm:$0xf0] }
 0x2be   :  { %5425 = vmatmul.bf16.vlgmr.msrb.gmra.mxu2 %v12632_v38  ;;  %v9621_v50 = vor.u32 %v11550_v52, %v9620_v44  ;;  %5379 = vmatpush.bf16.msra.mxu3 %v10045_v55  ;;  %v9689_v52 = vor.u32 %v11564_v35, %v9686_v32  ;;  %v10094_v55 = vld [vmem:[#allocation9 + $0x3d0] sm:$0xf0] }
 0x2bf   :  { %5473 = vmatpush.bf16.msra.mxu2 %v9989_v23  ;;  %v9909_v23 = vor.u32 %v11622_v39, %v9908_v41 }
 0x2c0   :  { %5447 = vmatpush.bf16.msra.mxu0 %v9701_v7  ;;  %v9862_v7 = vld [vmem:[#allocation9 + $0x1f8] sm:$0xf0]  ;;  %v12642_v17 = vpop.f32.mrf.mxu0 }
 0x2c1   :  { %5461 = vmatpush.bf16.msra.mxu1 %v9829_v60  ;;  %v12640_v60 = vpop.f32.mrf.mxu1  ;;  %v9865_v19 = vor.u32 %v11608_v5, %v9862_v7  ;;  %v9670_v7 = vld [vmem:[#allocation9 + $0x78] sm:$0xf0] }
 0x2c2   :  { %5380 = vmatpush.bf16.msra.mxu3 %v10029_v54 }
 0x2c3   :  { %5474 = vmatpush.bf16.msra.mxu2 %v9973_v33  ;;  %v9749_v33 = vor.u32 %v11582_v8, %v9748_v15  ;;  %v11632_v15 = vld [vmem:[#allocation9 + $0x2ac] sm:$0xf]  ;;  %v9958_v8 = vld [vmem:[#allocation9 + $0x2b8] sm:$0xf0] }
 0x2c4   :  { %5448 = vmatpush.bf16.msra.mxu0 %v9685_v34  ;;  %v11572_v34 = vld [vmem:[#allocation9 + $0xcc] sm:$0xf]  ;;  %v9961_v45 = vor.u32 %v11632_v15, %v9958_v8  ;;  %v9750_v15 = vld [vmem:[#allocation9 + $0x118] sm:$0xf0] }
 0x2c5   :  { %5462 = vmatpush.bf16.msra.mxu1 %v9813_v14  ;;  %v9846_v14 = vld [vmem:[#allocation9 + $0x1d8] sm:$0xf0]  ;;  %v9721_v36 = vor.u32 %v11572_v34, %v9718_v2  ;;  %v11628_v34 = vld [vmem:[#allocation9 + $0x28c] sm:$0xf] }
 0x2c6   :  { %5381 = vmatpush.bf16.msra.mxu3 %v10013_v1  ;;  %v9942_v2 = vld [vmem:[#allocation9 + $0x298] sm:$0xf0] }
 0x2c7   :  { %5475 = vmatpush.bf16.msra.mxu2 %v9957_v29  ;;  %v9876_v29 = vld [vmem:[#allocation9 + $0x208] sm:$0xf]  ;;  %v9945_v54 = vor.u32 %v11628_v34, %v9942_v2  ;;  %v10030_v34 = vld [vmem:[#allocation9 + $0x350] sm:$0xf0] }
 0x2c8   :  { %5449 = vmatpush.bf16.msra.mxu0 %v9669_v62  ;;  %v12646_v62 = vpop.f32.mrf.mxu3  ;;  %v9877_v20 = vor.u32 %v11614_v9, %v9876_v29  ;;  %v12652_v41 = vpop.f32.mrf.mxu0  ;;  %v11588_v29 = vld [vmem:[#allocation9 + $0x14c] sm:$0xf]  ;;  %v9782_v9 = vld [vmem:[#allocation9 + $0x158] sm:$0xf0] }
 0x2c9   :  { %5463 = vmatpush.bf16.msra.mxu1 %v9797_v16  ;;  %v9849_v16 = vor.u32 %v11604_v4, %v9846_v14  ;;  %v12650_v24 = vpop.f32.mrf.mxu1  ;;  %v10097_v4 = vor.u32 %v11667_v59, %v10094_v55  ;;  %v9785_v43 = vor.u32 %v11588_v29, %v9782_v9  ;;  %v10014_v9 = vld [vmem:[#allocation9 + $0x330] sm:$0xf0] }
 0x2cb   :  { %5476 = vmatpush.bf16.msra.mxu2 %v9941_v26  ;;  %v9830_v26 = vld [vmem:[#allocation9 + $0x1b8] sm:$0xf0] }
 0x2cc   :  { %5450 = vmatpush.bf16.msra.mxu0 %v9653_v58  ;;  %v9993_v58 = vor.u32 %v11640_v53, %v9990_v10  ;;  %v9833_v28 = vor.u32 %v11600_v11, %v9830_v26  ;;  %v10078_v53 = vld [vmem:[#allocation9 + $0x3b0] sm:$0xf0]  ;;  %v12664_v26 = vpop.f32.mrf.mxu2 }
 0x2cd   :  { %5464 = vmatpush.bf16.msra.mxu1 %v9781_v22  ;;  %v9974_v22 = vld [vmem:[#allocation9 + $0x2d8] sm:$0xf0] }
 0x2ce   :  { %v9977_v39 = vor.u32 %v11636_v49, %v9974_v22  ;;  %v9766_v49 = vld [vmem:[#allocation9 + $0x138] sm:$0xf0]  ;;  %v9929_v22 = vor.u32 %v11624_v37, %v9926_v48  ;;  %v9998_v37 = vld [vmem:[#allocation9 + $0x310] sm:$0xf0] }
 0x2cf   :  { %5477 = vmatpush.bf16.msra.mxu2 %v9925_v12  ;;  %v11596_v12 = vld [vmem:[#allocation9 + $0x18c] sm:$0xf] }
 0x2d0   :  { %5451 = vmatpush.bf16.msra.mxu0 %v9637_v21  ;;  %v11645_v21 = vld [vmem:[#allocation9 + $0x30c] sm:$0xf0]  ;;  %v9817_v5 = vor.u32 %v11596_v12, %v9814_v25  ;;  %v12657_v3 = vpop.f32.mrf.mxu3  ;;  %v11620_v25 = vld [vmem:[#allocation9 + $0x24c] sm:$0xf] }
 0x2d1   :  { %5465 = vmatpush.bf16.msra.mxu1 %v9765_v42  ;;  %v9997_v44 = vor.u32 %v11645_v21, %v9996_v30  ;;  %v10110_v42 = vld [vmem:[#allocation9 + $0x3f0] sm:$0xf0]  ;;  %v9910_v30 = vld [vmem:[#allocation9 + $0x258] sm:$0xf0] }
 0x2d2   :  { %v10113_v56 = vor.u32 %v11671_v47, %v10110_v42  ;;  %v9622_v47 = vld [vmem:[#allocation9 + $0x18] sm:$0xf0] }
 0x2d3   :  { %5478 = vmatpush.bf16.msra.mxu2 %v9909_v23  ;;  %v11560_v23 = vld [vmem:[#allocation9 + $0x6c] sm:$0xf]  ;;  %5382 = vmatpush.bf16.msra.mxu3 %v9997_v44 }
 0x2d4   :  { %5452 = vmatpush.bf16.msra.mxu0 %v9621_v50  ;;  %v9798_v50 = vld [vmem:[#allocation9 + $0x178] sm:$0xf0]  ;;  %v11548_v44 = vld [vmem:[#allocation9 + $0xc] sm:$0xf] }
 0x2d5   :  { %5466 = vmatpush.bf16.msra.mxu1 %v9749_v33  ;;  %v11970_v33 = vld [vmem:[#allocation7] sm:$0xf]  ;;  %v9801_v14 = vor.u32 %v11592_v51, %v9798_v50 }
 0x2d6   :  { %v9894_v51 = vld [vmem:[#allocation9 + $0x238] sm:$0xf0] }
 0x2d7   :  { %5479 = vmatpush.bf16.msra.mxu2 %v9893_v63  ;;  %5453 = vmatmul.bf16.vlgmr.msra.gmra.mxu0 %v12626_v46  ;;  %v12659_v63 = vpop.f32.mrf.mxu1 }
 0x2d8   :  { %5501 = vmatpush.bf16.msrb.mxu0 %v9737_v57  ;;  %5467 = vmatmul.bf16.vlgmr.msra.gmra.mxu1 %v12628_v18  ;;  %v1082_v57 = vperm.slane %v11970_v33, 3  ;;  %v12666_v1 = vpop.f32.mrf.mxu3  ;;  %v4414_v33 = vpop.f32.mrf.mxu2 }
 0x2d9   :  { %5515 = vmatpush.bf16.msrb.mxu1 %v9865_v19  ;;  %5431 = vmatpush.bf16.msrb.mxu3 %v10113_v56  ;;  %v9673_v19 = vor.u32 %v11560_v23, %v9670_v7  ;;  %v9913_v56 = vor.u32 %v11620_v25, %v9910_v30  ;;  %v9625_v23 = vor.u32 %v11548_v44, %v9622_v47  ;;  %v11616_v7 = vld [vmem:[#allocation9 + $0x22c] sm:$0xf] }
 0x2da   :  { %v4329_v10 = vadd.f32 %v12638_v0, %v1082_v57  ;;  %v11659_v0 = vld [vmem:[#allocation9 + $0x384] sm:$0xf]  ;;  %v4331_v32 = vadd.f32 %v12642_v17, %v1082_v57  ;;  %v9897_v57 = vor.u32 %v11616_v7, %v9894_v51 }
 0x2db   :  { %5480 = vmatpush.bf16.msra.mxu2 %v9877_v20  ;;  %v12662_v20 = vpop.f32.mrf.mxu0 }
 0x2dc   :  { %5502 = vmatpush.bf16.msrb.mxu0 %v9721_v36  ;;  %v11663_v36 = vld [vmem:[#allocation9 + $0x3a4] sm:$0xf]  ;;  %v4343_v35 = vadd.f32 %v12640_v60, %v4329_v10  ;;  %v4345_v17 = vadd.f32 %v12650_v24, %v4331_v32 }
 0x2dd   :  { %5516 = vmatpush.bf16.msrb.mxu1 %v9849_v16  ;;  %5432 = vmatpush.bf16.msrb.mxu3 %v10097_v4  ;;  %v9657_v16 = vor.u32 %v11556_v31, %v9654_v27  ;;  %v10081_v11 = vor.u32 %v11663_v36, %v10078_v53  ;;  %v11655_v60 = vld [vmem:[#allocation9 + $0x364] sm:$0xf]  ;;  %v11612_v4 = vld [vmem:[#allocation9 + $0x20c] sm:$0xf] }
 0x2de   :  { %5481 = vmatmul.bf16.vlgmr.msra.gmra.mxu2 %v12632_v38  ;;  %v4357_v42 = vadd.f32 %v12644_v40, %v4343_v35  ;;  %v4359_v55 = vadd.f32 %v12654_v61, %v4345_v17  ;;  %v11647_v61 = vld [vmem:[#allocation9 + $0x324] sm:$0xf]  ;;  %v10116_v17 = vld [vmem:[#allocation9 + $0x3e8] sm:$0xf] }
 0x2df   :  { %5529 = vmatpush.bf16.msrb.mxu2 %v9993_v58  ;;  %v9638_v58 = vld [vmem:[#allocation9 + $0x38] sm:$0xf0]  ;;  %v4400_v8 = vpop.f32.mrf.mxu1 }
 0x2e0   :  { %5503 = vmatpush.bf16.msrb.mxu0 %v9705_v6  ;;  %v11584_v6 = vld [vmem:[#allocation9 + $0x12c] sm:$0xf]  ;;  %v9641_v12 = vor.u32 %v11552_v13, %v9638_v58  ;;  %v4371_v40 = vadd.f32 %v12646_v62, %v4357_v42  ;;  %v4428_v2 = vpop.f32.mrf.mxu3  ;;  %v4373_v27 = vadd.f32 %v12657_v3, %v4359_v55  ;;  %v11643_v3 = vld [vmem:[#allocation9 + $0x304] sm:$0xf] }
 0x2e1   :  { %5517 = vmatpush.bf16.msrb.mxu1 %v9833_v28  ;;  %5433 = vmatpush.bf16.msrb.mxu3 %v10081_v11  ;;  %v10062_v28 = vld [vmem:[#allocation9 + $0x390] sm:$0xf0]  ;;  %v10001_v11 = vor.u32 %v11643_v3, %v9998_v37  ;;  %v11668_v37 = vld [vmem:[#allocation9 + $0x3cc] sm:$0xf] }
 0x2e2   :  { %v10065_v21 = vor.u32 %v11659_v0, %v10062_v28  ;;  %v4385_v24 = vadd.f32 %v12652_v41, %v4371_v40  ;;  %v4387_v36 = vadd.f32 %v12662_v20, %v4373_v27  ;;  %v10017_v41 = vor.u32 %v11647_v61, %v10014_v9  ;;  %v11670_v40 = vld [vmem:[#allocation9 + $0x3d4] sm:$0xf0]  ;;  %v10036_v27 = vld [vmem:[#allocation9 + $0x348] sm:$0xf] }
 0x2e3   :  { %5530 = vmatpush.bf16.msrb.mxu2 %v9977_v39  ;;  %v9769_v39 = vor.u32 %v11584_v6, %v9766_v49  ;;  %v10020_v61 = vld [vmem:[#allocation9 + $0x328] sm:$0xf]  ;;  %v11650_v9 = vld [vmem:[#allocation9 + $0x334] sm:$0xf0] }
 0x2e4   :  { %5504 = vmatpush.bf16.msrb.mxu0 %v9689_v52  ;;  %v11580_v52 = vld [vmem:[#allocation9 + $0x10c] sm:$0xf]  ;;  %v4401_v48 = vadd.f32 %v4400_v8, %v4387_v36  ;;  %v10004_v36 = vld [vmem:[#allocation9 + $0x308] sm:$0xf] }
 0x2e5   :  { %5518 = vmatpush.bf16.msrb.mxu1 %v9817_v5  ;;  %5434 = vmatpush.bf16.msrb.mxu3 %v10065_v21  ;;  %v10046_v5 = vld [vmem:[#allocation9 + $0x370] sm:$0xf0]  ;;  %v9753_v59 = vor.u32 %v11580_v52, %v9750_v15 }
 0x2e6   :  { %v10049_v50 = vor.u32 %v11655_v60, %v10046_v5 }
 0x2e7   :  { %5531 = vmatpush.bf16.msrb.mxu2 %v9961_v45  ;;  %v4440_v45 = vpop.f32.mrf.mxu0  ;;  %v4454_v29 = vpop.f32.mrf.mxu1 }
 0x2e8   :  { %5505 = vmatpush.bf16.msrb.mxu0 %v9673_v19  ;;  %v11651_v19 = vld [vmem:[#allocation9 + $0x344] sm:$0xf] }
 0x2e9   :  { %5519 = vmatpush.bf16.msrb.mxu1 %v9801_v14  ;;  %5435 = vmatpush.bf16.msrb.mxu3 %v10049_v50  ;;  %v9878_v14 = vld [vmem:[#allocation9 + $0x218] sm:$0xf0]  ;;  %v10033_v31 = vor.u32 %v11651_v19, %v10030_v34  ;;  %v10068_v34 = vld [vmem:[#allocation9 + $0x388] sm:$0xf] }
 0x2ea   :  { %v9881_v62 = vor.u32 %v11612_v4, %v9878_v14  ;;  %v10052_v4 = vld [vmem:[#allocation9 + $0x368] sm:$0xf]  ;;  %v11658_v14 = vld [vmem:[#allocation9 + $0x374] sm:$0xf0] }
 0x2eb   :  { %5532 = vmatpush.bf16.msrb.mxu2 %v9945_v54  ;;  %v4399_v54 = vadd.f32 %v12659_v63, %v4385_v24  ;;  %v4415_v63 = vadd.f32 %v4414_v33, %v4401_v48  ;;  %v10084_v33 = vld [vmem:[#allocation9 + $0x3a8] sm:$0xf]  ;;  %v11662_v24 = vld [vmem:[#allocation9 + $0x394] sm:$0xf0]  ;;  %v10102_v48 = vld [vmem:[#allocation9 + $0x3d8] sm:$0xf0] }
 0x2ec   :  { %5506 = vmatpush.bf16.msrb.mxu0 %v9657_v16  ;;  %v4468_v16 = vpop.f32.mrf.mxu2 }
 0x2ed   :  { %5520 = vmatpush.bf16.msrb.mxu1 %v9785_v43  ;;  %5436 = vmatpush.bf16.msrb.mxu3 %v10033_v31  ;;  %v4413_v53 = vadd.f32 %v12664_v26, %v4399_v54  ;;  %v4429_v13 = vadd.f32 %v4428_v2, %v4415_v63  ;;  %v10069_v2 = vor.u32 %v11662_v24, %v10068_v34  ;;  %v11685_v34 = vld [vmem:[#allocation12 + $0x50] sm:$0xf0]  ;;  %v10488_v24 = vld [vmem:[#allocation12 + $0x2d8] sm:$0xf] }
 0x2ee   :  { %v10053_v31 = vor.u32 %v11658_v14, %v10052_v4  ;;  %v10021_v54 = vor.u32 %v11650_v9, %v10020_v61  ;;  %v11769_v4 = vld [vmem:[#allocation12 + $0x2f0] sm:$0xf0]  ;;  %v11724_v61 = vld [vmem:[#allocation12 + $0x18c] sm:$0xf]  ;;  %v10322_v9 = vld [vmem:[#allocation12 + $0x1a4] sm:$0xf0] }
 0x2ef   :  { %5533 = vmatpush.bf16.msrb.mxu2 %v9929_v22  ;;  %v4442_v10 = vpop.f32.mrf.mxu0  ;;  %v4427_v43 = vadd.f32 %v12666_v1, %v4413_v53  ;;  %v11672_v53 = vld [vmem:[#allocation9 + $0x3ec] sm:$0xf]  ;;  %v10489_v14 = vor.u32 %v11769_v4, %v10488_v24  ;;  %v11682_v24 = vld [vmem:[#allocation12 + $0x3c] sm:$0xf] }
 0x2f0   :  { %5507 = vmatpush.bf16.msrb.mxu0 %v9641_v12  ;;  %v4443_v6 = vadd.f32 %v4442_v10, %v4429_v13  ;;  %v10118_v10 = vld [vmem:[#allocation9 + $0x3f8] sm:$0xf0]  ;;  %v11766_v4 = vld [vmem:[#allocation12 + $0x2dc] sm:$0xf] }
 0x2f1   :  { %5521 = vmatpush.bf16.msrb.mxu1 %v9769_v39  ;;  %5437 = vmatpush.bf16.msrb.mxu3 %v10017_v41  ;;  %v4441_v20 = vadd.f32 %v4440_v45, %v4427_v43  ;;  %v11646_v41 = vld [vmem:[#allocation9 + $0x314] sm:$0xf0]  ;;  %v10121_v3 = vor.u32 %v11672_v53, %v10118_v10  ;;  %v10086_v43 = vld [vmem:[#allocation9 + $0x3b8] sm:$0xf0] }
 0x2f3   :  { %5534 = vmatpush.bf16.msrb.mxu2 %v9913_v56  ;;  %v4455_v26 = vadd.f32 %v4454_v29, %v4441_v20  ;;  %v11654_v29 = vld [vmem:[#allocation9 + $0x354] sm:$0xf0]  ;;  %v11660_v20 = vld [vmem:[#allocation9 + $0x38c] sm:$0xf] }
 0x2f4   :  { %5508 = vmatpush.bf16.msrb.mxu0 %v9625_v23  ;;  %v4470_v49 = vpop.f32.mrf.mxu2  ;;  %v11674_v23 = vld [vmem:[#allocation9 + $0x3f4] sm:$0xf0] }
 0x2f5   :  { %5522 = vmatpush.bf16.msrb.mxu1 %v9753_v59  ;;  %5438 = vmatpush.bf16.msrb.mxu3 %v10001_v11  ;;  %v4469_v22 = vadd.f32 %v4468_v16, %v4455_v26  ;;  %v10117_v50 = vor.u32 %v11674_v23, %v10116_v17  ;;  %v10100_v59 = vld [vmem:[#allocation9 + $0x3c8] sm:$0xf]  ;;  %v10005_v16 = vor.u32 %v11646_v41, %v10004_v36  ;;  %v11664_v11 = vld [vmem:[#allocation9 + $0x3ac] sm:$0xf]  ;;  %v10054_v26 = vld [vmem:[#allocation9 + $0x378] sm:$0xf0] }
 0x2f6   :  { %v10101_v55 = vor.u32 %v11670_v40, %v10100_v59  ;;  %v10089_v63 = vor.u32 %v11664_v11, %v10086_v43  ;;  %v11699_v17 = vld [vmem:[#allocation12 + $0xc0] sm:$0xf0]  ;;  %v10544_v23 = vld [vmem:[#allocation12 + $0x348] sm:$0xf]  ;;  %v10180_v59 = vld [vmem:[#allocation12 + $0x70] sm:$0xf] }
 0x2f7   :  { %5535 = vmatpush.bf16.msrb.mxu2 %v9897_v57  ;;  %5509 = vmatmul.bf16.vlgmr.msrb.gmra.mxu0 %v12626_v46  ;;  %v4482_v46 = vpop.f32.mrf.mxu3  ;;  %v4496_v58 = vpop.f32.mrf.mxu0  ;;  %v11666_v57 = vld [vmem:[#allocation9 + $0x3b4] sm:$0xf0]  ;;  %v11692_v40 = vld [vmem:[#allocation12 + $0x88] sm:$0xf0]  ;;  %v11839_v36 = vld [vmem:[#allocation12 + $0x520] sm:$0xf0] }
 0x2f8   :  { %5523 = vmatmul.bf16.vlgmr.msrb.gmra.mxu1 %v12628_v18  ;;  %v4456_v18 = vpop.f32.mrf.mxu1  ;;  %v4483_v32 = vadd.f32 %v4482_v46, %v4469_v22  ;;  %v10085_v19 = vor.u32 %v11666_v57, %v10084_v33  ;;  %v10105_v46 = vor.u32 %v11668_v37, %v10102_v48  ;;  %v10038_v22 = vld [vmem:[#allocation9 + $0x358] sm:$0xf0]  ;;  %v11776_v33 = vld [vmem:[#allocation12 + $0x328] sm:$0xf0]  ;;  %v10740_v37 = vld [vmem:[#allocation12 + $0x4d0] sm:$0xf] }
 0x2f9   :  { %v4457_v28 = vadd.f32 %v4456_v18, %v4443_v6  ;;  %v10070_v18 = vld [vmem:[#allocation9 + $0x398] sm:$0xf0]  ;;  %v11832_v48 = vld [vmem:[#allocation12 + $0x4e8] sm:$0xf0]  ;;  %v11717_v11 = vld [vmem:[#allocation12 + $0x154] sm:$0xf] }
 0x2fa   :  { %v4497_v25 = vadd.f32 %v4496_v58, %v4483_v32  ;;  %v10073_v13 = vor.u32 %v11660_v20, %v10070_v18  ;;  %v11656_v58 = vld [vmem:[#allocation9 + $0x36c] sm:$0xf]  ;;  %v10294_v43 = vld [vmem:[#allocation12 + $0x16c] sm:$0xf0]  ;;  %v10712_v20 = vld [vmem:[#allocation12 + $0x498] sm:$0xf] }
 0x2fb   :  { %5536 = vmatpush.bf16.msrb.mxu2 %v9881_v62  ;;  %v4471_v12 = vadd.f32 %v4470_v49, %v4457_v28  ;;  %v10037_v62 = vor.u32 %v11654_v29, %v10036_v27  ;;  %v10057_v6 = vor.u32 %v11656_v58, %v10054_v26  ;;  %v11652_v49 = vld [vmem:[#allocation9 + $0x34c] sm:$0xf]  ;;  %v11678_v27 = vld [vmem:[#allocation12 + $0x18] sm:$0xf0]  ;;  %v10460_v29 = vld [vmem:[#allocation12 + $0x2a0] sm:$0xf]  ;;  %v10297_v58 = vor.u32 %v11717_v11, %v10294_v43 }
 0x2fc   :  { %v11648_v28 = vld [vmem:[#allocation9 + $0x32c] sm:$0xf]  ;;  %v11825_v18 = vld [vmem:[#allocation12 + $0x4b0] sm:$0xf0]  ;;  %v10404_v26 = vld [vmem:[#allocation12 + $0x230] sm:$0xf] }
 0x2fd   :  { %v11895_v11 = vld [vmem:[#allocation12 + $0x6e0] sm:$0xf0]  ;;  %v11752_v43 = vld [vmem:[#allocation12 + $0x26c] sm:$0xf] }
 0x2fe   :  { %5537 = vmatmul.bf16.vlgmr.msrb.gmra.mxu2 %v12632_v38 }
 0x2ff   :  { %v4484_v0 = vpop.f32.mrf.mxu3  ;;  %v4498_v30 = vpop.f32.mrf.mxu0 }
 0x300   :  { %v4510_v35 = vpop.f32.mrf.mxu1  ;;  %v4485_v21 = vadd.f32 %v4484_v0, %v4471_v12  ;;  %v10041_v0 = vor.u32 %v11652_v49, %v10038_v22  ;;  %v11644_v12 = vld [vmem:[#allocation9 + $0x30c] sm:$0xf]  ;;  %v11710_v49 = vld [vmem:[#allocation12 + $0x11c] sm:$0xf]  ;;  %v10266_v22 = vld [vmem:[#allocation12 + $0x134] sm:$0xf0] }
 0x301   :  { %v4524_v1 = vpop.f32.mrf.mxu2  ;;  %v4511_v38 = vadd.f32 %v4510_v35, %v4497_v25  ;;  %v10022_v35 = vld [vmem:[#allocation9 + $0x338] sm:$0xf0] }
 0x302   :  { %v4499_v44 = vadd.f32 %v4498_v30, %v4485_v21  ;;  %v10025_v32 = vor.u32 %v11648_v28, %v10022_v35  ;;  %v10006_v25 = vld [vmem:[#allocation9 + $0x318] sm:$0xf0]  ;;  %v11727_v21 = vld [vmem:[#allocation12 + $0x1a0] sm:$0xf0]  ;;  %v10269_v35 = vor.u32 %v11710_v49, %v10266_v22  ;;  %v11888_v49 = vld [vmem:[#allocation12 + $0x6a8] sm:$0xf0] }
 0x303   :  { %v4525_v47 = vadd.f32 %v4524_v1, %v4511_v38  ;;  %v10009_v30 = vor.u32 %v11644_v12, %v10006_v25  ;;  %v10320_v1 = vld [vmem:[#allocation12 + $0x188] sm:$0xf]  ;;  %v10292_v38 = vld [vmem:[#allocation12 + $0x150] sm:$0xf]  ;;  %v11741_v12 = vld [vmem:[#allocation12 + $0x210] sm:$0xf0] }
 0x304   :  { %v11703_v25 = vld [vmem:[#allocation12 + $0xe4] sm:$0xf] }
 0x307   :  { %v4538_v39 = vpop.f32.mrf.mxu3 }
 0x308   :  { %v4512_v42 = vpop.f32.mrf.mxu1  ;;  %v4539_v8 = vadd.f32 %v4538_v39, %v4525_v47  ;;  %v10321_v39 = vor.u32 %v11727_v21, %v10320_v1 }
 0x309   :  { %v4513_v52 = vadd.f32 %v4512_v42, %v4499_v44  ;;  %v4526_v15 = vpop.f32.mrf.mxu2  ;;  %v11720_v44 = vld [vmem:[#allocation12 + $0x168] sm:$0xf0]  ;;  %v10264_v42 = vld [vmem:[#allocation12 + $0x118] sm:$0xf] }
 0x30a   :  { %v4546_v7 = vmax.f32 %v4539_v8, 0.0  ;;  %6993 = vmatpush.bf16.msra.mxu0 %v10321_v39  ;;  %v10293_v47 = vor.u32 %v11720_v44, %v10292_v38  ;;  %v10236_v8 = vld [vmem:[#allocation12 + $0xe0] sm:$0xf]  ;;  %v11734_v38 = vld [vmem:[#allocation12 + $0x1d8] sm:$0xf0] }
 0x30b   :  { %v4527_v56 = vadd.f32 %v4526_v15, %v4513_v52  ;;  %v11713_v52 = vld [vmem:[#allocation12 + $0x130] sm:$0xf0]  ;;  %v10348_v39 = vld [vmem:[#allocation12 + $0x1c0] sm:$0xf] }
 0x30c   :  { %v10265_v15 = vor.u32 %v11713_v52, %v10264_v42  ;;  %v10684_v44 = vld [vmem:[#allocation12 + $0x460] sm:$0xf]  ;;  %v11818_v42 = vld [vmem:[#allocation12 + $0x478] sm:$0xf0]  ;;  %v11696_v52 = vld [vmem:[#allocation12 + $0xac] sm:$0xf] }
 0x30e   :  { %6994 = vmatpush.bf16.msra.mxu0 %v10293_v47  ;;  %v10349_v47 = vor.u32 %v11734_v38, %v10348_v39  ;;  %v10936_v39 = vld [vmem:[#allocation12 + $0x658] sm:$0xf]  ;;  %v11881_v38 = vld [vmem:[#allocation12 + $0x670] sm:$0xf0] }
 0x30f   :  { %v4540_v60 = vpop.f32.mrf.mxu3 }
 0x310   :  { %v4541_v5 = vadd.f32 %v4540_v60, %v4527_v56  ;;  %v11706_v56 = vld [vmem:[#allocation12 + $0xf8] sm:$0xf0] }
 0x311   :  { %v10237_v60 = vor.u32 %v11706_v56, %v10236_v8  ;;  %v10685_v8 = vor.u32 %v11818_v42, %v10684_v44  ;;  %v10937_v44 = vor.u32 %v11881_v38, %v10936_v39  ;;  %v10378_v42 = vld [vmem:[#allocation12 + $0x214] sm:$0xf0]  ;;  %v11787_v39 = vld [vmem:[#allocation12 + $0x384] sm:$0xf]  ;;  %v10574_v38 = vld [vmem:[#allocation12 + $0x39c] sm:$0xf0] }
 0x312   :  { %v4550_v51 = vmax.f32 %v4541_v5, 0.0  ;;  %6995 = vmatpush.bf16.msra.mxu0 %v10265_v15  ;;  %v10208_v5 = vld [vmem:[#allocation12 + $0xa8] sm:$0xf] }
 0x313   :  { %v10210_v15 = vld [vmem:[#allocation12 + $0xc4] sm:$0xf0] }
 0x314   :  { %v12683_v45 = vpack.c.bf16 %v4550_v51, %v4546_v7  ;;  %v10209_v7 = vor.u32 %v11699_v17, %v10208_v5  ;;  %v11783_v51 = vld [vmem:[#allocation12 + $0x360] sm:$0xf0]  ;;  %v10213_v56 = vor.u32 %v11696_v52, %v10210_v15  ;;  %v10546_v5 = vld [vmem:[#allocation12 + $0x364] sm:$0xf0]  ;;  %v11822_v52 = vld [vmem:[#allocation12 + $0x49c] sm:$0xf] }
 0x316   :  { %5383 = vmatmul.bf16.vlgmr.msra.gmra.mxu3 %v12683_v45  ;;  %6996 = vmatpush.bf16.msra.mxu0 %v10237_v60  ;;  %v11780_v60 = vld [vmem:[#allocation12 + $0x34c] sm:$0xf] }
 0x317   :  { %5487 = vmatpush.bf16.msra.mxu3 %v10117_v50  ;;  %v10545_v50 = vor.u32 %v11783_v51, %v10544_v23  ;;  %v10549_v17 = vor.u32 %v11780_v60, %v10546_v5  ;;  %v10656_v23 = vld [vmem:[#allocation12 + $0x428] sm:$0xf]  ;;  %v11689_v51 = vld [vmem:[#allocation12 + $0x74] sm:$0xf] }
 0x319   :  { %7007 = vmatpush.bf16.msra.mxu1 %v10545_v50 }
 0x31a   :  { %6997 = vmatpush.bf16.msra.mxu0 %v10209_v7  ;;  %v11811_v7 = vld [vmem:[#allocation12 + $0x440] sm:$0xf0] }
 0x31b   :  { %5488 = vmatpush.bf16.msra.mxu3 %v10101_v55  ;;  %v10181_v55 = vor.u32 %v11692_v40, %v10180_v59  ;;  %v10657_v50 = vor.u32 %v11811_v7, %v10656_v23  ;;  %v10182_v59 = vld [vmem:[#allocation12 + $0x8c] sm:$0xf0]  ;;  %v11773_v40 = vld [vmem:[#allocation12 + $0x314] sm:$0xf]  ;;  %v11874_v23 = vld [vmem:[#allocation12 + $0x638] sm:$0xf0] }
 0x31e   :  { %6998 = vmatpush.bf16.msra.mxu0 %v10181_v55  ;;  %v10185_v55 = vor.u32 %v11689_v51, %v10182_v59  ;;  %v11731_v51 = vld [vmem:[#allocation12 + $0x1c4] sm:$0xf] }
 0x31f   :  { %5489 = vmatpush.bf16.msra.mxu3 %v10085_v19  ;;  %v10152_v19 = vld [vmem:[#allocation12 + $0x38] sm:$0xf]  ;;  %v11815_v59 = vld [vmem:[#allocation12 + $0x464] sm:$0xf] }
 0x323   :  { %5490 = vmatpush.bf16.msra.mxu3 %v10069_v2  ;;  %v10153_v2 = vor.u32 %v11685_v34, %v10152_v19  ;;  %v11804_v19 = vld [vmem:[#allocation12 + $0x408] sm:$0xf0] }
 0x325   :  { %6999 = vmatpush.bf16.msra.mxu0 %v10153_v2  ;;  %v10154_v2 = vld [vmem:[#allocation12 + $0x54] sm:$0xf0] }
 0x326   :  { %5439 = vmatmul.bf16.vlgmr.msrb.gmra.mxu3 %v12683_v45 }
 0x327   :  { %5491 = vmatpush.bf16.msra.mxu3 %v10053_v31  ;;  %v10124_v31 = vld [vmem:[#allocation12] sm:$0xf] }
 0x328   :  { %v10125_v41 = vor.u32 %v11678_v27, %v10124_v31  ;;  %v10490_v31 = vld [vmem:[#allocation12 + $0x2f4] sm:$0xf0] }
 0x329   :  { %v10493_v27 = vor.u32 %v11766_v4, %v10490_v31  ;;  %v10658_v31 = vld [vmem:[#allocation12 + $0x444] sm:$0xf0] }
 0x32a   :  { %7000 = vmatpush.bf16.msra.mxu0 %v10125_v41 }
 0x32b   :  { %5492 = vmatpush.bf16.msra.mxu3 %v10037_v62  ;;  %v11762_v62 = vld [vmem:[#allocation12 + $0x2b8] sm:$0xf0] }
 0x32c   :  { %v10461_v10 = vor.u32 %v11762_v62, %v10460_v29  ;;  %v10600_v29 = vld [vmem:[#allocation12 + $0x3b8] sm:$0xf]  ;;  %v11797_v62 = vld [vmem:[#allocation12 + $0x3d0] sm:$0xf0] }
 0x32f   :  { %5493 = vmatpush.bf16.msra.mxu3 %v10021_v54  ;;  %v10768_v54 = vld [vmem:[#allocation12 + $0x508] sm:$0xf] }
 0x330   :  { %v10769_v53 = vor.u32 %v11839_v36, %v10768_v54  ;;  %v10126_v54 = vld [vmem:[#allocation12 + $0x1c] sm:$0xf0]  ;;  %v11759_v36 = vld [vmem:[#allocation12 + $0x2a4] sm:$0xf] }
 0x332   :  { %7021 = vmatpush.bf16.msra.mxu2 %v10769_v53  ;;  %v10462_v53 = vld [vmem:[#allocation12 + $0x2bc] sm:$0xf0] }
 0x333   :  { %5494 = vmatpush.bf16.msra.mxu3 %v10005_v16  ;;  %v10325_v16 = vor.u32 %v11724_v61, %v10322_v9  ;;  %v10601_v61 = vor.u32 %v11797_v62, %v10600_v29  ;;  %v11675_v9 = vld [vmem:[#allocation12 + $0x4] sm:$0xf] }
 0x334   :  { %v10129_v41 = vor.u32 %v11675_v9, %v10126_v54  ;;  %v10852_v9 = vld [vmem:[#allocation12 + $0x5b0] sm:$0xf]  ;;  %v11860_v54 = vld [vmem:[#allocation12 + $0x5c8] sm:$0xf0] }
 0x335   :  { %7049 = vmatpush.bf16.msrb.mxu0 %v10325_v16  ;;  %v10572_v16 = vld [vmem:[#allocation12 + $0x380] sm:$0xf] }
 0x336   :  { %5495 = vmatmul.bf16.vlgmr.msra.gmra.mxu3 %v12683_v45 }
 0x337   :  { %5543 = vmatpush.bf16.msrb.mxu3 %v10121_v3  ;;  %v10432_v3 = vld [vmem:[#allocation12 + $0x268] sm:$0xf] }
 0x339   :  { %7050 = vmatpush.bf16.msrb.mxu0 %v10297_v58  ;;  %v10770_v58 = vld [vmem:[#allocation12 + $0x524] sm:$0xf0] }
 0x33b   :  { %5544 = vmatpush.bf16.msrb.mxu3 %v10105_v46  ;;  %v11755_v46 = vld [vmem:[#allocation12 + $0x280] sm:$0xf0] }
 0x33d   :  { %7051 = vmatpush.bf16.msrb.mxu0 %v10269_v35  ;;  %v11829_v35 = vld [vmem:[#allocation12 + $0x4d4] sm:$0xf] }
 0x33f   :  { %5545 = vmatpush.bf16.msrb.mxu3 %v10089_v63  ;;  %v10741_v63 = vor.u32 %v11832_v48, %v10740_v37  ;;  %v10992_v37 = vld [vmem:[#allocation12 + $0x6c8] sm:$0xf]  ;;  %v5342_v48 = vpop.f32.mrf.mxu0 }
 0x341   :  { %7022 = vmatpush.bf16.msra.mxu2 %v10741_v63  ;;  %v10434_v63 = vld [vmem:[#allocation12 + $0x284] sm:$0xf0] }
 0x343   :  { %5546 = vmatpush.bf16.msrb.mxu3 %v10073_v13  ;;  %v10433_v13 = vor.u32 %v11755_v46, %v10432_v3  ;;  %v11790_v3 = vld [vmem:[#allocation12 + $0x398] sm:$0xf0] }
 0x344   :  { %v10573_v46 = vor.u32 %v11790_v3, %v10572_v16 }
 0x347   :  { %5547 = vmatpush.bf16.msrb.mxu3 %v10057_v6  ;;  %v11748_v6 = vld [vmem:[#allocation12 + $0x248] sm:$0xf0] }
 0x348   :  { %v10405_v28 = vor.u32 %v11748_v6, %v10404_v26  ;;  %v10964_v6 = vld [vmem:[#allocation12 + $0x690] sm:$0xf] }
 0x349   :  { %v10965_v22 = vor.u32 %v11888_v49, %v10964_v6  ;;  %v10328_v6 = vld [vmem:[#allocation12 + $0x190] sm:$0xf]  ;;  %v11728_v49 = vld [vmem:[#allocation12 + $0x1a8] sm:$0xf0] }
 0x34b   :  { %5548 = vmatpush.bf16.msrb.mxu3 %v10041_v0  ;;  %v10713_v0 = vor.u32 %v11825_v18, %v10712_v20  ;;  %v10993_v20 = vor.u32 %v11895_v11, %v10992_v37  ;;  %v10437_v18 = vor.u32 %v11752_v43, %v10434_v63  ;;  %v10824_v11 = vld [vmem:[#allocation12 + $0x578] sm:$0xf]  ;;  %v11853_v43 = vld [vmem:[#allocation12 + $0x590] sm:$0xf0] }
 0x34d   :  { %7023 = vmatpush.bf16.msra.mxu2 %v10713_v0  ;;  %v11745_v0 = vld [vmem:[#allocation12 + $0x234] sm:$0xf] }
 0x34f   :  { %5549 = vmatpush.bf16.msrb.mxu3 %v10025_v32  ;;  %v10376_v32 = vld [vmem:[#allocation12 + $0x1f8] sm:$0xf] }
 0x350   :  { %v10377_v1 = vor.u32 %v11741_v12, %v10376_v32  ;;  %v5356_v32 = vpop.f32.mrf.mxu1 }
 0x351   :  { %7024 = vmatpush.bf16.msra.mxu2 %v10685_v8  ;;  %v10714_v8 = vld [vmem:[#allocation12 + $0x4b4] sm:$0xf0] }
 0x352   :  { %v10717_v60 = vor.u32 %v11822_v52, %v10714_v8  ;;  %v11721_v52 = vld [vmem:[#allocation12 + $0x170] sm:$0xf0]  ;;  %v10994_v8 = vld [vmem:[#allocation12 + $0x6e4] sm:$0xf0] }
 0x353   :  { %5550 = vmatpush.bf16.msrb.mxu3 %v10009_v30  ;;  %v10238_v30 = vld [vmem:[#allocation12 + $0xfc] sm:$0xf0] }
 0x354   :  { %v10241_v21 = vor.u32 %v11703_v25, %v10238_v30  ;;  %v10742_v25 = vld [vmem:[#allocation12 + $0x4ec] sm:$0xf0]  ;;  %v5370_v30 = vpop.f32.mrf.mxu2 }
 0x355   :  { %7025 = vmatpush.bf16.msra.mxu2 %v10657_v50  ;;  %v10350_v50 = vld [vmem:[#allocation12 + $0x1dc] sm:$0xf0] }
 0x356   :  { %5551 = vmatmul.bf16.vlgmr.msrb.gmra.mxu3 %v12683_v45  ;;  %v10516_v45 = vld [vmem:[#allocation12 + $0x310] sm:$0xf]  ;;  %7052 = vmatpush.bf16.msrb.mxu0 %v10241_v21  ;;  %v12689_v21 = vld [vmem:[#allocation10] sm:$0xf] }
 0x357   :  { %v10517_v57 = vor.u32 %v11776_v33, %v10516_v45  ;;  %v10518_v45 = vld [vmem:[#allocation12 + $0x32c] sm:$0xf0]  ;;  %7035 = vmatpush.bf16.msra.mxu3 %v10993_v20  ;;  %v4685_v5 = vperm.slane %v12689_v21, 0 }
 0x358   :  { %v10521_v33 = vor.u32 %v11773_v40, %v10518_v45  ;;  %v10353_v40 = vor.u32 %v11731_v51, %v10350_v50  ;;  %v10686_v45 = vld [vmem:[#allocation12 + $0x47c] sm:$0xf0]  ;;  %v11714_v51 = vld [vmem:[#allocation12 + $0x138] sm:$0xf0]  ;;  %v11885_v50 = vld [vmem:[#allocation12 + $0x694] sm:$0xf] }
 0x359   :  { %7008 = vmatpush.bf16.msra.mxu1 %v10517_v57  ;;  %v10628_v57 = vld [vmem:[#allocation12 + $0x3f0] sm:$0xf] }
 0x35a   :  { %7053 = vmatpush.bf16.msrb.mxu0 %v10213_v56  ;;  %v10629_v34 = vor.u32 %v11804_v19, %v10628_v57  ;;  %v5344_v56 = vpop.f32.mrf.mxu0  ;;  %v5358_v57 = vpop.f32.mrf.mxu1  ;;  %v10880_v19 = vld [vmem:[#allocation12 + $0x5e8] sm:$0xf] }
 0x35b   :  { %7036 = vmatpush.bf16.msra.mxu3 %v10965_v22 }
 0x35c   :  { %7026 = vmatpush.bf16.msra.mxu2 %v10629_v34  ;;  %v11867_v34 = vld [vmem:[#allocation12 + $0x600] sm:$0xf0] }
 0x35d   :  { %7009 = vmatpush.bf16.msra.mxu1 %v10489_v14  ;;  %v10157_v14 = vor.u32 %v11682_v24, %v10154_v2  ;;  %v5372_v24 = vpop.f32.mrf.mxu2  ;;  %v10881_v4 = vor.u32 %v11867_v34, %v10880_v19  ;;  %v10244_v34 = vld [vmem:[#allocation12 + $0xe8] sm:$0xf] }
 0x35e   :  { %7054 = vmatpush.bf16.msrb.mxu0 %v10185_v55  ;;  %v10689_v55 = vor.u32 %v11815_v59, %v10686_v45  ;;  %v10966_v59 = vld [vmem:[#allocation12 + $0x6ac] sm:$0xf0] }
 0x35f   :  { %7037 = vmatpush.bf16.msra.mxu3 %v10937_v44  ;;  %v11892_v44 = vld [vmem:[#allocation12 + $0x6cc] sm:$0xf] }
 0x360   :  { %7027 = vmatpush.bf16.msra.mxu2 %v10601_v61 }
 0x361   :  { %7010 = vmatpush.bf16.msra.mxu1 %v10461_v10  ;;  %v10465_v10 = vor.u32 %v11759_v36, %v10462_v53  ;;  %v10853_v36 = vor.u32 %v11860_v54, %v10852_v9  ;;  %v10630_v53 = vld [vmem:[#allocation12 + $0x40c] sm:$0xf0] }
 0x362   :  { %7055 = vmatpush.bf16.msrb.mxu0 %v10157_v14  ;;  %v11808_v14 = vld [vmem:[#allocation12 + $0x42c] sm:$0xf]  ;;  %v5398_v62 = vpop.f32.mrf.mxu0  ;;  %v10216_v54 = vld [vmem:[#allocation12 + $0xb0] sm:$0xf] }
 0x363   :  { %v10661_v29 = vor.u32 %v11808_v14, %v10658_v31  ;;  %v11878_v14 = vld [vmem:[#allocation12 + $0x65c] sm:$0xf]  ;;  %v10938_v31 = vld [vmem:[#allocation12 + $0x674] sm:$0xf0] }
 0x364   :  { %7028 = vmatpush.bf16.msra.mxu2 %v10573_v46 }
 0x365   :  { %7011 = vmatpush.bf16.msra.mxu1 %v10433_v13  ;;  %v11836_v13 = vld [vmem:[#allocation12 + $0x50c] sm:$0xf]  ;;  %v5426_v63 = vpop.f32.mrf.mxu2 }
 0x366   :  { %7056 = vmatpush.bf16.msrb.mxu0 %v10129_v41  ;;  %v10773_v26 = vor.u32 %v11836_v13, %v10770_v58  ;;  %v11801_v41 = vld [vmem:[#allocation12 + $0x3f4] sm:$0xf]  ;;  %v11794_v13 = vld [vmem:[#allocation12 + $0x3bc] sm:$0xf]  ;;  %v10602_v58 = vld [vmem:[#allocation12 + $0x3d4] sm:$0xf0] }
 0x367   :  { %v10633_v3 = vor.u32 %v11801_v41, %v10630_v53  ;;  %v10605_v22 = vor.u32 %v11794_v13, %v10602_v58  ;;  %v10552_v41 = vld [vmem:[#allocation12 + $0x350] sm:$0xf]  ;;  %v10188_v13 = vld [vmem:[#allocation12 + $0x78] sm:$0xf]  ;;  %v11693_v58 = vld [vmem:[#allocation12 + $0x90] sm:$0xf0] }
 0x368   :  { %7077 = vmatpush.bf16.msrb.mxu2 %v10773_v26 }
 0x369   :  { %7012 = vmatpush.bf16.msra.mxu1 %v10405_v28  ;;  %v10406_v28 = vld [vmem:[#allocation12 + $0x24c] sm:$0xf0] }
 0x36a   :  { %v10409_v12 = vor.u32 %v11745_v0, %v10406_v28  ;;  %v4686_v0 = vperm.slane %v12689_v21, 1 }
 0x36d   :  { %7013 = vmatpush.bf16.msra.mxu1 %v10377_v1  ;;  %v10745_v1 = vor.u32 %v11829_v35, %v10742_v25  ;;  %v5400_v25 = vpop.f32.mrf.mxu0  ;;  %v5428_v45 = vpop.f32.mrf.mxu2 }
 0x36f   :  { %7078 = vmatpush.bf16.msrb.mxu2 %v10745_v1 }
 0x371   :  { %7014 = vmatpush.bf16.msra.mxu1 %v10349_v47  ;;  %v11738_v47 = vld [vmem:[#allocation12 + $0x1fc] sm:$0xf] }
 0x372   :  { %v10381_v15 = vor.u32 %v11738_v47, %v10378_v42  ;;  %v10300_v42 = vld [vmem:[#allocation12 + $0x158] sm:$0xf] }
 0x373   :  { %7079 = vmatpush.bf16.msrb.mxu2 %v10717_v60  ;;  %v5399_v60 = vadd.f32 %v5398_v62, %v4686_v0 }
 0x375   :  { %7063 = vmatpush.bf16.msrb.mxu1 %v10549_v17  ;;  %v10908_v17 = vld [vmem:[#allocation12 + $0x620] sm:$0xf] }
 0x376   :  { %v10909_v7 = vor.u32 %v11874_v23, %v10908_v17  ;;  %v10301_v17 = vor.u32 %v11721_v52, %v10300_v42  ;;  %v10272_v23 = vld [vmem:[#allocation12 + $0x120] sm:$0xf]  ;;  %v11770_v42 = vld [vmem:[#allocation12 + $0x2f8] sm:$0xf0]  ;;  %v11857_v52 = vld [vmem:[#allocation12 + $0x5b4] sm:$0xf] }
 0x377   :  { %7080 = vmatpush.bf16.msrb.mxu2 %v10689_v55  ;;  %v10969_v55 = vor.u32 %v11885_v50, %v10966_v59  ;;  %v10273_v19 = vor.u32 %v11714_v51, %v10272_v23  ;;  %v11679_v51 = vld [vmem:[#allocation12 + $0x20] sm:$0xf0]  ;;  %v10468_v50 = vld [vmem:[#allocation12 + $0x2a8] sm:$0xf] }
 0x378   :  { %7038 = vmatpush.bf16.msra.mxu3 %v10909_v7  ;;  %v5401_v7 = vadd.f32 %v5400_v25, %v4686_v0  ;;  %v10882_v0 = vld [vmem:[#allocation12 + $0x604] sm:$0xf0]  ;;  %v10189_v25 = vor.u32 %v11693_v58, %v10188_v13  ;;  %v11833_v13 = vld [vmem:[#allocation12 + $0x4f0] sm:$0xf0]  ;;  %v11711_v58 = vld [vmem:[#allocation12 + $0x124] sm:$0xf] }
 0x379   :  { %7064 = vmatpush.bf16.msrb.mxu1 %v10521_v33  ;;  %v5343_v33 = vadd.f32 %v5342_v48, %v4685_v5  ;;  %v5412_v48 = vpop.f32.mrf.mxu1 }
 0x37b   :  { %v5357_v61 = vadd.f32 %v5356_v32, %v5343_v33  ;;  %7081 = vmatpush.bf16.msrb.mxu2 %v10661_v29  ;;  %v10796_v32 = vld [vmem:[#allocation12 + $0x540] sm:$0xf]  ;;  %v5413_v33 = vadd.f32 %v5412_v48, %v5399_v60  ;;  %v5482_v48 = vpop.f32.mrf.mxu2 }
 0x37c   :  { %7039 = vmatpush.bf16.msra.mxu3 %v10881_v4  ;;  %v11707_v4 = vld [vmem:[#allocation12 + $0x100] sm:$0xf0] }
 0x37d   :  { %7065 = vmatpush.bf16.msrb.mxu1 %v10493_v27  ;;  %v5345_v27 = vadd.f32 %v5344_v56, %v4685_v5  ;;  %v5371_v16 = vadd.f32 %v5370_v30, %v5357_v61  ;;  %v10329_v30 = vor.u32 %v11728_v49, %v10328_v6  ;;  %v10997_v56 = vor.u32 %v11892_v44, %v10994_v8  ;;  %v11777_v49 = vld [vmem:[#allocation12 + $0x330] sm:$0xf0] }
 0x37e   :  { %v10245_v9 = vor.u32 %v11707_v4, %v10244_v34 }
 0x37f   :  { %7082 = vmatpush.bf16.msrb.mxu2 %v10633_v3  ;;  %v10910_v3 = vld [vmem:[#allocation12 + $0x63c] sm:$0xf0] }
 0x380   :  { %7040 = vmatpush.bf16.msra.mxu3 %v10853_v36  ;;  %v11700_v36 = vld [vmem:[#allocation12 + $0xc8] sm:$0xf0] }
 0x381   :  { %7066 = vmatpush.bf16.msrb.mxu1 %v10465_v10  ;;  %v5359_v10 = vadd.f32 %v5358_v57, %v5345_v27  ;;  %v5454_v57 = vpop.f32.mrf.mxu0  ;;  %v10941_v27 = vor.u32 %v11878_v14, %v10938_v31 }
 0x383   :  { %v5373_v37 = vadd.f32 %v5372_v24, %v5359_v10  ;;  %7083 = vmatpush.bf16.msrb.mxu2 %v10605_v22  ;;  %v11784_v10 = vld [vmem:[#allocation12 + $0x368] sm:$0xf0] }
 0x384   :  { %v11864_v22 = vld [vmem:[#allocation12 + $0x5ec] sm:$0xf] }
 0x385   :  { %7067 = vmatpush.bf16.msrb.mxu1 %v10437_v18  ;;  %v10825_v18 = vor.u32 %v11853_v43, %v10824_v11  ;;  %v4687_v11 = vperm.slane %v12689_v21, 2 }
 0x387   :  { %7041 = vmatpush.bf16.msra.mxu3 %v10825_v18  ;;  %v10553_v18 = vor.u32 %v11784_v10, %v10552_v41  ;;  %v11840_v41 = vld [vmem:[#allocation12 + $0x528] sm:$0xf0]  ;;  %v10302_v10 = vld [vmem:[#allocation12 + $0x174] sm:$0xf0] }
 0x389   :  { %7068 = vmatpush.bf16.msrb.mxu1 %v10409_v12  ;;  %v11846_v12 = vld [vmem:[#allocation12 + $0x558] sm:$0xf0] }
 0x38a   :  { %v10797_v1 = vor.u32 %v11846_v12, %v10796_v32  ;;  %v5455_v32 = vadd.f32 %v5454_v57, %v4687_v11  ;;  %v11725_v57 = vld [vmem:[#allocation12 + $0x194] sm:$0xf] }
 0x38c   :  { %7042 = vmatpush.bf16.msra.mxu3 %v10797_v1  ;;  %v10160_v1 = vld [vmem:[#allocation12 + $0x40] sm:$0xf] }
 0x38d   :  { %7069 = vmatpush.bf16.msrb.mxu1 %v10381_v15  ;;  %v10577_v15 = vor.u32 %v11787_v39, %v10574_v38  ;;  %v11686_v39 = vld [vmem:[#allocation12 + $0x58] sm:$0xf0]  ;;  %v10496_v38 = vld [vmem:[#allocation12 + $0x2e0] sm:$0xf] }
 0x38e   :  { %v10497_v23 = vor.u32 %v11770_v42, %v10496_v38  ;;  %v10356_v42 = vld [vmem:[#allocation12 + $0x1c8] sm:$0xf] }
 0x38f   :  { %7084 = vmatpush.bf16.msrb.mxu2 %v10577_v15  ;;  %v10854_v15 = vld [vmem:[#allocation12 + $0x5cc] sm:$0xf0] }
 0x390   :  { %7091 = vmatpush.bf16.msrb.mxu3 %v10997_v56  ;;  %v10857_v8 = vor.u32 %v11857_v52, %v10854_v15  ;;  %v11735_v52 = vld [vmem:[#allocation12 + $0x1e0] sm:$0xf0]  ;;  %v10692_v15 = vld [vmem:[#allocation12 + $0x468] sm:$0xf] }
 0x391   :  { %7070 = vmatpush.bf16.msrb.mxu1 %v10353_v40  ;;  %v5414_v40 = vpop.f32.mrf.mxu1 }
 0x392   :  { %v5415_v24 = vadd.f32 %v5414_v40, %v5401_v7  ;;  %v10132_v7 = vld [vmem:[#allocation12 + $0x8] sm:$0xf] }
 0x393   :  { %v10133_v14 = vor.u32 %v11679_v51, %v10132_v7  ;;  %v10554_v7 = vld [vmem:[#allocation12 + $0x36c] sm:$0xf0]  ;;  %v4688_v51 = vperm.slane %v12689_v21, 3 }
 0x394   :  { %7092 = vmatpush.bf16.msrb.mxu3 %v10969_v55  ;;  %v5429_v29 = vadd.f32 %v5428_v45, %v5415_v24  ;;  %v11763_v45 = vld [vmem:[#allocation12 + $0x2c0] sm:$0xf0]  ;;  %v11850_v55 = vld [vmem:[#allocation12 + $0x57c] sm:$0xf] }
 0x395   :  { %v10469_v31 = vor.u32 %v11763_v45, %v10468_v50  ;;  %v10357_v50 = vor.u32 %v11735_v52, %v10356_v42  ;;  %v10664_v45 = vld [vmem:[#allocation12 + $0x430] sm:$0xf]  ;;  %v11896_v42 = vld [vmem:[#allocation12 + $0x6e8] sm:$0xf0]  ;;  %v11753_v52 = vld [vmem:[#allocation12 + $0x274] sm:$0xf] }
 0x398   :  { %7093 = vmatpush.bf16.msrb.mxu3 %v10941_v27  ;;  %v10440_v27 = vld [vmem:[#allocation12 + $0x270] sm:$0xf] }
 0x399   :  { %v5384_v2 = vpop.f32.mrf.mxu3 }
 0x39a   :  { %v5385_v46 = vadd.f32 %v5384_v2, %v5371_v16  ;;  %v5427_v2 = vadd.f32 %v5426_v63, %v5413_v33  ;;  %v11871_v16 = vld [vmem:[#allocation12 + $0x624] sm:$0xf]  ;;  %v10826_v33 = vld [vmem:[#allocation12 + $0x594] sm:$0xf0] }
 0x39b   :  { %v10829_v34 = vor.u32 %v11850_v55, %v10826_v33  ;;  %v11812_v33 = vld [vmem:[#allocation12 + $0x448] sm:$0xf0] }
 0x39c   :  { %v5557_v28 = vmax.f32 %v5385_v46, 0.0  ;;  %v10913_v46 = vor.u32 %v11871_v16, %v10910_v3  ;;  %v10665_v21 = vor.u32 %v11812_v33, %v10664_v45  ;;  %v10972_v45 = vld [vmem:[#allocation12 + $0x698] sm:$0xf]  ;;  %v11746_v33 = vld [vmem:[#allocation12 + $0x23c] sm:$0xf] }
 0x39e   :  { %7094 = vmatpush.bf16.msrb.mxu3 %v10913_v46 }
 0x3a1   :  { %v5386_v20 = vpop.f32.mrf.mxu3 }
 0x3a2   :  { %v5387_v26 = vadd.f32 %v5386_v20, %v5373_v37  ;;  %v5468_v37 = vpop.f32.mrf.mxu1  ;;  %v10217_v20 = vor.u32 %v11700_v36, %v10216_v54  ;;  %v11843_v54 = vld [vmem:[#allocation12 + $0x544] sm:$0xf]  ;;  %v10798_v36 = vld [vmem:[#allocation12 + $0x55c] sm:$0xf0] }
 0x3a3   :  { %v5469_v56 = vadd.f32 %v5468_v37, %v5455_v32  ;;  %v10801_v16 = vor.u32 %v11843_v54, %v10798_v36  ;;  %v11742_v32 = vld [vmem:[#allocation12 + $0x218] sm:$0xf0]  ;;  %v10162_v54 = vld [vmem:[#allocation12 + $0x5c] sm:$0xf0]  ;;  %v11767_v36 = vld [vmem:[#allocation12 + $0x2e4] sm:$0xf] }
 0x3a4   :  { %v5561_v35 = vmax.f32 %v5387_v26, 0.0  ;;  %v10524_v26 = vld [vmem:[#allocation12 + $0x318] sm:$0xf] }
 0x3a5   :  { %v5483_v40 = vadd.f32 %v5482_v48, %v5469_v56  ;;  %v11697_v56 = vld [vmem:[#allocation12 + $0xb4] sm:$0xf] }
 0x3a6   :  { %v12693_v47 = vpack.c.bf16 %v5561_v35, %v5557_v28  ;;  %v5456_v28 = vpop.f32.mrf.mxu0  ;;  %v10885_v35 = vor.u32 %v11864_v22, %v10882_v0 }
 0x3a7   :  { %v5457_v44 = vadd.f32 %v5456_v28, %v4687_v11 }
 0x3a8   :  { %7001 = vmatmul.bf16.vlgmr.msra.gmra.mxu0 %v12693_v47  ;;  %7095 = vmatpush.bf16.msrb.mxu3 %v10885_v35  ;;  %v10384_v35 = vld [vmem:[#allocation12 + $0x200] sm:$0xf] }
 0x3a9   :  { %7105 = vmatpush.bf16.msra.mxu0 %v10329_v30  ;;  %v5440_v5 = vpop.f32.mrf.mxu3  ;;  %v10525_v30 = vor.u32 %v11777_v49, %v10524_v26  ;;  %v10274_v26 = vld [vmem:[#allocation12 + $0x13c] sm:$0xf0] }
 0x3aa   :  { %v5441_v62 = vadd.f32 %v5440_v5, %v5427_v2  ;;  %v5470_v60 = vpop.f32.mrf.mxu1  ;;  %v5484_v5 = vpop.f32.mrf.mxu2  ;;  %v10277_v28 = vor.u32 %v11711_v58, %v10274_v26  ;;  %v11760_v58 = vld [vmem:[#allocation12 + $0x2ac] sm:$0xf]  ;;  %v10470_v26 = vld [vmem:[#allocation12 + $0x2c4] sm:$0xf0] }
 0x3ab   :  { %v5471_v59 = vadd.f32 %v5470_v60, %v5457_v44  ;;  %v10218_v60 = vld [vmem:[#allocation12 + $0xcc] sm:$0xf0] }
 0x3ac   :  { %v5558_v43 = vmax.f32 %v5441_v62, 0.0  ;;  %7096 = vmatpush.bf16.msrb.mxu3 %v10857_v8  ;;  %v11819_v8 = vld [vmem:[#allocation12 + $0x480] sm:$0xf0] }
 0x3ad   :  { %7106 = vmatpush.bf16.msra.mxu0 %v10301_v17  ;;  %v10161_v17 = vor.u32 %v11686_v39, %v10160_v1  ;;  %v5485_v24 = vadd.f32 %v5484_v5, %v5471_v59  ;;  %v10246_v1 = vld [vmem:[#allocation12 + $0x104] sm:$0xf0]  ;;  %v10385_v39 = vor.u32 %v11742_v32, %v10384_v35  ;;  %v10693_v59 = vor.u32 %v11819_v8, %v10692_v15  ;;  %v10442_v15 = vld [vmem:[#allocation12 + $0x28c] sm:$0xf0]  ;;  %v11837_v8 = vld [vmem:[#allocation12 + $0x514] sm:$0xf] }
 0x3ae   :  { %v5510_v22 = vpop.f32.mrf.mxu0 }
 0x3b0   :  { %7097 = vmatpush.bf16.msrb.mxu3 %v10829_v34 }
 0x3b1   :  { %7107 = vmatpush.bf16.msra.mxu0 %v10273_v19  ;;  %v5442_v61 = vpop.f32.mrf.mxu3  ;;  %v10330_v19 = vld [vmem:[#allocation12 + $0x1ac] sm:$0xf0] }
 0x3b2   :  { %v5443_v53 = vadd.f32 %v5442_v61, %v5429_v29  ;;  %v11756_v29 = vld [vmem:[#allocation12 + $0x288] sm:$0xf0]  ;;  %v10333_v61 = vor.u32 %v11725_v57, %v10330_v19  ;;  %v5524_v5 = vpop.f32.mrf.mxu1  ;;  %v11690_v57 = vld [vmem:[#allocation12 + $0x7c] sm:$0xf]  ;;  %v10190_v19 = vld [vmem:[#allocation12 + $0x94] sm:$0xf0] }
 0x3b3   :  { %v10441_v48 = vor.u32 %v11756_v29, %v10440_v27  ;;  %v10636_v27 = vld [vmem:[#allocation12 + $0x3f8] sm:$0xf] }
 0x3b4   :  { %v5562_v63 = vmax.f32 %v5443_v53, 0.0  ;;  %v11718_v53 = vld [vmem:[#allocation12 + $0x15c] sm:$0xf]  ;;  %7098 = vmatpush.bf16.msrb.mxu3 %v10801_v16 }
 0x3b5   :  { %7108 = vmatpush.bf16.msra.mxu0 %v10245_v9  ;;  %v10776_v9 = vld [vmem:[#allocation12 + $0x510] sm:$0xf] }
 0x3b6   :  { %v12697_v6 = vpack.c.bf16 %v5562_v63, %v5558_v43  ;;  %v10777_v11 = vor.u32 %v11840_v41, %v10776_v9  ;;  %v10305_v43 = vor.u32 %v11718_v53, %v10302_v10  ;;  %v10412_v63 = vld [vmem:[#allocation12 + $0x238] sm:$0xf]  ;;  %v5512_v34 = vpop.f32.mrf.mxu0  ;;  %v11683_v9 = vld [vmem:[#allocation12 + $0x44] sm:$0xf]  ;;  %v10498_v41 = vld [vmem:[#allocation12 + $0x2fc] sm:$0xf0] }
 0x3b7   :  { %v5513_v29 = vadd.f32 %v5512_v34, %v4688_v51  ;;  %v11830_v34 = vld [vmem:[#allocation12 + $0x4dc] sm:$0xf] }
 0x3b8   :  { %7015 = vmatmul.bf16.vlgmr.msra.gmra.mxu1 %v12697_v6  ;;  %7057 = vmatmul.bf16.vlgmr.msrb.gmra.mxu0 %v12693_v47 }
 0x3b9   :  { %7109 = vmatpush.bf16.msra.mxu0 %v10217_v20  ;;  %7119 = vmatpush.bf16.msra.mxu1 %v10553_v18  ;;  %v5496_v12 = vpop.f32.mrf.mxu3  ;;  %v11749_v20 = vld [vmem:[#allocation12 + $0x250] sm:$0xf0]  ;;  %v10748_v18 = vld [vmem:[#allocation12 + $0x4d8] sm:$0xf] }
 0x3ba   :  { %v5497_v2 = vadd.f32 %v5496_v12, %v5483_v40  ;;  %v10413_v49 = vor.u32 %v11749_v20, %v10412_v63  ;;  %v10749_v0 = vor.u32 %v11833_v13, %v10748_v18  ;;  %v10720_v12 = vld [vmem:[#allocation12 + $0x4a0] sm:$0xf]  ;;  %v10221_v40 = vor.u32 %v11697_v56, %v10218_v60  ;;  %v5526_v10 = vpop.f32.mrf.mxu1  ;;  %v11676_v18 = vld [vmem:[#allocation12 + $0xc] sm:$0xf]  ;;  %v10134_v13 = vld [vmem:[#allocation12 + $0x24] sm:$0xf0] }
 0x3bb   :  { %v10501_v20 = vor.u32 %v11767_v36, %v10498_v41  ;;  %v10778_v56 = vld [vmem:[#allocation12 + $0x52c] sm:$0xf0]  ;;  %v10722_v36 = vld [vmem:[#allocation12 + $0x4bc] sm:$0xf0] }
 0x3bc   :  { %v5559_v3 = vmax.f32 %v5497_v2, 0.0  ;;  %v10526_v2 = vld [vmem:[#allocation12 + $0x334] sm:$0xf0]  ;;  %v10252_v41 = vld [vmem:[#allocation12 + $0xf0] sm:$0xf] }
 0x3bd   :  { %7110 = vmatpush.bf16.msra.mxu0 %v10189_v25  ;;  %7120 = vmatpush.bf16.msra.mxu1 %v10525_v30  ;;  %v11826_v25 = vld [vmem:[#allocation12 + $0x4b8] sm:$0xf0]  ;;  %v11704_v30 = vld [vmem:[#allocation12 + $0xec] sm:$0xf] }
 0x3be   :  { %v10721_v38 = vor.u32 %v11826_v25, %v10720_v12  ;;  %v10249_v44 = vor.u32 %v11704_v30, %v10246_v1  ;;  %v10137_v12 = vor.u32 %v11676_v18, %v10134_v13  ;;  %v10580_v25 = vld [vmem:[#allocation12 + $0x388] sm:$0xf]  ;;  %v11791_v30 = vld [vmem:[#allocation12 + $0x3a0] sm:$0xf0]  ;;  %v10224_v13 = vld [vmem:[#allocation12 + $0xb8] sm:$0xf] }
 0x3bf   :  { %v10694_v18 = vld [vmem:[#allocation12 + $0x484] sm:$0xf0] }
 0x3c1   :  { %7111 = vmatpush.bf16.msra.mxu0 %v10161_v17  ;;  %7121 = vmatpush.bf16.msra.mxu1 %v10497_v23  ;;  %v5498_v4 = vpop.f32.mrf.mxu3  ;;  %v5538_v17 = vpop.f32.mrf.mxu2  ;;  %v11781_v23 = vld [vmem:[#allocation12 + $0x354] sm:$0xf] }
 0x3c2   :  { %v5499_v62 = vadd.f32 %v5498_v4, %v5485_v24  ;;  %v10557_v55 = vor.u32 %v11781_v23, %v10554_v7  ;;  %v11774_v24 = vld [vmem:[#allocation12 + $0x31c] sm:$0xf]  ;;  %v5511_v4 = vadd.f32 %v5510_v22, %v4688_v51  ;;  %v11729_v22 = vld [vmem:[#allocation12 + $0x1b0] sm:$0xf0]  ;;  %v10581_v7 = vor.u32 %v11791_v30, %v10580_v25 }
 0x3c3   :  { %v11722_v23 = vld [vmem:[#allocation12 + $0x178] sm:$0xf0]  ;;  %v11809_v30 = vld [vmem:[#allocation12 + $0x434] sm:$0xf] }
 0x3c4   :  { %v5563_v37 = vmax.f32 %v5499_v62, 0.0  ;;  %v10529_v62 = vor.u32 %v11774_v24, %v10526_v2  ;;  %v5525_v53 = vadd.f32 %v5524_v5, %v5511_v4  ;;  %v10750_v24 = vld [vmem:[#allocation12 + $0x4f4] sm:$0xf0]  ;;  %v10280_v2 = vld [vmem:[#allocation12 + $0x128] sm:$0xf] }
 0x3c5   :  { %7112 = vmatpush.bf16.msra.mxu0 %v10133_v14  ;;  %7122 = vmatpush.bf16.msra.mxu1 %v10469_v31  ;;  %v10193_v31 = vor.u32 %v11690_v57, %v10190_v19  ;;  %v10414_v19 = vld [vmem:[#allocation12 + $0x254] sm:$0xf0]  ;;  %v11715_v4 = vld [vmem:[#allocation12 + $0x140] sm:$0xf0] }
 0x3c6   :  { %v12701_v46 = vpack.c.bf16 %v5563_v37, %v5559_v3  ;;  %v10165_v37 = vor.u32 %v11683_v9, %v10162_v54  ;;  %v5539_v63 = vadd.f32 %v5538_v17, %v5525_v53  ;;  %v10308_v17 = vld [vmem:[#allocation12 + $0x160] sm:$0xf]  ;;  %v11823_v54 = vld [vmem:[#allocation12 + $0x4a4] sm:$0xf]  ;;  %v11708_v53 = vld [vmem:[#allocation12 + $0x108] sm:$0xf0] }
 0x3c7   :  { %v10309_v57 = vor.u32 %v11722_v23, %v10308_v17  ;;  %v10386_v9 = vld [vmem:[#allocation12 + $0x21c] sm:$0xf0]  ;;  %v11802_v17 = vld [vmem:[#allocation12 + $0x3fc] sm:$0xf]  ;;  %v10638_v23 = vld [vmem:[#allocation12 + $0x414] sm:$0xf0] }
 0x3c8   :  { %7029 = vmatmul.bf16.vlgmr.msra.gmra.mxu2 %v12701_v46  ;;  %7071 = vmatmul.bf16.vlgmr.msrb.gmra.mxu1 %v12697_v6 }
 0x3c9   :  { %7161 = vmatpush.bf16.msrb.mxu0 %v10333_v61  ;;  %7123 = vmatpush.bf16.msra.mxu1 %v10441_v48  ;;  %v11805_v61 = vld [vmem:[#allocation12 + $0x410] sm:$0xf0]  ;;  %v5540_v16 = vpop.f32.mrf.mxu2  ;;  %v10608_v48 = vld [vmem:[#allocation12 + $0x3c0] sm:$0xf] }
 0x3ca   :  { %7113 = vmatmul.bf16.vlgmr.msra.gmra.mxu0 %v12693_v47  ;;  %7133 = vmatpush.bf16.msra.mxu2 %v10777_v11  ;;  %v10637_v3 = vor.u32 %v11805_v61, %v10636_v27  ;;  %v11798_v11 = vld [vmem:[#allocation12 + $0x3d8] sm:$0xf0]  ;;  %v10944_v27 = vld [vmem:[#allocation12 + $0x660] sm:$0xf]  ;;  %v10281_v61 = vor.u32 %v11715_v4, %v10280_v2  ;;  %v10140_v4 = vld [vmem:[#allocation12 + $0x10] sm:$0xf] }
 0x3cb   :  { %v10609_v32 = vor.u32 %v11798_v11, %v10608_v48  ;;  %v11875_v48 = vld [vmem:[#allocation12 + $0x640] sm:$0xf0]  ;;  %v11732_v11 = vld [vmem:[#allocation12 + $0x1cc] sm:$0xf]  ;;  %v10610_v2 = vld [vmem:[#allocation12 + $0x3dc] sm:$0xf0] }
 0x3cd   :  { %7162 = vmatpush.bf16.msrb.mxu0 %v10305_v43  ;;  %7124 = vmatpush.bf16.msra.mxu1 %v10413_v49  ;;  %v5527_v43 = vadd.f32 %v5526_v10, %v5513_v29  ;;  %v10336_v49 = vld [vmem:[#allocation12 + $0x198] sm:$0xf]  ;;  %v11882_v29 = vld [vmem:[#allocation12 + $0x678] sm:$0xf0] }
 0x3ce   :  { %7134 = vmatpush.bf16.msra.mxu2 %v10749_v0  ;;  %v10945_v10 = vor.u32 %v11882_v29, %v10944_v27  ;;  %v11726_v29 = vld [vmem:[#allocation12 + $0x19c] sm:$0xf] }
 0x3cf   :  { %v5541_v0 = vadd.f32 %v5540_v16, %v5527_v43  ;;  %v10916_v16 = vld [vmem:[#allocation12 + $0x628] sm:$0xf] }
 0x3d0   :  { %v10358_v43 = vld [vmem:[#allocation12 + $0x1e4] sm:$0xf0] }
 0x3d1   :  { %7163 = vmatpush.bf16.msrb.mxu0 %v10277_v28  ;;  %7125 = vmatpush.bf16.msra.mxu1 %v10385_v39  ;;  %v10473_v39 = vor.u32 %v11760_v58, %v10470_v26  ;;  %v11701_v58 = vld [vmem:[#allocation12 + $0xd0] sm:$0xf0]  ;;  %v10560_v26 = vld [vmem:[#allocation12 + $0x358] sm:$0xf] }
 0x3d2   :  { %7135 = vmatpush.bf16.msra.mxu2 %v10721_v38  ;;  %v10337_v38 = vor.u32 %v11729_v22, %v10336_v49  ;;  %v11785_v49 = vld [vmem:[#allocation12 + $0x370] sm:$0xf0]  ;;  %v10917_v22 = vor.u32 %v11875_v48, %v10916_v16  ;;  %v10448_v48 = vld [vmem:[#allocation12 + $0x278] sm:$0xf] }
 0x3d3   :  { %v10561_v25 = vor.u32 %v11785_v49, %v10560_v26  ;;  %v11893_v16 = vld [vmem:[#allocation12 + $0x6d4] sm:$0xf] }
 0x3d5   :  { %7164 = vmatpush.bf16.msrb.mxu0 %v10249_v44  ;;  %7126 = vmatpush.bf16.msra.mxu1 %v10357_v50  ;;  %v11000_v44 = vld [vmem:[#allocation12 + $0x6d0] sm:$0xf] }
 0x3d6   :  { %7136 = vmatpush.bf16.msra.mxu2 %v10693_v59  ;;  %v11001_v51 = vor.u32 %v11896_v42, %v11000_v44  ;;  %v10445_v59 = vor.u32 %v11753_v52, %v10442_v15  ;;  %v10532_v44 = vld [vmem:[#allocation12 + $0x320] sm:$0xf]  ;;  %v11778_v42 = vld [vmem:[#allocation12 + $0x338] sm:$0xf0] }
 0x3d8   :  { %7085 = vmatmul.bf16.vlgmr.msrb.gmra.mxu2 %v12701_v46  ;;  %7127 = vmatmul.bf16.vlgmr.msra.gmra.mxu1 %v12697_v6 }
 0x3d9   :  { %v5552_v14 = vpop.f32.mrf.mxu3  ;;  %7165 = vmatpush.bf16.msrb.mxu0 %v10221_v40  ;;  %7175 = vmatpush.bf16.msrb.mxu1 %v10557_v55  ;;  %v10781_v40 = vor.u32 %v11837_v8, %v10778_v56  ;;  %v11889_v55 = vld [vmem:[#allocation12 + $0x6b0] sm:$0xf0]  ;;  %v10860_v8 = vld [vmem:[#allocation12 + $0x5b8] sm:$0xf] }
 0x3da   :  { %7137 = vmatpush.bf16.msra.mxu2 %v10665_v21  ;;  %v5553_v28 = vadd.f32 %v5552_v14, %v5539_v63  ;;  %v10973_v14 = vor.u32 %v11889_v55, %v10972_v45  ;;  %v10417_v21 = vor.u32 %v11746_v33, %v10414_v19  ;;  %v10253_v63 = vor.u32 %v11708_v53, %v10252_v41  ;;  %v11861_v56 = vld [vmem:[#allocation12 + $0x5d0] sm:$0xf0]  ;;  %v10832_v33 = vld [vmem:[#allocation12 + $0x580] sm:$0xf] }
 0x3db   :  { %v10861_v45 = vor.u32 %v11861_v56, %v10860_v8  ;;  %v10641_v55 = vor.u32 %v11802_v17, %v10638_v23  ;;  %v10392_v56 = vld [vmem:[#allocation12 + $0x208] sm:$0xf]  ;;  %v11827_v17 = vld [vmem:[#allocation12 + $0x4c0] sm:$0xf0]  ;;  %v11705_v23 = vld [vmem:[#allocation12 + $0xf4] sm:$0xf] }
 0x3dc   :  { %v5560_v60 = vmax.f32 %v5553_v28, 0.0 }
 0x3dd   :  { %7166 = vmatpush.bf16.msrb.mxu0 %v10193_v31  ;;  %7176 = vmatpush.bf16.msrb.mxu1 %v10529_v62  ;;  %v10753_v31 = vor.u32 %v11830_v34, %v10750_v24  ;;  %v11739_v62 = vld [vmem:[#allocation12 + $0x204] sm:$0xf] }
 0x3de   :  { %7138 = vmatpush.bf16.msra.mxu2 %v10637_v3  ;;  %v10389_v3 = vor.u32 %v11739_v62, %v10386_v9  ;;  %v11795_v24 = vld [vmem:[#allocation12 + $0x3c4] sm:$0xf]  ;;  %v10338_v62 = vld [vmem:[#allocation12 + $0x1b4] sm:$0xf0]  ;;  %v10804_v9 = vld [vmem:[#allocation12 + $0x548] sm:$0xf] }
 0x3e1   :  { %v5554_v35 = vpop.f32.mrf.mxu3  ;;  %7167 = vmatpush.bf16.msrb.mxu0 %v10165_v37  ;;  %7177 = vmatpush.bf16.msrb.mxu1 %v10501_v20  ;;  %v10725_v37 = vor.u32 %v11823_v54, %v10722_v36  ;;  %v11816_v20 = vld [vmem:[#allocation12 + $0x46c] sm:$0xf]  ;;  %v11847_v54 = vld [vmem:[#allocation12 + $0x560] sm:$0xf0] }
 0x3e2   :  { %v5555_v1 = vadd.f32 %v5554_v35, %v5541_v0  ;;  %7139 = vmatpush.bf16.msra.mxu2 %v10609_v32  ;;  %v10361_v0 = vor.u32 %v11732_v11, %v10358_v43  ;;  %v10697_v28 = vor.u32 %v11816_v20, %v10694_v18  ;;  %v10888_v35 = vld [vmem:[#allocation12 + $0x5f0] sm:$0xf]  ;;  %v11868_v32 = vld [vmem:[#allocation12 + $0x608] sm:$0xf0]  ;;  %v11757_v11 = vld [vmem:[#allocation12 + $0x290] sm:$0xf0] }
 0x3e3   :  { %v10889_v52 = vor.u32 %v11868_v32, %v10888_v35  ;;  %v11788_v36 = vld [vmem:[#allocation12 + $0x38c] sm:$0xf]  ;;  %v10784_v43 = vld [vmem:[#allocation12 + $0x518] sm:$0xf]  ;;  %v11841_v20 = vld [vmem:[#allocation12 + $0x530] sm:$0xf0]  ;;  %v10449_v49 = vor.u32 %v11757_v11, %v10448_v48 }
 0x3e4   :  { %v5564_v5 = vmax.f32 %v5555_v1, 0.0  ;;  %v10666_v1 = vld [vmem:[#allocation12 + $0x44c] sm:$0xf0]  ;;  %v11719_v18 = vld [vmem:[#allocation12 + $0x164] sm:$0xf] }
 0x3e5   :  { %7168 = vmatpush.bf16.msrb.mxu0 %v10137_v12  ;;  %7178 = vmatpush.bf16.msrb.mxu1 %v10473_v39  ;;  %v10225_v12 = vor.u32 %v11701_v58, %v10224_v13  ;;  %v10196_v39 = vld [vmem:[#allocation12 + $0x80] sm:$0xf]  ;;  %v10669_v15 = vor.u32 %v11809_v30, %v10666_v1  ;;  %v11834_v30 = vld [vmem:[#allocation12 + $0x4f8] sm:$0xf0]  ;;  %v11712_v1 = vld [vmem:[#allocation12 + $0x12c] sm:$0xf] }
 0x3e6   :  { %v12709_v50 = vpack.c.bf16 %v5564_v5, %v5560_v60  ;;  %7140 = vmatpush.bf16.msra.mxu2 %v10581_v7  ;;  %v10533_v5 = vor.u32 %v11778_v42, %v10532_v44  ;;  %v10168_v7 = vld [vmem:[#allocation12 + $0x48] sm:$0xf]  ;;  %v10310_v13 = vld [vmem:[#allocation12 + $0x17c] sm:$0xf0]  ;;  %v11879_v42 = vld [vmem:[#allocation12 + $0x664] sm:$0xf] }
 0x3e7   :  { %v10313_v35 = vor.u32 %v11719_v18, %v10310_v13  ;;  %v10420_v32 = vld [vmem:[#allocation12 + $0x240] sm:$0xf]  ;;  %v11858_v48 = vld [vmem:[#allocation12 + $0x5bc] sm:$0xf]  ;;  %v10862_v11 = vld [vmem:[#allocation12 + $0x5d4] sm:$0xf0] }
 0x3e8   :  { %7043 = vmatmul.bf16.vlgmr.msra.gmra.mxu3 %v12709_v50  ;;  %7169 = vmatmul.bf16.vlgmr.msrb.gmra.mxu0 %v12693_v47  ;;  %v11806_v13 = vld [vmem:[#allocation12 + $0x418] sm:$0xf0] }
 0x3e9   :  { %7217 = vmatpush.bf16.msra.mxu0 %v10337_v38  ;;  %7147 = vmatpush.bf16.msra.mxu3 %v11001_v51  ;;  %v11694_v38 = vld [vmem:[#allocation12 + $0x98] sm:$0xf0]  ;;  %v11687_v51 = vld [vmem:[#allocation12 + $0x60] sm:$0xf0] }
 0x3ea   :  { %7179 = vmatpush.bf16.msrb.mxu1 %v10445_v59  ;;  %7189 = vmatpush.bf16.msrb.mxu2 %v10781_v40  ;;  %v10197_v60 = vor.u32 %v11694_v38, %v10196_v39  ;;  %v10504_v59 = vld [vmem:[#allocation12 + $0x2e8] sm:$0xf]  ;;  %v11771_v40 = vld [vmem:[#allocation12 + $0x300] sm:$0xf0]  ;;  %v10169_v19 = vor.u32 %v11687_v51, %v10168_v7  ;;  %v10254_v7 = vld [vmem:[#allocation12 + $0x10c] sm:$0xf0] }
 0x3eb   :  { %7141 = vmatmul.bf16.vlgmr.msra.gmra.mxu2 %v12701_v46  ;;  %v10505_v34 = vor.u32 %v11771_v40, %v10504_v59  ;;  %v10282_v39 = vld [vmem:[#allocation12 + $0x144] sm:$0xf0]  ;;  %v11872_v40 = vld [vmem:[#allocation12 + $0x62c] sm:$0xf] }
 0x3ec   :  { %v10285_v8 = vor.u32 %v11712_v1, %v10282_v39  ;;  %v11677_v39 = vld [vmem:[#allocation12 + $0x14] sm:$0xf] }
 0x3ed   :  { %7218 = vmatpush.bf16.msra.mxu0 %v10309_v57  ;;  %7148 = vmatpush.bf16.msra.mxu3 %v10973_v14  ;;  %v11854_v57 = vld [vmem:[#allocation12 + $0x598] sm:$0xf0]  ;;  %v11680_v14 = vld [vmem:[#allocation12 + $0x28] sm:$0xf0] }
 0x3ee   :  { %7180 = vmatpush.bf16.msrb.mxu1 %v10417_v21  ;;  %7190 = vmatpush.bf16.msrb.mxu2 %v10753_v31  ;;  %v10476_v21 = vld [vmem:[#allocation12 + $0x2b0] sm:$0xf]  ;;  %v11764_v31 = vld [vmem:[#allocation12 + $0x2c8] sm:$0xf0]  ;;  %v10833_v27 = vor.u32 %v11854_v57, %v10832_v33  ;;  %v10141_v41 = vor.u32 %v11680_v14, %v10140_v4  ;;  %v10257_v33 = vor.u32 %v11705_v23, %v10254_v7  ;;  %v10226_v4 = vld [vmem:[#allocation12 + $0xd4] sm:$0xf0] }
 0x3ef   :  { %v10477_v53 = vor.u32 %v11764_v31, %v10476_v21  ;;  %v10364_v57 = vld [vmem:[#allocation12 + $0x1d0] sm:$0xf]  ;;  %v11782_v21 = vld [vmem:[#allocation12 + $0x35c] sm:$0xf]  ;;  %v10562_v31 = vld [vmem:[#allocation12 + $0x374] sm:$0xf0] }
 0x3f0   :  { %v11008_v23 = vld [vmem:[#allocation12 + $0x6d8] sm:$0xf]  ;;  %v11897_v7 = vld [vmem:[#allocation12 + $0x6f0] sm:$0xf0] }
 0x3f1   :  { %7219 = vmatpush.bf16.msra.mxu0 %v10281_v61  ;;  %7149 = vmatpush.bf16.msra.mxu3 %v10945_v10  ;;  %v10613_v61 = vor.u32 %v11795_v24, %v10610_v2  ;;  %v10582_v10 = vld [vmem:[#allocation12 + $0x3a4] sm:$0xf0]  ;;  %v11820_v24 = vld [vmem:[#allocation12 + $0x488] sm:$0xf0]  ;;  %v11698_v2 = vld [vmem:[#allocation12 + $0xbc] sm:$0xf] }
 0x3f2   :  { %7181 = vmatpush.bf16.msrb.mxu1 %v10389_v3  ;;  %7191 = vmatpush.bf16.msrb.mxu2 %v10725_v37  ;;  %v11002_v3 = vld [vmem:[#allocation12 + $0x6ec] sm:$0xf0]  ;;  %v10341_v37 = vor.u32 %v11726_v29, %v10338_v62  ;;  %v10585_v58 = vor.u32 %v11788_v36, %v10582_v10  ;;  %v11865_v29 = vld [vmem:[#allocation12 + $0x5f4] sm:$0xf]  ;;  %v10565_v36 = vor.u32 %v11782_v21, %v10562_v31  ;;  %v10198_v10 = vld [vmem:[#allocation12 + $0x9c] sm:$0xf0] }
 0x3f3   :  { %v11005_v26 = vor.u32 %v11893_v16, %v11002_v3  ;;  %v10890_v62 = vld [vmem:[#allocation12 + $0x60c] sm:$0xf0]  ;;  %v11775_v3 = vld [vmem:[#allocation12 + $0x324] sm:$0xf]  ;;  %v10980_v21 = vld [vmem:[#allocation12 + $0x6a0] sm:$0xf] }
 0x3f4   :  { %v10893_v16 = vor.u32 %v11865_v29, %v10890_v62  ;;  %v11890_v31 = vld [vmem:[#allocation12 + $0x6b8] sm:$0xf0]  ;;  %v11747_v62 = vld [vmem:[#allocation12 + $0x244] sm:$0xf] }
 0x3f5   :  { %7220 = vmatpush.bf16.msra.mxu0 %v10253_v63  ;;  %7150 = vmatpush.bf16.msra.mxu3 %v10917_v22  ;;  %v10805_v63 = vor.u32 %v11847_v54, %v10804_v9  ;;  %v11886_v22 = vld [vmem:[#allocation12 + $0x69c] sm:$0xf]  ;;  %v10229_v9 = vor.u32 %v11698_v2, %v10226_v4  ;;  %v10672_v54 = vld [vmem:[#allocation12 + $0x438] sm:$0xf]  ;;  %v10316_v2 = vld [vmem:[#allocation12 + $0x168] sm:$0xf] }
 0x3f6   :  { %7182 = vmatpush.bf16.msrb.mxu1 %v10361_v0  ;;  %7192 = vmatpush.bf16.msrb.mxu2 %v10697_v28  ;;  %v10974_v0 = vld [vmem:[#allocation12 + $0x6b4] sm:$0xf0]  ;;  %v10785_v28 = vor.u32 %v11841_v20, %v10784_v43  ;;  %v10644_v20 = vld [vmem:[#allocation12 + $0x400] sm:$0xf]  ;;  %v11723_v4 = vld [vmem:[#allocation12 + $0x180] sm:$0xf0] }
 0x3f7   :  { %v10977_v38 = vor.u32 %v11886_v22, %v10974_v0  ;;  %v11768_v22 = vld [vmem:[#allocation12 + $0x2ec] sm:$0xf]  ;;  %v10506_v0 = vld [vmem:[#allocation12 + $0x304] sm:$0xf0] }
 0x3f8   :  { %7099 = vmatmul.bf16.vlgmr.msrb.gmra.mxu3 %v12709_v50  ;;  %v10509_v1 = vor.u32 %v11768_v22, %v10506_v0  ;;  %v11876_v22 = vld [vmem:[#allocation12 + $0x648] sm:$0xf0] }
 0x3f9   :  { %7221 = vmatpush.bf16.msra.mxu0 %v10225_v12  ;;  %7151 = vmatpush.bf16.msra.mxu3 %v10889_v52  ;;  %v11750_v12 = vld [vmem:[#allocation12 + $0x258] sm:$0xf0]  ;;  %v10946_v52 = vld [vmem:[#allocation12 + $0x67c] sm:$0xf0] }
 0x3fa   :  { %7231 = vmatpush.bf16.msra.mxu1 %v10561_v25  ;;  %7193 = vmatpush.bf16.msrb.mxu2 %v10669_v15  ;;  %v10756_v25 = vld [vmem:[#allocation12 + $0x4e0] sm:$0xf]  ;;  %v10421_v44 = vor.u32 %v11750_v12, %v10420_v32  ;;  %v10949_v51 = vor.u32 %v11879_v42, %v10946_v52  ;;  %v10645_v32 = vor.u32 %v11806_v13, %v10644_v20  ;;  %v10478_v52 = vld [vmem:[#allocation12 + $0x2cc] sm:$0xf0]  ;;  %v11824_v20 = vld [vmem:[#allocation12 + $0x4ac] sm:$0xf] }
 0x3fb   :  { %7183 = vmatmul.bf16.vlgmr.msrb.gmra.mxu1 %v12697_v6  ;;  %v10757_v15 = vor.u32 %v11834_v30, %v10756_v25  ;;  %v10616_v25 = vld [vmem:[#allocation12 + $0x3c8] sm:$0xf]  ;;  %v11799_v30 = vld [vmem:[#allocation12 + $0x3e0] sm:$0xf0] }
 0x3fd   :  { %7222 = vmatpush.bf16.msra.mxu0 %v10197_v60  ;;  %7152 = vmatpush.bf16.msra.mxu3 %v10861_v45  ;;  %v11743_v60 = vld [vmem:[#allocation12 + $0x220] sm:$0xf0]  ;;  %v10918_v45 = vld [vmem:[#allocation12 + $0x644] sm:$0xf0] }
 0x3fe   :  { %7232 = vmatpush.bf16.msra.mxu1 %v10533_v5  ;;  %7194 = vmatpush.bf16.msrb.mxu2 %v10641_v55  ;;  %v10728_v5 = vld [vmem:[#allocation12 + $0x4a8] sm:$0xf]  ;;  %v10393_v59 = vor.u32 %v11743_v60, %v10392_v56  ;;  %v10921_v14 = vor.u32 %v11872_v40, %v10918_v45  ;;  %v11844_v56 = vld [vmem:[#allocation12 + $0x54c] sm:$0xf]  ;;  %v10588_v40 = vld [vmem:[#allocation12 + $0x390] sm:$0xf] }
 0x3ff   :  { %v10729_v55 = vor.u32 %v11827_v17, %v10728_v5  ;;  %v10806_v60 = vld [vmem:[#allocation12 + $0x564] sm:$0xf0]  ;;  %v10617_v5 = vor.u32 %v11799_v30, %v10616_v25  ;;  %v11792_v45 = vld [vmem:[#allocation12 + $0x3a8] sm:$0xf0]  ;;  %v11817_v25 = vld [vmem:[#allocation12 + $0x474] sm:$0xf] }
 0x400   :  { %v10702_v30 = vld [vmem:[#allocation12 + $0x48c] sm:$0xf0] }
 0x401   :  { %7223 = vmatpush.bf16.msra.mxu0 %v10169_v19  ;;  %7153 = vmatpush.bf16.msra.mxu3 %v10833_v27  ;;  %v11736_v19 = vld [vmem:[#allocation12 + $0x1e8] sm:$0xf0] }
 0x402   :  { %7233 = vmatpush.bf16.msra.mxu1 %v10505_v34  ;;  %7195 = vmatpush.bf16.msrb.mxu2 %v10613_v61  ;;  %v10700_v34 = vld [vmem:[#allocation12 + $0x470] sm:$0xf]  ;;  %v10365_v27 = vor.u32 %v11736_v19, %v10364_v57  ;;  %v10450_v57 = vld [vmem:[#allocation12 + $0x294] sm:$0xf0]  ;;  %v11838_v19 = vld [vmem:[#allocation12 + $0x51c] sm:$0xf] }
 0x403   :  { %v10701_v61 = vor.u32 %v11820_v24, %v10700_v34  ;;  %v10786_v34 = vld [vmem:[#allocation12 + $0x534] sm:$0xf0]  ;;  %v11009_v24 = vor.u32 %v11897_v7, %v11008_v23  ;;  %v10204_v7 = vld [vmem:[#allocation12 + $0x88] sm:$0xf] }
 0x404   :  { %v10789_v29 = vor.u32 %v11838_v19, %v10786_v34  ;;  %v10674_v23 = vld [vmem:[#allocation12 + $0x454] sm:$0xf0] }
 0x405   :  { %7224 = vmatpush.bf16.msra.mxu0 %v10141_v41  ;;  %7154 = vmatpush.bf16.msra.mxu3 %v10805_v63  ;;  %v11813_v41 = vld [vmem:[#allocation12 + $0x450] sm:$0xf0] }
 0x406   :  { %7234 = vmatpush.bf16.msra.mxu1 %v10477_v53  ;;  %7196 = vmatpush.bf16.msrb.mxu2 %v10585_v58  ;;  %v11691_v53 = vld [vmem:[#allocation12 + $0x84] sm:$0xf]  ;;  %v10673_v43 = vor.u32 %v11813_v41, %v10672_v54  ;;  %v11684_v58 = vld [vmem:[#allocation12 + $0x4c] sm:$0xf]  ;;  %v10981_v41 = vor.u32 %v11890_v31, %v10980_v21  ;;  %v10512_v31 = vld [vmem:[#allocation12 + $0x2f0] sm:$0xf] }
 0x407   :  { %v10201_v63 = vor.u32 %v11691_v53, %v10198_v10  ;;  %v11831_v54 = vld [vmem:[#allocation12 + $0x4e4] sm:$0xf]  ;;  %v10288_v53 = vld [vmem:[#allocation12 + $0x130] sm:$0xf]  ;;  %v11716_v10 = vld [vmem:[#allocation12 + $0x148] sm:$0xf0] }
 0x408   :  { %7225 = vmatmul.bf16.vlgmr.msra.gmra.mxu0 %v12693_v47  ;;  %7155 = vmatmul.bf16.vlgmr.msra.gmra.mxu3 %v12709_v50  ;;  %v11688_v21 = vld [vmem:[#allocation12 + $0x68] sm:$0xf0] }
 0x409   :  { %7273 = vmatpush.bf16.msrb.mxu0 %v10341_v37  ;;  %7203 = vmatpush.bf16.msrb.mxu3 %v11005_v26  ;;  %v10534_v37 = vld [vmem:[#allocation12 + $0x33c] sm:$0xf0]  ;;  %v10170_v26 = vld [vmem:[#allocation12 + $0x64] sm:$0xf0] }
 0x40a   :  { %7235 = vmatpush.bf16.msra.mxu1 %v10449_v49  ;;  %7245 = vmatpush.bf16.msra.mxu2 %v10785_v28  ;;  %v10537_v18 = vor.u32 %v11775_v3, %v10534_v37  ;;  %v10865_v49 = vor.u32 %v11858_v48, %v10862_v11  ;;  %v11851_v28 = vld [vmem:[#allocation12 + $0x584] sm:$0xf]  ;;  %v10173_v12 = vor.u32 %v11684_v58, %v10170_v26  ;;  %v11740_v11 = vld [vmem:[#allocation12 + $0x20c] sm:$0xf]  ;;  %v10260_v58 = vld [vmem:[#allocation12 + $0xf8] sm:$0xf] }
 0x40b   :  { %7197 = vmatmul.bf16.vlgmr.msrb.gmra.mxu2 %v12701_v46  ;;  %v11883_v3 = vld [vmem:[#allocation12 + $0x680] sm:$0xf0]  ;;  %v11709_v26 = vld [vmem:[#allocation12 + $0x110] sm:$0xf0] }
 0x40d   :  { %7274 = vmatpush.bf16.msrb.mxu0 %v10313_v35  ;;  %7204 = vmatpush.bf16.msrb.mxu3 %v10977_v38  ;;  %v10834_v35 = vld [vmem:[#allocation12 + $0x59c] sm:$0xf0]  ;;  %v10142_v38 = vld [vmem:[#allocation12 + $0x2c] sm:$0xf0] }
 0x40e   :  { %7236 = vmatpush.bf16.msra.mxu1 %v10421_v44  ;;  %7246 = vmatpush.bf16.msra.mxu2 %v10757_v15  ;;  %v11761_v44 = vld [vmem:[#allocation12 + $0x2b4] sm:$0xf]  ;;  %v10837_v42 = vor.u32 %v11851_v28, %v10834_v35  ;;  %v10344_v15 = vld [vmem:[#allocation12 + $0x1a0] sm:$0xf]  ;;  %v10145_v17 = vor.u32 %v11677_v39, %v10142_v38  ;;  %v11702_v38 = vld [vmem:[#allocation12 + $0xd8] sm:$0xf0] }
 0x40f   :  { %v11733_v35 = vld [vmem:[#allocation12 + $0x1d4] sm:$0xf] }
 0x411   :  { %7275 = vmatpush.bf16.msrb.mxu0 %v10285_v8  ;;  %7205 = vmatpush.bf16.msrb.mxu3 %v10949_v51  ;;  %v11730_v8 = vld [vmem:[#allocation12 + $0x1b8] sm:$0xf0]  ;;  %v10481_v51 = vor.u32 %v11761_v44, %v10478_v52  ;;  %v10568_v44 = vld [vmem:[#allocation12 + $0x360] sm:$0xf]  ;;  %v10896_v52 = vld [vmem:[#allocation12 + $0x5f8] sm:$0xf] }
 0x412   :  { %7237 = vmatpush.bf16.msra.mxu1 %v10393_v59  ;;  %7247 = vmatpush.bf16.msra.mxu2 %v10729_v55  ;;  %v10345_v59 = vor.u32 %v11730_v8, %v10344_v15  ;;  %v11754_v55 = vld [vmem:[#allocation12 + $0x27c] sm:$0xf]  ;;  %v11869_v15 = vld [vmem:[#allocation12 + $0x610] sm:$0xf0] }
 0x415   :  { %7276 = vmatpush.bf16.msrb.mxu0 %v10257_v33  ;;  %7206 = vmatpush.bf16.msrb.mxu3 %v10921_v14  ;;  %v10809_v33 = vor.u32 %v11844_v56, %v10806_v60  ;;  %v10589_v14 = vor.u32 %v11792_v45, %v10588_v40  ;;  %v10705_v56 = vor.u32 %v11817_v25, %v10702_v30  ;;  %v10540_v40 = vld [vmem:[#allocation12 + $0x328] sm:$0xf]  ;;  %v11779_v45 = vld [vmem:[#allocation12 + $0x340] sm:$0xf0]  ;;  %v10982_v30 = vld [vmem:[#allocation12 + $0x6bc] sm:$0xf0] }
 0x416   :  { %7238 = vmatpush.bf16.msra.mxu1 %v10365_v27  ;;  %7248 = vmatpush.bf16.msra.mxu2 %v10701_v61  ;;  %v10453_v27 = vor.u32 %v11754_v55, %v10450_v57  ;;  %v10317_v61 = vor.u32 %v11723_v4, %v10316_v2  ;;  %v10868_v55 = vld [vmem:[#allocation12 + $0x5c0] sm:$0xf]  ;;  %v10541_v34 = vor.u32 %v11779_v45, %v10540_v40  ;;  %v10176_v4 = vld [vmem:[#allocation12 + $0x50] sm:$0xf]  ;;  %v11887_v25 = vld [vmem:[#allocation12 + $0x6a4] sm:$0xf] }
 0x417   :  { %v10646_v2 = vld [vmem:[#allocation12 + $0x41c] sm:$0xf0]  ;;  %v11873_v40 = vld [vmem:[#allocation12 + $0x634] sm:$0xf]  ;;  %v10926_v45 = vld [vmem:[#allocation12 + $0x64c] sm:$0xf0] }
 0x419   :  { %7277 = vmatpush.bf16.msrb.mxu0 %v10229_v9  ;;  %7207 = vmatpush.bf16.msrb.mxu3 %v10893_v16  ;;  %v10422_v9 = vld [vmem:[#allocation12 + $0x25c] sm:$0xf0]  ;;  %v10952_v16 = vld [vmem:[#allocation12 + $0x668] sm:$0xf] }
 0x41a   :  { %7287 = vmatpush.bf16.msrb.mxu1 %v10565_v36  ;;  %7249 = vmatpush.bf16.msra.mxu2 %v10673_v43  ;;  %v10758_v36 = vld [vmem:[#allocation12 + $0x4fc] sm:$0xf0]  ;;  %v10425_v37 = vor.u32 %v11747_v62, %v10422_v9  ;;  %v10289_v43 = vor.u32 %v11716_v10, %v10288_v53  ;;  %v10953_v13 = vor.u32 %v11883_v3, %v10952_v16  ;;  %v11855_v62 = vld [vmem:[#allocation12 + $0x5a0] sm:$0xf0]  ;;  %v10148_v53 = vld [vmem:[#allocation12 + $0x18] sm:$0xf] }
 0x41b   :  { %7239 = vmatmul.bf16.vlgmr.msra.gmra.mxu1 %v12697_v6  ;;  %v10761_v48 = vor.u32 %v11831_v54, %v10758_v36  ;;  %v10177_v9 = vor.u32 %v11688_v21, %v10176_v4  ;;  %v11796_v36 = vld [vmem:[#allocation12 + $0x3cc] sm:$0xf]  ;;  %v11681_v16 = vld [vmem:[#allocation12 + $0x30] sm:$0xf0]  ;;  %v10484_v3 = vld [vmem:[#allocation12 + $0x2b8] sm:$0xf] }
 0x41c   :  { %v10898_v4 = vld [vmem:[#allocation12 + $0x614] sm:$0xf0] }
 0x41d   :  { %7278 = vmatpush.bf16.msrb.mxu0 %v10201_v63  ;;  %7208 = vmatpush.bf16.msrb.mxu3 %v10865_v49  ;;  %v10394_v63 = vld [vmem:[#allocation12 + $0x224] sm:$0xf0]  ;;  %v10924_v49 = vld [vmem:[#allocation12 + $0x630] sm:$0xf] }
 0x41e   :  { %7288 = vmatpush.bf16.msrb.mxu1 %v10537_v18  ;;  %7250 = vmatpush.bf16.msra.mxu2 %v10645_v32  ;;  %v10730_v18 = vld [vmem:[#allocation12 + $0x4c4] sm:$0xf0]  ;;  %v10397_v0 = vor.u32 %v11740_v11, %v10394_v63  ;;  %v10366_v32 = vld [vmem:[#allocation12 + $0x1ec] sm:$0xf0]  ;;  %v10925_v39 = vor.u32 %v11876_v22, %v10924_v49  ;;  %v11848_v11 = vld [vmem:[#allocation12 + $0x568] sm:$0xf0] }
 0x41f   :  { %v10733_v28 = vor.u32 %v11824_v20, %v10730_v18  ;;  %v10369_v8 = vor.u32 %v11733_v35, %v10366_v32  ;;  %v11894_v63 = vld [vmem:[#allocation12 + $0x6dc] sm:$0xf]  ;;  %v11010_v20 = vld [vmem:[#allocation12 + $0x6f4] sm:$0xf0]  ;;  %v10149_v18 = vor.u32 %v11681_v16, %v10148_v53  ;;  %v10456_v49 = vld [vmem:[#allocation12 + $0x280] sm:$0xf] }
 0x420   :  { %v11842_v35 = vld [vmem:[#allocation12 + $0x538] sm:$0xf0]  ;;  %v11013_v32 = vor.u32 %v11894_v63, %v11010_v20  ;;  %v11852_v53 = vld [vmem:[#allocation12 + $0x58c] sm:$0xf]  ;;  %v11016_v20 = vld [vmem:[#allocation12 + $0x6e0] sm:$0xf] }
 0x421   :  { %7279 = vmatpush.bf16.msrb.mxu0 %v10173_v12  ;;  %7209 = vmatpush.bf16.msrb.mxu3 %v10837_v42  ;;  %v10261_v12 = vor.u32 %v11709_v26, %v10260_v58  ;;  %v11786_v42 = vld [vmem:[#allocation12 + $0x378] sm:$0xf0]  ;;  %v11789_v58 = vld [vmem:[#allocation12 + $0x394] sm:$0xf]  ;;  %v10590_v26 = vld [vmem:[#allocation12 + $0x3ac] sm:$0xf0] }
 0x422   :  { %7289 = vmatpush.bf16.msrb.mxu1 %v10509_v1  ;;  %7251 = vmatpush.bf16.msra.mxu2 %v10617_v5  ;;  %v10232_v1 = vld [vmem:[#allocation12 + $0xc0] sm:$0xf]  ;;  %v10569_v5 = vor.u32 %v11786_v42, %v10568_v44  ;;  %v11751_v44 = vld [vmem:[#allocation12 + $0x260] sm:$0xf0]  ;;  %v10764_v42 = vld [vmem:[#allocation12 + $0x4e8] sm:$0xf] }
 0x423   :  { %v10233_v60 = vor.u32 %v11702_v38, %v10232_v1  ;;  %v10428_v38 = vld [vmem:[#allocation12 + $0x248] sm:$0xf] }
 0x425   :  { %7280 = vmatpush.bf16.msrb.mxu0 %v10145_v17  ;;  %7210 = vmatpush.bf16.msrb.mxu3 %v10809_v33  ;;  %v11810_v17 = vld [vmem:[#allocation12 + $0x43c] sm:$0xf] }
 0x426   :  { %7290 = vmatpush.bf16.msrb.mxu1 %v10481_v51  ;;  %7252 = vmatpush.bf16.msra.mxu2 %v10589_v14  ;;  %v10897_v51 = vor.u32 %v11869_v15, %v10896_v52  ;;  %v11862_v33 = vld [vmem:[#allocation12 + $0x5d8] sm:$0xf0]  ;;  %v10677_v57 = vor.u32 %v11810_v17, %v10674_v23  ;;  %v11835_v52 = vld [vmem:[#allocation12 + $0x500] sm:$0xf0]  ;;  %v10985_v15 = vor.u32 %v11887_v25, %v10982_v30  ;;  %v10400_v17 = vld [vmem:[#allocation12 + $0x210] sm:$0xf] }
 0x427   :  { %v10869_v14 = vor.u32 %v11862_v33, %v10868_v55  ;;  %v11744_v23 = vld [vmem:[#allocation12 + $0x228] sm:$0xf0]  ;;  %v10372_v33 = vld [vmem:[#allocation12 + $0x1d8] sm:$0xf]  ;;  %v10960_v25 = vld [vmem:[#allocation12 + $0x670] sm:$0xf] }
 0x428   :  { %7281 = vmatmul.bf16.vlgmr.msrb.gmra.mxu0 %v12693_v47  ;;  %7211 = vmatmul.bf16.vlgmr.msrb.gmra.mxu3 %v12709_v50  ;;  %v11884_v30 = vld [vmem:[#allocation12 + $0x688] sm:$0xf0] }
 0x429   :  { %7329 = vmatpush.bf16.msra.mxu0 %v10345_v59  ;;  %7259 = vmatpush.bf16.msra.mxu3 %v11009_v24  ;;  %v11695_v59 = vld [vmem:[#allocation12 + $0xa0] sm:$0xf0] }
 0x42a   :  { %7291 = vmatpush.bf16.msrb.mxu1 %v10453_v27  ;;  %7301 = vmatpush.bf16.msrb.mxu2 %v10789_v29  ;;  %v10205_v19 = vor.u32 %v11695_v59, %v10204_v7  ;;  %v11803_v24 = vld [vmem:[#allocation12 + $0x404] sm:$0xf]  ;;  %v11772_v27 = vld [vmem:[#allocation12 + $0x308] sm:$0xf0]  ;;  %v10840_v29 = vld [vmem:[#allocation12 + $0x588] sm:$0xf] }
 0x42b   :  { %7253 = vmatmul.bf16.vlgmr.msra.gmra.mxu2 %v12701_v46  ;;  %v10513_v54 = vor.u32 %v11772_v27, %v10512_v31  ;;  %v10841_v10 = vor.u32 %v11855_v62, %v10840_v29  ;;  %v10736_v7 = vld [vmem:[#allocation12 + $0x4b0] sm:$0xf]  ;;  %v10680_v31 = vld [vmem:[#allocation12 + $0x440] sm:$0xf]  ;;  %v11814_v27 = vld [vmem:[#allocation12 + $0x458] sm:$0xf0] }
 0x42c   :  { %v11859_v62 = vld [vmem:[#allocation12 + $0x5c4] sm:$0xf] }
 0x42d   :  { %7330 = vmatpush.bf16.msra.mxu0 %v10317_v61  ;;  %7260 = vmatpush.bf16.msra.mxu3 %v10981_v41  ;;  %v10649_v61 = vor.u32 %v11803_v24, %v10646_v2  ;;  %v10618_v41 = vld [vmem:[#allocation12 + $0x3e4] sm:$0xf0]  ;;  %v10929_v24 = vor.u32 %v11873_v40, %v10926_v45  ;;  %v11866_v2 = vld [vmem:[#allocation12 + $0x5fc] sm:$0xf] }
 0x42e   :  { %7292 = vmatpush.bf16.msrb.mxu1 %v10425_v37  ;;  %7302 = vmatpush.bf16.msrb.mxu2 %v10761_v48  ;;  %v11765_v37 = vld [vmem:[#allocation12 + $0x2d0] sm:$0xf0]  ;;  %v10812_v48 = vld [vmem:[#allocation12 + $0x550] sm:$0xf]  ;;  %v10901_v29 = vor.u32 %v11866_v2, %v10898_v4 }
 0x42f   :  { %v10813_v22 = vor.u32 %v11848_v11, %v10812_v48  ;;  %v11845_v11 = vld [vmem:[#allocation12 + $0x554] sm:$0xf] }
 0x431   :  { %7331 = vmatpush.bf16.msra.mxu0 %v10289_v43  ;;  %7261 = vmatpush.bf16.msra.mxu3 %v10953_v13  ;;  %v10621_v43 = vor.u32 %v11796_v36, %v10618_v41  ;;  %v10485_v13 = vor.u32 %v11765_v37, %v10484_v3  ;;  %v11807_v36 = vld [vmem:[#allocation12 + $0x420] sm:$0xf0]  ;;  %v10624_v3 = vld [vmem:[#allocation12 + $0x3d0] sm:$0xf]  ;;  %v11800_v37 = vld [vmem:[#allocation12 + $0x3e8] sm:$0xf0] }
 0x432   :  { %7293 = vmatpush.bf16.msrb.mxu1 %v10397_v0  ;;  %7303 = vmatpush.bf16.msrb.mxu2 %v10733_v28  ;;  %v11758_v0 = vld [vmem:[#allocation12 + $0x298] sm:$0xf0]  ;;  %v10792_v28 = vld [vmem:[#allocation12 + $0x520] sm:$0xf]  ;;  %v10625_v63 = vor.u32 %v11800_v37, %v10624_v3 }
 0x433   :  { %v10457_v1 = vor.u32 %v11758_v0, %v10456_v49  ;;  %v10988_v0 = vld [vmem:[#allocation12 + $0x6a8] sm:$0xf] }
 0x435   :  { %7332 = vmatpush.bf16.msra.mxu0 %v10261_v12  ;;  %7262 = vmatpush.bf16.msra.mxu3 %v10925_v39  ;;  %v10593_v12 = vor.u32 %v11789_v58, %v10590_v26  ;;  %v10793_v39 = vor.u32 %v11842_v35, %v10792_v28  ;;  %v11793_v58 = vld [vmem:[#allocation12 + $0x3b0] sm:$0xf0]  ;;  %v11891_v28 = vld [vmem:[#allocation12 + $0x6c0] sm:$0xf0]  ;;  %v7016_v35 = vpop.f32.mrf.mxu1 }
 0x436   :  { %7294 = vmatpush.bf16.msrb.mxu1 %v10369_v8  ;;  %7304 = vmatpush.bf16.msrb.mxu2 %v10705_v56  ;;  %v11880_v8 = vld [vmem:[#allocation12 + $0x66c] sm:$0xf]  ;;  %v10954_v56 = vld [vmem:[#allocation12 + $0x684] sm:$0xf0] }
 0x437   :  { %v10957_v59 = vor.u32 %v11880_v8, %v10954_v56 }
 0x439   :  { %7333 = vmatpush.bf16.msra.mxu0 %v10233_v60  ;;  %7263 = vmatpush.bf16.msra.mxu3 %v10897_v51  ;;  %v10429_v60 = vor.u32 %v11751_v44, %v10428_v38  ;;  %v11828_v51 = vld [vmem:[#allocation12 + $0x4c8] sm:$0xf0]  ;;  %v10932_v44 = vld [vmem:[#allocation12 + $0x638] sm:$0xf] }
 0x43a   :  { %7343 = vmatpush.bf16.msra.mxu1 %v10569_v5  ;;  %7305 = vmatpush.bf16.msrb.mxu2 %v10677_v57  ;;  %v10765_v5 = vor.u32 %v11835_v52, %v10764_v42  ;;  %v10737_v55 = vor.u32 %v11828_v51, %v10736_v7  ;;  %v11737_v57 = vld [vmem:[#allocation12 + $0x1f0] sm:$0xf0] }
 0x43b   :  { %7295 = vmatmul.bf16.vlgmr.msrb.gmra.mxu1 %v12697_v6  ;;  %v11877_v42 = vld [vmem:[#allocation12 + $0x650] sm:$0xf0] }
 0x43d   :  { %7334 = vmatpush.bf16.msra.mxu0 %v10205_v19  ;;  %7264 = vmatpush.bf16.msra.mxu3 %v10869_v14  ;;  %v10708_v19 = vld [vmem:[#allocation12 + $0x478] sm:$0xf]  ;;  %v10373_v14 = vor.u32 %v11737_v57, %v10372_v33  ;;  %v7018_v56 = vpop.f32.mrf.mxu1 }
 0x43e   :  { %7344 = vmatpush.bf16.msra.mxu1 %v10541_v34  ;;  %7306 = vmatpush.bf16.msrb.mxu2 %v10649_v61  ;;  %v11821_v34 = vld [vmem:[#allocation12 + $0x490] sm:$0xf0]  ;;  %v10870_v61 = vld [vmem:[#allocation12 + $0x5dc] sm:$0xf0] }
 0x43f   :  { %v10709_v21 = vor.u32 %v11821_v34, %v10708_v19  ;;  %v10873_v41 = vor.u32 %v11859_v62, %v10870_v61  ;;  %v10848_v19 = vld [vmem:[#allocation12 + $0x590] sm:$0xf]  ;;  %v11856_v34 = vld [vmem:[#allocation12 + $0x5a8] sm:$0xf0]  ;;  %v11849_v62 = vld [vmem:[#allocation12 + $0x570] sm:$0xf0] }
 0x441   :  { %7335 = vmatpush.bf16.msra.mxu0 %v10177_v9  ;;  %7265 = vmatpush.bf16.msra.mxu3 %v10841_v10  ;;  %v10681_v9 = vor.u32 %v11814_v27, %v10680_v31  ;;  %v10842_v10 = vld [vmem:[#allocation12 + $0x5a4] sm:$0xf0] }
 0x442   :  { %7345 = vmatpush.bf16.msra.mxu1 %v10513_v54  ;;  %7307 = vmatpush.bf16.msrb.mxu2 %v10621_v43  ;;  %v10652_v54 = vld [vmem:[#allocation12 + $0x408] sm:$0xf]  ;;  %v10845_v48 = vor.u32 %v11852_v53, %v10842_v10  ;;  %v10814_v43 = vld [vmem:[#allocation12 + $0x56c] sm:$0xf0] }
 0x443   :  { %v10653_v16 = vor.u32 %v11807_v36, %v10652_v54  ;;  %v10817_v26 = vor.u32 %v11845_v11, %v10814_v43 }
 0x445   :  { %7336 = vmatpush.bf16.msra.mxu0 %v10149_v18  ;;  %7266 = vmatpush.bf16.msra.mxu3 %v10813_v22  ;;  %v11898_v18 = vld [vmem:[#allocation12 + $0x6f8] sm:$0xf0]  ;;  %v7072_v2 = vpop.f32.mrf.mxu1 }
 0x446   :  { %7346 = vmatpush.bf16.msra.mxu1 %v10485_v13  ;;  %7308 = vmatpush.bf16.msrb.mxu2 %v10593_v12  ;;  %v10596_v13 = vld [vmem:[#allocation12 + $0x398] sm:$0xf]  ;;  %v11017_v49 = vor.u32 %v11898_v18, %v11016_v20 }
 0x447   :  { %v10597_v22 = vor.u32 %v11793_v58, %v10596_v13 }
 0x448   :  { %7337 = vmatmul.bf16.vlgmr.msra.gmra.mxu0 %v12693_v47  ;;  %7267 = vmatmul.bf16.vlgmr.msra.gmra.mxu3 %v12709_v50  ;;  %v10401_v47 = vor.u32 %v11744_v23, %v10400_v17 }
 0x449   :  { %7315 = vmatpush.bf16.msrb.mxu3 %v11013_v32  ;;  %7309 = vmatmul.bf16.vlgmr.msrb.gmra.mxu2 %v12701_v46  ;;  %v10989_v32 = vor.u32 %v11891_v28, %v10988_v0 }
 0x44a   :  { %7347 = vmatpush.bf16.msra.mxu1 %v10457_v1  ;;  %7357 = vmatpush.bf16.msra.mxu2 %v10793_v39  ;;  %v12728_v1 = vld [vmem:[#allocation13] sm:$0xff]  ;;  %v10961_v39 = vor.u32 %v11884_v30, %v10960_v25 }
 0x44b   :  { %v7030_v12 = vpop.f32.mrf.mxu2  ;;  %v5827_v38 = vperm.slane %v12728_v1, 0 }
 0x44d   :  { %7316 = vmatpush.bf16.msrb.mxu3 %v10985_v15  ;;  %v10933_v15 = vor.u32 %v11877_v42, %v10932_v44 }
 0x44e   :  { %7348 = vmatpush.bf16.msra.mxu1 %v10429_v60  ;;  %7358 = vmatpush.bf16.msra.mxu2 %v10765_v5  ;;  %v10904_v60 = vld [vmem:[#allocation12 + $0x600] sm:$0xf]  ;;  %v11870_v5 = vld [vmem:[#allocation12 + $0x618] sm:$0xf0] }
 0x44f   :  { %v10905_v7 = vor.u32 %v11870_v5, %v10904_v60 }
 0x451   :  { %7317 = vmatpush.bf16.msrb.mxu3 %v10957_v59  ;;  %v10876_v59 = vld [vmem:[#allocation12 + $0x5c8] sm:$0xf] }
 0x452   :  { %7349 = vmatpush.bf16.msra.mxu1 %v10401_v47  ;;  %7359 = vmatpush.bf16.msra.mxu2 %v10737_v55 }
 0x453   :  { %v7032_v23 = vpop.f32.mrf.mxu2 }
 0x455   :  { %7318 = vmatpush.bf16.msrb.mxu3 %v10929_v24 }
 0x456   :  { %7350 = vmatpush.bf16.msra.mxu1 %v10373_v14  ;;  %7360 = vmatpush.bf16.msra.mxu2 %v10709_v21  ;;  %v10849_v14 = vor.u32 %v11856_v34, %v10848_v19  ;;  %v5828_v21 = vperm.slane %v12728_v1, 1 }
 0x459   :  { %7319 = vmatpush.bf16.msrb.mxu3 %v10901_v29  ;;  %7351 = vmatmul.bf16.vlgmr.msra.gmra.mxu1 %v12697_v6  ;;  %v7002_v6 = vpop.f32.mrf.mxu0  ;;  %v10820_v29 = vld [vmem:[#allocation12 + $0x558] sm:$0xf] }
 0x45a   :  { %7361 = vmatpush.bf16.msra.mxu2 %v10681_v9  ;;  %v7003_v8 = vadd.f32 %v7002_v6, %v5827_v38  ;;  %v10821_v54 = vor.u32 %v11849_v62, %v10820_v29 }
 0x45b   :  { %v7086_v27 = vpop.f32.mrf.mxu2 }
 0x45c   :  { %v7017_v17 = vadd.f32 %v7016_v35, %v7003_v8  ;;  %v5829_v35 = vperm.slane %v12728_v1, 2 }
 0x45d   :  { %7320 = vmatpush.bf16.msrb.mxu3 %v10873_v41 }
 0x45e   :  { %7362 = vmatpush.bf16.msra.mxu2 %v10653_v16  ;;  %v7031_v51 = vadd.f32 %v7030_v12, %v7017_v17 }
 0x461   :  { %7321 = vmatpush.bf16.msrb.mxu3 %v10845_v48  ;;  %v7004_v52 = vpop.f32.mrf.mxu0  ;;  %v7074_v48 = vpop.f32.mrf.mxu1 }
 0x462   :  { %7363 = vmatpush.bf16.msra.mxu2 %v10625_v63  ;;  %v7005_v55 = vadd.f32 %v7004_v52, %v5827_v38 }
 0x463   :  { %v7088_v63 = vpop.f32.mrf.mxu2 }
 0x464   :  { %v7019_v24 = vadd.f32 %v7018_v56, %v7005_v55 }
 0x465   :  { %7322 = vmatpush.bf16.msrb.mxu3 %v10817_v26 }
 0x466   :  { %7364 = vmatpush.bf16.msra.mxu2 %v10597_v22  ;;  %v7033_v31 = vadd.f32 %v7032_v23, %v7019_v24 }
 0x468   :  { %7323 = vmatmul.bf16.vlgmr.msrb.gmra.mxu3 %v12709_v50 }
 0x469   :  { %7371 = vmatpush.bf16.msra.mxu3 %v11017_v49  ;;  %7365 = vmatmul.bf16.vlgmr.msra.gmra.mxu2 %v12701_v46  ;;  %v11863_v46 = vld [vmem:[#allocation12 + $0x5e0] sm:$0xf0]  ;;  %v7058_v33 = vpop.f32.mrf.mxu0  ;;  %v7128_v12 = vpop.f32.mrf.mxu1 }
 0x46a   :  { %v10877_v47 = vor.u32 %v11863_v46, %v10876_v59  ;;  %v7059_v36 = vadd.f32 %v7058_v33, %v5828_v21 }
 0x46b   :  { %v7044_v40 = vpop.f32.mrf.mxu3 }
 0x46c   :  { %v7045_v45 = vadd.f32 %v7044_v40, %v7031_v51  ;;  %v7073_v16 = vadd.f32 %v7072_v2, %v7059_v36 }
 0x46d   :  { %7372 = vmatpush.bf16.msra.mxu3 %v10989_v32 }
 0x46e   :  { %v7385_v57 = vsub.f32 0.0, %v7045_v45  ;;  %v7087_v11 = vadd.f32 %v7086_v27, %v7073_v16  ;;  %v7142_v25 = vpop.f32.mrf.mxu2 }
 0x470   :  { %v7399_v4 = vmul.f32 1.442695, %v7385_v57 }
 0x471   :  { %7373 = vmatpush.bf16.msra.mxu3 %v10961_v39  ;;  %v7060_v10 = vpop.f32.mrf.mxu0  ;;  %v7130_v17 = vpop.f32.mrf.mxu1 }
 0x472   :  { %11913 = vpow2.f32 %v7399_v4  ;;  %v7061_v18 = vadd.f32 %v7060_v10, %v5828_v21  ;;  %v5830_v21 = vperm.slane %v12728_v1, 3 }
 0x473   :  { %v7046_v61 = vpop.f32.mrf.mxu3 }
 0x474   :  { %v7047_v9 = vadd.f32 %v7046_v61, %v7033_v31  ;;  %v7075_v26 = vadd.f32 %v7074_v48, %v7061_v18 }
 0x475   :  { %7374 = vmatpush.bf16.msra.mxu3 %v10933_v15 }
 0x476   :  { %v7392_v41 = vsub.f32 0.0, %v7047_v9  ;;  %v7089_v28 = vadd.f32 %v7088_v63, %v7075_v26  ;;  %v7144_v59 = vpop.f32.mrf.mxu2 }
 0x478   :  { %v11914_v53 = vpop.eup %11913  ;;  %v7413_v3 = vmul.f32 1.442695, %v7392_v41 }
 0x479   :  { %7375 = vmatpush.bf16.msra.mxu3 %v10905_v7  ;;  %v7427_v37 = vadd.f32 1.0, %v11914_v53  ;;  %v7114_v0 = vpop.f32.mrf.mxu0  ;;  %v7184_v27 = vpop.f32.mrf.mxu1 }
 0x47a   :  { %11915 = vpow2.f32 %v7413_v3  ;;  %v7115_v39 = vadd.f32 %v7114_v0, %v5829_v35  ;;  %v5831_v0 = vperm.slane %v12728_v1, 4 }
 0x47b   :  { %11917 = vrcp.f32 %v7427_v37  ;;  %v7100_v43 = vpop.f32.mrf.mxu3 }
 0x47c   :  { %v7101_v20 = vadd.f32 %v7100_v43, %v7087_v11  ;;  %v7129_v52 = vadd.f32 %v7128_v12, %v7115_v39 }
 0x47d   :  { %7376 = vmatpush.bf16.msra.mxu3 %v10877_v47 }
 0x47e   :  { %v7386_v13 = vsub.f32 0.0, %v7101_v20  ;;  %v7143_v8 = vadd.f32 %v7142_v25, %v7129_v52 }
 0x480   :  { %v11916_v58 = vpop.eup %11915  ;;  %v7401_v49 = vmul.f32 1.442695, %v7386_v13 }
 0x481   :  { %7377 = vmatpush.bf16.msra.mxu3 %v10849_v14  ;;  %v11918_v6 = vpop.eup %11917  ;;  %v7434_v22 = vadd.f32 1.0, %v11916_v58  ;;  %v7116_v56 = vpop.f32.mrf.mxu0 }
 0x482   :  { %7455 = vst [vmem:[%s12791_s9] sm:$0xff] %v11918_v6  ;;  %11919 = vpow2.f32 %v7401_v49  ;;  %v7117_v23 = vadd.f32 %v7116_v56, %v5829_v35  ;;  %v7186_v3 = vpop.f32.mrf.mxu1 }
 0x483   :  { %11921 = vrcp.f32 %v7434_v22  ;;  %v7102_v32 = vpop.f32.mrf.mxu3 }
 0x484   :  { %v7131_v40 = vadd.f32 %v7130_v17, %v7117_v23 }
 0x485   :  { %7378 = vmatpush.bf16.msra.mxu3 %v10821_v54 }
 0x486   :  { %v7145_v55 = vadd.f32 %v7144_v59, %v7131_v40 }
 0x488   :  { %7379 = vmatmul.bf16.vlgmr.msra.gmra.mxu3 %v12709_v50  ;;  %v7103_v50 = vadd.f32 %v7102_v32, %v7089_v28  ;;  %v11920_v38 = vpop.eup %11919 }
 0x489   :  { %v11922_v42 = vpop.eup %11921  ;;  %v7428_v15 = vadd.f32 1.0, %v11920_v38  ;;  %v7170_v14 = vpop.f32.mrf.mxu0 }
 0x48a   :  { %v7393_v30 = vsub.f32 0.0, %v7103_v50  ;;  %7462 = vst [vmem:[%s12791_s9 + $0x38] sm:$0xff] %v11922_v42  ;;  %v7171_v9 = vadd.f32 %v7170_v14, %v5830_v21 }
 0x48b   :  { %v7156_v60 = vpop.f32.mrf.mxu3 }
 0x48c   :  { %v7415_v44 = vmul.f32 1.442695, %v7393_v30  ;;  %v7157_v5 = vadd.f32 %v7156_v60, %v7143_v8  ;;  %v7185_v54 = vadd.f32 %v7184_v27, %v7171_v9 }
 0x48e   :  { %11923 = vpow2.f32 %v7415_v44  ;;  %v7387_v7 = vsub.f32 0.0, %v7157_v5  ;;  %v7198_v61 = vpop.f32.mrf.mxu2 }
 0x48f   :  { %11925 = vrcp.f32 %v7428_v15  ;;  %v7199_v36 = vadd.f32 %v7198_v61, %v7185_v54 }
 0x490   :  { %v7403_v47 = vmul.f32 1.442695, %v7387_v7 }
 0x491   :  { %v7172_v41 = vpop.f32.mrf.mxu0 }
 0x492   :  { %v7173_v37 = vadd.f32 %v7172_v41, %v5830_v21 }
 0x493   :  { %v7158_v33 = vpop.f32.mrf.mxu3 }
 0x494   :  { %v11924_v51 = vpop.eup %11923  ;;  %v7159_v57 = vadd.f32 %v7158_v33, %v7145_v55  ;;  %v7187_v43 = vadd.f32 %v7186_v3, %v7173_v37  ;;  %v5832_v55 = vperm.slane %v12728_v1, 5 }
 0x495   :  { %v11926_v46 = vpop.eup %11925  ;;  %v7435_v45 = vadd.f32 1.0, %v11924_v51 }
 0x496   :  { %7456 = vst [vmem:[%s12791_s9 + $0x8] sm:$0xff] %v11926_v46  ;;  %v7394_v19 = vsub.f32 0.0, %v7159_v57  ;;  %v7200_v11 = vpop.f32.mrf.mxu2 }
 0x497   :  { %11927 = vrcp.f32 %v7435_v45  ;;  %v7201_v20 = vadd.f32 %v7200_v11, %v7187_v43 }
 0x498   :  { %11929 = vpow2.f32 %v7403_v47  ;;  %v7417_v24 = vmul.f32 1.442695, %v7394_v19  ;;  %v7240_v35 = vpop.f32.mrf.mxu1 }
 0x499   :  { %v7226_v22 = vpop.f32.mrf.mxu0 }
 0x49a   :  { %11931 = vpow2.f32 %v7417_v24  ;;  %v7227_v25 = vadd.f32 %v7226_v22, %v5831_v0 }
 0x49c   :  { %v7241_v30 = vadd.f32 %v7240_v35, %v7227_v25 }
 0x49d   :  { %v11928_v34 = vpop.eup %11927 }
 0x49e   :  { %v11930_v2 = vpop.eup %11929  ;;  %7463 = vst [vmem:[%s12791_s9 + $0x40] sm:$0xff] %v11928_v34 }
 0x49f   :  { %v7429_v4 = vadd.f32 1.0, %v11930_v2 }
 0x4a0   :  { %v11932_v31 = vpop.eup %11931  ;;  %v7242_v15 = vpop.f32.mrf.mxu1 }
 0x4a1   :  { %11933 = vrcp.f32 %v7429_v4  ;;  %v7436_v29 = vadd.f32 1.0, %v11932_v31  ;;  %v7228_v38 = vpop.f32.mrf.mxu0 }
 0x4a2   :  { %v7229_v8 = vadd.f32 %v7228_v38, %v5831_v0 }
 0x4a3   :  { %11935 = vrcp.f32 %v7436_v29 }
 0x4a4   :  { %v7243_v5 = vadd.f32 %v7242_v15, %v7229_v8 }
 0x4a7   :  { %v11934_v62 = vpop.eup %11933 }
 0x4a8   :  { %7457 = vst [vmem:[%s12791_s9 + $0x10] sm:$0xff] %v11934_v62 }
 0x4a9   :  { %v11936_v10 = vpop.eup %11935  ;;  %v7282_v47 = vpop.f32.mrf.mxu0 }
 0x4aa   :  { %7464 = vst [vmem:[%s12791_s9 + $0x48] sm:$0xff] %v11936_v10  ;;  %v7283_v2 = vadd.f32 %v7282_v47, %v5832_v55 }
 0x4ab   :  { %v7212_v53 = vpop.f32.mrf.mxu3 }
 0x4ac   :  { %v7213_v16 = vadd.f32 %v7212_v53, %v7199_v36 }
 0x4ae   :  { %v7388_v48 = vsub.f32 0.0, %v7213_v16  ;;  %v7254_v50 = vpop.f32.mrf.mxu2 }
 0x4af   :  { %v7255_v39 = vadd.f32 %v7254_v50, %v7241_v30 }
 0x4b0   :  { %v7405_v63 = vmul.f32 1.442695, %v7388_v48 }
 0x4b1   :  { %v7284_v21 = vpop.f32.mrf.mxu0 }
 0x4b2   :  { %11937 = vpow2.f32 %v7405_v63  ;;  %v7285_v61 = vadd.f32 %v7284_v21, %v5832_v55  ;;  %v5833_v63 = vperm.slane %v12728_v1, 6 }
 0x4b3   :  { %v7214_v18 = vpop.f32.mrf.mxu3 }
 0x4b4   :  { %v7215_v13 = vadd.f32 %v7214_v18, %v7201_v20 }
 0x4b6   :  { %v7395_v58 = vsub.f32 0.0, %v7215_v13  ;;  %v7256_v60 = vpop.f32.mrf.mxu2 }
 0x4b7   :  { %v7257_v23 = vadd.f32 %v7256_v60, %v7243_v5 }
 0x4b8   :  { %v11938_v26 = vpop.eup %11937  ;;  %v7419_v49 = vmul.f32 1.442695, %v7395_v58  ;;  %v7296_v33 = vpop.f32.mrf.mxu1 }
 0x4b9   :  { %v7430_v6 = vadd.f32 1.0, %v11938_v26  ;;  %v7297_v4 = vadd.f32 %v7296_v33, %v7283_v2 }
 0x4ba   :  { %11939 = vpow2.f32 %v7419_v49 }
 0x4bb   :  { %11941 = vrcp.f32 %v7430_v6 }
 0x4c0   :  { %v11940_v28 = vpop.eup %11939  ;;  %v7298_v62 = vpop.f32.mrf.mxu1 }
 0x4c1   :  { %v11942_v32 = vpop.eup %11941  ;;  %v7437_v12 = vadd.f32 1.0, %v11940_v28  ;;  %v7299_v36 = vadd.f32 %v7298_v62, %v7285_v61 }
 0x4c2   :  { %7458 = vst [vmem:[%s12791_s9 + $0x18] sm:$0xff] %v11942_v32 }
 0x4c3   :  { %11943 = vrcp.f32 %v7437_v12 }
 0x4c5   :  { %v7338_v43 = vpop.f32.mrf.mxu0 }
 0x4c6   :  { %v7339_v49 = vadd.f32 %v7338_v43, %v5833_v63 }
 0x4c9   :  { %v11944_v42 = vpop.eup %11943 }
 0x4ca   :  { %7465 = vst [vmem:[%s12791_s9 + $0x50] sm:$0xff] %v11944_v42 }
 0x4cb   :  { %v7268_v44 = vpop.f32.mrf.mxu3 }
 0x4cc   :  { %v7269_v52 = vadd.f32 %v7268_v44, %v7255_v39  ;;  %v7310_v34 = vpop.f32.mrf.mxu2 }
 0x4cd   :  { %v7311_v14 = vadd.f32 %v7310_v34, %v7297_v4  ;;  %v7340_v0 = vpop.f32.mrf.mxu0 }
 0x4ce   :  { %v7389_v56 = vsub.f32 0.0, %v7269_v52  ;;  %v7341_v1 = vadd.f32 %v7340_v0, %v5833_v63 }
 0x4d0   :  { %v7407_v17 = vmul.f32 1.442695, %v7389_v56 }
 0x4d2   :  { %11945 = vpow2.f32 %v7407_v17 }
 0x4d3   :  { %v7270_v7 = vpop.f32.mrf.mxu3 }
 0x4d4   :  { %v7271_v51 = vadd.f32 %v7270_v7, %v7257_v23  ;;  %v7312_v54 = vpop.f32.mrf.mxu2 }
 0x4d5   :  { %v7313_v53 = vadd.f32 %v7312_v54, %v7299_v36 }
 0x4d6   :  { %v7396_v59 = vsub.f32 0.0, %v7271_v51  ;;  %v7352_v18 = vpop.f32.mrf.mxu1 }
 0x4d7   :  { %v7353_v6 = vadd.f32 %v7352_v18, %v7339_v49 }
 0x4d8   :  { %v11946_v46 = vpop.eup %11945  ;;  %v7421_v40 = vmul.f32 1.442695, %v7396_v59 }
 0x4d9   :  { %v7431_v45 = vadd.f32 1.0, %v11946_v46 }
 0x4da   :  { %11947 = vpow2.f32 %v7421_v40 }
 0x4db   :  { %11949 = vrcp.f32 %v7431_v45 }
 0x4de   :  { %v7354_v12 = vpop.f32.mrf.mxu1 }
 0x4df   :  { %v7355_v30 = vadd.f32 %v7354_v12, %v7341_v1 }
 0x4e0   :  { %v11948_v57 = vpop.eup %11947 }
 0x4e1   :  { %v11950_v19 = vpop.eup %11949  ;;  %v7438_v24 = vadd.f32 1.0, %v11948_v57 }
 0x4e2   :  { %7459 = vst [vmem:[%s12791_s9 + $0x20] sm:$0xff] %v11950_v19 }
 0x4e3   :  { %11951 = vrcp.f32 %v7438_v24 }
 0x4e9   :  { %v11952_v29 = vpop.eup %11951 }
 0x4ea   :  { %7466 = vst [vmem:[%s12791_s9 + $0x58] sm:$0xff] %v11952_v29 }
 0x4eb   :  { %v7324_v31 = vpop.f32.mrf.mxu3 }
 0x4ec   :  { %v7325_v27 = vadd.f32 %v7324_v31, %v7311_v14  ;;  %v7366_v26 = vpop.f32.mrf.mxu2 }
 0x4ed   :  { %v7367_v22 = vadd.f32 %v7366_v26, %v7353_v6 }
 0x4ee   :  { %v7390_v9 = vsub.f32 0.0, %v7325_v27 }
 0x4f0   :  { %v7409_v41 = vmul.f32 1.442695, %v7390_v9 }
 0x4f2   :  { %11953 = vpow2.f32 %v7409_v41 }
 0x4f3   :  { %v7326_v10 = vpop.f32.mrf.mxu3 }
 0x4f4   :  { %v7327_v16 = vadd.f32 %v7326_v10, %v7313_v53  ;;  %v7368_v25 = vpop.f32.mrf.mxu2 }
 0x4f5   :  { %v7369_v38 = vadd.f32 %v7368_v25, %v7355_v30 }
 0x4f6   :  { %v7397_v3 = vsub.f32 0.0, %v7327_v16 }
 0x4f8   :  { %v11954_v37 = vpop.eup %11953  ;;  %v7423_v48 = vmul.f32 1.442695, %v7397_v3 }
 0x4f9   :  { %v7432_v11 = vadd.f32 1.0, %v11954_v37 }
 0x4fa   :  { %11955 = vpow2.f32 %v7423_v48 }
 0x4fb   :  { %11957 = vrcp.f32 %v7432_v11 }
 0x500   :  { %v11956_v20 = vpop.eup %11955 }
 0x501   :  { %v11958_v13 = vpop.eup %11957  ;;  %v7439_v58 = vadd.f32 1.0, %v11956_v20 }
 0x502   :  { %7460 = vst [vmem:[%s12791_s9 + $0x28] sm:$0xff] %v11958_v13 }
 0x503   :  { %11959 = vrcp.f32 %v7439_v58 }
 0x509   :  { %v11960_v35 = vpop.eup %11959 }
 0x50a   :  { %7467 = vst [vmem:[%s12791_s9 + $0x60] sm:$0xff] %v11960_v35 }
 0x50b   :  { %v7380_v28 = vpop.f32.mrf.mxu3 }
 0x50c   :  { %v7381_v32 = vadd.f32 %v7380_v28, %v7367_v22 }
 0x50e   :  { %v7391_v50 = vsub.f32 0.0, %v7381_v32 }
 0x510   :  { %v7411_v39 = vmul.f32 1.442695, %v7391_v50 }
 0x512   :  { %11961 = vpow2.f32 %v7411_v39 }
 0x513   :  { %v7382_v44 = vpop.f32.mrf.mxu3 }
 0x514   :  { %v7383_v42 = vadd.f32 %v7382_v44, %v7369_v38 }
 0x516   :  { %v7398_v52 = vsub.f32 0.0, %v7383_v42 }
 0x518   :  { %v11962_v15 = vpop.eup %11961  ;;  %v7425_v8 = vmul.f32 1.442695, %v7398_v52 }
 0x519   :  { %v7433_v56 = vadd.f32 1.0, %v11962_v15 }
 0x51a   :  { %11963 = vpow2.f32 %v7425_v8 }
 0x51b   :  { %11965 = vrcp.f32 %v7433_v56 }
 0x520   :  { %v11964_v60 = vpop.eup %11963 }
 0x521   :  { %v11966_v5 = vpop.eup %11965  ;;  %v7440_v17 = vadd.f32 1.0, %v11964_v60 }
 0x522   :  { %7461 = vst [vmem:[%s12791_s9 + $0x30] sm:$0xff] %v11966_v5 }
 0x523   :  { %11967 = vrcp.f32 %v7440_v17 }
 0x529   :  { %v11968_v23 = vpop.eup %11967 }
 0x52a   :  { %7468 = vst [vmem:[%s12791_s9 + $0x68] sm:$0xff] %v11968_v23 }
 0x52b   :  { %7473 = vsyncpa [#allocation3], 1 }
 0x52c   :  { %7474 = vsyncpa [#allocation5], 1 }
 0x52d   :  { %7475 = vsyncpa [#allocation8], 1 }
 0x52e   :  { %7476 = vsyncpa [#allocation11], 1 }
 0x52f   :  { %7477 = vsyncpa [#allocation14], 1 }

</bundles_post_ra>
